<compile_context>
chip_gen: v6e
topology: v6e:2x2x1
jax: 0.10.0
libtpu: 0.0.40
codegen_flags: <defaults>
</compile_context>

<pallas_src>
import functools

import jax
import jax.numpy as jnp
from jax.experimental import pallas as pl
from jax.experimental.pallas import tpu as pltpu

HIDDEN_DIM = 64
HIDDEN_PAD = 128          # per-gate column padding -> 128-lane-aligned gate slices
OUT_PAD = 128             # lane-dense FC output slab
INPUT_DIM = 13
NUM_LAYERS = 2
OFFSET = 5
OUTPUT_DIM = 13
SEQ_LEN = 10
SUBLANE = 8               # batch rows padded to a full sublane tile


def _lstm_fc_kernel(x_ref, wih0_ref, b0_ref, wfused_ref, b1_ref,
                    wfc_ref, bfc_ref, out_ref, xg_ref, hk_ref,
                    *, batch_pad, start):
    """2-layer LSTM recurrence + FC head, fully resident in VMEM.

    x_ref    : (T*BP, D)        time-major, batch padded to BP rows, flattened
    wih0     : (D, 4*HP)        layer-0 input weights, gate-padded
    b0       : (1, 4*HP)        fused layer-0 bias (b_ih0 + b_hh0)
    wfused   : (2*HP, 8*HP)     [[Whh0 | Wih1]; [0 | Whh1]] (one MXU push per step)
    b1       : (1, 4*HP)        fused layer-1 bias
    wfc      : (HP, OUT_PAD)    FC weights (lane-padded)
    out_ref  : (n_keep*BP, OUT_PAD)  lane-dense output slab (time-major rows)
    xg_ref   : (T*BP, 4*HP)     scratch: hoisted input projection (+ layer-0 bias)
    hk_ref   : (n_keep*BP, HP)  scratch: kept layer-1 hidden states
    """
    f32 = jnp.float32
    BP = batch_pad
    TB = x_ref.shape[0]
    T = TB // BP
    G8 = wfused_ref.shape[1]          # 8 * HP
    G4 = G8 // 2                      # 4 * HP
    HP = G4 // 4
    n_rows = hk_ref.shape[0]

    # ---- hoisted input projection: ONE matmul for all timesteps, bias folded in ----
    xg_ref[...] = (jnp.dot(x_ref[...], wih0_ref[...], preferred_element_type=f32)
                   + jnp.broadcast_to(b0_ref[...], (TB, G4)))

    # weights loaded once; bias broadcast hoisted out of the unrolled loop
    wfused = wfused_ref[...]                                 # (2*HP, 8*HP)
    b1 = jnp.broadcast_to(b1_ref[...], (BP, G4))             # (BP, 4*HP)

    h0 = jnp.zeros((BP, HP), f32)
    c0 = jnp.zeros((BP, HP), f32)
    h1 = jnp.zeros((BP, HP), f32)
    c1 = jnp.zeros((BP, HP), f32)
    g0_rec = jnp.zeros((BP, G4), f32)                        # h0_{-1} @ Whh0 == 0

    def activate(gates, c):
        # HP = 128 -> every gate slice starts on a lane-tile boundary (free vreg view)
        i = jax.nn.sigmoid(gates[:, 0 * HP:1 * HP])
        f = jax.nn.sigmoid(gates[:, 1 * HP:2 * HP])
        g = jnp.tanh(gates[:, 2 * HP:3 * HP])
        o = jax.nn.sigmoid(gates[:, 3 * HP:4 * HP])
        c_new = f * c + i * g
        h_new = o * jnp.tanh(c_new)
        return h_new, c_new

    # short, fixed, inherently sequential recurrence -> unrolled Python loop
    for t in range(T):
        # layer 0: recurrent term was produced by the previous step's fused matmul
        g0 = xg_ref[t * BP:(t + 1) * BP, :] + g0_rec
        h0, c0 = activate(g0, c0)
        # ONE fused MXU push per step:
        #   left half  = h0_t @ Whh0                      (layer-0 recurrent term for t+1)
        #   right half = h0_t @ Wih1 + h1_{t-1} @ Whh1    (layer-1 gate pre-activations)
        fused = jnp.dot(jnp.concatenate([h0, h1], axis=1), wfused,
                        preferred_element_type=f32)
        g0_rec = fused[:, :G4]
        h1, c1 = activate(fused[:, G4:] + b1, c1)
        # stash only the timesteps the module actually returns (sublane-aligned rows)
        if t >= start:
            j = t - start
            hk_ref[j * BP:(j + 1) * BP, :] = h1

    # ---- FC head: one matmul over the kept states, one lane-dense store ----
    out_ref[...] = (jnp.dot(hk_ref[...], wfc_ref[...], preferred_element_type=f32)
                    + jnp.broadcast_to(bfc_ref[...], (n_rows, wfc_ref.shape[1])))


def prepare_params(params, *, hidden_dim=HIDDEN_DIM, hidden_pad=HIDDEN_PAD,
                   out_pad=OUT_PAD):
    """One-time weight prep (transpose, gate-pad to 128 lanes, fuse biases, concat).

    Runs off the hot path so lstm_forward doesn't re-do it every call.
    Gate order follows PyTorch: i, f, g, o.  Padding lanes provably stay zero through
    the recurrence (zero weights + zero bias -> c,h padded lanes remain 0).
    """
    H, HP = hidden_dim, hidden_pad

    def pad_gates(w_t):  # (rows, 4*H) -> (rows, 4*HP), zero-pad each gate block
        r = w_t.shape[0]
        return jnp.pad(w_t.reshape(r, 4, H),
                       ((0, 0), (0, 0), (0, HP - H))).reshape(r, 4 * HP)

    def pad_rows(w, rows):
        return jnp.pad(w, ((0, rows - w.shape[0]), (0, 0)))

    wih0 = pad_gates(params["w_ih0"].T)                                   # (D, 4*HP)
    whh0 = pad_rows(pad_gates(params["w_hh0"].T), HP)                     # (HP, 4*HP)
    b0 = pad_gates((params["b_ih0"] + params["b_hh0"])[None, :])          # (1, 4*HP)
    wih1 = pad_rows(pad_gates(params["w_ih1"].T), HP)                     # (HP, 4*HP)
    whh1 = pad_rows(pad_gates(params["w_hh1"].T), HP)                     # (HP, 4*HP)
    # fused per-step weight: [h0 | h1] @ [[Whh0 | Wih1]; [0 | Whh1]]
    left = jnp.concatenate([whh0, jnp.zeros((HP, 4 * HP), whh0.dtype)], axis=0)
    right = jnp.concatenate([wih1, whh1], axis=0)
    wfused = jnp.concatenate([left, right], axis=1)                       # (2*HP, 8*HP)
    b1 = pad_gates((params["b_ih1"] + params["b_hh1"])[None, :])          # (1, 4*HP)
    out_dim = params["w_fc"].shape[0]
    wfc = jnp.pad(params["w_fc"].T, ((0, HP - H), (0, out_pad - out_dim)))  # (HP, out_pad)
    bfc = jnp.pad(params["b_fc"], (0, out_pad - out_dim))[None, :]          # (1, out_pad)
    return {"wih0": wih0, "b0": b0, "wfused": wfused, "b1": b1,
            "wfc": wfc, "bfc": bfc}


@functools.partial(jax.jit, static_argnames=("seq_len", "offset", "output_dim"))
def lstm_forward(x, prep, *, seq_len=SEQ_LEN, offset=OFFSET, output_dim=OUTPUT_DIM):
    B, T, D = x.shape
    start = seq_len - offset - 1          # = 4 for the default config
    n_keep = T - start                    # = offset + 1
    BP = ((B + SUBLANE - 1) // SUBLANE) * SUBLANE   # batch rows -> full sublane tile
    G4 = 4 * HIDDEN_PAD

    # pad batch to BP rows, then time-major 2D view: each timestep's rows are a
    # contiguous, sublane-tile-aligned slice
    x_pad = jnp.pad(x, ((0, BP - B), (0, 0), (0, 0)))
    x2d = jnp.transpose(x_pad, (1, 0, 2)).reshape(T * BP, D)

    kernel = functools.partial(_lstm_fc_kernel, batch_pad=BP, start=start)
    vmem = pl.BlockSpec(memory_space=pltpu.MemorySpace.VMEM)

    out2d = pl.pallas_call(
        kernel,
        out_shape=jax.ShapeDtypeStruct((n_keep * BP, OUT_PAD), jnp.float32),
        in_specs=[vmem] * 7,
        out_specs=vmem,
        scratch_shapes=[pltpu.VMEM((T * BP, G4), jnp.float32),            # input projection
                        pltpu.VMEM((n_keep * BP, HIDDEN_PAD), jnp.float32)],  # kept h1
    )(x2d, prep["wih0"], prep["b0"], prep["wfused"], prep["b1"],
      prep["wfc"], prep["bfc"])

    # rows are time-major; restore (B, n_keep, output_dim), drop batch/lane padding
    out = out2d.reshape(n_keep, BP, OUT_PAD)[:, :B, :output_dim]
    return jnp.transpose(out, (1, 0, 2))


def init_params(key, input_dim, hidden_dim, output_dim):
    """Deterministic init, same shapes as nn.LSTM / nn.Linear (U(-1/sqrt(H), 1/sqrt(H)))."""
    k = 1.0 / jnp.sqrt(jnp.float32(hidden_dim))
    ks = jax.random.split(key, 10)
    u = lambda kk, shape: jax.random.uniform(kk, shape, jnp.float32, -k, k)
    return {
        # layer 0
        "w_ih0": u(ks[0], (4 * hidden_dim, input_dim)),
        "w_hh0": u(ks[1], (4 * hidden_dim, hidden_dim)),
        "b_ih0": u(ks[2], (4 * hidden_dim,)),
        "b_hh0": u(ks[3], (4 * hidden_dim,)),
        # layer 1
        "w_ih1": u(ks[4], (4 * hidden_dim, hidden_dim)),
        "w_hh1": u(ks[5], (4 * hidden_dim, hidden_dim)),
        "b_ih1": u(ks[6], (4 * hidden_dim,)),
        "b_hh1": u(ks[7], (4 * hidden_dim,)),
        # fc
        "w_fc": u(ks[8], (output_dim, hidden_dim)),
        "b_fc": u(ks[9], (output_dim,)),
    }


def _reference_forward(x, params, hidden_dim, seq_len, offset):
    """Pure-JAX reference of the PyTorch forward (for correctness check)."""
    B, T, _ = x.shape
    H = hidden_dim

    def cell(xt, h, c, wih, whh, bih, bhh):
        gates = xt @ wih.T + bih + h @ whh.T + bhh
        i = jax.nn.sigmoid(gates[:, 0 * H:1 * H])
        f = jax.nn.sigmoid(gates[:, 1 * H:2 * H])
        g = jnp.tanh(gates[:, 2 * H:3 * H])
        o = jax.nn.sigmoid(gates[:, 3 * H:4 * H])
        c = f * c + i * g
        h = o * jnp.tanh(c)
        return h, c

    h0 = c0 = h1 = c1 = jnp.zeros((B, H), jnp.float32)
    ys = []
    for t in range(T):
        h0, c0 = cell(x[:, t, :], h0, c0, params["w_ih0"], params["w_hh0"],
                      params["b_ih0"], params["b_hh0"])
        h1, c1 = cell(h0, h1, c1, params["w_ih1"], params["w_hh1"],
                      params["b_ih1"], params["b_hh1"])
        ys.append(h1)
    out = jnp.stack(ys, axis=1)                      # (B, T, H)
    out = out[:, seq_len - offset - 1:, :] @ params["w_fc"].T + params["b_fc"]
    return out


if __name__ == "__main__":
    key = jax.random.PRNGKey(0)
    k_x, k_p = jax.random.split(key)

    batch = 2
    x = jax.random.normal(k_x, (batch, SEQ_LEN, INPUT_DIM), jnp.float32)
    params = init_params(k_p, INPUT_DIM, HIDDEN_DIM, OUTPUT_DIM)

    # one-time weight preparation (off the per-call hot path)
    prep = jax.block_until_ready(prepare_params(params))

    out = lstm_forward(x, prep)
    out = jax.block_until_ready(out)

    ref = _reference_forward(x, params, HIDDEN_DIM, SEQ_LEN, OFFSET)
    assert out.shape == (batch, OFFSET + 1, OUTPUT_DIM), out.shape
    assert jnp.allclose(out, ref, atol=1e-4, rtol=1e-4), float(jnp.max(jnp.abs(out - ref)))

    print("KERNEL_OK")
</pallas_src>

<mosaic_0001>
module attributes {stable_mosaic.version = 11 : i64} {
  func.func @_lstm_fc_kernel(%arg0: memref<80x13xf32, #tpu.memory_space<vmem>>, %arg1: memref<13x512xf32, #tpu.memory_space<vmem>>, %arg2: memref<1x512xf32, #tpu.memory_space<vmem>>, %arg3: memref<256x1024xf32, #tpu.memory_space<vmem>>, %arg4: memref<1x512xf32, #tpu.memory_space<vmem>>, %arg5: memref<128x128xf32, #tpu.memory_space<vmem>>, %arg6: memref<1x128xf32, #tpu.memory_space<vmem>>, %arg7: memref<48x128xf32, #tpu.memory_space<vmem>>, %arg8: memref<80x512xf32, #tpu.memory_space<vmem>>, %arg9: memref<48x128xf32, #tpu.memory_space<vmem>>) attributes {dimension_semantics = [], scalar_prefetch = 0 : i64, scratch_operands = 2 : i64, tpu.core_type = #tpu.core_type<tc>} {
    %c0 = arith.constant 0 : index
    %c0_0 = arith.constant 0 : index
    %0 = vector.load %arg0[%c0, %c0_0] : memref<80x13xf32, #tpu.memory_space<vmem>>, vector<80x13xf32>
    %c0_1 = arith.constant 0 : index
    %c0_2 = arith.constant 0 : index
    %1 = vector.load %arg1[%c0_1, %c0_2] : memref<13x512xf32, #tpu.memory_space<vmem>>, vector<13x512xf32>
    %cst = arith.constant dense<0.000000e+00> : vector<80x512xf32>
    %2 = tpu.matmul %0, %1, %cst {dimension_numbers = #tpu.dot_dimension_numbers<[1], [0], [0], [1], [0, 0, 1, 1], [], []>} : vector<80x13xf32>, vector<13x512xf32>, vector<80x512xf32> -> vector<80x512xf32>
    %c0_3 = arith.constant 0 : index
    %c0_4 = arith.constant 0 : index
    %3 = vector.load %arg2[%c0_3, %c0_4] : memref<1x512xf32, #tpu.memory_space<vmem>>, vector<1x512xf32>
    %4 = vector.shape_cast %3 : vector<1x512xf32> to vector<1x512xf32>
    %5 = vector.broadcast %4 : vector<1x512xf32> to vector<80x512xf32>
    %6 = arith.addf %2, %5 : vector<80x512xf32>
    %c0_5 = arith.constant 0 : index
    %c0_6 = arith.constant 0 : index
    %7 = vector.load %arg8[%c0_5, %c0_6] : memref<80x512xf32, #tpu.memory_space<vmem>>, vector<80x512xf32>
    tpu.vector_store %arg8[%c0_5, %c0_6], %6 {strides = array<i32>} : memref<80x512xf32, #tpu.memory_space<vmem>>, vector<80x512xf32>,
    %c0_7 = arith.constant 0 : index
    %c0_8 = arith.constant 0 : index
    %8 = vector.load %arg3[%c0_7, %c0_8] : memref<256x1024xf32, #tpu.memory_space<vmem>>, vector<256x1024xf32>
    %c0_9 = arith.constant 0 : index
    %c0_10 = arith.constant 0 : index
    %9 = vector.load %arg4[%c0_9, %c0_10] : memref<1x512xf32, #tpu.memory_space<vmem>>, vector<1x512xf32>
    %10 = vector.shape_cast %9 : vector<1x512xf32> to vector<1x512xf32>
    %11 = vector.broadcast %10 : vector<1x512xf32> to vector<8x512xf32>
    %cst_11 = arith.constant 0.000000e+00 : f32
    %12 = vector.broadcast %cst_11 : f32 to vector<8x128xf32>
    %cst_12 = arith.constant 0.000000e+00 : f32
    %13 = vector.broadcast %cst_12 : f32 to vector<8x128xf32>
    %cst_13 = arith.constant 0.000000e+00 : f32
    %14 = vector.broadcast %cst_13 : f32 to vector<8x128xf32>
    %cst_14 = arith.constant 0.000000e+00 : f32
    %15 = vector.broadcast %cst_14 : f32 to vector<8x512xf32>
    %c0_15 = arith.constant 0 : index
    %c0_16 = arith.constant 0 : index
    %16 = vector.load %arg8[%c0_15, %c0_16] : memref<80x512xf32, #tpu.memory_space<vmem>>, vector<8x512xf32>
    %17 = arith.addf %16, %15 : vector<8x512xf32>
    %18 = vector.extract_strided_slice %17 {offsets = [0, 0], sizes = [8, 128], strides = [1, 1]} : vector<8x512xf32> to vector<8x128xf32>
    %19 = arith.negf %18 : vector<8x128xf32>
    %20 = math.exp %19 : vector<8x128xf32>
    %cst_17 = arith.constant 1.000000e+00 : f32
    %21 = vector.broadcast %cst_17 : f32 to vector<8x128xf32>
    %22 = arith.addf %21, %20 : vector<8x128xf32>
    %23 = arith.divf %21, %22 : vector<8x128xf32>
    %24 = vector.extract_strided_slice %17 {offsets = [0, 128], sizes = [8, 128], strides = [1, 1]} : vector<8x512xf32> to vector<8x128xf32>
    %25 = arith.negf %24 : vector<8x128xf32>
    %26 = math.exp %25 : vector<8x128xf32>
    %cst_18 = arith.constant 1.000000e+00 : f32
    %27 = vector.broadcast %cst_18 : f32 to vector<8x128xf32>
    %28 = arith.addf %27, %26 : vector<8x128xf32>
    %29 = arith.divf %27, %28 : vector<8x128xf32>
    %30 = vector.extract_strided_slice %17 {offsets = [0, 256], sizes = [8, 128], strides = [1, 1]} : vector<8x512xf32> to vector<8x128xf32>
    %31 = math.tanh %30 : vector<8x128xf32>
    %32 = vector.extract_strided_slice %17 {offsets = [0, 384], sizes = [8, 128], strides = [1, 1]} : vector<8x512xf32> to vector<8x128xf32>
    %33 = arith.negf %32 : vector<8x128xf32>
    %34 = math.exp %33 : vector<8x128xf32>
    %cst_19 = arith.constant 1.000000e+00 : f32
    %35 = vector.broadcast %cst_19 : f32 to vector<8x128xf32>
    %36 = arith.addf %35, %34 : vector<8x128xf32>
    %37 = arith.divf %35, %36 : vector<8x128xf32>
    %38 = arith.mulf %29, %12 : vector<8x128xf32>
    %39 = arith.mulf %23, %31 : vector<8x128xf32>
    %40 = arith.addf %38, %39 : vector<8x128xf32>
    %41 = math.tanh %40 : vector<8x128xf32>
    %42 = arith.mulf %37, %41 : vector<8x128xf32>
    %43 = tpu.concatenate %42, %13 in 1 : vector<8x128xf32>, vector<8x128xf32> -> vector<8x256xf32>
    %cst_20 = arith.constant dense<0.000000e+00> : vector<8x1024xf32>
    %44 = tpu.matmul %43, %8, %cst_20 {dimension_numbers = #tpu.dot_dimension_numbers<[1], [0], [0], [1], [0, 0, 1, 1], [], []>} : vector<8x256xf32>, vector<256x1024xf32>, vector<8x1024xf32> -> vector<8x1024xf32>
    %45 = vector.extract_strided_slice %44 {offsets = [0, 0], sizes = [8, 512], strides = [1, 1]} : vector<8x1024xf32> to vector<8x512xf32>
    %46 = vector.extract_strided_slice %44 {offsets = [0, 512], sizes = [8, 512], strides = [1, 1]} : vector<8x1024xf32> to vector<8x512xf32>
    %47 = arith.addf %46, %11 : vector<8x512xf32>
    %48 = vector.extract_strided_slice %47 {offsets = [0, 0], sizes = [8, 128], strides = [1, 1]} : vector<8x512xf32> to vector<8x128xf32>
    %49 = arith.negf %48 : vector<8x128xf32>
    %50 = math.exp %49 : vector<8x128xf32>
    %cst_21 = arith.constant 1.000000e+00 : f32
    %51 = vector.broadcast %cst_21 : f32 to vector<8x128xf32>
    %52 = arith.addf %51, %50 : vector<8x128xf32>
    %53 = arith.divf %51, %52 : vector<8x128xf32>
    %54 = vector.extract_strided_slice %47 {offsets = [0, 128], sizes = [8, 128], strides = [1, 1]} : vector<8x512xf32> to vector<8x128xf32>
    %55 = arith.negf %54 : vector<8x128xf32>
    %56 = math.exp %55 : vector<8x128xf32>
    %cst_22 = arith.constant 1.000000e+00 : f32
    %57 = vector.broadcast %cst_22 : f32 to vector<8x128xf32>
    %58 = arith.addf %57, %56 : vector<8x128xf32>
    %59 = arith.divf %57, %58 : vector<8x128xf32>
    %60 = vector.extract_strided_slice %47 {offsets = [0, 256], sizes = [8, 128], strides = [1, 1]} : vector<8x512xf32> to vector<8x128xf32>
    %61 = math.tanh %60 : vector<8x128xf32>
    %62 = vector.extract_strided_slice %47 {offsets = [0, 384], sizes = [8, 128], strides = [1, 1]} : vector<8x512xf32> to vector<8x128xf32>
    %63 = arith.negf %62 : vector<8x128xf32>
    %64 = math.exp %63 : vector<8x128xf32>
    %cst_23 = arith.constant 1.000000e+00 : f32
    %65 = vector.broadcast %cst_23 : f32 to vector<8x128xf32>
    %66 = arith.addf %65, %64 : vector<8x128xf32>
    %67 = arith.divf %65, %66 : vector<8x128xf32>
    %68 = arith.mulf %59, %14 : vector<8x128xf32>
    %69 = arith.mulf %53, %61 : vector<8x128xf32>
    %70 = arith.addf %68, %69 : vector<8x128xf32>
    %71 = math.tanh %70 : vector<8x128xf32>
    %72 = arith.mulf %67, %71 : vector<8x128xf32>
    %c8 = arith.constant 8 : index
    %c0_24 = arith.constant 0 : index
    %73 = vector.load %arg8[%c8, %c0_24] : memref<80x512xf32, #tpu.memory_space<vmem>>, vector<8x512xf32>
    %74 = arith.addf %73, %45 : vector<8x512xf32>
    %75 = vector.extract_strided_slice %74 {offsets = [0, 0], sizes = [8, 128], strides = [1, 1]} : vector<8x512xf32> to vector<8x128xf32>
    %76 = arith.negf %75 : vector<8x128xf32>
    %77 = math.exp %76 : vector<8x128xf32>
    %cst_25 = arith.constant 1.000000e+00 : f32
    %78 = vector.broadcast %cst_25 : f32 to vector<8x128xf32>
    %79 = arith.addf %78, %77 : vector<8x128xf32>
    %80 = arith.divf %78, %79 : vector<8x128xf32>
    %81 = vector.extract_strided_slice %74 {offsets = [0, 128], sizes = [8, 128], strides = [1, 1]} : vector<8x512xf32> to vector<8x128xf32>
    %82 = arith.negf %81 : vector<8x128xf32>
    %83 = math.exp %82 : vector<8x128xf32>
    %cst_26 = arith.constant 1.000000e+00 : f32
    %84 = vector.broadcast %cst_26 : f32 to vector<8x128xf32>
    %85 = arith.addf %84, %83 : vector<8x128xf32>
    %86 = arith.divf %84, %85 : vector<8x128xf32>
    %87 = vector.extract_strided_slice %74 {offsets = [0, 256], sizes = [8, 128], strides = [1, 1]} : vector<8x512xf32> to vector<8x128xf32>
    %88 = math.tanh %87 : vector<8x128xf32>
    %89 = vector.extract_strided_slice %74 {offsets = [0, 384], sizes = [8, 128], strides = [1, 1]} : vector<8x512xf32> to vector<8x128xf32>
    %90 = arith.negf %89 : vector<8x128xf32>
    %91 = math.exp %90 : vector<8x128xf32>
    %cst_27 = arith.constant 1.000000e+00 : f32
    %92 = vector.broadcast %cst_27 : f32 to vector<8x128xf32>
    %93 = arith.addf %92, %91 : vector<8x128xf32>
    %94 = arith.divf %92, %93 : vector<8x128xf32>
    %95 = arith.mulf %86, %40 : vector<8x128xf32>
    %96 = arith.mulf %80, %88 : vector<8x128xf32>
    %97 = arith.addf %95, %96 : vector<8x128xf32>
    %98 = math.tanh %97 : vector<8x128xf32>
    %99 = arith.mulf %94, %98 : vector<8x128xf32>
    %100 = tpu.concatenate %99, %72 in 1 : vector<8x128xf32>, vector<8x128xf32> -> vector<8x256xf32>
    %cst_28 = arith.constant dense<0.000000e+00> : vector<8x1024xf32>
    %101 = tpu.matmul %100, %8, %cst_28 {dimension_numbers = #tpu.dot_dimension_numbers<[1], [0], [0], [1], [0, 0, 1, 1], [], []>} : vector<8x256xf32>, vector<256x1024xf32>, vector<8x1024xf32> -> vector<8x1024xf32>
    %102 = vector.extract_strided_slice %101 {offsets = [0, 0], sizes = [8, 512], strides = [1, 1]} : vector<8x1024xf32> to vector<8x512xf32>
    %103 = vector.extract_strided_slice %101 {offsets = [0, 512], sizes = [8, 512], strides = [1, 1]} : vector<8x1024xf32> to vector<8x512xf32>
    %104 = arith.addf %103, %11 : vector<8x512xf32>
    %105 = vector.extract_strided_slice %104 {offsets = [0, 0], sizes = [8, 128], strides = [1, 1]} : vector<8x512xf32> to vector<8x128xf32>
    %106 = arith.negf %105 : vector<8x128xf32>
    %107 = math.exp %106 : vector<8x128xf32>
    %cst_29 = arith.constant 1.000000e+00 : f32
    %108 = vector.broadcast %cst_29 : f32 to vector<8x128xf32>
    %109 = arith.addf %108, %107 : vector<8x128xf32>
    %110 = arith.divf %108, %109 : vector<8x128xf32>
    %111 = vector.extract_strided_slice %104 {offsets = [0, 128], sizes = [8, 128], strides = [1, 1]} : vector<8x512xf32> to vector<8x128xf32>
    %112 = arith.negf %111 : vector<8x128xf32>
    %113 = math.exp %112 : vector<8x128xf32>
    %cst_30 = arith.constant 1.000000e+00 : f32
    %114 = vector.broadcast %cst_30 : f32 to vector<8x128xf32>
    %115 = arith.addf %114, %113 : vector<8x128xf32>
    %116 = arith.divf %114, %115 : vector<8x128xf32>
    %117 = vector.extract_strided_slice %104 {offsets = [0, 256], sizes = [8, 128], strides = [1, 1]} : vector<8x512xf32> to vector<8x128xf32>
    %118 = math.tanh %117 : vector<8x128xf32>
    %119 = vector.extract_strided_slice %104 {offsets = [0, 384], sizes = [8, 128], strides = [1, 1]} : vector<8x512xf32> to vector<8x128xf32>
    %120 = arith.negf %119 : vector<8x128xf32>
    %121 = math.exp %120 : vector<8x128xf32>
    %cst_31 = arith.constant 1.000000e+00 : f32
    %122 = vector.broadcast %cst_31 : f32 to vector<8x128xf32>
    %123 = arith.addf %122, %121 : vector<8x128xf32>
    %124 = arith.divf %122, %123 : vector<8x128xf32>
    %125 = arith.mulf %116, %70 : vector<8x128xf32>
    %126 = arith.mulf %110, %118 : vector<8x128xf32>
    %127 = arith.addf %125, %126 : vector<8x128xf32>
    %128 = math.tanh %127 : vector<8x128xf32>
    %129 = arith.mulf %124, %128 : vector<8x128xf32>
    %c16 = arith.constant 16 : index
    %c0_32 = arith.constant 0 : index
    %130 = vector.load %arg8[%c16, %c0_32] : memref<80x512xf32, #tpu.memory_space<vmem>>, vector<8x512xf32>
    %131 = arith.addf %130, %102 : vector<8x512xf32>
    %132 = vector.extract_strided_slice %131 {offsets = [0, 0], sizes = [8, 128], strides = [1, 1]} : vector<8x512xf32> to vector<8x128xf32>
    %133 = arith.negf %132 : vector<8x128xf32>
    %134 = math.exp %133 : vector<8x128xf32>
    %cst_33 = arith.constant 1.000000e+00 : f32
    %135 = vector.broadcast %cst_33 : f32 to vector<8x128xf32>
    %136 = arith.addf %135, %134 : vector<8x128xf32>
    %137 = arith.divf %135, %136 : vector<8x128xf32>
    %138 = vector.extract_strided_slice %131 {offsets = [0, 128], sizes = [8, 128], strides = [1, 1]} : vector<8x512xf32> to vector<8x128xf32>
    %139 = arith.negf %138 : vector<8x128xf32>
    %140 = math.exp %139 : vector<8x128xf32>
    %cst_34 = arith.constant 1.000000e+00 : f32
    %141 = vector.broadcast %cst_34 : f32 to vector<8x128xf32>
    %142 = arith.addf %141, %140 : vector<8x128xf32>
    %143 = arith.divf %141, %142 : vector<8x128xf32>
    %144 = vector.extract_strided_slice %131 {offsets = [0, 256], sizes = [8, 128], strides = [1, 1]} : vector<8x512xf32> to vector<8x128xf32>
    %145 = math.tanh %144 : vector<8x128xf32>
    %146 = vector.extract_strided_slice %131 {offsets = [0, 384], sizes = [8, 128], strides = [1, 1]} : vector<8x512xf32> to vector<8x128xf32>
    %147 = arith.negf %146 : vector<8x128xf32>
    %148 = math.exp %147 : vector<8x128xf32>
    %cst_35 = arith.constant 1.000000e+00 : f32
    %149 = vector.broadcast %cst_35 : f32 to vector<8x128xf32>
    %150 = arith.addf %149, %148 : vector<8x128xf32>
    %151 = arith.divf %149, %150 : vector<8x128xf32>
    %152 = arith.mulf %143, %97 : vector<8x128xf32>
    %153 = arith.mulf %137, %145 : vector<8x128xf32>
    %154 = arith.addf %152, %153 : vector<8x128xf32>
    %155 = math.tanh %154 : vector<8x128xf32>
    %156 = arith.mulf %151, %155 : vector<8x128xf32>
    %157 = tpu.concatenate %156, %129 in 1 : vector<8x128xf32>, vector<8x128xf32> -> vector<8x256xf32>
    %cst_36 = arith.constant dense<0.000000e+00> : vector<8x1024xf32>
    %158 = tpu.matmul %157, %8, %cst_36 {dimension_numbers = #tpu.dot_dimension_numbers<[1], [0], [0], [1], [0, 0, 1, 1], [], []>} : vector<8x256xf32>, vector<256x1024xf32>, vector<8x1024xf32> -> vector<8x1024xf32>
    %159 = vector.extract_strided_slice %158 {offsets = [0, 0], sizes = [8, 512], strides = [1, 1]} : vector<8x1024xf32> to vector<8x512xf32>
    %160 = vector.extract_strided_slice %158 {offsets = [0, 512], sizes = [8, 512], strides = [1, 1]} : vector<8x1024xf32> to vector<8x512xf32>
    %161 = arith.addf %160, %11 : vector<8x512xf32>
    %162 = vector.extract_strided_slice %161 {offsets = [0, 0], sizes = [8, 128], strides = [1, 1]} : vector<8x512xf32> to vector<8x128xf32>
    %163 = arith.negf %162 : vector<8x128xf32>
    %164 = math.exp %163 : vector<8x128xf32>
    %cst_37 = arith.constant 1.000000e+00 : f32
    %165 = vector.broadcast %cst_37 : f32 to vector<8x128xf32>
    %166 = arith.addf %165, %164 : vector<8x128xf32>
    %167 = arith.divf %165, %166 : vector<8x128xf32>
    %168 = vector.extract_strided_slice %161 {offsets = [0, 128], sizes = [8, 128], strides = [1, 1]} : vector<8x512xf32> to vector<8x128xf32>
    %169 = arith.negf %168 : vector<8x128xf32>
    %170 = math.exp %169 : vector<8x128xf32>
    %cst_38 = arith.constant 1.000000e+00 : f32
    %171 = vector.broadcast %cst_38 : f32 to vector<8x128xf32>
    %172 = arith.addf %171, %170 : vector<8x128xf32>
    %173 = arith.divf %171, %172 : vector<8x128xf32>
    %174 = vector.extract_strided_slice %161 {offsets = [0, 256], sizes = [8, 128], strides = [1, 1]} : vector<8x512xf32> to vector<8x128xf32>
    %175 = math.tanh %174 : vector<8x128xf32>
    %176 = vector.extract_strided_slice %161 {offsets = [0, 384], sizes = [8, 128], strides = [1, 1]} : vector<8x512xf32> to vector<8x128xf32>
    %177 = arith.negf %176 : vector<8x128xf32>
    %178 = math.exp %177 : vector<8x128xf32>
    %cst_39 = arith.constant 1.000000e+00 : f32
    %179 = vector.broadcast %cst_39 : f32 to vector<8x128xf32>
    %180 = arith.addf %179, %178 : vector<8x128xf32>
    %181 = arith.divf %179, %180 : vector<8x128xf32>
    %182 = arith.mulf %173, %127 : vector<8x128xf32>
    %183 = arith.mulf %167, %175 : vector<8x128xf32>
    %184 = arith.addf %182, %183 : vector<8x128xf32>
    %185 = math.tanh %184 : vector<8x128xf32>
    %186 = arith.mulf %181, %185 : vector<8x128xf32>
    %c24 = arith.constant 24 : index
    %c0_40 = arith.constant 0 : index
    %187 = vector.load %arg8[%c24, %c0_40] : memref<80x512xf32, #tpu.memory_space<vmem>>, vector<8x512xf32>
    %188 = arith.addf %187, %159 : vector<8x512xf32>
    %189 = vector.extract_strided_slice %188 {offsets = [0, 0], sizes = [8, 128], strides = [1, 1]} : vector<8x512xf32> to vector<8x128xf32>
    %190 = arith.negf %189 : vector<8x128xf32>
    %191 = math.exp %190 : vector<8x128xf32>
    %cst_41 = arith.constant 1.000000e+00 : f32
    %192 = vector.broadcast %cst_41 : f32 to vector<8x128xf32>
    %193 = arith.addf %192, %191 : vector<8x128xf32>
    %194 = arith.divf %192, %193 : vector<8x128xf32>
    %195 = vector.extract_strided_slice %188 {offsets = [0, 128], sizes = [8, 128], strides = [1, 1]} : vector<8x512xf32> to vector<8x128xf32>
    %196 = arith.negf %195 : vector<8x128xf32>
    %197 = math.exp %196 : vector<8x128xf32>
    %cst_42 = arith.constant 1.000000e+00 : f32
    %198 = vector.broadcast %cst_42 : f32 to vector<8x128xf32>
    %199 = arith.addf %198, %197 : vector<8x128xf32>
    %200 = arith.divf %198, %199 : vector<8x128xf32>
    %201 = vector.extract_strided_slice %188 {offsets = [0, 256], sizes = [8, 128], strides = [1, 1]} : vector<8x512xf32> to vector<8x128xf32>
    %202 = math.tanh %201 : vector<8x128xf32>
    %203 = vector.extract_strided_slice %188 {offsets = [0, 384], sizes = [8, 128], strides = [1, 1]} : vector<8x512xf32> to vector<8x128xf32>
    %204 = arith.negf %203 : vector<8x128xf32>
    %205 = math.exp %204 : vector<8x128xf32>
    %cst_43 = arith.constant 1.000000e+00 : f32
    %206 = vector.broadcast %cst_43 : f32 to vector<8x128xf32>
    %207 = arith.addf %206, %205 : vector<8x128xf32>
    %208 = arith.divf %206, %207 : vector<8x128xf32>
    %209 = arith.mulf %200, %154 : vector<8x128xf32>
    %210 = arith.mulf %194, %202 : vector<8x128xf32>
    %211 = arith.addf %209, %210 : vector<8x128xf32>
    %212 = math.tanh %211 : vector<8x128xf32>
    %213 = arith.mulf %208, %212 : vector<8x128xf32>
    %214 = tpu.concatenate %213, %186 in 1 : vector<8x128xf32>, vector<8x128xf32> -> vector<8x256xf32>
    %cst_44 = arith.constant dense<0.000000e+00> : vector<8x1024xf32>
    %215 = tpu.matmul %214, %8, %cst_44 {dimension_numbers = #tpu.dot_dimension_numbers<[1], [0], [0], [1], [0, 0, 1, 1], [], []>} : vector<8x256xf32>, vector<256x1024xf32>, vector<8x1024xf32> -> vector<8x1024xf32>
    %216 = vector.extract_strided_slice %215 {offsets = [0, 0], sizes = [8, 512], strides = [1, 1]} : vector<8x1024xf32> to vector<8x512xf32>
    %217 = vector.extract_strided_slice %215 {offsets = [0, 512], sizes = [8, 512], strides = [1, 1]} : vector<8x1024xf32> to vector<8x512xf32>
    %218 = arith.addf %217, %11 : vector<8x512xf32>
    %219 = vector.extract_strided_slice %218 {offsets = [0, 0], sizes = [8, 128], strides = [1, 1]} : vector<8x512xf32> to vector<8x128xf32>
    %220 = arith.negf %219 : vector<8x128xf32>
    %221 = math.exp %220 : vector<8x128xf32>
    %cst_45 = arith.constant 1.000000e+00 : f32
    %222 = vector.broadcast %cst_45 : f32 to vector<8x128xf32>
    %223 = arith.addf %222, %221 : vector<8x128xf32>
    %224 = arith.divf %222, %223 : vector<8x128xf32>
    %225 = vector.extract_strided_slice %218 {offsets = [0, 128], sizes = [8, 128], strides = [1, 1]} : vector<8x512xf32> to vector<8x128xf32>
    %226 = arith.negf %225 : vector<8x128xf32>
    %227 = math.exp %226 : vector<8x128xf32>
    %cst_46 = arith.constant 1.000000e+00 : f32
    %228 = vector.broadcast %cst_46 : f32 to vector<8x128xf32>
    %229 = arith.addf %228, %227 : vector<8x128xf32>
    %230 = arith.divf %228, %229 : vector<8x128xf32>
    %231 = vector.extract_strided_slice %218 {offsets = [0, 256], sizes = [8, 128], strides = [1, 1]} : vector<8x512xf32> to vector<8x128xf32>
    %232 = math.tanh %231 : vector<8x128xf32>
    %233 = vector.extract_strided_slice %218 {offsets = [0, 384], sizes = [8, 128], strides = [1, 1]} : vector<8x512xf32> to vector<8x128xf32>
    %234 = arith.negf %233 : vector<8x128xf32>
    %235 = math.exp %234 : vector<8x128xf32>
    %cst_47 = arith.constant 1.000000e+00 : f32
    %236 = vector.broadcast %cst_47 : f32 to vector<8x128xf32>
    %237 = arith.addf %236, %235 : vector<8x128xf32>
    %238 = arith.divf %236, %237 : vector<8x128xf32>
    %239 = arith.mulf %230, %184 : vector<8x128xf32>
    %240 = arith.mulf %224, %232 : vector<8x128xf32>
    %241 = arith.addf %239, %240 : vector<8x128xf32>
    %242 = math.tanh %241 : vector<8x128xf32>
    %243 = arith.mulf %238, %242 : vector<8x128xf32>
    %c32 = arith.constant 32 : index
    %c0_48 = arith.constant 0 : index
    %244 = vector.load %arg8[%c32, %c0_48] : memref<80x512xf32, #tpu.memory_space<vmem>>, vector<8x512xf32>
    %245 = arith.addf %244, %216 : vector<8x512xf32>
    %246 = vector.extract_strided_slice %245 {offsets = [0, 0], sizes = [8, 128], strides = [1, 1]} : vector<8x512xf32> to vector<8x128xf32>
    %247 = arith.negf %246 : vector<8x128xf32>
    %248 = math.exp %247 : vector<8x128xf32>
    %cst_49 = arith.constant 1.000000e+00 : f32
    %249 = vector.broadcast %cst_49 : f32 to vector<8x128xf32>
    %250 = arith.addf %249, %248 : vector<8x128xf32>
    %251 = arith.divf %249, %250 : vector<8x128xf32>
    %252 = vector.extract_strided_slice %245 {offsets = [0, 128], sizes = [8, 128], strides = [1, 1]} : vector<8x512xf32> to vector<8x128xf32>
    %253 = arith.negf %252 : vector<8x128xf32>
    %254 = math.exp %253 : vector<8x128xf32>
    %cst_50 = arith.constant 1.000000e+00 : f32
    %255 = vector.broadcast %cst_50 : f32 to vector<8x128xf32>
    %256 = arith.addf %255, %254 : vector<8x128xf32>
    %257 = arith.divf %255, %256 : vector<8x128xf32>
    %258 = vector.extract_strided_slice %245 {offsets = [0, 256], sizes = [8, 128], strides = [1, 1]} : vector<8x512xf32> to vector<8x128xf32>
    %259 = math.tanh %258 : vector<8x128xf32>
    %260 = vector.extract_strided_slice %245 {offsets = [0, 384], sizes = [8, 128], strides = [1, 1]} : vector<8x512xf32> to vector<8x128xf32>
    %261 = arith.negf %260 : vector<8x128xf32>
    %262 = math.exp %261 : vector<8x128xf32>
    %cst_51 = arith.constant 1.000000e+00 : f32
    %263 = vector.broadcast %cst_51 : f32 to vector<8x128xf32>
    %264 = arith.addf %263, %262 : vector<8x128xf32>
    %265 = arith.divf %263, %264 : vector<8x128xf32>
    %266 = arith.mulf %257, %211 : vector<8x128xf32>
    %267 = arith.mulf %251, %259 : vector<8x128xf32>
    %268 = arith.addf %266, %267 : vector<8x128xf32>
    %269 = math.tanh %268 : vector<8x128xf32>
    %270 = arith.mulf %265, %269 : vector<8x128xf32>
    %271 = tpu.concatenate %270, %243 in 1 : vector<8x128xf32>, vector<8x128xf32> -> vector<8x256xf32>
    %cst_52 = arith.constant dense<0.000000e+00> : vector<8x1024xf32>
    %272 = tpu.matmul %271, %8, %cst_52 {dimension_numbers = #tpu.dot_dimension_numbers<[1], [0], [0], [1], [0, 0, 1, 1], [], []>} : vector<8x256xf32>, vector<256x1024xf32>, vector<8x1024xf32> -> vector<8x1024xf32>
    %273 = vector.extract_strided_slice %272 {offsets = [0, 0], sizes = [8, 512], strides = [1, 1]} : vector<8x1024xf32> to vector<8x512xf32>
    %274 = vector.extract_strided_slice %272 {offsets = [0, 512], sizes = [8, 512], strides = [1, 1]} : vector<8x1024xf32> to vector<8x512xf32>
    %275 = arith.addf %274, %11 : vector<8x512xf32>
    %276 = vector.extract_strided_slice %275 {offsets = [0, 0], sizes = [8, 128], strides = [1, 1]} : vector<8x512xf32> to vector<8x128xf32>
    %277 = arith.negf %276 : vector<8x128xf32>
    %278 = math.exp %277 : vector<8x128xf32>
    %cst_53 = arith.constant 1.000000e+00 : f32
    %279 = vector.broadcast %cst_53 : f32 to vector<8x128xf32>
    %280 = arith.addf %279, %278 : vector<8x128xf32>
    %281 = arith.divf %279, %280 : vector<8x128xf32>
    %282 = vector.extract_strided_slice %275 {offsets = [0, 128], sizes = [8, 128], strides = [1, 1]} : vector<8x512xf32> to vector<8x128xf32>
    %283 = arith.negf %282 : vector<8x128xf32>
    %284 = math.exp %283 : vector<8x128xf32>
    %cst_54 = arith.constant 1.000000e+00 : f32
    %285 = vector.broadcast %cst_54 : f32 to vector<8x128xf32>
    %286 = arith.addf %285, %284 : vector<8x128xf32>
    %287 = arith.divf %285, %286 : vector<8x128xf32>
    %288 = vector.extract_strided_slice %275 {offsets = [0, 256], sizes = [8, 128], strides = [1, 1]} : vector<8x512xf32> to vector<8x128xf32>
    %289 = math.tanh %288 : vector<8x128xf32>
    %290 = vector.extract_strided_slice %275 {offsets = [0, 384], sizes = [8, 128], strides = [1, 1]} : vector<8x512xf32> to vector<8x128xf32>
    %291 = arith.negf %290 : vector<8x128xf32>
    %292 = math.exp %291 : vector<8x128xf32>
    %cst_55 = arith.constant 1.000000e+00 : f32
    %293 = vector.broadcast %cst_55 : f32 to vector<8x128xf32>
    %294 = arith.addf %293, %292 : vector<8x128xf32>
    %295 = arith.divf %293, %294 : vector<8x128xf32>
    %296 = arith.mulf %287, %241 : vector<8x128xf32>
    %297 = arith.mulf %281, %289 : vector<8x128xf32>
    %298 = arith.addf %296, %297 : vector<8x128xf32>
    %299 = math.tanh %298 : vector<8x128xf32>
    %300 = arith.mulf %295, %299 : vector<8x128xf32>
    %c0_56 = arith.constant 0 : index
    %c0_57 = arith.constant 0 : index
    %301 = vector.load %arg9[%c0_56, %c0_57] : memref<48x128xf32, #tpu.memory_space<vmem>>, vector<8x128xf32>
    tpu.vector_store %arg9[%c0_56, %c0_57], %300 {strides = array<i32>} : memref<48x128xf32, #tpu.memory_space<vmem>>, vector<8x128xf32>,
    %c40 = arith.constant 40 : index
    %c0_58 = arith.constant 0 : index
    %302 = vector.load %arg8[%c40, %c0_58] : memref<80x512xf32, #tpu.memory_space<vmem>>, vector<8x512xf32>
    %303 = arith.addf %302, %273 : vector<8x512xf32>
    %304 = vector.extract_strided_slice %303 {offsets = [0, 0], sizes = [8, 128], strides = [1, 1]} : vector<8x512xf32> to vector<8x128xf32>
    %305 = arith.negf %304 : vector<8x128xf32>
    %306 = math.exp %305 : vector<8x128xf32>
    %cst_59 = arith.constant 1.000000e+00 : f32
    %307 = vector.broadcast %cst_59 : f32 to vector<8x128xf32>
    %308 = arith.addf %307, %306 : vector<8x128xf32>
    %309 = arith.divf %307, %308 : vector<8x128xf32>
    %310 = vector.extract_strided_slice %303 {offsets = [0, 128], sizes = [8, 128], strides = [1, 1]} : vector<8x512xf32> to vector<8x128xf32>
    %311 = arith.negf %310 : vector<8x128xf32>
    %312 = math.exp %311 : vector<8x128xf32>
    %cst_60 = arith.constant 1.000000e+00 : f32
    %313 = vector.broadcast %cst_60 : f32 to vector<8x128xf32>
    %314 = arith.addf %313, %312 : vector<8x128xf32>
    %315 = arith.divf %313, %314 : vector<8x128xf32>
    %316 = vector.extract_strided_slice %303 {offsets = [0, 256], sizes = [8, 128], strides = [1, 1]} : vector<8x512xf32> to vector<8x128xf32>
    %317 = math.tanh %316 : vector<8x128xf32>
    %318 = vector.extract_strided_slice %303 {offsets = [0, 384], sizes = [8, 128], strides = [1, 1]} : vector<8x512xf32> to vector<8x128xf32>
    %319 = arith.negf %318 : vector<8x128xf32>
    %320 = math.exp %319 : vector<8x128xf32>
    %cst_61 = arith.constant 1.000000e+00 : f32
    %321 = vector.broadcast %cst_61 : f32 to vector<8x128xf32>
    %322 = arith.addf %321, %320 : vector<8x128xf32>
    %323 = arith.divf %321, %322 : vector<8x128xf32>
    %324 = arith.mulf %315, %268 : vector<8x128xf32>
    %325 = arith.mulf %309, %317 : vector<8x128xf32>
    %326 = arith.addf %324, %325 : vector<8x128xf32>
    %327 = math.tanh %326 : vector<8x128xf32>
    %328 = arith.mulf %323, %327 : vector<8x128xf32>
    %329 = tpu.concatenate %328, %300 in 1 : vector<8x128xf32>, vector<8x128xf32> -> vector<8x256xf32>
    %cst_62 = arith.constant dense<0.000000e+00> : vector<8x1024xf32>
    %330 = tpu.matmul %329, %8, %cst_62 {dimension_numbers = #tpu.dot_dimension_numbers<[1], [0], [0], [1], [0, 0, 1, 1], [], []>} : vector<8x256xf32>, vector<256x1024xf32>, vector<8x1024xf32> -> vector<8x1024xf32>
    %331 = vector.extract_strided_slice %330 {offsets = [0, 0], sizes = [8, 512], strides = [1, 1]} : vector<8x1024xf32> to vector<8x512xf32>
    %332 = vector.extract_strided_slice %330 {offsets = [0, 512], sizes = [8, 512], strides = [1, 1]} : vector<8x1024xf32> to vector<8x512xf32>
    %333 = arith.addf %332, %11 : vector<8x512xf32>
    %334 = vector.extract_strided_slice %333 {offsets = [0, 0], sizes = [8, 128], strides = [1, 1]} : vector<8x512xf32> to vector<8x128xf32>
    %335 = arith.negf %334 : vector<8x128xf32>
    %336 = math.exp %335 : vector<8x128xf32>
    %cst_63 = arith.constant 1.000000e+00 : f32
    %337 = vector.broadcast %cst_63 : f32 to vector<8x128xf32>
    %338 = arith.addf %337, %336 : vector<8x128xf32>
    %339 = arith.divf %337, %338 : vector<8x128xf32>
    %340 = vector.extract_strided_slice %333 {offsets = [0, 128], sizes = [8, 128], strides = [1, 1]} : vector<8x512xf32> to vector<8x128xf32>
    %341 = arith.negf %340 : vector<8x128xf32>
    %342 = math.exp %341 : vector<8x128xf32>
    %cst_64 = arith.constant 1.000000e+00 : f32
    %343 = vector.broadcast %cst_64 : f32 to vector<8x128xf32>
    %344 = arith.addf %343, %342 : vector<8x128xf32>
    %345 = arith.divf %343, %344 : vector<8x128xf32>
    %346 = vector.extract_strided_slice %333 {offsets = [0, 256], sizes = [8, 128], strides = [1, 1]} : vector<8x512xf32> to vector<8x128xf32>
    %347 = math.tanh %346 : vector<8x128xf32>
    %348 = vector.extract_strided_slice %333 {offsets = [0, 384], sizes = [8, 128], strides = [1, 1]} : vector<8x512xf32> to vector<8x128xf32>
    %349 = arith.negf %348 : vector<8x128xf32>
    %350 = math.exp %349 : vector<8x128xf32>
    %cst_65 = arith.constant 1.000000e+00 : f32
    %351 = vector.broadcast %cst_65 : f32 to vector<8x128xf32>
    %352 = arith.addf %351, %350 : vector<8x128xf32>
    %353 = arith.divf %351, %352 : vector<8x128xf32>
    %354 = arith.mulf %345, %298 : vector<8x128xf32>
    %355 = arith.mulf %339, %347 : vector<8x128xf32>
    %356 = arith.addf %354, %355 : vector<8x128xf32>
    %357 = math.tanh %356 : vector<8x128xf32>
    %358 = arith.mulf %353, %357 : vector<8x128xf32>
    %c8_66 = arith.constant 8 : index
    %c0_67 = arith.constant 0 : index
    %359 = vector.load %arg9[%c8_66, %c0_67] : memref<48x128xf32, #tpu.memory_space<vmem>>, vector<8x128xf32>
    tpu.vector_store %arg9[%c8_66, %c0_67], %358 {strides = array<i32>} : memref<48x128xf32, #tpu.memory_space<vmem>>, vector<8x128xf32>,
    %c48 = arith.constant 48 : index
    %c0_68 = arith.constant 0 : index
    %360 = vector.load %arg8[%c48, %c0_68] : memref<80x512xf32, #tpu.memory_space<vmem>>, vector<8x512xf32>
    %361 = arith.addf %360, %331 : vector<8x512xf32>
    %362 = vector.extract_strided_slice %361 {offsets = [0, 0], sizes = [8, 128], strides = [1, 1]} : vector<8x512xf32> to vector<8x128xf32>
    %363 = arith.negf %362 : vector<8x128xf32>
    %364 = math.exp %363 : vector<8x128xf32>
    %cst_69 = arith.constant 1.000000e+00 : f32
    %365 = vector.broadcast %cst_69 : f32 to vector<8x128xf32>
    %366 = arith.addf %365, %364 : vector<8x128xf32>
    %367 = arith.divf %365, %366 : vector<8x128xf32>
    %368 = vector.extract_strided_slice %361 {offsets = [0, 128], sizes = [8, 128], strides = [1, 1]} : vector<8x512xf32> to vector<8x128xf32>
    %369 = arith.negf %368 : vector<8x128xf32>
    %370 = math.exp %369 : vector<8x128xf32>
    %cst_70 = arith.constant 1.000000e+00 : f32
    %371 = vector.broadcast %cst_70 : f32 to vector<8x128xf32>
    %372 = arith.addf %371, %370 : vector<8x128xf32>
    %373 = arith.divf %371, %372 : vector<8x128xf32>
    %374 = vector.extract_strided_slice %361 {offsets = [0, 256], sizes = [8, 128], strides = [1, 1]} : vector<8x512xf32> to vector<8x128xf32>
    %375 = math.tanh %374 : vector<8x128xf32>
    %376 = vector.extract_strided_slice %361 {offsets = [0, 384], sizes = [8, 128], strides = [1, 1]} : vector<8x512xf32> to vector<8x128xf32>
    %377 = arith.negf %376 : vector<8x128xf32>
    %378 = math.exp %377 : vector<8x128xf32>
    %cst_71 = arith.constant 1.000000e+00 : f32
    %379 = vector.broadcast %cst_71 : f32 to vector<8x128xf32>
    %380 = arith.addf %379, %378 : vector<8x128xf32>
    %381 = arith.divf %379, %380 : vector<8x128xf32>
    %382 = arith.mulf %373, %326 : vector<8x128xf32>
    %383 = arith.mulf %367, %375 : vector<8x128xf32>
    %384 = arith.addf %382, %383 : vector<8x128xf32>
    %385 = math.tanh %384 : vector<8x128xf32>
    %386 = arith.mulf %381, %385 : vector<8x128xf32>
    %387 = tpu.concatenate %386, %358 in 1 : vector<8x128xf32>, vector<8x128xf32> -> vector<8x256xf32>
    %cst_72 = arith.constant dense<0.000000e+00> : vector<8x1024xf32>
    %388 = tpu.matmul %387, %8, %cst_72 {dimension_numbers = #tpu.dot_dimension_numbers<[1], [0], [0], [1], [0, 0, 1, 1], [], []>} : vector<8x256xf32>, vector<256x1024xf32>, vector<8x1024xf32> -> vector<8x1024xf32>
    %389 = vector.extract_strided_slice %388 {offsets = [0, 0], sizes = [8, 512], strides = [1, 1]} : vector<8x1024xf32> to vector<8x512xf32>
    %390 = vector.extract_strided_slice %388 {offsets = [0, 512], sizes = [8, 512], strides = [1, 1]} : vector<8x1024xf32> to vector<8x512xf32>
    %391 = arith.addf %390, %11 : vector<8x512xf32>
    %392 = vector.extract_strided_slice %391 {offsets = [0, 0], sizes = [8, 128], strides = [1, 1]} : vector<8x512xf32> to vector<8x128xf32>
    %393 = arith.negf %392 : vector<8x128xf32>
    %394 = math.exp %393 : vector<8x128xf32>
    %cst_73 = arith.constant 1.000000e+00 : f32
    %395 = vector.broadcast %cst_73 : f32 to vector<8x128xf32>
    %396 = arith.addf %395, %394 : vector<8x128xf32>
    %397 = arith.divf %395, %396 : vector<8x128xf32>
    %398 = vector.extract_strided_slice %391 {offsets = [0, 128], sizes = [8, 128], strides = [1, 1]} : vector<8x512xf32> to vector<8x128xf32>
    %399 = arith.negf %398 : vector<8x128xf32>
    %400 = math.exp %399 : vector<8x128xf32>
    %cst_74 = arith.constant 1.000000e+00 : f32
    %401 = vector.broadcast %cst_74 : f32 to vector<8x128xf32>
    %402 = arith.addf %401, %400 : vector<8x128xf32>
    %403 = arith.divf %401, %402 : vector<8x128xf32>
    %404 = vector.extract_strided_slice %391 {offsets = [0, 256], sizes = [8, 128], strides = [1, 1]} : vector<8x512xf32> to vector<8x128xf32>
    %405 = math.tanh %404 : vector<8x128xf32>
    %406 = vector.extract_strided_slice %391 {offsets = [0, 384], sizes = [8, 128], strides = [1, 1]} : vector<8x512xf32> to vector<8x128xf32>
    %407 = arith.negf %406 : vector<8x128xf32>
    %408 = math.exp %407 : vector<8x128xf32>
    %cst_75 = arith.constant 1.000000e+00 : f32
    %409 = vector.broadcast %cst_75 : f32 to vector<8x128xf32>
    %410 = arith.addf %409, %408 : vector<8x128xf32>
    %411 = arith.divf %409, %410 : vector<8x128xf32>
    %412 = arith.mulf %403, %356 : vector<8x128xf32>
    %413 = arith.mulf %397, %405 : vector<8x128xf32>
    %414 = arith.addf %412, %413 : vector<8x128xf32>
    %415 = math.tanh %414 : vector<8x128xf32>
    %416 = arith.mulf %411, %415 : vector<8x128xf32>
    %c16_76 = arith.constant 16 : index
    %c0_77 = arith.constant 0 : index
    %417 = vector.load %arg9[%c16_76, %c0_77] : memref<48x128xf32, #tpu.memory_space<vmem>>, vector<8x128xf32>
    tpu.vector_store %arg9[%c16_76, %c0_77], %416 {strides = array<i32>} : memref<48x128xf32, #tpu.memory_space<vmem>>, vector<8x128xf32>,
    %c56 = arith.constant 56 : index
    %c0_78 = arith.constant 0 : index
    %418 = vector.load %arg8[%c56, %c0_78] : memref<80x512xf32, #tpu.memory_space<vmem>>, vector<8x512xf32>
    %419 = arith.addf %418, %389 : vector<8x512xf32>
    %420 = vector.extract_strided_slice %419 {offsets = [0, 0], sizes = [8, 128], strides = [1, 1]} : vector<8x512xf32> to vector<8x128xf32>
    %421 = arith.negf %420 : vector<8x128xf32>
    %422 = math.exp %421 : vector<8x128xf32>
    %cst_79 = arith.constant 1.000000e+00 : f32
    %423 = vector.broadcast %cst_79 : f32 to vector<8x128xf32>
    %424 = arith.addf %423, %422 : vector<8x128xf32>
    %425 = arith.divf %423, %424 : vector<8x128xf32>
    %426 = vector.extract_strided_slice %419 {offsets = [0, 128], sizes = [8, 128], strides = [1, 1]} : vector<8x512xf32> to vector<8x128xf32>
    %427 = arith.negf %426 : vector<8x128xf32>
    %428 = math.exp %427 : vector<8x128xf32>
    %cst_80 = arith.constant 1.000000e+00 : f32
    %429 = vector.broadcast %cst_80 : f32 to vector<8x128xf32>
    %430 = arith.addf %429, %428 : vector<8x128xf32>
    %431 = arith.divf %429, %430 : vector<8x128xf32>
    %432 = vector.extract_strided_slice %419 {offsets = [0, 256], sizes = [8, 128], strides = [1, 1]} : vector<8x512xf32> to vector<8x128xf32>
    %433 = math.tanh %432 : vector<8x128xf32>
    %434 = vector.extract_strided_slice %419 {offsets = [0, 384], sizes = [8, 128], strides = [1, 1]} : vector<8x512xf32> to vector<8x128xf32>
    %435 = arith.negf %434 : vector<8x128xf32>
    %436 = math.exp %435 : vector<8x128xf32>
    %cst_81 = arith.constant 1.000000e+00 : f32
    %437 = vector.broadcast %cst_81 : f32 to vector<8x128xf32>
    %438 = arith.addf %437, %436 : vector<8x128xf32>
    %439 = arith.divf %437, %438 : vector<8x128xf32>
    %440 = arith.mulf %431, %384 : vector<8x128xf32>
    %441 = arith.mulf %425, %433 : vector<8x128xf32>
    %442 = arith.addf %440, %441 : vector<8x128xf32>
    %443 = math.tanh %442 : vector<8x128xf32>
    %444 = arith.mulf %439, %443 : vector<8x128xf32>
    %445 = tpu.concatenate %444, %416 in 1 : vector<8x128xf32>, vector<8x128xf32> -> vector<8x256xf32>
    %cst_82 = arith.constant dense<0.000000e+00> : vector<8x1024xf32>
    %446 = tpu.matmul %445, %8, %cst_82 {dimension_numbers = #tpu.dot_dimension_numbers<[1], [0], [0], [1], [0, 0, 1, 1], [], []>} : vector<8x256xf32>, vector<256x1024xf32>, vector<8x1024xf32> -> vector<8x1024xf32>
    %447 = vector.extract_strided_slice %446 {offsets = [0, 0], sizes = [8, 512], strides = [1, 1]} : vector<8x1024xf32> to vector<8x512xf32>
    %448 = vector.extract_strided_slice %446 {offsets = [0, 512], sizes = [8, 512], strides = [1, 1]} : vector<8x1024xf32> to vector<8x512xf32>
    %449 = arith.addf %448, %11 : vector<8x512xf32>
    %450 = vector.extract_strided_slice %449 {offsets = [0, 0], sizes = [8, 128], strides = [1, 1]} : vector<8x512xf32> to vector<8x128xf32>
    %451 = arith.negf %450 : vector<8x128xf32>
    %452 = math.exp %451 : vector<8x128xf32>
    %cst_83 = arith.constant 1.000000e+00 : f32
    %453 = vector.broadcast %cst_83 : f32 to vector<8x128xf32>
    %454 = arith.addf %453, %452 : vector<8x128xf32>
    %455 = arith.divf %453, %454 : vector<8x128xf32>
    %456 = vector.extract_strided_slice %449 {offsets = [0, 128], sizes = [8, 128], strides = [1, 1]} : vector<8x512xf32> to vector<8x128xf32>
    %457 = arith.negf %456 : vector<8x128xf32>
    %458 = math.exp %457 : vector<8x128xf32>
    %cst_84 = arith.constant 1.000000e+00 : f32
    %459 = vector.broadcast %cst_84 : f32 to vector<8x128xf32>
    %460 = arith.addf %459, %458 : vector<8x128xf32>
    %461 = arith.divf %459, %460 : vector<8x128xf32>
    %462 = vector.extract_strided_slice %449 {offsets = [0, 256], sizes = [8, 128], strides = [1, 1]} : vector<8x512xf32> to vector<8x128xf32>
    %463 = math.tanh %462 : vector<8x128xf32>
    %464 = vector.extract_strided_slice %449 {offsets = [0, 384], sizes = [8, 128], strides = [1, 1]} : vector<8x512xf32> to vector<8x128xf32>
    %465 = arith.negf %464 : vector<8x128xf32>
    %466 = math.exp %465 : vector<8x128xf32>
    %cst_85 = arith.constant 1.000000e+00 : f32
    %467 = vector.broadcast %cst_85 : f32 to vector<8x128xf32>
    %468 = arith.addf %467, %466 : vector<8x128xf32>
    %469 = arith.divf %467, %468 : vector<8x128xf32>
    %470 = arith.mulf %461, %414 : vector<8x128xf32>
    %471 = arith.mulf %455, %463 : vector<8x128xf32>
    %472 = arith.addf %470, %471 : vector<8x128xf32>
    %473 = math.tanh %472 : vector<8x128xf32>
    %474 = arith.mulf %469, %473 : vector<8x128xf32>
    %c24_86 = arith.constant 24 : index
    %c0_87 = arith.constant 0 : index
    %475 = vector.load %arg9[%c24_86, %c0_87] : memref<48x128xf32, #tpu.memory_space<vmem>>, vector<8x128xf32>
    tpu.vector_store %arg9[%c24_86, %c0_87], %474 {strides = array<i32>} : memref<48x128xf32, #tpu.memory_space<vmem>>, vector<8x128xf32>,
    %c64 = arith.constant 64 : index
    %c0_88 = arith.constant 0 : index
    %476 = vector.load %arg8[%c64, %c0_88] : memref<80x512xf32, #tpu.memory_space<vmem>>, vector<8x512xf32>
    %477 = arith.addf %476, %447 : vector<8x512xf32>
    %478 = vector.extract_strided_slice %477 {offsets = [0, 0], sizes = [8, 128], strides = [1, 1]} : vector<8x512xf32> to vector<8x128xf32>
    %479 = arith.negf %478 : vector<8x128xf32>
    %480 = math.exp %479 : vector<8x128xf32>
    %cst_89 = arith.constant 1.000000e+00 : f32
    %481 = vector.broadcast %cst_89 : f32 to vector<8x128xf32>
    %482 = arith.addf %481, %480 : vector<8x128xf32>
    %483 = arith.divf %481, %482 : vector<8x128xf32>
    %484 = vector.extract_strided_slice %477 {offsets = [0, 128], sizes = [8, 128], strides = [1, 1]} : vector<8x512xf32> to vector<8x128xf32>
    %485 = arith.negf %484 : vector<8x128xf32>
    %486 = math.exp %485 : vector<8x128xf32>
    %cst_90 = arith.constant 1.000000e+00 : f32
    %487 = vector.broadcast %cst_90 : f32 to vector<8x128xf32>
    %488 = arith.addf %487, %486 : vector<8x128xf32>
    %489 = arith.divf %487, %488 : vector<8x128xf32>
    %490 = vector.extract_strided_slice %477 {offsets = [0, 256], sizes = [8, 128], strides = [1, 1]} : vector<8x512xf32> to vector<8x128xf32>
    %491 = math.tanh %490 : vector<8x128xf32>
    %492 = vector.extract_strided_slice %477 {offsets = [0, 384], sizes = [8, 128], strides = [1, 1]} : vector<8x512xf32> to vector<8x128xf32>
    %493 = arith.negf %492 : vector<8x128xf32>
    %494 = math.exp %493 : vector<8x128xf32>
    %cst_91 = arith.constant 1.000000e+00 : f32
    %495 = vector.broadcast %cst_91 : f32 to vector<8x128xf32>
    %496 = arith.addf %495, %494 : vector<8x128xf32>
    %497 = arith.divf %495, %496 : vector<8x128xf32>
    %498 = arith.mulf %489, %442 : vector<8x128xf32>
    %499 = arith.mulf %483, %491 : vector<8x128xf32>
    %500 = arith.addf %498, %499 : vector<8x128xf32>
    %501 = math.tanh %500 : vector<8x128xf32>
    %502 = arith.mulf %497, %501 : vector<8x128xf32>
    %503 = tpu.concatenate %502, %474 in 1 : vector<8x128xf32>, vector<8x128xf32> -> vector<8x256xf32>
    %cst_92 = arith.constant dense<0.000000e+00> : vector<8x1024xf32>
    %504 = tpu.matmul %503, %8, %cst_92 {dimension_numbers = #tpu.dot_dimension_numbers<[1], [0], [0], [1], [0, 0, 1, 1], [], []>} : vector<8x256xf32>, vector<256x1024xf32>, vector<8x1024xf32> -> vector<8x1024xf32>
    %505 = vector.extract_strided_slice %504 {offsets = [0, 0], sizes = [8, 512], strides = [1, 1]} : vector<8x1024xf32> to vector<8x512xf32>
    %506 = vector.extract_strided_slice %504 {offsets = [0, 512], sizes = [8, 512], strides = [1, 1]} : vector<8x1024xf32> to vector<8x512xf32>
    %507 = arith.addf %506, %11 : vector<8x512xf32>
    %508 = vector.extract_strided_slice %507 {offsets = [0, 0], sizes = [8, 128], strides = [1, 1]} : vector<8x512xf32> to vector<8x128xf32>
    %509 = arith.negf %508 : vector<8x128xf32>
    %510 = math.exp %509 : vector<8x128xf32>
    %cst_93 = arith.constant 1.000000e+00 : f32
    %511 = vector.broadcast %cst_93 : f32 to vector<8x128xf32>
    %512 = arith.addf %511, %510 : vector<8x128xf32>
    %513 = arith.divf %511, %512 : vector<8x128xf32>
    %514 = vector.extract_strided_slice %507 {offsets = [0, 128], sizes = [8, 128], strides = [1, 1]} : vector<8x512xf32> to vector<8x128xf32>
    %515 = arith.negf %514 : vector<8x128xf32>
    %516 = math.exp %515 : vector<8x128xf32>
    %cst_94 = arith.constant 1.000000e+00 : f32
    %517 = vector.broadcast %cst_94 : f32 to vector<8x128xf32>
    %518 = arith.addf %517, %516 : vector<8x128xf32>
    %519 = arith.divf %517, %518 : vector<8x128xf32>
    %520 = vector.extract_strided_slice %507 {offsets = [0, 256], sizes = [8, 128], strides = [1, 1]} : vector<8x512xf32> to vector<8x128xf32>
    %521 = math.tanh %520 : vector<8x128xf32>
    %522 = vector.extract_strided_slice %507 {offsets = [0, 384], sizes = [8, 128], strides = [1, 1]} : vector<8x512xf32> to vector<8x128xf32>
    %523 = arith.negf %522 : vector<8x128xf32>
    %524 = math.exp %523 : vector<8x128xf32>
    %cst_95 = arith.constant 1.000000e+00 : f32
    %525 = vector.broadcast %cst_95 : f32 to vector<8x128xf32>
    %526 = arith.addf %525, %524 : vector<8x128xf32>
    %527 = arith.divf %525, %526 : vector<8x128xf32>
    %528 = arith.mulf %519, %472 : vector<8x128xf32>
    %529 = arith.mulf %513, %521 : vector<8x128xf32>
    %530 = arith.addf %528, %529 : vector<8x128xf32>
    %531 = math.tanh %530 : vector<8x128xf32>
    %532 = arith.mulf %527, %531 : vector<8x128xf32>
    %c32_96 = arith.constant 32 : index
    %c0_97 = arith.constant 0 : index
    %533 = vector.load %arg9[%c32_96, %c0_97] : memref<48x128xf32, #tpu.memory_space<vmem>>, vector<8x128xf32>
    tpu.vector_store %arg9[%c32_96, %c0_97], %532 {strides = array<i32>} : memref<48x128xf32, #tpu.memory_space<vmem>>, vector<8x128xf32>,
    %c72 = arith.constant 72 : index
    %c0_98 = arith.constant 0 : index
    %534 = vector.load %arg8[%c72, %c0_98] : memref<80x512xf32, #tpu.memory_space<vmem>>, vector<8x512xf32>
    %535 = arith.addf %534, %505 : vector<8x512xf32>
    %536 = vector.extract_strided_slice %535 {offsets = [0, 0], sizes = [8, 128], strides = [1, 1]} : vector<8x512xf32> to vector<8x128xf32>
    %537 = arith.negf %536 : vector<8x128xf32>
    %538 = math.exp %537 : vector<8x128xf32>
    %cst_99 = arith.constant 1.000000e+00 : f32
    %539 = vector.broadcast %cst_99 : f32 to vector<8x128xf32>
    %540 = arith.addf %539, %538 : vector<8x128xf32>
    %541 = arith.divf %539, %540 : vector<8x128xf32>
    %542 = vector.extract_strided_slice %535 {offsets = [0, 128], sizes = [8, 128], strides = [1, 1]} : vector<8x512xf32> to vector<8x128xf32>
    %543 = arith.negf %542 : vector<8x128xf32>
    %544 = math.exp %543 : vector<8x128xf32>
    %cst_100 = arith.constant 1.000000e+00 : f32
    %545 = vector.broadcast %cst_100 : f32 to vector<8x128xf32>
    %546 = arith.addf %545, %544 : vector<8x128xf32>
    %547 = arith.divf %545, %546 : vector<8x128xf32>
    %548 = vector.extract_strided_slice %535 {offsets = [0, 256], sizes = [8, 128], strides = [1, 1]} : vector<8x512xf32> to vector<8x128xf32>
    %549 = math.tanh %548 : vector<8x128xf32>
    %550 = vector.extract_strided_slice %535 {offsets = [0, 384], sizes = [8, 128], strides = [1, 1]} : vector<8x512xf32> to vector<8x128xf32>
    %551 = arith.negf %550 : vector<8x128xf32>
    %552 = math.exp %551 : vector<8x128xf32>
    %cst_101 = arith.constant 1.000000e+00 : f32
    %553 = vector.broadcast %cst_101 : f32 to vector<8x128xf32>
    %554 = arith.addf %553, %552 : vector<8x128xf32>
    %555 = arith.divf %553, %554 : vector<8x128xf32>
    %556 = arith.mulf %547, %500 : vector<8x128xf32>
    %557 = arith.mulf %541, %549 : vector<8x128xf32>
    %558 = arith.addf %556, %557 : vector<8x128xf32>
    %559 = math.tanh %558 : vector<8x128xf32>
    %560 = arith.mulf %555, %559 : vector<8x128xf32>
    %561 = tpu.concatenate %560, %532 in 1 : vector<8x128xf32>, vector<8x128xf32> -> vector<8x256xf32>
    %cst_102 = arith.constant dense<0.000000e+00> : vector<8x1024xf32>
    %562 = tpu.matmul %561, %8, %cst_102 {dimension_numbers = #tpu.dot_dimension_numbers<[1], [0], [0], [1], [0, 0, 1, 1], [], []>} : vector<8x256xf32>, vector<256x1024xf32>, vector<8x1024xf32> -> vector<8x1024xf32>
    %563 = vector.extract_strided_slice %562 {offsets = [0, 512], sizes = [8, 512], strides = [1, 1]} : vector<8x1024xf32> to vector<8x512xf32>
    %564 = arith.addf %563, %11 : vector<8x512xf32>
    %565 = vector.extract_strided_slice %564 {offsets = [0, 0], sizes = [8, 128], strides = [1, 1]} : vector<8x512xf32> to vector<8x128xf32>
    %566 = arith.negf %565 : vector<8x128xf32>
    %567 = math.exp %566 : vector<8x128xf32>
    %cst_103 = arith.constant 1.000000e+00 : f32
    %568 = vector.broadcast %cst_103 : f32 to vector<8x128xf32>
    %569 = arith.addf %568, %567 : vector<8x128xf32>
    %570 = arith.divf %568, %569 : vector<8x128xf32>
    %571 = vector.extract_strided_slice %564 {offsets = [0, 128], sizes = [8, 128], strides = [1, 1]} : vector<8x512xf32> to vector<8x128xf32>
    %572 = arith.negf %571 : vector<8x128xf32>
    %573 = math.exp %572 : vector<8x128xf32>
    %cst_104 = arith.constant 1.000000e+00 : f32
    %574 = vector.broadcast %cst_104 : f32 to vector<8x128xf32>
    %575 = arith.addf %574, %573 : vector<8x128xf32>
    %576 = arith.divf %574, %575 : vector<8x128xf32>
    %577 = vector.extract_strided_slice %564 {offsets = [0, 256], sizes = [8, 128], strides = [1, 1]} : vector<8x512xf32> to vector<8x128xf32>
    %578 = math.tanh %577 : vector<8x128xf32>
    %579 = vector.extract_strided_slice %564 {offsets = [0, 384], sizes = [8, 128], strides = [1, 1]} : vector<8x512xf32> to vector<8x128xf32>
    %580 = arith.negf %579 : vector<8x128xf32>
    %581 = math.exp %580 : vector<8x128xf32>
    %cst_105 = arith.constant 1.000000e+00 : f32
    %582 = vector.broadcast %cst_105 : f32 to vector<8x128xf32>
    %583 = arith.addf %582, %581 : vector<8x128xf32>
    %584 = arith.divf %582, %583 : vector<8x128xf32>
    %585 = arith.mulf %576, %530 : vector<8x128xf32>
    %586 = arith.mulf %570, %578 : vector<8x128xf32>
    %587 = arith.addf %585, %586 : vector<8x128xf32>
    %588 = math.tanh %587 : vector<8x128xf32>
    %589 = arith.mulf %584, %588 : vector<8x128xf32>
    %c40_106 = arith.constant 40 : index
    %c0_107 = arith.constant 0 : index
    %590 = vector.load %arg9[%c40_106, %c0_107] : memref<48x128xf32, #tpu.memory_space<vmem>>, vector<8x128xf32>
    tpu.vector_store %arg9[%c40_106, %c0_107], %589 {strides = array<i32>} : memref<48x128xf32, #tpu.memory_space<vmem>>, vector<8x128xf32>,
    %c0_108 = arith.constant 0 : index
    %c0_109 = arith.constant 0 : index
    %591 = vector.load %arg9[%c0_108, %c0_109] : memref<48x128xf32, #tpu.memory_space<vmem>>, vector<48x128xf32>
    %c0_110 = arith.constant 0 : index
    %c0_111 = arith.constant 0 : index
    %592 = vector.load %arg5[%c0_110, %c0_111] : memref<128x128xf32, #tpu.memory_space<vmem>>, vector<128x128xf32>
    %cst_112 = arith.constant dense<0.000000e+00> : vector<48x128xf32>
    %593 = tpu.matmul %591, %592, %cst_112 {dimension_numbers = #tpu.dot_dimension_numbers<[1], [0], [0], [1], [0, 0, 1, 1], [], []>} : vector<48x128xf32>, vector<128x128xf32>, vector<48x128xf32> -> vector<48x128xf32>
    %c0_113 = arith.constant 0 : index
    %c0_114 = arith.constant 0 : index
    %594 = vector.load %arg6[%c0_113, %c0_114] : memref<1x128xf32, #tpu.memory_space<vmem>>, vector<1x128xf32>
    %595 = vector.shape_cast %594 : vector<1x128xf32> to vector<1x128xf32>
    %596 = vector.broadcast %595 : vector<1x128xf32> to vector<48x128xf32>
    %597 = arith.addf %593, %596 : vector<48x128xf32>
    %c0_115 = arith.constant 0 : index
    %c0_116 = arith.constant 0 : index
    %598 = vector.load %arg7[%c0_115, %c0_116] : memref<48x128xf32, #tpu.memory_space<vmem>>, vector<48x128xf32>
    tpu.vector_store %arg7[%c0_115, %c0_116], %597 {strides = array<i32>} : memref<48x128xf32, #tpu.memory_space<vmem>>, vector<48x128xf32>,
    return
  }
}

</mosaic_0001>

<bundles_post_ra>
// kernel: lstm_forward.1
= control target key start
LH: loop header
LB: loop body
LE: loop exit
PB: predicated region body
PF: predicated region fallthrough
CT: control target
= control target key end

     0   :  { %12 = vsyncpa [#allocation5], 0  ;;  %s10886_s0 = inlined_call_operand.vmem [shape: f32[80,13], index: 0, kind: input, shape index: {}]   ;;  %s10887_s1 = inlined_call_operand.vmem [shape: f32[13,512], index: 1, kind: input, shape index: {}]   ;;  %s10888_s2 = inlined_call_operand.vmem [shape: f32[1,512], index: 2, kind: input, shape index: {}]   ;;  %s10889_s3 = inlined_call_operand.hbm [shape: f32[256,1024], index: 3, kind: input, shape index: {}]   ;;  %s10890_s4 = inlined_call_operand.vmem [shape: f32[1,512], index: 4, kind: input, shape index: {}]   ;;  %s10891_s5 = inlined_call_operand.hbm [shape: f32[128,128], index: 5, kind: input, shape index: {}]   ;;  %s10892_s6 = inlined_call_operand.vmem [shape: f32[1,128], index: 6, kind: input, shape index: {}]   ;;  %s10893_s7 = inlined_call_operand.vmem [shape: f32[48,128], index: 7, kind: output, shape index: {}]  }
   0x1   :  { %13 = vsyncpa [#allocation7], 0  ;;  %s5721_s24 = smov [#allocation4]  }
   0x2   :  { %s25_s25 = sshll.u32 %s5721_s24, 4  ;;  %s26_s25 = int_to_ptr.vmem [resolvable:$true] %s25_s25 }
   0x3   :  { %s5685_s26 = scalar_lea.vmem %s26_s25, 32768  ;;  %p5690_p1 = scmp.lt.s32.totalorder %s26_s25, %s26_s25 }
   0x4   :  { %p5686_p0 = scmp.ne.s32.totalorder %s26_s25, %s5685_s26  ;;  %p5691_p2 = scmp.lt.s32.totalorder %s5685_s26, %s5685_s26 }
   0x6   :  { %p5692_p3 = por %p5691_p2, %p5690_p1 }
   0x8   :  { %p5693_p4 = pnand %p5692_p3, %p5686_p0 }
   0xa   :  { %5696 = shalt.err (!%p5693_p4)
}
   0xb   :  { %s5722_s27 = smov 1024   ;;  %s5723_s28 = smov 64  }
   0xc   :  { %31 = dma.hbm_to_vmem [thread:$0]  %s10889_s3, 32768, %s26_s25, [#allocation5], %s5722_s27, %s5722_s27, %s5723_s28  }
   0xd   :  { %s5724_s8 = smov [#allocation6]  }
   0xe   :  { %s39_s9 = sshll.u32 %s5724_s8, 4  ;;  %s40_s9 = int_to_ptr.vmem [resolvable:$true] %s39_s9 }
   0xf   :  { %s5705_s10 = scalar_lea.vmem %s40_s9, 2048  ;;  %p5710_p6 = scmp.lt.s32.totalorder %s40_s9, %s40_s9 }
  0x10   :  { %p5706_p5 = scmp.ne.s32.totalorder %s40_s9, %s5705_s10  ;;  %p5711_p7 = scmp.lt.s32.totalorder %s5705_s10, %s5705_s10 }
  0x12   :  { %p5712_p8 = por %p5711_p7, %p5710_p6 }
  0x14   :  { %p5713_p9 = pnand %p5712_p8, %p5706_p5 }
  0x16   :  { %5716 = shalt.err (!%p5713_p9)
}
  0x17   :  { %s5725_s11 = smov 128   ;;  %s5726_s12 = smov 8  }
  0x18   :  { %45 = dma.hbm_to_vmem [thread:$0]  %s10891_s5, 2048, %s40_s9, [#allocation7], %s5725_s11, %s5725_s11, %s5726_s12  }
  0x19   :  { %5717 = dma.done.wait [#allocation5], 32768  }
  0x1a   :  { %5718 = vsyncadd [#allocation5], 4294934528 }
  0x1b   :  { %5719 = dma.done.wait [#allocation7], 2048  }
  0x1c   :  { %5720 = vsyncadd [#allocation7], 4294965248  ;;  %v10897_v0 = vmov 0.0   ;;  %vm125_vm0 = vcmask 1044480   ;;  %v69_v1 = vld [vmem:[%s10887_s1 + $0x28] sm:$0x1f] }
  0x1d   :  { %202 = vmatprep.mubr.f32.mxu0 %v10897_v0  ;;  %327 = vmatprep.mubr.f32.mxu1 %v10897_v0  ;;  %v68_v2 = vld [vmem:[%s10887_s1 + $0x20] sm:$0x1f]  ;;  %v65_v3 = vld [vmem:[%s10887_s1 + $0x8] sm:$0xff]  ;;  %v71_v6 = vld [vmem:[%s10887_s1 + $0x38] sm:$0x1f]  ;;  %vm94_vm1 = vcmask 105472  }
  0x1e   :  { %4146 = vmatprep.subr.msk.mxu0 %vm125_vm0, %v69_v1  ;;  %v64_v4 = vld [vmem:[%s10887_s1] sm:$0xff]  ;;  %4158 = vmatprep.subr.msk.mxu1 %vm125_vm0, %v71_v6  ;;  %v70_v7 = vld [vmem:[%s10887_s1 + $0x30] sm:$0x1f]  ;;  %v67_v8 = vld [vmem:[%s10887_s1 + $0x18] sm:$0xff] }
  0x1f   :  { %v54_v5 = vld [vmem:[%s10886_s0] sm:$0xff]  ;;  %4147 = vmatpush1.msk.msra.mxu0 %vm125_vm0, %v68_v2  ;;  %v66_v9 = vld [vmem:[%s10887_s1 + $0x10] sm:$0xff]  ;;  %4159 = vmatpush1.msk.msra.mxu1 %vm125_vm0, %v70_v7  ;;  %v549_v10 = vld [vmem:[#allocation4 + $0x3c8] sm:$0xff] }
  0x20   :  { %168 = vmatprep.subr.mxu0 %v65_v3  ;;  %293 = vmatprep.subr.mxu1 %v67_v8  ;;  %v551_v11 = vld [vmem:[#allocation4 + $0x3d8] sm:$0xff]  ;;  %v548_v12 = vld [vmem:[#allocation4 + $0x3c0] sm:$0xff]  ;;  %v550_v13 = vld [vmem:[#allocation4 + $0x3d0] sm:$0xff] }
  0x21   :  { %169 = vmatpush1.msra.mxu0 %v64_v4  ;;  %294 = vmatpush1.msra.mxu1 %v66_v9  ;;  %v541_v14 = vld [vmem:[#allocation4 + $0x388] sm:$0xff]  ;;  %v543_v15 = vld [vmem:[#allocation4 + $0x398] sm:$0xff]  ;;  %v540_v16 = vld [vmem:[#allocation4 + $0x380] sm:$0xff] }
  0x22   :  { %4148 = vmatmul.mubr.msk.f32.vlgmr.msra.gmra.mxu0 %vm94_vm1, %v54_v5  ;;  %4160 = vmatmul.mubr.msk.f32.vlgmr.msra.gmra.mxu1 %vm94_vm1, %v54_v5  ;;  %v542_v17 = vld [vmem:[#allocation4 + $0x390] sm:$0xff]  ;;  %v533_v18 = vld [vmem:[#allocation4 + $0x348] sm:$0xff]  ;;  %v535_v19 = vld [vmem:[#allocation4 + $0x358] sm:$0xff] }
  0x23   :  { %738 = vmatprep.subr.mxu0 %v549_v10  ;;  %809 = vmatprep.subr.mxu1 %v551_v11  ;;  %v532_v20 = vld [vmem:[#allocation4 + $0x340] sm:$0xff]  ;;  %v534_v21 = vld [vmem:[#allocation4 + $0x350] sm:$0xff]  ;;  %v525_v22 = vld [vmem:[#allocation4 + $0x308] sm:$0xff] }
  0x24   :  { %739 = vmatpush1.msra.mxu0 %v548_v12  ;;  %810 = vmatpush1.msra.mxu1 %v550_v13  ;;  %v527_v23 = vld [vmem:[#allocation4 + $0x318] sm:$0xff]  ;;  %v524_v24 = vld [vmem:[#allocation4 + $0x300] sm:$0xff]  ;;  %v526_v25 = vld [vmem:[#allocation4 + $0x310] sm:$0xff] }
  0x25   :  { %740 = vmatprep.subr.mxu0 %v541_v14  ;;  %811 = vmatprep.subr.mxu1 %v543_v15  ;;  %v517_v26 = vld [vmem:[#allocation4 + $0x2c8] sm:$0xff]  ;;  %v519_v27 = vld [vmem:[#allocation4 + $0x2d8] sm:$0xff]  ;;  %v516_v28 = vld [vmem:[#allocation4 + $0x2c0] sm:$0xff] }
  0x26   :  { %741 = vmatpush1.msra.mxu0 %v540_v16  ;;  %812 = vmatpush1.msra.mxu1 %v542_v17  ;;  %v518_v29 = vld [vmem:[#allocation4 + $0x2d0] sm:$0xff]  ;;  %v509_v30 = vld [vmem:[#allocation4 + $0x288] sm:$0xff]  ;;  %v511_v31 = vld [vmem:[#allocation4 + $0x298] sm:$0xff] }
  0x27   :  { %742 = vmatprep.subr.mxu0 %v533_v18  ;;  %813 = vmatprep.subr.mxu1 %v535_v19  ;;  %v508_v32 = vld [vmem:[#allocation4 + $0x280] sm:$0xff]  ;;  %v510_v33 = vld [vmem:[#allocation4 + $0x290] sm:$0xff]  ;;  %v501_v34 = vld [vmem:[#allocation4 + $0x248] sm:$0xff] }
  0x28   :  { %743 = vmatpush1.msra.mxu0 %v532_v20  ;;  %814 = vmatpush1.msra.mxu1 %v534_v21  ;;  %v503_v35 = vld [vmem:[#allocation4 + $0x258] sm:$0xff]  ;;  %v500_v36 = vld [vmem:[#allocation4 + $0x240] sm:$0xff]  ;;  %v502_v37 = vld [vmem:[#allocation4 + $0x250] sm:$0xff] }
  0x29   :  { %744 = vmatprep.subr.mxu0 %v525_v22  ;;  %815 = vmatprep.subr.mxu1 %v527_v23  ;;  %v493_v38 = vld [vmem:[#allocation4 + $0x208] sm:$0xff]  ;;  %v495_v39 = vld [vmem:[#allocation4 + $0x218] sm:$0xff]  ;;  %v492_v40 = vld [vmem:[#allocation4 + $0x200] sm:$0xff] }
  0x2a   :  { %745 = vmatpush1.msra.mxu0 %v524_v24  ;;  %816 = vmatpush1.msra.mxu1 %v526_v25  ;;  %v494_v41 = vld [vmem:[#allocation4 + $0x210] sm:$0xff]  ;;  %v485_v42 = vld [vmem:[#allocation4 + $0x1c8] sm:$0xff]  ;;  %v487_v43 = vld [vmem:[#allocation4 + $0x1d8] sm:$0xff] }
  0x2b   :  { %208 = vmatprep.mubr.f32.mxu0 %v10897_v0  ;;  %333 = vmatprep.mubr.f32.mxu1 %v10897_v0  ;;  %v484_v44 = vld [vmem:[#allocation4 + $0x1c0] sm:$0xff]  ;;  %v486_v45 = vld [vmem:[#allocation4 + $0x1d0] sm:$0xff]  ;;  %v477_v46 = vld [vmem:[#allocation4 + $0x188] sm:$0xff] }
  0x2c   :  { %746 = vmatprep.subr.mxu0 %v517_v26  ;;  %817 = vmatprep.subr.mxu1 %v519_v27  ;;  %v479_v47 = vld [vmem:[#allocation4 + $0x198] sm:$0xff]  ;;  %v476_v48 = vld [vmem:[#allocation4 + $0x180] sm:$0xff]  ;;  %v478_v49 = vld [vmem:[#allocation4 + $0x190] sm:$0xff] }
  0x2d   :  { %747 = vmatpush1.msra.mxu0 %v516_v28  ;;  %818 = vmatpush1.msra.mxu1 %v518_v29  ;;  %v469_v50 = vld [vmem:[#allocation4 + $0x148] sm:$0xff]  ;;  %v471_v51 = vld [vmem:[#allocation4 + $0x158] sm:$0xff]  ;;  %v468_v52 = vld [vmem:[#allocation4 + $0x140] sm:$0xff] }
  0x2e   :  { %748 = vmatprep.subr.mxu0 %v509_v30  ;;  %819 = vmatprep.subr.mxu1 %v511_v31  ;;  %v470_v53 = vld [vmem:[#allocation4 + $0x150] sm:$0xff]  ;;  %v461_v54 = vld [vmem:[#allocation4 + $0x108] sm:$0xff]  ;;  %v463_v55 = vld [vmem:[#allocation4 + $0x118] sm:$0xff] }
  0x2f   :  { %749 = vmatpush1.msra.mxu0 %v508_v32  ;;  %820 = vmatpush1.msra.mxu1 %v510_v33  ;;  %v460_v56 = vld [vmem:[#allocation4 + $0x100] sm:$0xff]  ;;  %v462_v57 = vld [vmem:[#allocation4 + $0x110] sm:$0xff]  ;;  %v453_v58 = vld [vmem:[#allocation4 + $0xc8] sm:$0xff] }
  0x30   :  { %750 = vmatprep.subr.mxu0 %v501_v34  ;;  %821 = vmatprep.subr.mxu1 %v503_v35  ;;  %v455_v59 = vld [vmem:[#allocation4 + $0xd8] sm:$0xff]  ;;  %v452_v60 = vld [vmem:[#allocation4 + $0xc0] sm:$0xff]  ;;  %v454_v61 = vld [vmem:[#allocation4 + $0xd0] sm:$0xff] }
  0x31   :  { %751 = vmatpush1.msra.mxu0 %v500_v36  ;;  %822 = vmatpush1.msra.mxu1 %v502_v37  ;;  %v445_v62 = vld [vmem:[#allocation4 + $0x88] sm:$0xff]  ;;  %v447_v63 = vld [vmem:[#allocation4 + $0x98] sm:$0xff]  ;;  %v444_v2 = vld [vmem:[#allocation4 + $0x80] sm:$0xff] }
  0x32   :  { %752 = vmatprep.subr.mxu0 %v493_v38  ;;  %823 = vmatprep.subr.mxu1 %v495_v39  ;;  %v55_v1 = vld [vmem:[%s10886_s0 + $0x8] sm:$0xff]  ;;  %v446_v3 = vld [vmem:[#allocation4 + $0x90] sm:$0xff]  ;;  %v439_v5 = vld [vmem:[#allocation4 + $0x58] sm:$0xff] }
  0x33   :  { %753 = vmatpush1.msra.mxu0 %v492_v40  ;;  %824 = vmatpush1.msra.mxu1 %v494_v41  ;;  %v437_v4 = vld [vmem:[#allocation4 + $0x48] sm:$0xff]  ;;  %v436_v6 = vld [vmem:[#allocation4 + $0x40] sm:$0xff]  ;;  %v438_v7 = vld [vmem:[#allocation4 + $0x50] sm:$0xff] }
  0x34   :  { %754 = vmatprep.subr.mxu0 %v485_v42  ;;  %825 = vmatprep.subr.mxu1 %v487_v43  ;;  %v429_v8 = vld [vmem:[#allocation4 + $0x8] sm:$0xff]  ;;  %v431_v9 = vld [vmem:[#allocation4 + $0x18] sm:$0xff]  ;;  %v56_v10 = vld [vmem:[%s10886_s0 + $0x10] sm:$0xff] }
  0x35   :  { %755 = vmatpush1.msra.mxu0 %v484_v44  ;;  %826 = vmatpush1.msra.mxu1 %v486_v45  ;;  %v428_v11 = vld [vmem:[#allocation4] sm:$0xff]  ;;  %v430_v12 = vld [vmem:[#allocation4 + $0x10] sm:$0xff]  ;;  %v677_v13 = vld [vmem:[#allocation4 + $0x7c8] sm:$0xff] }
  0x36   :  { %756 = vmatprep.subr.mxu0 %v477_v46  ;;  %827 = vmatprep.subr.mxu1 %v479_v47  ;;  %v679_v14 = vld [vmem:[#allocation4 + $0x7d8] sm:$0xff]  ;;  %v676_v15 = vld [vmem:[#allocation4 + $0x7c0] sm:$0xff]  ;;  %v678_v16 = vld [vmem:[#allocation4 + $0x7d0] sm:$0xff] }
  0x37   :  { %757 = vmatpush1.msra.mxu0 %v476_v48  ;;  %828 = vmatpush1.msra.mxu1 %v478_v49  ;;  %v669_v17 = vld [vmem:[#allocation4 + $0x788] sm:$0xff]  ;;  %v671_v18 = vld [vmem:[#allocation4 + $0x798] sm:$0xff]  ;;  %v668_v20 = vld [vmem:[#allocation4 + $0x780] sm:$0xff] }
  0x38   :  { %758 = vmatprep.subr.mxu0 %v469_v50  ;;  %829 = vmatprep.subr.mxu1 %v471_v51  ;;  %v57_v19 = vld [vmem:[%s10886_s0 + $0x18] sm:$0xff]  ;;  %v670_v21 = vld [vmem:[#allocation4 + $0x790] sm:$0xff]  ;;  %v661_v22 = vld [vmem:[#allocation4 + $0x748] sm:$0xff] }
  0x39   :  { %759 = vmatpush1.msra.mxu0 %v468_v52  ;;  %830 = vmatpush1.msra.mxu1 %v470_v53  ;;  %v663_v23 = vld [vmem:[#allocation4 + $0x758] sm:$0xff]  ;;  %v660_v24 = vld [vmem:[#allocation4 + $0x740] sm:$0xff]  ;;  %v662_v25 = vld [vmem:[#allocation4 + $0x750] sm:$0xff] }
  0x3a   :  { %760 = vmatprep.subr.mxu0 %v461_v54  ;;  %831 = vmatprep.subr.mxu1 %v463_v55  ;;  %v653_v26 = vld [vmem:[#allocation4 + $0x708] sm:$0xff]  ;;  %v655_v27 = vld [vmem:[#allocation4 + $0x718] sm:$0xff]  ;;  %v58_v28 = vld [vmem:[%s10886_s0 + $0x20] sm:$0xff] }
  0x3b   :  { %761 = vmatpush1.msra.mxu0 %v460_v56  ;;  %832 = vmatpush1.msra.mxu1 %v462_v57  ;;  %v652_v29 = vld [vmem:[#allocation4 + $0x700] sm:$0xff]  ;;  %v654_v30 = vld [vmem:[#allocation4 + $0x710] sm:$0xff]  ;;  %v645_v31 = vld [vmem:[#allocation4 + $0x6c8] sm:$0xff] }
  0x3c   :  { %762 = vmatprep.subr.mxu0 %v453_v58  ;;  %833 = vmatprep.subr.mxu1 %v455_v59  ;;  %v647_v32 = vld [vmem:[#allocation4 + $0x6d8] sm:$0xff]  ;;  %v644_v33 = vld [vmem:[#allocation4 + $0x6c0] sm:$0xff]  ;;  %v646_v34 = vld [vmem:[#allocation4 + $0x6d0] sm:$0xff] }
  0x3d   :  { %763 = vmatpush1.msra.mxu0 %v452_v60  ;;  %834 = vmatpush1.msra.mxu1 %v454_v61  ;;  %v5832_v35 = vld [vmem:[#allocation4 + $0x688] sm:$0xff]  ;;  %v5835_v36 = vld [vmem:[#allocation4 + $0x698] sm:$0xff]  ;;  %v5840_v38 = vld [vmem:[#allocation4 + $0x680] sm:$0xff] }
  0x3e   :  { %764 = vmatprep.subr.mxu0 %v445_v62  ;;  %835 = vmatprep.subr.mxu1 %v447_v63  ;;  %v59_v37 = vld [vmem:[%s10886_s0 + $0x28] sm:$0xff]  ;;  %v5842_v39 = vld [vmem:[#allocation4 + $0x690] sm:$0xff]  ;;  %v5850_v41 = vld [vmem:[#allocation4 + $0x658] sm:$0xff] }
  0x3f   :  { %4149 = vmatmul.mubr.msk.f32.gmra.mxu0 %vm94_vm1, %v55_v1  ;;  %836 = vmatpush1.msra.mxu1 %v446_v3  ;;  %v5846_v40 = vld [vmem:[#allocation4 + $0x648] sm:$0xff]  ;;  %v5854_v42 = vld [vmem:[#allocation4 + $0x640] sm:$0xff]  ;;  %v5856_v43 = vld [vmem:[#allocation4 + $0x650] sm:$0xff] }
  0x40   :  { %765 = vmatpush1.msra.mxu0 %v444_v2  ;;  %837 = vmatprep.subr.mxu1 %v439_v5  ;;  %v5860_v44 = vld [vmem:[#allocation4 + $0x608] sm:$0xff]  ;;  %v5864_v45 = vld [vmem:[#allocation4 + $0x618] sm:$0xff]  ;;  %v60_v46 = vld [vmem:[%s10886_s0 + $0x30] sm:$0xff] }
  0x41   :  { %766 = vmatprep.subr.mxu0 %v437_v4  ;;  %4161 = vmatmul.mubr.msk.f32.gmra.mxu1 %vm94_vm1, %v55_v1  ;;  %v5871_v47 = vld [vmem:[#allocation4 + $0x600] sm:$0xff]  ;;  %v5873_v48 = vld [vmem:[#allocation4 + $0x610] sm:$0xff]  ;;  %v5877_v49 = vld [vmem:[#allocation4 + $0x5c8] sm:$0xff] }
  0x42   :  { %767 = vmatpush1.msra.mxu0 %v436_v6  ;;  %838 = vmatpush1.msra.mxu1 %v438_v7  ;;  %v5881_v50 = vld [vmem:[#allocation4 + $0x5d8] sm:$0xff]  ;;  %v5885_v51 = vld [vmem:[#allocation4 + $0x5c0] sm:$0xff]  ;;  %v5887_v52 = vld [vmem:[#allocation4 + $0x5d0] sm:$0xff] }
  0x43   :  { %214 = vmatprep.mubr.f32.mxu0 %v10897_v0  ;;  %768 = vmatprep.subr.mxu0 %v429_v8  ;;  %v5891_v53 = vld [vmem:[#allocation4 + $0x588] sm:$0xff]  ;;  %v5895_v54 = vld [vmem:[#allocation4 + $0x598] sm:$0xff]  ;;  %v5902_v56 = vld [vmem:[#allocation4 + $0x580] sm:$0xff] }
  0x44   :  { %839 = vmatprep.subr.mxu1 %v431_v9  ;;  %4150 = vmatmul.mubr.msk.f32.gmra.mxu0 %vm94_vm1, %v56_v10  ;;  %v61_v55 = vld [vmem:[%s10886_s0 + $0x38] sm:$0xff]  ;;  %v5904_v57 = vld [vmem:[#allocation4 + $0x590] sm:$0xff]  ;;  %v5908_v58 = vld [vmem:[#allocation4 + $0x548] sm:$0xff] }
  0x45   :  { %769 = vmatpush1.msra.mxu0 %v428_v11  ;;  %840 = vmatpush1.msra.mxu1 %v430_v12  ;;  %v5912_v59 = vld [vmem:[#allocation4 + $0x558] sm:$0xff]  ;;  %v5916_v60 = vld [vmem:[#allocation4 + $0x540] sm:$0xff]  ;;  %v5918_v61 = vld [vmem:[#allocation4 + $0x550] sm:$0xff] }
  0x46   :  { %339 = vmatprep.mubr.f32.mxu1 %v10897_v0  ;;  %770 = vmatprep.subr.mxu0 %v677_v13  ;;  %v5922_v62 = vld [vmem:[#allocation4 + $0x508] sm:$0xff]  ;;  %v5926_v63 = vld [vmem:[#allocation4 + $0x518] sm:$0xff]  ;;  %v62_v1 = vld [vmem:[%s10886_s0 + $0x40] sm:$0xff] }
  0x47   :  { %841 = vmatprep.subr.mxu1 %v679_v14  ;;  %4162 = vmatmul.mubr.msk.f32.gmra.mxu1 %vm94_vm1, %v56_v10  ;;  %v5933_v2 = vld [vmem:[#allocation4 + $0x500] sm:$0xff]  ;;  %v5935_v3 = vld [vmem:[#allocation4 + $0x510] sm:$0xff]  ;;  %v5939_v4 = vld [vmem:[#allocation4 + $0x4c8] sm:$0xff] }
  0x48   :  { %771 = vmatpush2.msra.mxu0 %v676_v15  ;;  %842 = vmatpush2.msra.mxu1 %v678_v16  ;;  %v5943_v5 = vld [vmem:[#allocation4 + $0x4d8] sm:$0xff]  ;;  %v5947_v6 = vld [vmem:[#allocation4 + $0x4c0] sm:$0xff]  ;;  %v5949_v7 = vld [vmem:[#allocation4 + $0x4d0] sm:$0xff] }
  0x49   :  { %220 = vmatprep.mubr.f32.mxu0 %v10897_v0  ;;  %772 = vmatprep.subr.mxu0 %v669_v17  ;;  %v5953_v8 = vld [vmem:[#allocation4 + $0x488] sm:$0xff]  ;;  %v5957_v9 = vld [vmem:[#allocation4 + $0x498] sm:$0xff]  ;;  %v5964_v11 = vld [vmem:[#allocation4 + $0x480] sm:$0xff] }
  0x4a   :  { %843 = vmatprep.subr.mxu1 %v671_v18  ;;  %4151 = vmatmul.mubr.msk.f32.gmra.mxu0 %vm94_vm1, %v57_v19  ;;  %v63_v10 = vld [vmem:[%s10886_s0 + $0x48] sm:$0xff]  ;;  %v5966_v12 = vld [vmem:[#allocation4 + $0x490] sm:$0xff]  ;;  %v5974_v14 = vld [vmem:[#allocation4 + $0x458] sm:$0xff] }
  0x4b   :  { %773 = vmatpush2.msra.mxu0 %v668_v20  ;;  %844 = vmatpush2.msra.mxu1 %v670_v21  ;;  %v5970_v13 = vld [vmem:[#allocation4 + $0x448] sm:$0xff]  ;;  %v5978_v15 = vld [vmem:[#allocation4 + $0x440] sm:$0xff]  ;;  %v5980_v16 = vld [vmem:[#allocation4 + $0x450] sm:$0xff] }
  0x4c   :  { %345 = vmatprep.mubr.f32.mxu1 %v10897_v0  ;;  %774 = vmatprep.subr.mxu0 %v661_v22  ;;  %v5984_v17 = vld [vmem:[#allocation4 + $0x408] sm:$0xff]  ;;  %v5986_v18 = vld [vmem:[#allocation4 + $0x418] sm:$0xff]  ;;  %v5992_v20 = vld [vmem:[#allocation4 + $0x410] sm:$0xff] }
  0x4d   :  { %845 = vmatprep.subr.mxu1 %v663_v23  ;;  %4163 = vmatmul.mubr.msk.f32.gmra.mxu1 %vm94_vm1, %v57_v19  ;;  %v5990_v19 = vld [vmem:[#allocation4 + $0x400] sm:$0xff]  ;;  %v5998_v21 = vld [vmem:[#allocation4 + $0x3e8] sm:$0xff]  ;;  %v6000_v22 = vld [vmem:[#allocation4 + $0x3f8] sm:$0xff]  ;;  %v74_v23 = vlaneseq }
  0x4e   :  { %775 = vmatpush2.msra.mxu0 %v660_v24  ;;  %846 = vmatpush2.msra.mxu1 %v662_v25  ;;  %11790 = vst [vmem:[#allocation10_spill] sm:$0xff] %v6000_v22 }
  0x4f   :  { %226 = vmatprep.mubr.f32.mxu0 %v10897_v0  ;;  %776 = vmatprep.subr.mxu0 %v653_v26  ;;  %v6008_v24 = vshrl.u32 %v74_v23, 7  ;;  %v72_v26 = vld [vmem:[%s10888_s2] sm:$0xf] }
  0x50   :  { %847 = vmatprep.subr.mxu1 %v655_v27  ;;  %4152 = vmatmul.mubr.msk.f32.gmra.mxu0 %vm94_vm1, %v58_v28 }
  0x51   :  { %777 = vmatpush2.msra.mxu0 %v652_v29  ;;  %848 = vmatpush2.msra.mxu1 %v654_v30  ;;  %11791 = vst [vmem:[#allocation11_spill] sm:$0xff] %v6008_v24  ;;  %v10895_v25 = vsub.s32 0, %v6008_v24  ;;  %v10894_v27 = vsub.s32 1, %v6008_v24 }
  0x52   :  { %351 = vmatprep.mubr.f32.mxu1 %v10897_v0  ;;  %778 = vmatprep.subr.mxu0 %v645_v31 }
  0x53   :  { %849 = vmatprep.subr.mxu1 %v647_v32  ;;  %4164 = vmatmul.mubr.msk.f32.gmra.mxu1 %vm94_vm1, %v58_v28  ;;  %v6017_v28 = vrot.slane %v72_v26, %v10895_v25  ;;  %v6021_v29 = vrot.slane %v72_v26, %v10894_v27 }
  0x54   :  { %779 = vmatpush2.msra.mxu0 %v644_v33  ;;  %850 = vmatpush2.msra.mxu1 %v646_v34 }
  0x55   :  { %232 = vmatprep.mubr.f32.mxu0 %v10897_v0  ;;  %780 = vmatprep.subr.mxu0 %v5832_v35  ;;  %11792 = vst [vmem:[#allocation12_spill] sm:$0xff] %v6017_v28  ;;  %11793 = vst [vmem:[#allocation13_spill] sm:$0xff] %v6021_v29 }
  0x56   :  { %851 = vmatprep.subr.mxu1 %v5835_v36  ;;  %4153 = vmatmul.mubr.msk.f32.gmra.mxu0 %vm94_vm1, %v59_v37 }
  0x57   :  { %781 = vmatpush2.msra.mxu0 %v5840_v38  ;;  %852 = vmatpush2.msra.mxu1 %v5842_v39 }
  0x58   :  { %357 = vmatprep.mubr.f32.mxu1 %v10897_v0  ;;  %782 = vmatprep.subr.mxu0 %v5846_v40 }
  0x59   :  { %853 = vmatprep.subr.mxu1 %v5850_v41  ;;  %4165 = vmatmul.mubr.msk.f32.gmra.mxu1 %vm94_vm1, %v59_v37  ;;  %v10896_v37 = vsub.s32 3, %v6008_v24 }
  0x5a   :  { %783 = vmatpush2.msra.mxu0 %v5854_v42  ;;  %854 = vmatpush2.msra.mxu1 %v5856_v43 }
  0x5b   :  { %238 = vmatprep.mubr.f32.mxu0 %v10897_v0  ;;  %784 = vmatprep.subr.mxu0 %v5860_v44 }
  0x5c   :  { %855 = vmatprep.subr.mxu1 %v5864_v45  ;;  %4154 = vmatmul.mubr.msk.f32.gmra.mxu0 %vm94_vm1, %v60_v46 }
  0x5d   :  { %785 = vmatpush2.msra.mxu0 %v5871_v47  ;;  %856 = vmatpush2.msra.mxu1 %v5873_v48 }
  0x5e   :  { %363 = vmatprep.mubr.f32.mxu1 %v10897_v0  ;;  %786 = vmatprep.subr.mxu0 %v5877_v49 }
  0x5f   :  { %857 = vmatprep.subr.mxu1 %v5881_v50  ;;  %4166 = vmatmul.mubr.msk.f32.gmra.mxu1 %vm94_vm1, %v60_v46 }
  0x60   :  { %787 = vmatpush2.msra.mxu0 %v5885_v51  ;;  %858 = vmatpush2.msra.mxu1 %v5887_v52 }
  0x61   :  { %244 = vmatprep.mubr.f32.mxu0 %v10897_v0  ;;  %788 = vmatprep.subr.mxu0 %v5891_v53 }
  0x62   :  { %859 = vmatprep.subr.mxu1 %v5895_v54  ;;  %4155 = vmatmul.mubr.msk.f32.gmra.mxu0 %vm94_vm1, %v61_v55 }
  0x63   :  { %789 = vmatpush2.msra.mxu0 %v5902_v56  ;;  %860 = vmatpush2.msra.mxu1 %v5904_v57 }
  0x64   :  { %369 = vmatprep.mubr.f32.mxu1 %v10897_v0  ;;  %790 = vmatprep.subr.mxu0 %v5908_v58 }
  0x65   :  { %861 = vmatprep.subr.mxu1 %v5912_v59  ;;  %4167 = vmatmul.mubr.msk.f32.gmra.mxu1 %vm94_vm1, %v61_v55 }
  0x66   :  { %791 = vmatpush2.msra.mxu0 %v5916_v60  ;;  %862 = vmatpush2.msra.mxu1 %v5918_v61 }
  0x67   :  { %250 = vmatprep.mubr.f32.mxu0 %v10897_v0  ;;  %792 = vmatprep.subr.mxu0 %v5922_v62 }
  0x68   :  { %863 = vmatprep.subr.mxu1 %v5926_v63  ;;  %4156 = vmatmul.mubr.msk.f32.gmra.mxu0 %vm94_vm1, %v62_v1 }
  0x69   :  { %793 = vmatpush2.msra.mxu0 %v5933_v2  ;;  %864 = vmatpush2.msra.mxu1 %v5935_v3 }
  0x6a   :  { %375 = vmatprep.mubr.f32.mxu1 %v10897_v0  ;;  %794 = vmatprep.subr.mxu0 %v5939_v4 }
  0x6b   :  { %865 = vmatprep.subr.mxu1 %v5943_v5  ;;  %4168 = vmatmul.mubr.msk.f32.gmra.mxu1 %vm94_vm1, %v62_v1  ;;  %v10905_v1 = vsub.s32 2, %v6008_v24 }
  0x6c   :  { %795 = vmatpush2.msra.mxu0 %v5947_v6  ;;  %866 = vmatpush2.msra.mxu1 %v5949_v7 }
  0x6d   :  { %256 = vmatprep.mubr.f32.mxu0 %v10897_v0  ;;  %796 = vmatprep.subr.mxu0 %v5953_v8 }
  0x6e   :  { %867 = vmatprep.subr.mxu1 %v5957_v9  ;;  %4157 = vmatmul.mubr.msk.f32.gmra.mxu0 %vm94_vm1, %v63_v10 }
  0x6f   :  { %797 = vmatpush2.msra.mxu0 %v5964_v11  ;;  %868 = vmatpush2.msra.mxu1 %v5966_v12 }
  0x70   :  { %381 = vmatprep.mubr.f32.mxu1 %v10897_v0  ;;  %798 = vmatprep.subr.mxu0 %v5970_v13 }
  0x71   :  { %869 = vmatprep.subr.mxu1 %v5974_v14  ;;  %4169 = vmatmul.mubr.msk.f32.gmra.mxu1 %vm94_vm1, %v63_v10  ;;  %v6029_v10 = vrot.slane %v72_v26, %v10896_v37 }
  0x72   :  { %799 = vmatpush2.msra.mxu0 %v5978_v15  ;;  %870 = vmatpush2.msra.mxu1 %v5980_v16 }
  0x73   :  { %800 = vmatprep.subr.mxu0 %v5984_v17  ;;  %871 = vmatprep.subr.mxu1 %v5986_v18  ;;  %11794 = vst [vmem:[#allocation14_spill] sm:$0xff] %v6029_v10 }
  0x74   :  { %801 = vmatpush2.msra.mxu0 %v5990_v19  ;;  %872 = vmatpush2.msra.mxu1 %v5992_v20 }
  0x75   :  { %802 = vmatprep.mubr.f32.mxu0 %v10897_v0  ;;  %873 = vmatprep.mubr.f32.mxu1 %v10897_v0 }
  0x76   :  { %880 = vmatprep.subr.mxu0 %v5998_v21  ;;  %951 = vmatprep.subr.mxu1 %v6000_v22 }
  0xe2   :  { %v204_v30 = vpop.f32.mrf.mxu0  ;;  %v329_v55 = vpop.f32.mrf.mxu1 }
  0xe3   :  { %v205_v31 = vadd.f32 %v204_v30, %v6017_v28  ;;  %v6033_v30 = vrot.slane %v72_v26, %v10905_v1 }
  0xe4   :  { %v206_v32 = vpop.f32.mrf.mxu0  ;;  %v331_v23 = vpop.f32.mrf.mxu1 }
  0xe5   :  { %v4170_v33 = vmul.f32 -1.442695, %v205_v31  ;;  %v207_v34 = vadd.f32 %v206_v32, %v6021_v29  ;;  %11795 = vst [vmem:[#allocation15_spill] sm:$0xff] %v6033_v30  ;;  %v332_v31 = vadd.f32 %v331_v23, %v6029_v10  ;;  %v330_v32 = vadd.f32 %v329_v55, %v6033_v30 }
  0xe7   :  { %4333 = vpow2.f32 %v4170_v33  ;;  %v4171_v46 = vmul.f32 -1.442695, %v207_v34  ;;  %v4172_v27 = vmul.f32 -1.442695, %v332_v31 }
  0xe9   :  { %4335 = vpow2.f32 %v4171_v46 }
  0xea   :  { %4337 = vtanh.f32 %v330_v32  ;;  %v6044_v32 = vld [vmem:[#allocation4 + $0x3f0] sm:$0xff] }
  0xeb   :  { %4339 = vpow2.f32 %v4172_v27  ;;  %v6042_v27 = vld [vmem:[#allocation4 + $0x3e0] sm:$0xff] }
  0xf4   :  { %v4334_v33 = vpop.eup %4333 }
  0xf5   :  { %v717_v34 = vadd.f32 1.0, %v4334_v33  ;;  %v6048_v33 = vld [vmem:[#allocation4 + $0x3b8] sm:$0xff] }
  0xf6   :  { %v4336_v46 = vpop.eup %4335 }
  0xf7   :  { %4341 = vrcp.f32 %v717_v34  ;;  %v723_v25 = vadd.f32 1.0, %v4336_v46  ;;  %v4338_v37 = vpop.eup %4337  ;;  %v6070_v34 = vld [vmem:[#allocation4 + $0x328] sm:$0xff]  ;;  %v6072_v46 = vld [vmem:[#allocation4 + $0x338] sm:$0xff] }
  0xf8   :  { %v4340_v0 = vpop.eup %4339  ;;  %11802 = vst [vmem:[#allocation22_spill] sm:$0xff] %v6070_v34  ;;  %11803 = vst [vmem:[#allocation23_spill] sm:$0xff] %v6072_v46 }
  0xf9   :  { %4343 = vrcp.f32 %v723_v25  ;;  %v730_v24 = vadd.f32 1.0, %v4340_v0  ;;  %v6046_v25 = vld [vmem:[#allocation4 + $0x3a8] sm:$0xff]  ;;  %v6052_v0 = vld [vmem:[#allocation4 + $0x3a0] sm:$0xff] }
  0xfa   :  { %11796 = vst [vmem:[#allocation16_spill] sm:$0xff] %v6052_v0 }
  0xfb   :  { %4345 = vrcp.f32 %v730_v24  ;;  %v6054_v24 = vld [vmem:[#allocation4 + $0x3b0] sm:$0xff] }
  0xfc   :  { %11797 = vst [vmem:[#allocation17_spill] sm:$0xff] %v6054_v24 }
 0x104   :  { %v4342_v28 = vpop.eup %4341 }
 0x105   :  { %v734_v1 = vmul.f32 %v4342_v28, %v4338_v37  ;;  %v6058_v28 = vld [vmem:[#allocation4 + $0x368] sm:$0xff]  ;;  %v6064_v37 = vld [vmem:[#allocation4 + $0x360] sm:$0xff] }
 0x106   :  { %v4344_v29 = vpop.eup %4343  ;;  %11798 = vst [vmem:[#allocation18_spill] sm:$0xff] %v6058_v28  ;;  %11800 = vst [vmem:[#allocation20_spill] sm:$0xff] %v6064_v37 }
 0x107   :  { %v733_v26 = vmul.f32 0.0, %v4344_v29  ;;  %v6060_v29 = vld [vmem:[#allocation4 + $0x378] sm:$0xff] }
 0x108   :  { %v4346_v55 = vpop.eup %4345  ;;  %11799 = vst [vmem:[#allocation19_spill] sm:$0xff] %v6060_v29 }
 0x109   :  { %v6037_v22 = vadd.f32 %v734_v1, %v733_v26  ;;  %v6066_v1 = vld [vmem:[#allocation4 + $0x370] sm:$0xff]  ;;  %v6076_v26 = vld [vmem:[#allocation4 + $0x320] sm:$0xff] }
 0x10a   :  { %11801 = vst [vmem:[#allocation21_spill] sm:$0xff] %v6066_v1  ;;  %11804 = vst [vmem:[#allocation24_spill] sm:$0xff] %v6076_v26 }
 0x10b   :  { %4347 = vtanh.f32 %v6037_v22 }
 0x118   :  { %v4348_v23 = vpop.eup %4347 }
 0x119   :  { %v6040_v31 = vmul.f32 %v4348_v23, %v4346_v55  ;;  %v6078_v55 = vld [vmem:[#allocation4 + $0x330] sm:$0xff]  ;;  %v6082_v23 = vld [vmem:[#allocation4 + $0x2e8] sm:$0xff] }
 0x11a   :  { %11805 = vst [vmem:[#allocation25_spill] sm:$0xff] %v6078_v55  ;;  %11806 = vst [vmem:[#allocation26_spill] sm:$0xff] %v6082_v23 }
 0x11b   :  { %803 = vmatmul.mubr.f32.vlgmr.msra.gmra.mxu0 %v6040_v31  ;;  %874 = vmatmul.mubr.f32.vlgmr.msra.gmra.mxu1 %v6040_v31 }
 0x11c   :  { %881 = vmatpush1.msra.mxu0 %v6042_v27  ;;  %952 = vmatpush1.msra.mxu1 %v6044_v32 }
 0x11d   :  { %882 = vmatprep.subr.mxu0 %v6046_v25  ;;  %953 = vmatprep.subr.mxu1 %v6048_v33 }
 0x11e   :  { %883 = vmatpush1.msra.mxu0 %v6052_v0  ;;  %954 = vmatpush1.msra.mxu1 %v6054_v24  ;;  %v6084_v0 = vld [vmem:[#allocation4 + $0x2f8] sm:$0xff]  ;;  %v6088_v24 = vld [vmem:[#allocation4 + $0x2e0] sm:$0xff] }
 0x11f   :  { %884 = vmatprep.subr.mxu0 %v6058_v28  ;;  %955 = vmatprep.subr.mxu1 %v6060_v29  ;;  %11807 = vst [vmem:[#allocation27_spill] sm:$0xff] %v6084_v0  ;;  %11808 = vst [vmem:[#allocation28_spill] sm:$0xff] %v6088_v24  ;;  %v6090_v28 = vld [vmem:[#allocation4 + $0x2f0] sm:$0xff]  ;;  %v6094_v29 = vld [vmem:[#allocation4 + $0x2a8] sm:$0xff] }
 0x120   :  { %885 = vmatpush1.msra.mxu0 %v6064_v37  ;;  %956 = vmatpush1.msra.mxu1 %v6066_v1  ;;  %11809 = vst [vmem:[#allocation29_spill] sm:$0xff] %v6090_v28  ;;  %11810 = vst [vmem:[#allocation30_spill] sm:$0xff] %v6094_v29  ;;  %v6096_v37 = vld [vmem:[#allocation4 + $0x2b8] sm:$0xff]  ;;  %v6100_v1 = vld [vmem:[#allocation4 + $0x2a0] sm:$0xff] }
 0x121   :  { %886 = vmatprep.subr.mxu0 %v6070_v34  ;;  %957 = vmatprep.subr.mxu1 %v6072_v46  ;;  %11811 = vst [vmem:[#allocation31_spill] sm:$0xff] %v6096_v37  ;;  %11812 = vst [vmem:[#allocation32_spill] sm:$0xff] %v6100_v1  ;;  %v6102_v34 = vld [vmem:[#allocation4 + $0x2b0] sm:$0xff]  ;;  %v6106_v46 = vld [vmem:[#allocation4 + $0x268] sm:$0xff] }
 0x122   :  { %887 = vmatpush1.msra.mxu0 %v6076_v26  ;;  %958 = vmatpush1.msra.mxu1 %v6078_v55  ;;  %11813 = vst [vmem:[#allocation33_spill] sm:$0xff] %v6102_v34  ;;  %11814 = vst [vmem:[#allocation34_spill] sm:$0xff] %v6106_v46  ;;  %v6108_v26 = vld [vmem:[#allocation4 + $0x278] sm:$0xff]  ;;  %v6112_v55 = vld [vmem:[#allocation4 + $0x260] sm:$0xff] }
 0x123   :  { %888 = vmatprep.subr.mxu0 %v6082_v23  ;;  %959 = vmatprep.subr.mxu1 %v6084_v0  ;;  %11815 = vst [vmem:[#allocation35_spill] sm:$0xff] %v6108_v26  ;;  %11816 = vst [vmem:[#allocation36_spill] sm:$0xff] %v6112_v55  ;;  %v6114_v23 = vld [vmem:[#allocation4 + $0x270] sm:$0xff]  ;;  %v6118_v0 = vld [vmem:[#allocation4 + $0x228] sm:$0xff] }
 0x124   :  { %889 = vmatpush1.msra.mxu0 %v6088_v24  ;;  %960 = vmatpush1.msra.mxu1 %v6090_v28  ;;  %11817 = vst [vmem:[#allocation37_spill] sm:$0xff] %v6114_v23  ;;  %11818 = vst [vmem:[#allocation38_spill] sm:$0xff] %v6118_v0  ;;  %v6120_v24 = vld [vmem:[#allocation4 + $0x238] sm:$0xff]  ;;  %v6124_v28 = vld [vmem:[#allocation4 + $0x220] sm:$0xff] }
 0x125   :  { %890 = vmatprep.subr.mxu0 %v6094_v29  ;;  %961 = vmatprep.subr.mxu1 %v6096_v37  ;;  %11819 = vst [vmem:[#allocation39_spill] sm:$0xff] %v6120_v24  ;;  %11820 = vst [vmem:[#allocation40_spill] sm:$0xff] %v6124_v28  ;;  %v6126_v29 = vld [vmem:[#allocation4 + $0x230] sm:$0xff]  ;;  %v6130_v37 = vld [vmem:[#allocation4 + $0x1e8] sm:$0xff] }
 0x126   :  { %891 = vmatpush1.msra.mxu0 %v6100_v1  ;;  %962 = vmatpush1.msra.mxu1 %v6102_v34  ;;  %11821 = vst [vmem:[#allocation41_spill] sm:$0xff] %v6126_v29  ;;  %11822 = vst [vmem:[#allocation42_spill] sm:$0xff] %v6130_v37  ;;  %v6132_v1 = vld [vmem:[#allocation4 + $0x1f8] sm:$0xff]  ;;  %v6136_v34 = vld [vmem:[#allocation4 + $0x1e0] sm:$0xff] }
 0x127   :  { %892 = vmatprep.subr.mxu0 %v6106_v46  ;;  %963 = vmatprep.subr.mxu1 %v6108_v26  ;;  %11823 = vst [vmem:[#allocation43_spill] sm:$0xff] %v6132_v1  ;;  %11824 = vst [vmem:[#allocation44_spill] sm:$0xff] %v6136_v34  ;;  %v6138_v46 = vld [vmem:[#allocation4 + $0x1f0] sm:$0xff]  ;;  %v6142_v26 = vld [vmem:[#allocation4 + $0x1a8] sm:$0xff] }
 0x128   :  { %893 = vmatpush1.msra.mxu0 %v6112_v55  ;;  %964 = vmatpush1.msra.mxu1 %v6114_v23  ;;  %11825 = vst [vmem:[#allocation45_spill] sm:$0xff] %v6138_v46  ;;  %11826 = vst [vmem:[#allocation46_spill] sm:$0xff] %v6142_v26  ;;  %v6144_v55 = vld [vmem:[#allocation4 + $0x1b8] sm:$0xff]  ;;  %v6148_v23 = vld [vmem:[#allocation4 + $0x1a0] sm:$0xff] }
 0x129   :  { %894 = vmatprep.subr.mxu0 %v6118_v0  ;;  %965 = vmatprep.subr.mxu1 %v6120_v24  ;;  %11827 = vst [vmem:[#allocation47_spill] sm:$0xff] %v6144_v55  ;;  %11828 = vst [vmem:[#allocation48_spill] sm:$0xff] %v6148_v23  ;;  %v6150_v0 = vld [vmem:[#allocation4 + $0x1b0] sm:$0xff]  ;;  %v6154_v24 = vld [vmem:[#allocation4 + $0x168] sm:$0xff] }
 0x12a   :  { %895 = vmatpush1.msra.mxu0 %v6124_v28  ;;  %966 = vmatpush1.msra.mxu1 %v6126_v29  ;;  %11829 = vst [vmem:[#allocation49_spill] sm:$0xff] %v6150_v0  ;;  %11830 = vst [vmem:[#allocation50_spill] sm:$0xff] %v6154_v24  ;;  %v6156_v28 = vld [vmem:[#allocation4 + $0x178] sm:$0xff]  ;;  %v6160_v29 = vld [vmem:[#allocation4 + $0x160] sm:$0xff] }
 0x12b   :  { %896 = vmatprep.subr.mxu0 %v6130_v37  ;;  %967 = vmatprep.subr.mxu1 %v6132_v1  ;;  %11831 = vst [vmem:[#allocation51_spill] sm:$0xff] %v6156_v28  ;;  %11832 = vst [vmem:[#allocation52_spill] sm:$0xff] %v6160_v29  ;;  %v6162_v37 = vld [vmem:[#allocation4 + $0x170] sm:$0xff]  ;;  %v6166_v1 = vld [vmem:[#allocation4 + $0x128] sm:$0xff] }
 0x12c   :  { %897 = vmatpush1.msra.mxu0 %v6136_v34  ;;  %968 = vmatpush1.msra.mxu1 %v6138_v46  ;;  %11833 = vst [vmem:[#allocation53_spill] sm:$0xff] %v6162_v37  ;;  %11834 = vst [vmem:[#allocation54_spill] sm:$0xff] %v6166_v1  ;;  %v6168_v34 = vld [vmem:[#allocation4 + $0x138] sm:$0xff]  ;;  %v6172_v46 = vld [vmem:[#allocation4 + $0x120] sm:$0xff] }
 0x12d   :  { %898 = vmatprep.subr.mxu0 %v6142_v26  ;;  %969 = vmatprep.subr.mxu1 %v6144_v55  ;;  %11835 = vst [vmem:[#allocation55_spill] sm:$0xff] %v6168_v34  ;;  %11836 = vst [vmem:[#allocation56_spill] sm:$0xff] %v6172_v46  ;;  %v6174_v26 = vld [vmem:[#allocation4 + $0x130] sm:$0xff]  ;;  %v6178_v55 = vld [vmem:[#allocation4 + $0xe8] sm:$0xff] }
 0x12e   :  { %899 = vmatpush1.msra.mxu0 %v6148_v23  ;;  %970 = vmatpush1.msra.mxu1 %v6150_v0  ;;  %11837 = vst [vmem:[#allocation57_spill] sm:$0xff] %v6174_v26  ;;  %11838 = vst [vmem:[#allocation58_spill] sm:$0xff] %v6178_v55  ;;  %v6180_v23 = vld [vmem:[#allocation4 + $0xf8] sm:$0xff]  ;;  %v6184_v0 = vld [vmem:[#allocation4 + $0xe0] sm:$0xff] }
 0x12f   :  { %900 = vmatprep.subr.mxu0 %v6154_v24  ;;  %971 = vmatprep.subr.mxu1 %v6156_v28  ;;  %11839 = vst [vmem:[#allocation59_spill] sm:$0xff] %v6180_v23  ;;  %11840 = vst [vmem:[#allocation60_spill] sm:$0xff] %v6184_v0  ;;  %v6186_v24 = vld [vmem:[#allocation4 + $0xf0] sm:$0xff]  ;;  %v6190_v28 = vld [vmem:[#allocation4 + $0xa8] sm:$0xff] }
 0x130   :  { %901 = vmatpush1.msra.mxu0 %v6160_v29  ;;  %972 = vmatpush1.msra.mxu1 %v6162_v37  ;;  %11841 = vst [vmem:[#allocation61_spill] sm:$0xff] %v6186_v24  ;;  %11842 = vst [vmem:[#allocation62_spill] sm:$0xff] %v6190_v28  ;;  %v6192_v29 = vld [vmem:[#allocation4 + $0xb8] sm:$0xff]  ;;  %v6196_v37 = vld [vmem:[#allocation4 + $0xa0] sm:$0xff] }
 0x131   :  { %902 = vmatprep.subr.mxu0 %v6166_v1  ;;  %973 = vmatprep.subr.mxu1 %v6168_v34  ;;  %11843 = vst [vmem:[#allocation63_spill] sm:$0xff] %v6192_v29  ;;  %11844 = vst [vmem:[#allocation64_spill] sm:$0xff] %v6196_v37  ;;  %v6198_v1 = vld [vmem:[#allocation4 + $0xb0] sm:$0xff]  ;;  %v6202_v34 = vld [vmem:[#allocation4 + $0x68] sm:$0xff] }
 0x132   :  { %903 = vmatpush1.msra.mxu0 %v6172_v46  ;;  %974 = vmatpush1.msra.mxu1 %v6174_v26  ;;  %11845 = vst [vmem:[#allocation65_spill] sm:$0xff] %v6198_v1  ;;  %11846 = vst [vmem:[#allocation66_spill] sm:$0xff] %v6202_v34  ;;  %v6204_v46 = vld [vmem:[#allocation4 + $0x78] sm:$0xff]  ;;  %v6208_v26 = vld [vmem:[#allocation4 + $0x60] sm:$0xff] }
 0x133   :  { %904 = vmatprep.subr.mxu0 %v6178_v55  ;;  %975 = vmatprep.subr.mxu1 %v6180_v23  ;;  %11847 = vst [vmem:[#allocation67_spill] sm:$0xff] %v6204_v46  ;;  %11848 = vst [vmem:[#allocation68_spill] sm:$0xff] %v6208_v26  ;;  %v6210_v55 = vld [vmem:[#allocation4 + $0x70] sm:$0xff]  ;;  %v6214_v23 = vld [vmem:[#allocation4 + $0x28] sm:$0xff] }
 0x134   :  { %905 = vmatpush1.msra.mxu0 %v6184_v0  ;;  %976 = vmatpush1.msra.mxu1 %v6186_v24  ;;  %11849 = vst [vmem:[#allocation69_spill] sm:$0xff] %v6210_v55  ;;  %11850 = vst [vmem:[#allocation70_spill] sm:$0xff] %v6214_v23  ;;  %v6216_v0 = vld [vmem:[#allocation4 + $0x38] sm:$0xff]  ;;  %v6220_v24 = vld [vmem:[#allocation4 + $0x20] sm:$0xff] }
 0x135   :  { %906 = vmatprep.subr.mxu0 %v6190_v28  ;;  %977 = vmatprep.subr.mxu1 %v6192_v29  ;;  %11851 = vst [vmem:[#allocation71_spill] sm:$0xff] %v6216_v0  ;;  %11852 = vst [vmem:[#allocation72_spill] sm:$0xff] %v6220_v24  ;;  %v6222_v28 = vld [vmem:[#allocation4 + $0x30] sm:$0xff]  ;;  %v6226_v29 = vld [vmem:[#allocation4 + $0x7e8] sm:$0xff] }
 0x136   :  { %907 = vmatpush1.msra.mxu0 %v6196_v37  ;;  %978 = vmatpush1.msra.mxu1 %v6198_v1  ;;  %11853 = vst [vmem:[#allocation73_spill] sm:$0xff] %v6222_v28  ;;  %11854 = vst [vmem:[#allocation74_spill] sm:$0xff] %v6226_v29  ;;  %v6228_v37 = vld [vmem:[#allocation4 + $0x7f8] sm:$0xff]  ;;  %v6232_v1 = vld [vmem:[#allocation4 + $0x7e0] sm:$0xff] }
 0x137   :  { %908 = vmatprep.subr.mxu0 %v6202_v34  ;;  %979 = vmatprep.subr.mxu1 %v6204_v46  ;;  %11855 = vst [vmem:[#allocation75_spill] sm:$0xff] %v6228_v37  ;;  %11856 = vst [vmem:[#allocation76_spill] sm:$0xff] %v6232_v1  ;;  %v6234_v34 = vld [vmem:[#allocation4 + $0x7f0] sm:$0xff]  ;;  %v6238_v46 = vld [vmem:[#allocation4 + $0x7a8] sm:$0xff] }
 0x138   :  { %909 = vmatpush1.msra.mxu0 %v6208_v26  ;;  %980 = vmatpush1.msra.mxu1 %v6210_v55  ;;  %11857 = vst [vmem:[#allocation77_spill] sm:$0xff] %v6234_v34  ;;  %11858 = vst [vmem:[#allocation78_spill] sm:$0xff] %v6238_v46  ;;  %v6240_v26 = vld [vmem:[#allocation4 + $0x7b8] sm:$0xff]  ;;  %v6244_v55 = vld [vmem:[#allocation4 + $0x7a0] sm:$0xff] }
 0x139   :  { %910 = vmatprep.subr.mxu0 %v6214_v23  ;;  %981 = vmatprep.subr.mxu1 %v6216_v0  ;;  %11859 = vst [vmem:[#allocation79_spill] sm:$0xff] %v6240_v26  ;;  %11860 = vst [vmem:[#allocation80_spill] sm:$0xff] %v6244_v55  ;;  %v6246_v23 = vld [vmem:[#allocation4 + $0x7b0] sm:$0xff]  ;;  %v6250_v0 = vld [vmem:[#allocation4 + $0x768] sm:$0xff] }
 0x13a   :  { %911 = vmatpush1.msra.mxu0 %v6220_v24  ;;  %982 = vmatpush1.msra.mxu1 %v6222_v28  ;;  %11861 = vst [vmem:[#allocation81_spill] sm:$0xff] %v6246_v23  ;;  %11862 = vst [vmem:[#allocation82_spill] sm:$0xff] %v6250_v0  ;;  %v6252_v24 = vld [vmem:[#allocation4 + $0x778] sm:$0xff]  ;;  %v6256_v28 = vld [vmem:[#allocation4 + $0x760] sm:$0xff] }
 0x13b   :  { %912 = vmatprep.subr.mxu0 %v6226_v29  ;;  %983 = vmatprep.subr.mxu1 %v6228_v37  ;;  %11863 = vst [vmem:[#allocation83_spill] sm:$0xff] %v6252_v24  ;;  %11864 = vst [vmem:[#allocation84_spill] sm:$0xff] %v6256_v28  ;;  %v6258_v29 = vld [vmem:[#allocation4 + $0x770] sm:$0xff]  ;;  %v6262_v37 = vld [vmem:[#allocation4 + $0x728] sm:$0xff] }
 0x13c   :  { %913 = vmatpush2.msra.mxu0 %v6232_v1  ;;  %984 = vmatpush2.msra.mxu1 %v6234_v34  ;;  %11865 = vst [vmem:[#allocation85_spill] sm:$0xff] %v6258_v29  ;;  %11866 = vst [vmem:[#allocation86_spill] sm:$0xff] %v6262_v37  ;;  %v6264_v1 = vld [vmem:[#allocation4 + $0x738] sm:$0xff]  ;;  %v6268_v34 = vld [vmem:[#allocation4 + $0x720] sm:$0xff] }
 0x13d   :  { %914 = vmatprep.subr.mxu0 %v6238_v46  ;;  %985 = vmatprep.subr.mxu1 %v6240_v26  ;;  %11867 = vst [vmem:[#allocation87_spill] sm:$0xff] %v6264_v1  ;;  %11868 = vst [vmem:[#allocation88_spill] sm:$0xff] %v6268_v34  ;;  %v6270_v46 = vld [vmem:[#allocation4 + $0x730] sm:$0xff]  ;;  %v6274_v26 = vld [vmem:[#allocation4 + $0x6e8] sm:$0xff] }
 0x13e   :  { %915 = vmatpush2.msra.mxu0 %v6244_v55  ;;  %986 = vmatpush2.msra.mxu1 %v6246_v23  ;;  %11869 = vst [vmem:[#allocation89_spill] sm:$0xff] %v6270_v46  ;;  %11870 = vst [vmem:[#allocation90_spill] sm:$0xff] %v6274_v26  ;;  %v6276_v55 = vld [vmem:[#allocation4 + $0x6f8] sm:$0xff]  ;;  %v6280_v23 = vld [vmem:[#allocation4 + $0x6e0] sm:$0xff] }
 0x13f   :  { %916 = vmatprep.subr.mxu0 %v6250_v0  ;;  %987 = vmatprep.subr.mxu1 %v6252_v24  ;;  %11871 = vst [vmem:[#allocation91_spill] sm:$0xff] %v6276_v55  ;;  %11872 = vst [vmem:[#allocation92_spill] sm:$0xff] %v6280_v23  ;;  %v6282_v0 = vld [vmem:[#allocation4 + $0x6f0] sm:$0xff]  ;;  %v6286_v24 = vld [vmem:[#allocation4 + $0x6a8] sm:$0xff] }
 0x140   :  { %917 = vmatpush2.msra.mxu0 %v6256_v28  ;;  %988 = vmatpush2.msra.mxu1 %v6258_v29  ;;  %11873 = vst [vmem:[#allocation93_spill] sm:$0xff] %v6282_v0  ;;  %11874 = vst [vmem:[#allocation94_spill] sm:$0xff] %v6286_v24  ;;  %v6288_v28 = vld [vmem:[#allocation4 + $0x6b8] sm:$0xff]  ;;  %v6292_v29 = vld [vmem:[#allocation4 + $0x6a0] sm:$0xff] }
 0x141   :  { %918 = vmatprep.subr.mxu0 %v6262_v37  ;;  %989 = vmatprep.subr.mxu1 %v6264_v1  ;;  %11875 = vst [vmem:[#allocation95_spill] sm:$0xff] %v6288_v28  ;;  %11876 = vst [vmem:[#allocation96_spill] sm:$0xff] %v6292_v29  ;;  %v6294_v37 = vld [vmem:[#allocation4 + $0x6b0] sm:$0xff]  ;;  %v6298_v1 = vld [vmem:[#allocation4 + $0x668] sm:$0xff] }
 0x142   :  { %919 = vmatpush2.msra.mxu0 %v6268_v34  ;;  %990 = vmatpush2.msra.mxu1 %v6270_v46  ;;  %11877 = vst [vmem:[#allocation97_spill] sm:$0xff] %v6294_v37  ;;  %11878 = vst [vmem:[#allocation98_spill] sm:$0xff] %v6298_v1  ;;  %v6300_v34 = vld [vmem:[#allocation4 + $0x678] sm:$0xff]  ;;  %v6304_v46 = vld [vmem:[#allocation4 + $0x660] sm:$0xff] }
 0x143   :  { %920 = vmatprep.subr.mxu0 %v6274_v26  ;;  %991 = vmatprep.subr.mxu1 %v6276_v55  ;;  %11879 = vst [vmem:[#allocation99_spill] sm:$0xff] %v6300_v34  ;;  %11880 = vst [vmem:[#allocation100_spill] sm:$0xff] %v6304_v46  ;;  %v6306_v26 = vld [vmem:[#allocation4 + $0x670] sm:$0xff]  ;;  %v6310_v55 = vld [vmem:[#allocation4 + $0x628] sm:$0xff] }
 0x144   :  { %921 = vmatpush2.msra.mxu0 %v6280_v23  ;;  %992 = vmatpush2.msra.mxu1 %v6282_v0  ;;  %11881 = vst [vmem:[#allocation101_spill] sm:$0xff] %v6306_v26  ;;  %11882 = vst [vmem:[#allocation102_spill] sm:$0xff] %v6310_v55  ;;  %v6312_v23 = vld [vmem:[#allocation4 + $0x638] sm:$0xff]  ;;  %v6316_v0 = vld [vmem:[#allocation4 + $0x620] sm:$0xff] }
 0x145   :  { %922 = vmatprep.subr.mxu0 %v6286_v24  ;;  %993 = vmatprep.subr.mxu1 %v6288_v28  ;;  %11883 = vst [vmem:[#allocation103_spill] sm:$0xff] %v6312_v23  ;;  %11884 = vst [vmem:[#allocation104_spill] sm:$0xff] %v6316_v0  ;;  %v6318_v24 = vld [vmem:[#allocation4 + $0x630] sm:$0xff]  ;;  %v6322_v28 = vld [vmem:[#allocation4 + $0x5e8] sm:$0xff] }
 0x146   :  { %923 = vmatpush2.msra.mxu0 %v6292_v29  ;;  %994 = vmatpush2.msra.mxu1 %v6294_v37  ;;  %11885 = vst [vmem:[#allocation105_spill] sm:$0xff] %v6318_v24  ;;  %11886 = vst [vmem:[#allocation106_spill] sm:$0xff] %v6322_v28  ;;  %v6324_v29 = vld [vmem:[#allocation4 + $0x5f8] sm:$0xff]  ;;  %v6328_v37 = vld [vmem:[#allocation4 + $0x5e0] sm:$0xff] }
 0x147   :  { %924 = vmatprep.subr.mxu0 %v6298_v1  ;;  %995 = vmatprep.subr.mxu1 %v6300_v34  ;;  %11887 = vst [vmem:[#allocation107_spill] sm:$0xff] %v6324_v29  ;;  %11888 = vst [vmem:[#allocation108_spill] sm:$0xff] %v6328_v37  ;;  %v6330_v1 = vld [vmem:[#allocation4 + $0x5f0] sm:$0xff]  ;;  %v6334_v34 = vld [vmem:[#allocation4 + $0x5a8] sm:$0xff] }
 0x148   :  { %925 = vmatpush2.msra.mxu0 %v6304_v46  ;;  %996 = vmatpush2.msra.mxu1 %v6306_v26  ;;  %11889 = vst [vmem:[#allocation109_spill] sm:$0xff] %v6330_v1  ;;  %11890 = vst [vmem:[#allocation110_spill] sm:$0xff] %v6334_v34  ;;  %v6336_v46 = vld [vmem:[#allocation4 + $0x5b8] sm:$0xff]  ;;  %v6340_v26 = vld [vmem:[#allocation4 + $0x5a0] sm:$0xff] }
 0x149   :  { %926 = vmatprep.subr.mxu0 %v6310_v55  ;;  %997 = vmatprep.subr.mxu1 %v6312_v23  ;;  %11891 = vst [vmem:[#allocation111_spill] sm:$0xff] %v6336_v46  ;;  %11892 = vst [vmem:[#allocation112_spill] sm:$0xff] %v6340_v26  ;;  %v6342_v55 = vld [vmem:[#allocation4 + $0x5b0] sm:$0xff]  ;;  %v6346_v23 = vld [vmem:[#allocation4 + $0x568] sm:$0xff] }
 0x14a   :  { %927 = vmatpush2.msra.mxu0 %v6316_v0  ;;  %998 = vmatpush2.msra.mxu1 %v6318_v24  ;;  %11893 = vst [vmem:[#allocation113_spill] sm:$0xff] %v6342_v55  ;;  %11894 = vst [vmem:[#allocation114_spill] sm:$0xff] %v6346_v23  ;;  %v6348_v0 = vld [vmem:[#allocation4 + $0x578] sm:$0xff]  ;;  %v6352_v24 = vld [vmem:[#allocation4 + $0x560] sm:$0xff] }
 0x14b   :  { %928 = vmatprep.subr.mxu0 %v6322_v28  ;;  %999 = vmatprep.subr.mxu1 %v6324_v29  ;;  %11895 = vst [vmem:[#allocation115_spill] sm:$0xff] %v6348_v0  ;;  %11896 = vst [vmem:[#allocation116_spill] sm:$0xff] %v6352_v24  ;;  %v6354_v28 = vld [vmem:[#allocation4 + $0x570] sm:$0xff]  ;;  %v6358_v29 = vld [vmem:[#allocation4 + $0x528] sm:$0xff] }
 0x14c   :  { %929 = vmatpush2.msra.mxu0 %v6328_v37  ;;  %1000 = vmatpush2.msra.mxu1 %v6330_v1  ;;  %11897 = vst [vmem:[#allocation117_spill] sm:$0xff] %v6354_v28  ;;  %11898 = vst [vmem:[#allocation118_spill] sm:$0xff] %v6358_v29  ;;  %v6360_v37 = vld [vmem:[#allocation4 + $0x538] sm:$0xff]  ;;  %v6364_v1 = vld [vmem:[#allocation4 + $0x520] sm:$0xff] }
 0x14d   :  { %930 = vmatprep.subr.mxu0 %v6334_v34  ;;  %1001 = vmatprep.subr.mxu1 %v6336_v46  ;;  %11899 = vst [vmem:[#allocation119_spill] sm:$0xff] %v6360_v37  ;;  %11900 = vst [vmem:[#allocation120_spill] sm:$0xff] %v6364_v1  ;;  %v6366_v34 = vld [vmem:[#allocation4 + $0x530] sm:$0xff]  ;;  %v6370_v46 = vld [vmem:[#allocation4 + $0x4e8] sm:$0xff] }
 0x14e   :  { %931 = vmatpush2.msra.mxu0 %v6340_v26  ;;  %1002 = vmatpush2.msra.mxu1 %v6342_v55  ;;  %11901 = vst [vmem:[#allocation121_spill] sm:$0xff] %v6366_v34  ;;  %11902 = vst [vmem:[#allocation122_spill] sm:$0xff] %v6370_v46  ;;  %v6372_v26 = vld [vmem:[#allocation4 + $0x4f8] sm:$0xff]  ;;  %v6376_v55 = vld [vmem:[#allocation4 + $0x4e0] sm:$0xff] }
 0x14f   :  { %932 = vmatprep.subr.mxu0 %v6346_v23  ;;  %1003 = vmatprep.subr.mxu1 %v6348_v0  ;;  %11903 = vst [vmem:[#allocation123_spill] sm:$0xff] %v6372_v26  ;;  %11904 = vst [vmem:[#allocation124_spill] sm:$0xff] %v6376_v55  ;;  %v6378_v23 = vld [vmem:[#allocation4 + $0x4f0] sm:$0xff]  ;;  %v6382_v0 = vld [vmem:[#allocation4 + $0x4a8] sm:$0xff] }
 0x150   :  { %933 = vmatpush2.msra.mxu0 %v6352_v24  ;;  %1004 = vmatpush2.msra.mxu1 %v6354_v28  ;;  %11905 = vst [vmem:[#allocation125_spill] sm:$0xff] %v6378_v23  ;;  %v6384_v24 = vld [vmem:[#allocation4 + $0x4b8] sm:$0xff]  ;;  %v6388_v28 = vld [vmem:[#allocation4 + $0x4a0] sm:$0xff] }
 0x151   :  { %934 = vmatprep.subr.mxu0 %v6358_v29  ;;  %1005 = vmatprep.subr.mxu1 %v6360_v37  ;;  %11906 = vst [vmem:[#allocation126_spill] sm:$0xff] %v6384_v24  ;;  %v6390_v29 = vld [vmem:[#allocation4 + $0x4b0] sm:$0xff]  ;;  %v6394_v37 = vld [vmem:[#allocation4 + $0x468] sm:$0xff] }
 0x152   :  { %935 = vmatpush2.msra.mxu0 %v6364_v1  ;;  %1006 = vmatpush2.msra.mxu1 %v6366_v34  ;;  %11907 = vst [vmem:[#allocation127_spill] sm:$0xff] %v6390_v29  ;;  %v6396_v1 = vld [vmem:[#allocation4 + $0x478] sm:$0xff]  ;;  %v6400_v34 = vld [vmem:[#allocation4 + $0x460] sm:$0xff] }
 0x153   :  { %936 = vmatprep.subr.mxu0 %v6370_v46  ;;  %1007 = vmatprep.subr.mxu1 %v6372_v26  ;;  %11908 = vst [vmem:[#allocation128_spill] sm:$0xff] %v6400_v34  ;;  %v6402_v46 = vld [vmem:[#allocation4 + $0x470] sm:$0xff]  ;;  %v6406_v26 = vld [vmem:[#allocation4 + $0x428] sm:$0xff] }
 0x154   :  { %937 = vmatpush2.msra.mxu0 %v6376_v55  ;;  %1008 = vmatpush2.msra.mxu1 %v6378_v23  ;;  %11909 = vst [vmem:[#allocation129_spill] sm:$0xff] %v6402_v46  ;;  %v6408_v55 = vld [vmem:[#allocation4 + $0x438] sm:$0xff]  ;;  %v6412_v23 = vld [vmem:[#allocation4 + $0x420] sm:$0xff] }
 0x155   :  { %938 = vmatprep.subr.mxu0 %v6382_v0  ;;  %1009 = vmatprep.subr.mxu1 %v6384_v24  ;;  %11910 = vst [vmem:[#allocation130_spill] sm:$0xff] %v6408_v55  ;;  %11911 = vst [vmem:[#allocation131_spill] sm:$0xff] %v6412_v23  ;;  %v6416_v24 = vld [vmem:[#allocation4 + $0x430] sm:$0xff] }
 0x156   :  { %939 = vmatpush2.msra.mxu0 %v6388_v28  ;;  %1010 = vmatpush2.msra.mxu1 %v6390_v29  ;;  %v11912_v29 = vmov 0.0  }
 0x157   :  { %940 = vmatprep.subr.mxu0 %v6394_v37  ;;  %1011 = vmatprep.subr.mxu1 %v6396_v1 }
 0x158   :  { %941 = vmatpush2.msra.mxu0 %v6400_v34  ;;  %1012 = vmatpush2.msra.mxu1 %v6402_v46  ;;  %v6426_v34 = vld [vmem:[#allocation4 + $0x3c8] sm:$0xff]  ;;  %v6429_v46 = vld [vmem:[#allocation4 + $0x3d8] sm:$0xff] }
 0x159   :  { %942 = vmatprep.subr.mxu0 %v6406_v26  ;;  %1013 = vmatprep.subr.mxu1 %v6408_v55  ;;  %11913 = vst [vmem:[#allocation132_spill] sm:$0xff] %v6426_v34  ;;  %11914 = vst [vmem:[#allocation133_spill] sm:$0xff] %v6429_v46  ;;  %v6432_v55 = vld [vmem:[#allocation4 + $0x3c0] sm:$0xff] }
 0x15a   :  { %943 = vmatpush2.msra.mxu0 %v6412_v23  ;;  %944 = vmatprep.mubr.f32.mxu0 %v11912_v29  ;;  %11915 = vst [vmem:[#allocation134_spill] sm:$0xff] %v6432_v55  ;;  %v6435_v23 = vld [vmem:[#allocation4 + $0x3d0] sm:$0xff] }
 0x15b   :  { %1014 = vmatpush2.msra.mxu1 %v6416_v24  ;;  %1015 = vmatprep.mubr.f32.mxu1 %v11912_v29  ;;  %11916 = vst [vmem:[#allocation135_spill] sm:$0xff] %v6435_v23  ;;  %v6438_v29 = vld [vmem:[#allocation4 + $0x388] sm:$0xff] }
 0x15c   :  { %945 = vmatmul.mubr.f32.vlgmr.msra.gmra.mxu0 %v6040_v31  ;;  %1016 = vmatmul.mubr.f32.vlgmr.msra.gmra.mxu1 %v6040_v31  ;;  %11917 = vst [vmem:[#allocation136_spill] sm:$0xff] %v6438_v29  ;;  %v6441_v31 = vld [vmem:[#allocation4 + $0x398] sm:$0xff] }
 0x15d   :  { %1082 = vmatprep.subr.mxu0 %v6426_v34  ;;  %1153 = vmatprep.subr.mxu1 %v6429_v46  ;;  %11918 = vst [vmem:[#allocation137_spill] sm:$0xff] %v6441_v31  ;;  %v6444_v34 = vld [vmem:[#allocation4 + $0x380] sm:$0xff]  ;;  %v6447_v46 = vld [vmem:[#allocation4 + $0x390] sm:$0xff] }
 0x15e   :  { %1083 = vmatpush1.msra.mxu0 %v6432_v55  ;;  %1154 = vmatpush1.msra.mxu1 %v6435_v23  ;;  %11919 = vst [vmem:[#allocation138_spill] sm:$0xff] %v6444_v34  ;;  %11920 = vst [vmem:[#allocation139_spill] sm:$0xff] %v6447_v46  ;;  %v6450_v55 = vld [vmem:[#allocation4 + $0x348] sm:$0xff]  ;;  %v6453_v23 = vld [vmem:[#allocation4 + $0x358] sm:$0xff] }
 0x15f   :  { %1084 = vmatprep.subr.mxu0 %v6438_v29  ;;  %1155 = vmatprep.subr.mxu1 %v6441_v31  ;;  %11921 = vst [vmem:[#allocation140_spill] sm:$0xff] %v6450_v55  ;;  %11922 = vst [vmem:[#allocation141_spill] sm:$0xff] %v6453_v23  ;;  %v6456_v29 = vld [vmem:[#allocation4 + $0x340] sm:$0xff]  ;;  %v6459_v31 = vld [vmem:[#allocation4 + $0x350] sm:$0xff] }
 0x160   :  { %1085 = vmatpush1.msra.mxu0 %v6444_v34  ;;  %1156 = vmatpush1.msra.mxu1 %v6447_v46  ;;  %11923 = vst [vmem:[#allocation142_spill] sm:$0xff] %v6456_v29  ;;  %11924 = vst [vmem:[#allocation143_spill] sm:$0xff] %v6459_v31  ;;  %v6462_v34 = vld [vmem:[#allocation4 + $0x308] sm:$0xff]  ;;  %v6465_v46 = vld [vmem:[#allocation4 + $0x318] sm:$0xff] }
 0x161   :  { %1086 = vmatprep.subr.mxu0 %v6450_v55  ;;  %1157 = vmatprep.subr.mxu1 %v6453_v23  ;;  %11925 = vst [vmem:[#allocation144_spill] sm:$0xff] %v6462_v34  ;;  %11926 = vst [vmem:[#allocation145_spill] sm:$0xff] %v6465_v46  ;;  %v6468_v55 = vld [vmem:[#allocation4 + $0x300] sm:$0xff]  ;;  %v6471_v23 = vld [vmem:[#allocation4 + $0x310] sm:$0xff] }
 0x162   :  { %1087 = vmatpush1.msra.mxu0 %v6456_v29  ;;  %1158 = vmatpush1.msra.mxu1 %v6459_v31  ;;  %11927 = vst [vmem:[#allocation146_spill] sm:$0xff] %v6468_v55  ;;  %11928 = vst [vmem:[#allocation147_spill] sm:$0xff] %v6471_v23  ;;  %v6474_v29 = vld [vmem:[#allocation4 + $0x2c8] sm:$0xff]  ;;  %v6477_v31 = vld [vmem:[#allocation4 + $0x2d8] sm:$0xff] }
 0x163   :  { %1088 = vmatprep.subr.mxu0 %v6462_v34  ;;  %1159 = vmatprep.subr.mxu1 %v6465_v46  ;;  %11929 = vst [vmem:[#allocation148_spill] sm:$0xff] %v6474_v29  ;;  %11930 = vst [vmem:[#allocation149_spill] sm:$0xff] %v6477_v31  ;;  %v6480_v34 = vld [vmem:[#allocation4 + $0x2c0] sm:$0xff]  ;;  %v6483_v46 = vld [vmem:[#allocation4 + $0x2d0] sm:$0xff] }
 0x164   :  { %1089 = vmatpush1.msra.mxu0 %v6468_v55  ;;  %1160 = vmatpush1.msra.mxu1 %v6471_v23  ;;  %11931 = vst [vmem:[#allocation150_spill] sm:$0xff] %v6480_v34  ;;  %11932 = vst [vmem:[#allocation151_spill] sm:$0xff] %v6483_v46  ;;  %v6486_v55 = vld [vmem:[#allocation4 + $0x288] sm:$0xff]  ;;  %v6489_v23 = vld [vmem:[#allocation4 + $0x298] sm:$0xff] }
 0x165   :  { %1090 = vmatprep.subr.mxu0 %v6474_v29  ;;  %1161 = vmatprep.subr.mxu1 %v6477_v31  ;;  %11933 = vst [vmem:[#allocation152_spill] sm:$0xff] %v6486_v55  ;;  %11934 = vst [vmem:[#allocation153_spill] sm:$0xff] %v6489_v23  ;;  %v6492_v29 = vld [vmem:[#allocation4 + $0x280] sm:$0xff]  ;;  %v6495_v31 = vld [vmem:[#allocation4 + $0x290] sm:$0xff] }
 0x166   :  { %1091 = vmatpush1.msra.mxu0 %v6480_v34  ;;  %1162 = vmatpush1.msra.mxu1 %v6483_v46  ;;  %11935 = vst [vmem:[#allocation154_spill] sm:$0xff] %v6492_v29  ;;  %11936 = vst [vmem:[#allocation155_spill] sm:$0xff] %v6495_v31  ;;  %v6498_v34 = vld [vmem:[#allocation4 + $0x248] sm:$0xff]  ;;  %v6501_v46 = vld [vmem:[#allocation4 + $0x258] sm:$0xff] }
 0x167   :  { %1092 = vmatprep.subr.mxu0 %v6486_v55  ;;  %1163 = vmatprep.subr.mxu1 %v6489_v23  ;;  %11937 = vst [vmem:[#allocation156_spill] sm:$0xff] %v6498_v34  ;;  %11938 = vst [vmem:[#allocation157_spill] sm:$0xff] %v6501_v46  ;;  %v6504_v55 = vld [vmem:[#allocation4 + $0x240] sm:$0xff]  ;;  %v6507_v23 = vld [vmem:[#allocation4 + $0x250] sm:$0xff] }
 0x168   :  { %1093 = vmatpush1.msra.mxu0 %v6492_v29  ;;  %1164 = vmatpush1.msra.mxu1 %v6495_v31  ;;  %11939 = vst [vmem:[#allocation158_spill] sm:$0xff] %v6504_v55  ;;  %11940 = vst [vmem:[#allocation159_spill] sm:$0xff] %v6507_v23  ;;  %v6510_v29 = vld [vmem:[#allocation4 + $0x208] sm:$0xff]  ;;  %v6513_v31 = vld [vmem:[#allocation4 + $0x218] sm:$0xff] }
 0x169   :  { %1094 = vmatprep.subr.mxu0 %v6498_v34  ;;  %1165 = vmatprep.subr.mxu1 %v6501_v46  ;;  %11941 = vst [vmem:[#allocation160_spill] sm:$0xff] %v6510_v29  ;;  %11942 = vst [vmem:[#allocation161_spill] sm:$0xff] %v6513_v31  ;;  %v6516_v34 = vld [vmem:[#allocation4 + $0x200] sm:$0xff]  ;;  %v6519_v46 = vld [vmem:[#allocation4 + $0x210] sm:$0xff] }
 0x16a   :  { %1095 = vmatpush1.msra.mxu0 %v6504_v55  ;;  %1166 = vmatpush1.msra.mxu1 %v6507_v23  ;;  %11943 = vst [vmem:[#allocation162_spill] sm:$0xff] %v6516_v34  ;;  %11944 = vst [vmem:[#allocation163_spill] sm:$0xff] %v6519_v46  ;;  %v6522_v55 = vld [vmem:[#allocation4 + $0x1c8] sm:$0xff]  ;;  %v6525_v23 = vld [vmem:[#allocation4 + $0x1d8] sm:$0xff] }
 0x16b   :  { %1096 = vmatprep.subr.mxu0 %v6510_v29  ;;  %1167 = vmatprep.subr.mxu1 %v6513_v31  ;;  %11945 = vst [vmem:[#allocation164_spill] sm:$0xff] %v6522_v55  ;;  %11946 = vst [vmem:[#allocation165_spill] sm:$0xff] %v6525_v23  ;;  %v6528_v29 = vld [vmem:[#allocation4 + $0x1c0] sm:$0xff]  ;;  %v6531_v31 = vld [vmem:[#allocation4 + $0x1d0] sm:$0xff] }
 0x16c   :  { %1097 = vmatpush1.msra.mxu0 %v6516_v34  ;;  %1168 = vmatpush1.msra.mxu1 %v6519_v46  ;;  %11947 = vst [vmem:[#allocation166_spill] sm:$0xff] %v6528_v29  ;;  %11948 = vst [vmem:[#allocation167_spill] sm:$0xff] %v6531_v31  ;;  %v6534_v34 = vld [vmem:[#allocation4 + $0x188] sm:$0xff]  ;;  %v6537_v46 = vld [vmem:[#allocation4 + $0x198] sm:$0xff] }
 0x16d   :  { %1098 = vmatprep.subr.mxu0 %v6522_v55  ;;  %1169 = vmatprep.subr.mxu1 %v6525_v23  ;;  %11949 = vst [vmem:[#allocation168_spill] sm:$0xff] %v6534_v34  ;;  %11950 = vst [vmem:[#allocation169_spill] sm:$0xff] %v6537_v46  ;;  %v6540_v55 = vld [vmem:[#allocation4 + $0x180] sm:$0xff]  ;;  %v6543_v23 = vld [vmem:[#allocation4 + $0x190] sm:$0xff] }
 0x16e   :  { %1099 = vmatpush1.msra.mxu0 %v6528_v29  ;;  %1170 = vmatpush1.msra.mxu1 %v6531_v31  ;;  %11951 = vst [vmem:[#allocation170_spill] sm:$0xff] %v6540_v55  ;;  %11952 = vst [vmem:[#allocation171_spill] sm:$0xff] %v6543_v23  ;;  %v6546_v29 = vld [vmem:[#allocation4 + $0x148] sm:$0xff]  ;;  %v6549_v31 = vld [vmem:[#allocation4 + $0x158] sm:$0xff] }
 0x16f   :  { %1100 = vmatprep.subr.mxu0 %v6534_v34  ;;  %1171 = vmatprep.subr.mxu1 %v6537_v46  ;;  %11953 = vst [vmem:[#allocation172_spill] sm:$0xff] %v6546_v29  ;;  %11954 = vst [vmem:[#allocation173_spill] sm:$0xff] %v6549_v31  ;;  %v6552_v34 = vld [vmem:[#allocation4 + $0x140] sm:$0xff]  ;;  %v6555_v46 = vld [vmem:[#allocation4 + $0x150] sm:$0xff] }
 0x170   :  { %1101 = vmatpush1.msra.mxu0 %v6540_v55  ;;  %1172 = vmatpush1.msra.mxu1 %v6543_v23  ;;  %11955 = vst [vmem:[#allocation174_spill] sm:$0xff] %v6552_v34  ;;  %11956 = vst [vmem:[#allocation175_spill] sm:$0xff] %v6555_v46  ;;  %v6558_v55 = vld [vmem:[#allocation4 + $0x108] sm:$0xff]  ;;  %v6561_v23 = vld [vmem:[#allocation4 + $0x118] sm:$0xff] }
 0x171   :  { %1102 = vmatprep.subr.mxu0 %v6546_v29  ;;  %1173 = vmatprep.subr.mxu1 %v6549_v31  ;;  %11957 = vst [vmem:[#allocation176_spill] sm:$0xff] %v6558_v55  ;;  %11958 = vst [vmem:[#allocation177_spill] sm:$0xff] %v6561_v23  ;;  %v6564_v29 = vld [vmem:[#allocation4 + $0x100] sm:$0xff]  ;;  %v6567_v31 = vld [vmem:[#allocation4 + $0x110] sm:$0xff] }
 0x172   :  { %1103 = vmatpush1.msra.mxu0 %v6552_v34  ;;  %1174 = vmatpush1.msra.mxu1 %v6555_v46  ;;  %11959 = vst [vmem:[#allocation178_spill] sm:$0xff] %v6564_v29  ;;  %11960 = vst [vmem:[#allocation179_spill] sm:$0xff] %v6567_v31  ;;  %v6570_v34 = vld [vmem:[#allocation4 + $0xc8] sm:$0xff]  ;;  %v6573_v46 = vld [vmem:[#allocation4 + $0xd8] sm:$0xff] }
 0x173   :  { %1104 = vmatprep.subr.mxu0 %v6558_v55  ;;  %1175 = vmatprep.subr.mxu1 %v6561_v23  ;;  %11961 = vst [vmem:[#allocation180_spill] sm:$0xff] %v6570_v34  ;;  %11962 = vst [vmem:[#allocation181_spill] sm:$0xff] %v6573_v46  ;;  %v6576_v55 = vld [vmem:[#allocation4 + $0xc0] sm:$0xff]  ;;  %v6579_v23 = vld [vmem:[#allocation4 + $0xd0] sm:$0xff] }
 0x174   :  { %1105 = vmatpush1.msra.mxu0 %v6564_v29  ;;  %1176 = vmatpush1.msra.mxu1 %v6567_v31  ;;  %11963 = vst [vmem:[#allocation182_spill] sm:$0xff] %v6576_v55  ;;  %11964 = vst [vmem:[#allocation183_spill] sm:$0xff] %v6579_v23  ;;  %v6582_v29 = vld [vmem:[#allocation4 + $0x88] sm:$0xff]  ;;  %v6585_v31 = vld [vmem:[#allocation4 + $0x98] sm:$0xff] }
 0x175   :  { %1106 = vmatprep.subr.mxu0 %v6570_v34  ;;  %1177 = vmatprep.subr.mxu1 %v6573_v46  ;;  %11965 = vst [vmem:[#allocation184_spill] sm:$0xff] %v6582_v29  ;;  %11966 = vst [vmem:[#allocation185_spill] sm:$0xff] %v6585_v31  ;;  %v6588_v34 = vld [vmem:[#allocation4 + $0x80] sm:$0xff]  ;;  %v6591_v46 = vld [vmem:[#allocation4 + $0x90] sm:$0xff] }
 0x176   :  { %1107 = vmatpush1.msra.mxu0 %v6576_v55  ;;  %1178 = vmatpush1.msra.mxu1 %v6579_v23  ;;  %11967 = vst [vmem:[#allocation186_spill] sm:$0xff] %v6588_v34  ;;  %11968 = vst [vmem:[#allocation187_spill] sm:$0xff] %v6591_v46  ;;  %v6594_v55 = vld [vmem:[#allocation4 + $0x48] sm:$0xff]  ;;  %v6597_v23 = vld [vmem:[#allocation4 + $0x58] sm:$0xff] }
 0x177   :  { %1108 = vmatprep.subr.mxu0 %v6582_v29  ;;  %1179 = vmatprep.subr.mxu1 %v6585_v31  ;;  %11969 = vst [vmem:[#allocation188_spill] sm:$0xff] %v6594_v55  ;;  %11970 = vst [vmem:[#allocation189_spill] sm:$0xff] %v6597_v23  ;;  %v6600_v29 = vld [vmem:[#allocation4 + $0x40] sm:$0xff]  ;;  %v6603_v31 = vld [vmem:[#allocation4 + $0x50] sm:$0xff] }
 0x178   :  { %1109 = vmatpush1.msra.mxu0 %v6588_v34  ;;  %1180 = vmatpush1.msra.mxu1 %v6591_v46  ;;  %11971 = vst [vmem:[#allocation190_spill] sm:$0xff] %v6600_v29  ;;  %11972 = vst [vmem:[#allocation191_spill] sm:$0xff] %v6603_v31  ;;  %v6606_v34 = vld [vmem:[#allocation4 + $0x8] sm:$0xff]  ;;  %v6609_v46 = vld [vmem:[#allocation4 + $0x18] sm:$0xff] }
 0x179   :  { %1110 = vmatprep.subr.mxu0 %v6594_v55  ;;  %1181 = vmatprep.subr.mxu1 %v6597_v23  ;;  %11973 = vst [vmem:[#allocation192_spill] sm:$0xff] %v6606_v34  ;;  %11974 = vst [vmem:[#allocation193_spill] sm:$0xff] %v6609_v46  ;;  %v6612_v55 = vld [vmem:[#allocation4] sm:$0xff]  ;;  %v6615_v23 = vld [vmem:[#allocation4 + $0x10] sm:$0xff] }
 0x17a   :  { %1111 = vmatpush1.msra.mxu0 %v6600_v29  ;;  %1182 = vmatpush1.msra.mxu1 %v6603_v31  ;;  %11975 = vst [vmem:[#allocation194_spill] sm:$0xff] %v6612_v55  ;;  %11976 = vst [vmem:[#allocation195_spill] sm:$0xff] %v6615_v23  ;;  %v6618_v29 = vld [vmem:[#allocation4 + $0x7c8] sm:$0xff]  ;;  %v6621_v31 = vld [vmem:[#allocation4 + $0x7d8] sm:$0xff] }
 0x17b   :  { %1112 = vmatprep.subr.mxu0 %v6606_v34  ;;  %1183 = vmatprep.subr.mxu1 %v6609_v46  ;;  %11977 = vst [vmem:[#allocation196_spill] sm:$0xff] %v6618_v29  ;;  %11978 = vst [vmem:[#allocation197_spill] sm:$0xff] %v6621_v31  ;;  %v6624_v34 = vld [vmem:[#allocation4 + $0x7c0] sm:$0xff]  ;;  %v6627_v46 = vld [vmem:[#allocation4 + $0x7d0] sm:$0xff] }
 0x17c   :  { %1113 = vmatpush1.msra.mxu0 %v6612_v55  ;;  %1184 = vmatpush1.msra.mxu1 %v6615_v23  ;;  %11979 = vst [vmem:[#allocation198_spill] sm:$0xff] %v6624_v34  ;;  %11980 = vst [vmem:[#allocation199_spill] sm:$0xff] %v6627_v46  ;;  %v6630_v55 = vld [vmem:[#allocation4 + $0x788] sm:$0xff]  ;;  %v6633_v23 = vld [vmem:[#allocation4 + $0x798] sm:$0xff] }
 0x17d   :  { %1114 = vmatprep.subr.mxu0 %v6618_v29  ;;  %1185 = vmatprep.subr.mxu1 %v6621_v31  ;;  %11981 = vst [vmem:[#allocation200_spill] sm:$0xff] %v6630_v55  ;;  %11982 = vst [vmem:[#allocation201_spill] sm:$0xff] %v6633_v23  ;;  %v6636_v29 = vld [vmem:[#allocation4 + $0x780] sm:$0xff]  ;;  %v6639_v31 = vld [vmem:[#allocation4 + $0x790] sm:$0xff] }
 0x17e   :  { %1115 = vmatpush2.msra.mxu0 %v6624_v34  ;;  %1186 = vmatpush2.msra.mxu1 %v6627_v46  ;;  %11983 = vst [vmem:[#allocation202_spill] sm:$0xff] %v6636_v29  ;;  %11984 = vst [vmem:[#allocation203_spill] sm:$0xff] %v6639_v31  ;;  %v6642_v34 = vld [vmem:[#allocation4 + $0x748] sm:$0xff]  ;;  %v6645_v46 = vld [vmem:[#allocation4 + $0x758] sm:$0xff] }
 0x17f   :  { %1116 = vmatprep.subr.mxu0 %v6630_v55  ;;  %1187 = vmatprep.subr.mxu1 %v6633_v23  ;;  %11985 = vst [vmem:[#allocation204_spill] sm:$0xff] %v6642_v34  ;;  %11986 = vst [vmem:[#allocation205_spill] sm:$0xff] %v6645_v46  ;;  %v6648_v55 = vld [vmem:[#allocation4 + $0x740] sm:$0xff]  ;;  %v6651_v23 = vld [vmem:[#allocation4 + $0x750] sm:$0xff] }
 0x180   :  { %1117 = vmatpush2.msra.mxu0 %v6636_v29  ;;  %1188 = vmatpush2.msra.mxu1 %v6639_v31  ;;  %11987 = vst [vmem:[#allocation206_spill] sm:$0xff] %v6648_v55  ;;  %11988 = vst [vmem:[#allocation207_spill] sm:$0xff] %v6651_v23  ;;  %v6654_v29 = vld [vmem:[#allocation4 + $0x708] sm:$0xff]  ;;  %v6657_v31 = vld [vmem:[#allocation4 + $0x718] sm:$0xff] }
 0x181   :  { %1118 = vmatprep.subr.mxu0 %v6642_v34  ;;  %1189 = vmatprep.subr.mxu1 %v6645_v46  ;;  %11989 = vst [vmem:[#allocation208_spill] sm:$0xff] %v6654_v29  ;;  %11990 = vst [vmem:[#allocation209_spill] sm:$0xff] %v6657_v31  ;;  %v6660_v34 = vld [vmem:[#allocation4 + $0x700] sm:$0xff]  ;;  %v6663_v46 = vld [vmem:[#allocation4 + $0x710] sm:$0xff] }
 0x182   :  { %1119 = vmatpush2.msra.mxu0 %v6648_v55  ;;  %1190 = vmatpush2.msra.mxu1 %v6651_v23  ;;  %v6666_v55 = vld [vmem:[#allocation4 + $0x6c8] sm:$0xff]  ;;  %v6669_v23 = vld [vmem:[#allocation4 + $0x6d8] sm:$0xff] }
 0x183   :  { %1120 = vmatprep.subr.mxu0 %v6654_v29  ;;  %1191 = vmatprep.subr.mxu1 %v6657_v31  ;;  %v6672_v29 = vld [vmem:[#allocation4 + $0x6c0] sm:$0xff]  ;;  %v6675_v31 = vld [vmem:[#allocation4 + $0x6d0] sm:$0xff] }
 0x184   :  { %1121 = vmatpush2.msra.mxu0 %v6660_v34  ;;  %1192 = vmatpush2.msra.mxu1 %v6663_v46 }
 0x185   :  { %1122 = vmatprep.subr.mxu0 %v6666_v55  ;;  %1193 = vmatprep.subr.mxu1 %v6669_v23 }
 0x186   :  { %1123 = vmatpush2.msra.mxu0 %v6672_v29  ;;  %1194 = vmatpush2.msra.mxu1 %v6675_v31 }
 0x187   :  { %1124 = vmatprep.subr.mxu0 %v5832_v35  ;;  %1195 = vmatprep.subr.mxu1 %v5835_v36  ;;  %v11991_v35 = vld [vmem:[#allocation10_spill] sm:$0xff]  ;;  %v210_v36 = vpop.f32.mrf.mxu0 }
 0x188   :  { %1125 = vmatpush2.msra.mxu0 %v5840_v38  ;;  %1196 = vmatpush2.msra.mxu1 %v5842_v39 }
 0x189   :  { %1126 = vmatprep.subr.mxu0 %v5846_v40  ;;  %1197 = vmatprep.subr.mxu1 %v5850_v41  ;;  %v212_v38 = vpop.f32.mrf.mxu0 }
 0x18a   :  { %1127 = vmatpush2.msra.mxu0 %v5854_v42  ;;  %1198 = vmatpush2.msra.mxu1 %v5856_v43  ;;  %v335_v42 = vpop.f32.mrf.mxu1 }
 0x18b   :  { %1128 = vmatprep.subr.mxu0 %v5860_v44  ;;  %1199 = vmatprep.subr.mxu1 %v5864_v45  ;;  %v6724_v39 = vpop.f32.mrf.mxu0 }
 0x18c   :  { %1129 = vmatpush2.msra.mxu0 %v5871_v47  ;;  %1200 = vmatpush2.msra.mxu1 %v5873_v48  ;;  %v337_v44 = vpop.f32.mrf.mxu1 }
 0x18d   :  { %1130 = vmatprep.subr.mxu0 %v5877_v49  ;;  %1201 = vmatprep.subr.mxu1 %v5881_v50  ;;  %v6726_v40 = vpop.f32.mrf.mxu0 }
 0x18e   :  { %1131 = vmatpush2.msra.mxu0 %v5885_v51  ;;  %1202 = vmatpush2.msra.mxu1 %v5887_v52  ;;  %v6734_v47 = vpop.f32.mrf.mxu1 }
 0x18f   :  { %1132 = vmatprep.subr.mxu0 %v5891_v53  ;;  %1203 = vmatprep.subr.mxu1 %v5895_v54  ;;  %v6728_v41 = vpop.f32.mrf.mxu0 }
 0x190   :  { %1133 = vmatpush2.msra.mxu0 %v5902_v56  ;;  %1204 = vmatpush2.msra.mxu1 %v5904_v57  ;;  %11992 = vst [vmem:[#allocation10_spill] sm:$0xff] %v6728_v41  ;;  %v6738_v49 = vpop.f32.mrf.mxu1 }
 0x191   :  { %1134 = vmatprep.subr.mxu0 %v5908_v58  ;;  %1205 = vmatprep.subr.mxu1 %v5912_v59  ;;  %v6730_v43 = vpop.f32.mrf.mxu0 }
 0x192   :  { %1135 = vmatpush2.msra.mxu0 %v5916_v60  ;;  %1206 = vmatpush2.msra.mxu1 %v5918_v61  ;;  %11993 = vst [vmem:[#allocation210_spill] sm:$0xff] %v6730_v43  ;;  %v6742_v51 = vpop.f32.mrf.mxu1 }
 0x193   :  { %1136 = vmatprep.subr.mxu0 %v5922_v62  ;;  %1207 = vmatprep.subr.mxu1 %v5926_v63  ;;  %v6732_v45 = vpop.f32.mrf.mxu0  ;;  %11997 = vst [vmem:[#allocation214_spill] sm:$0xff] %v6742_v51 }
 0x194   :  { %1137 = vmatpush2.msra.mxu0 %v5933_v2  ;;  %1208 = vmatpush2.msra.mxu1 %v5935_v3  ;;  %11994 = vst [vmem:[#allocation211_spill] sm:$0xff] %v6732_v45  ;;  %v6746_v53 = vpop.f32.mrf.mxu1  ;;  %v7173_v45 = vld [vmem:[#allocation4 + $0x3f8] sm:$0xff] }
 0x195   :  { %1138 = vmatprep.subr.mxu0 %v5939_v4  ;;  %1209 = vmatprep.subr.mxu1 %v5943_v5  ;;  %v6736_v48 = vpop.f32.mrf.mxu0  ;;  %11999 = vst [vmem:[#allocation216_spill] sm:$0xff] %v6746_v53 }
 0x196   :  { %1139 = vmatpush2.msra.mxu0 %v5947_v6  ;;  %1210 = vmatpush2.msra.mxu1 %v5949_v7  ;;  %11995 = vst [vmem:[#allocation212_spill] sm:$0xff] %v6736_v48  ;;  %v6750_v56 = vpop.f32.mrf.mxu1  ;;  %v7170_v48 = vld [vmem:[#allocation4 + $0x3e8] sm:$0xff] }
 0x197   :  { %1140 = vmatprep.subr.mxu0 %v5953_v8  ;;  %1211 = vmatprep.subr.mxu1 %v5957_v9  ;;  %v6740_v50 = vpop.f32.mrf.mxu0  ;;  %12001 = vst [vmem:[#allocation218_spill] sm:$0xff] %v6750_v56  ;;  %v7167_v56 = vld [vmem:[#allocation4 + $0x410] sm:$0xff] }
 0x198   :  { %1141 = vmatpush2.msra.mxu0 %v5964_v11  ;;  %1212 = vmatpush2.msra.mxu1 %v5966_v12  ;;  %11996 = vst [vmem:[#allocation213_spill] sm:$0xff] %v6740_v50  ;;  %v6754_v58 = vpop.f32.mrf.mxu1  ;;  %v7161_v50 = vld [vmem:[#allocation4 + $0x418] sm:$0xff] }
 0x199   :  { %1142 = vmatprep.subr.mxu0 %v5970_v13  ;;  %1213 = vmatprep.subr.mxu1 %v5974_v14  ;;  %v6744_v52 = vpop.f32.mrf.mxu0  ;;  %12003 = vst [vmem:[#allocation220_spill] sm:$0xff] %v6754_v58  ;;  %v12017_v13 = vld [vmem:[#allocation13_spill] sm:$0xff]  ;;  %v7164_v58 = vld [vmem:[#allocation4 + $0x400] sm:$0xff] }
 0x19a   :  { %1143 = vmatpush2.msra.mxu0 %v5978_v15  ;;  %1214 = vmatpush2.msra.mxu1 %v5980_v16  ;;  %11998 = vst [vmem:[#allocation215_spill] sm:$0xff] %v6744_v52  ;;  %v6758_v60 = vpop.f32.mrf.mxu1  ;;  %v213_v14 = vadd.f32 %v212_v38, %v12017_v13  ;;  %v12018_v15 = vld [vmem:[#allocation12_spill] sm:$0xff]  ;;  %v7158_v52 = vld [vmem:[#allocation4 + $0x408] sm:$0xff]  ;;  %v219_v43 = vadd.f32 %v6726_v40, %v12017_v13 }
 0x19b   :  { %1144 = vmatprep.subr.mxu0 %v5984_v17  ;;  %1215 = vmatprep.subr.mxu1 %v5986_v18  ;;  %v6748_v54 = vpop.f32.mrf.mxu0  ;;  %12005 = vst [vmem:[#allocation222_spill] sm:$0xff] %v6758_v60  ;;  %v211_v16 = vadd.f32 %v210_v36, %v12018_v15  ;;  %v7155_v60 = vld [vmem:[#allocation4 + $0x450] sm:$0xff]  ;;  %v217_v53 = vadd.f32 %v6724_v39, %v12018_v15 }
 0x19c   :  { %1145 = vmatpush2.msra.mxu0 %v5990_v19  ;;  %1216 = vmatpush2.msra.mxu1 %v5992_v20  ;;  %12000 = vst [vmem:[#allocation217_spill] sm:$0xff] %v6748_v54  ;;  %v6762_v62 = vpop.f32.mrf.mxu1  ;;  %v7149_v54 = vld [vmem:[#allocation4 + $0x458] sm:$0xff] }
 0x19d   :  { %1224 = vmatprep.subr.mxu0 %v5998_v21  ;;  %1295 = vmatprep.subr.mxu1 %v11991_v35  ;;  %v6752_v57 = vpop.f32.mrf.mxu0  ;;  %12007 = vst [vmem:[#allocation224_spill] sm:$0xff] %v6762_v62  ;;  %v7152_v62 = vld [vmem:[#allocation4 + $0x440] sm:$0xff] }
 0x19e   :  { %12002 = vst [vmem:[#allocation219_spill] sm:$0xff] %v6752_v57  ;;  %v6766_v2 = vpop.f32.mrf.mxu1  ;;  %v7146_v57 = vld [vmem:[#allocation4 + $0x448] sm:$0xff] }
 0x19f   :  { %v6756_v59 = vpop.f32.mrf.mxu0  ;;  %12009 = vst [vmem:[#allocation226_spill] sm:$0xff] %v6766_v2 }
 0x1a0   :  { %12004 = vst [vmem:[#allocation221_spill] sm:$0xff] %v6756_v59  ;;  %v6770_v4 = vpop.f32.mrf.mxu1  ;;  %v336_v59 = vadd.f32 %v335_v42, %v6033_v30 }
 0x1a1   :  { %v6760_v61 = vpop.f32.mrf.mxu0  ;;  %12011 = vst [vmem:[#allocation228_spill] sm:$0xff] %v6770_v4 }
 0x1a2   :  { %12006 = vst [vmem:[#allocation223_spill] sm:$0xff] %v6760_v61  ;;  %v6774_v6 = vpop.f32.mrf.mxu1 }
 0x1a3   :  { %v6764_v63 = vpop.f32.mrf.mxu0  ;;  %12013 = vst [vmem:[#allocation230_spill] sm:$0xff] %v6774_v6 }
 0x1a4   :  { %12008 = vst [vmem:[#allocation225_spill] sm:$0xff] %v6764_v63  ;;  %v6778_v8 = vpop.f32.mrf.mxu1 }
 0x1a5   :  { %v6768_v3 = vpop.f32.mrf.mxu0  ;;  %12015 = vst [vmem:[#allocation232_spill] sm:$0xff] %v6778_v8 }
 0x1a6   :  { %12010 = vst [vmem:[#allocation227_spill] sm:$0xff] %v6768_v3  ;;  %v6780_v11 = vpop.f32.mrf.mxu1 }
 0x1a7   :  { %v6772_v5 = vpop.f32.mrf.mxu0  ;;  %12016 = vst [vmem:[#allocation233_spill] sm:$0xff] %v6780_v11  ;;  %v12022_v11 = vld [vmem:[#allocation11_spill] sm:$0xff] }
 0x1a8   :  { %12012 = vst [vmem:[#allocation229_spill] sm:$0xff] %v6772_v5  ;;  %v6784_v17 = vpop.f32.mrf.mxu1  ;;  %v12023_v38 = vsub.s32 0, %v12022_v11 }
 0x1a9   :  { %v6776_v7 = vpop.f32.mrf.mxu0  ;;  %12019 = vst [vmem:[#allocation234_spill] sm:$0xff] %v6784_v17 }
 0x1aa   :  { %12014 = vst [vmem:[#allocation231_spill] sm:$0xff] %v6776_v7  ;;  %v6786_v20 = vpop.f32.mrf.mxu1  ;;  %v684_v7 = vld [vmem:[%s10890_s4] sm:$0xf] }
 0x1ab   :  { %12020 = vst [vmem:[#allocation235_spill] sm:$0xff] %v6786_v20  ;;  %v6795_v3 = vrot.slane %v684_v7, %v12023_v38  ;;  %v12027_v38 = vsub.s32 3, %v12022_v11 }
 0x1ac   :  { %v6791_v5 = vpop.f32.mrf.mxu1 }
 0x1ad   :  { %12021 = vst [vmem:[#allocation236_spill] sm:$0xff] %v6791_v5  ;;  %12024 = vst [vmem:[#allocation11_spill] sm:$0xff] %v6795_v3  ;;  %v6805_v63 = vrot.slane %v684_v7, %v12027_v38 }
 0x1af   :  { %12028 = vst [vmem:[#allocation238_spill] sm:$0xff] %v6805_v63 }
 0x1db   :  { %v804_v9 = vpop.f32.mrf.mxu0  ;;  %v875_v36 = vpop.f32.mrf.mxu1 }
 0x1dc   :  { %v1054_v19 = vadd.f32 %v804_v9, %v211_v16 }
 0x1dd   :  { %v806_v12 = vpop.f32.mrf.mxu0 }
 0x1de   :  { %v1055_v18 = vadd.f32 %v806_v12, %v213_v14  ;;  %v4176_v35 = vmul.f32 -1.442695, %v1054_v19  ;;  %v12025_v12 = vsub.s32 1, %v12022_v11  ;;  %v877_v19 = vpop.f32.mrf.mxu1 }
 0x1e0   :  { %v4177_v21 = vmul.f32 -1.442695, %v1055_v18  ;;  %v6799_v9 = vrot.slane %v684_v7, %v12025_v12  ;;  %v338_v12 = vadd.f32 %v337_v44, %v6029_v10 }
 0x1e2   :  { %4349 = vpow2.f32 %v4177_v21  ;;  %12026 = vst [vmem:[#allocation237_spill] sm:$0xff] %v6799_v9 }
 0x1e3   :  { %4351 = vpow2.f32 %v4176_v35 }
 0x1ef   :  { %v4350_v5 = vpop.eup %4349 }
 0x1f0   :  { %v4352_v6 = vpop.eup %4351  ;;  %v1067_v61 = vadd.f32 1.0, %v4350_v5 }
 0x21c   :  { %v946_v14 = vpop.f32.mrf.mxu0  ;;  %v1017_v21 = vpop.f32.mrf.mxu1 }
 0x21d   :  { %v1022_v16 = vadd.f32 %v946_v14, %v6795_v3  ;;  %v1057_v14 = vadd.f32 %v877_v19, %v338_v12 }
 0x21e   :  { %v948_v18 = vpop.f32.mrf.mxu0  ;;  %v1019_v8 = vpop.f32.mrf.mxu1 }
 0x21f   :  { %v4173_v20 = vmul.f32 -1.442695, %v1022_v16  ;;  %v1023_v17 = vadd.f32 %v948_v18, %v6799_v9  ;;  %v1025_v16 = vadd.f32 %v1019_v8, %v6805_v63  ;;  %v1061_v18 = vadd.f32 1.0, %v4352_v6 }
 0x220   :  { %v4178_v4 = vmul.f32 -1.442695, %v1057_v14 }
 0x221   :  { %4353 = vpow2.f32 %v4173_v20  ;;  %v4174_v35 = vmul.f32 -1.442695, %v1023_v17  ;;  %v1056_v20 = vadd.f32 %v875_v36, %v336_v59  ;;  %v12029_v17 = vsub.s32 2, %v12022_v11 }
 0x222   :  { %v4175_v38 = vmul.f32 -1.442695, %v1025_v16 }
 0x223   :  { %4355 = vpow2.f32 %v4174_v35  ;;  %v6812_v35 = vrot.slane %v684_v7, %v12029_v17 }
 0x224   :  { %4357 = vrcp.f32 %v1067_v61 }
 0x225   :  { %12030 = vst [vmem:[#allocation239_spill] sm:$0xff] %v6812_v35  ;;  %4359 = vrcp.f32 %v1061_v18  ;;  %v1024_v44 = vadd.f32 %v1017_v21, %v6812_v35 }
 0x226   :  { %4361 = vtanh.f32 %v1056_v20 }
 0x227   :  { %4363 = vpow2.f32 %v4178_v4 }
 0x228   :  { %4365 = vpow2.f32 %v4175_v38 }
 0x22e   :  { %v4354_v2 = vpop.eup %4353 }
 0x22f   :  { %v1029_v5 = vadd.f32 1.0, %v4354_v2 }
 0x230   :  { %v4356_v19 = vpop.eup %4355 }
 0x231   :  { %4367 = vrcp.f32 %v1029_v5  ;;  %v1035_v42 = vadd.f32 1.0, %v4356_v19  ;;  %v4358_v59 = vpop.eup %4357 }
 0x232   :  { %4369 = vtanh.f32 %v1024_v44  ;;  %v4360_v6 = vpop.eup %4359  ;;  %v1077_v61 = vmul.f32 %v4358_v59, %v6037_v22  ;;  %v12031_v59 = vld [vmem:[#allocation16_spill] sm:$0xff] }
 0x233   :  { %4371 = vrcp.f32 %v1035_v42  ;;  %v4362_v7 = vpop.eup %4361  ;;  %12225 = vst [vmem:[#allocation16_spill] sm:$0xff] %v7146_v57 }
 0x234   :  { %v4364_v8 = vpop.eup %4363  ;;  %v1078_v36 = vmul.f32 %v4362_v7, %v4360_v6  ;;  %v12032_v6 = vld [vmem:[#allocation17_spill] sm:$0xff]  ;;  %v12033_v7 = vld [vmem:[#allocation18_spill] sm:$0xff] }
 0x235   :  { %v4366_v11 = vpop.eup %4365  ;;  %v1074_v20 = vadd.f32 1.0, %v4364_v8  ;;  %v12035_v8 = vld [vmem:[#allocation20_spill] sm:$0xff]  ;;  %12226 = vst [vmem:[#allocation17_spill] sm:$0xff] %v7149_v54  ;;  %12227 = vst [vmem:[#allocation18_spill] sm:$0xff] %v7152_v62 }
 0x236   :  { %v6816_v16 = vadd.f32 %v1078_v36, %v1077_v61  ;;  %v1042_v2 = vadd.f32 1.0, %v4366_v11  ;;  %v12034_v61 = vld [vmem:[#allocation19_spill] sm:$0xff]  ;;  %v12036_v11 = vld [vmem:[#allocation21_spill] sm:$0xff]  ;;  %v12041_v36 = vld [vmem:[#allocation26_spill] sm:$0xff]  ;;  %12229 = vst [vmem:[#allocation20_spill] sm:$0xff] %v7158_v52 }
 0x237   :  { %12228 = vst [vmem:[#allocation19_spill] sm:$0xff] %v7155_v60  ;;  %12230 = vst [vmem:[#allocation21_spill] sm:$0xff] %v7161_v50 }
 0x238   :  { %4373 = vtanh.f32 %v6816_v16 }
 0x239   :  { %4375 = vrcp.f32 %v1042_v2  ;;  %v12045_v2 = vld [vmem:[#allocation30_spill] sm:$0xff] }
 0x23e   :  { %v4368_v12 = vpop.eup %4367 }
 0x23f   :  { %v4370_v14 = vpop.eup %4369 }
 0x240   :  { %v4372_v4 = vpop.eup %4371  ;;  %v1046_v18 = vmul.f32 %v4370_v14, %v4368_v12  ;;  %v12042_v12 = vld [vmem:[#allocation27_spill] sm:$0xff]  ;;  %v12043_v14 = vld [vmem:[#allocation28_spill] sm:$0xff] }
 0x241   :  { %v1045_v21 = vmul.f32 0.0, %v4372_v4  ;;  %v12044_v4 = vld [vmem:[#allocation29_spill] sm:$0xff] }
 0x243   :  { %v6818_v17 = vadd.f32 %v1046_v18, %v1045_v21  ;;  %v12046_v21 = vld [vmem:[#allocation31_spill] sm:$0xff]  ;;  %v12047_v18 = vld [vmem:[#allocation32_spill] sm:$0xff] }
 0x245   :  { %4377 = vtanh.f32 %v6818_v17  ;;  %v4374_v22 = vpop.eup %4373 }
 0x246   :  { %4379 = vrcp.f32 %v1074_v20  ;;  %v4376_v38 = vpop.eup %4375  ;;  %v12048_v20 = vld [vmem:[#allocation33_spill] sm:$0xff] }
 0x252   :  { %v4378_v44 = vpop.eup %4377 }
 0x253   :  { %v4380_v5 = vpop.eup %4379  ;;  %v1049_v19 = vmul.f32 %v4378_v44, %v4376_v38  ;;  %v12050_v38 = vld [vmem:[#allocation35_spill] sm:$0xff]  ;;  %v12051_v44 = vld [vmem:[#allocation36_spill] sm:$0xff] }
 0x254   :  { %v6822_v42 = vmul.f32 %v4380_v5, %v4374_v22  ;;  %v12049_v22 = vld [vmem:[#allocation34_spill] sm:$0xff]  ;;  %v12052_v5 = vld [vmem:[#allocation37_spill] sm:$0xff] }
 0x255   :  { %1146 = vmatprep.mubr.f32.mxu0 %v1049_v19  ;;  %1217 = vmatprep.mubr.f32.mxu1 %v1049_v19 }
 0x256   :  { %1147 = vmatmul.mubr.f32.vlgmr.msra.gmra.mxu0 %v6822_v42  ;;  %1218 = vmatmul.mubr.f32.vlgmr.msra.gmra.mxu1 %v6822_v42 }
 0x257   :  { %1225 = vmatpush1.msra.mxu0 %v6042_v27  ;;  %1296 = vmatpush1.msra.mxu1 %v6044_v32  ;;  %v12037_v27 = vld [vmem:[#allocation22_spill] sm:$0xff]  ;;  %v12038_v32 = vld [vmem:[#allocation23_spill] sm:$0xff] }
 0x258   :  { %1226 = vmatprep.subr.mxu0 %v6046_v25  ;;  %1288 = vmatprep.mubr.f32.mxu0 %v1049_v19  ;;  %v12039_v25 = vld [vmem:[#allocation24_spill] sm:$0xff]  ;;  %12231 = vst [vmem:[#allocation22_spill] sm:$0xff] %v7164_v58  ;;  %12232 = vst [vmem:[#allocation23_spill] sm:$0xff] %v7167_v56 }
 0x259   :  { %1297 = vmatprep.subr.mxu1 %v6048_v33  ;;  %1359 = vmatprep.mubr.f32.mxu1 %v1049_v19  ;;  %v12040_v33 = vld [vmem:[#allocation25_spill] sm:$0xff]  ;;  %v12053_v19 = vld [vmem:[#allocation38_spill] sm:$0xff]  ;;  %12233 = vst [vmem:[#allocation24_spill] sm:$0xff] %v7170_v48 }
 0x25a   :  { %1227 = vmatpush1.msra.mxu0 %v12031_v59  ;;  %1298 = vmatpush1.msra.mxu1 %v12032_v6  ;;  %v12054_v59 = vld [vmem:[#allocation39_spill] sm:$0xff]  ;;  %v12055_v6 = vld [vmem:[#allocation40_spill] sm:$0xff]  ;;  %12234 = vst [vmem:[#allocation25_spill] sm:$0xff] %v7173_v45 }
 0x25b   :  { %1228 = vmatprep.subr.mxu0 %v12033_v7  ;;  %1299 = vmatprep.subr.mxu1 %v12034_v61  ;;  %v12056_v7 = vld [vmem:[#allocation41_spill] sm:$0xff]  ;;  %v12057_v61 = vld [vmem:[#allocation42_spill] sm:$0xff] }
 0x25c   :  { %1229 = vmatpush1.msra.mxu0 %v12035_v8  ;;  %1300 = vmatpush1.msra.mxu1 %v12036_v11  ;;  %v12058_v8 = vld [vmem:[#allocation43_spill] sm:$0xff]  ;;  %v12059_v11 = vld [vmem:[#allocation44_spill] sm:$0xff] }
 0x25d   :  { %1230 = vmatprep.subr.mxu0 %v12037_v27  ;;  %1301 = vmatprep.subr.mxu1 %v12038_v32  ;;  %v12060_v27 = vld [vmem:[#allocation45_spill] sm:$0xff]  ;;  %v12061_v32 = vld [vmem:[#allocation46_spill] sm:$0xff] }
 0x25e   :  { %1231 = vmatpush1.msra.mxu0 %v12039_v25  ;;  %1302 = vmatpush1.msra.mxu1 %v12040_v33  ;;  %v12062_v25 = vld [vmem:[#allocation47_spill] sm:$0xff]  ;;  %v12063_v33 = vld [vmem:[#allocation48_spill] sm:$0xff] }
 0x25f   :  { %1232 = vmatprep.subr.mxu0 %v12041_v36  ;;  %1303 = vmatprep.subr.mxu1 %v12042_v12  ;;  %v12064_v36 = vld [vmem:[#allocation49_spill] sm:$0xff]  ;;  %v12065_v12 = vld [vmem:[#allocation50_spill] sm:$0xff] }
 0x260   :  { %1233 = vmatpush1.msra.mxu0 %v12043_v14  ;;  %1304 = vmatpush1.msra.mxu1 %v12044_v4  ;;  %v12066_v14 = vld [vmem:[#allocation51_spill] sm:$0xff]  ;;  %v12067_v4 = vld [vmem:[#allocation52_spill] sm:$0xff] }
 0x261   :  { %1234 = vmatprep.subr.mxu0 %v12045_v2  ;;  %1305 = vmatprep.subr.mxu1 %v12046_v21  ;;  %v12068_v2 = vld [vmem:[#allocation53_spill] sm:$0xff]  ;;  %v12069_v21 = vld [vmem:[#allocation54_spill] sm:$0xff] }
 0x262   :  { %1235 = vmatpush1.msra.mxu0 %v12047_v18  ;;  %1306 = vmatpush1.msra.mxu1 %v12048_v20  ;;  %v12070_v18 = vld [vmem:[#allocation55_spill] sm:$0xff]  ;;  %v12071_v20 = vld [vmem:[#allocation56_spill] sm:$0xff] }
 0x263   :  { %1236 = vmatprep.subr.mxu0 %v12049_v22  ;;  %1307 = vmatprep.subr.mxu1 %v12050_v38  ;;  %v12072_v22 = vld [vmem:[#allocation57_spill] sm:$0xff]  ;;  %v12073_v38 = vld [vmem:[#allocation58_spill] sm:$0xff] }
 0x264   :  { %1237 = vmatpush1.msra.mxu0 %v12051_v44  ;;  %1308 = vmatpush1.msra.mxu1 %v12052_v5  ;;  %v12074_v44 = vld [vmem:[#allocation59_spill] sm:$0xff]  ;;  %v12075_v5 = vld [vmem:[#allocation60_spill] sm:$0xff] }
 0x265   :  { %1238 = vmatprep.subr.mxu0 %v12053_v19  ;;  %1309 = vmatprep.subr.mxu1 %v12054_v59  ;;  %v12076_v19 = vld [vmem:[#allocation61_spill] sm:$0xff]  ;;  %v12077_v59 = vld [vmem:[#allocation62_spill] sm:$0xff] }
 0x266   :  { %1239 = vmatpush1.msra.mxu0 %v12055_v6  ;;  %1310 = vmatpush1.msra.mxu1 %v12056_v7  ;;  %v12078_v6 = vld [vmem:[#allocation63_spill] sm:$0xff]  ;;  %v12079_v7 = vld [vmem:[#allocation64_spill] sm:$0xff] }
 0x267   :  { %1240 = vmatprep.subr.mxu0 %v12057_v61  ;;  %1311 = vmatprep.subr.mxu1 %v12058_v8  ;;  %v12080_v61 = vld [vmem:[#allocation65_spill] sm:$0xff]  ;;  %v12081_v8 = vld [vmem:[#allocation66_spill] sm:$0xff] }
 0x268   :  { %1241 = vmatpush1.msra.mxu0 %v12059_v11  ;;  %1312 = vmatpush1.msra.mxu1 %v12060_v27  ;;  %v12082_v11 = vld [vmem:[#allocation67_spill] sm:$0xff]  ;;  %v12083_v27 = vld [vmem:[#allocation68_spill] sm:$0xff] }
 0x269   :  { %1242 = vmatprep.subr.mxu0 %v12061_v32  ;;  %1313 = vmatprep.subr.mxu1 %v12062_v25  ;;  %v12084_v32 = vld [vmem:[#allocation69_spill] sm:$0xff]  ;;  %v12085_v25 = vld [vmem:[#allocation70_spill] sm:$0xff] }
 0x26a   :  { %1243 = vmatpush1.msra.mxu0 %v12063_v33  ;;  %1314 = vmatpush1.msra.mxu1 %v12064_v36  ;;  %v12086_v33 = vld [vmem:[#allocation71_spill] sm:$0xff]  ;;  %v12087_v36 = vld [vmem:[#allocation72_spill] sm:$0xff] }
 0x26b   :  { %1244 = vmatprep.subr.mxu0 %v12065_v12  ;;  %1315 = vmatprep.subr.mxu1 %v12066_v14  ;;  %v12088_v12 = vld [vmem:[#allocation73_spill] sm:$0xff]  ;;  %v12089_v14 = vld [vmem:[#allocation74_spill] sm:$0xff] }
 0x26c   :  { %1245 = vmatpush1.msra.mxu0 %v12067_v4  ;;  %1316 = vmatpush1.msra.mxu1 %v12068_v2  ;;  %v12090_v4 = vld [vmem:[#allocation75_spill] sm:$0xff]  ;;  %v12091_v2 = vld [vmem:[#allocation76_spill] sm:$0xff] }
 0x26d   :  { %1246 = vmatprep.subr.mxu0 %v12069_v21  ;;  %1317 = vmatprep.subr.mxu1 %v12070_v18  ;;  %v12092_v21 = vld [vmem:[#allocation77_spill] sm:$0xff]  ;;  %v12093_v18 = vld [vmem:[#allocation78_spill] sm:$0xff] }
 0x26e   :  { %1247 = vmatpush1.msra.mxu0 %v12071_v20  ;;  %1318 = vmatpush1.msra.mxu1 %v12072_v22  ;;  %v12094_v20 = vld [vmem:[#allocation79_spill] sm:$0xff]  ;;  %v12095_v22 = vld [vmem:[#allocation80_spill] sm:$0xff] }
 0x26f   :  { %1248 = vmatprep.subr.mxu0 %v12073_v38  ;;  %1319 = vmatprep.subr.mxu1 %v12074_v44  ;;  %v12096_v38 = vld [vmem:[#allocation81_spill] sm:$0xff]  ;;  %v12097_v44 = vld [vmem:[#allocation82_spill] sm:$0xff] }
 0x270   :  { %1249 = vmatpush1.msra.mxu0 %v12075_v5  ;;  %1320 = vmatpush1.msra.mxu1 %v12076_v19  ;;  %v12098_v5 = vld [vmem:[#allocation83_spill] sm:$0xff]  ;;  %v12099_v19 = vld [vmem:[#allocation84_spill] sm:$0xff] }
 0x271   :  { %1250 = vmatprep.subr.mxu0 %v12077_v59  ;;  %1321 = vmatprep.subr.mxu1 %v12078_v6  ;;  %v12100_v59 = vld [vmem:[#allocation85_spill] sm:$0xff]  ;;  %v12101_v6 = vld [vmem:[#allocation86_spill] sm:$0xff] }
 0x272   :  { %1251 = vmatpush1.msra.mxu0 %v12079_v7  ;;  %1322 = vmatpush1.msra.mxu1 %v12080_v61  ;;  %v12102_v7 = vld [vmem:[#allocation87_spill] sm:$0xff]  ;;  %v12103_v61 = vld [vmem:[#allocation88_spill] sm:$0xff] }
 0x273   :  { %1252 = vmatprep.subr.mxu0 %v12081_v8  ;;  %1323 = vmatprep.subr.mxu1 %v12082_v11  ;;  %v12104_v8 = vld [vmem:[#allocation89_spill] sm:$0xff]  ;;  %v12105_v11 = vld [vmem:[#allocation90_spill] sm:$0xff] }
 0x274   :  { %1253 = vmatpush1.msra.mxu0 %v12083_v27  ;;  %1324 = vmatpush1.msra.mxu1 %v12084_v32  ;;  %v12106_v27 = vld [vmem:[#allocation91_spill] sm:$0xff]  ;;  %v12107_v32 = vld [vmem:[#allocation92_spill] sm:$0xff] }
 0x275   :  { %1254 = vmatprep.subr.mxu0 %v12085_v25  ;;  %1325 = vmatprep.subr.mxu1 %v12086_v33  ;;  %v12108_v25 = vld [vmem:[#allocation93_spill] sm:$0xff]  ;;  %v12109_v33 = vld [vmem:[#allocation94_spill] sm:$0xff] }
 0x276   :  { %1255 = vmatpush1.msra.mxu0 %v12087_v36  ;;  %1326 = vmatpush1.msra.mxu1 %v12088_v12  ;;  %v12110_v36 = vld [vmem:[#allocation95_spill] sm:$0xff]  ;;  %v12111_v12 = vld [vmem:[#allocation96_spill] sm:$0xff] }
 0x277   :  { %1256 = vmatprep.subr.mxu0 %v12089_v14  ;;  %1327 = vmatprep.subr.mxu1 %v12090_v4  ;;  %v12112_v14 = vld [vmem:[#allocation97_spill] sm:$0xff]  ;;  %v12113_v4 = vld [vmem:[#allocation98_spill] sm:$0xff] }
 0x278   :  { %1257 = vmatpush2.msra.mxu0 %v12091_v2  ;;  %1328 = vmatpush2.msra.mxu1 %v12092_v21  ;;  %v12114_v2 = vld [vmem:[#allocation99_spill] sm:$0xff]  ;;  %v12115_v21 = vld [vmem:[#allocation100_spill] sm:$0xff] }
 0x279   :  { %1258 = vmatprep.subr.mxu0 %v12093_v18  ;;  %1329 = vmatprep.subr.mxu1 %v12094_v20  ;;  %v12116_v18 = vld [vmem:[#allocation101_spill] sm:$0xff]  ;;  %v12117_v20 = vld [vmem:[#allocation102_spill] sm:$0xff] }
 0x27a   :  { %1259 = vmatpush2.msra.mxu0 %v12095_v22  ;;  %1330 = vmatpush2.msra.mxu1 %v12096_v38  ;;  %v12118_v22 = vld [vmem:[#allocation103_spill] sm:$0xff]  ;;  %v12119_v38 = vld [vmem:[#allocation104_spill] sm:$0xff] }
 0x27b   :  { %1260 = vmatprep.subr.mxu0 %v12097_v44  ;;  %1331 = vmatprep.subr.mxu1 %v12098_v5  ;;  %v12120_v44 = vld [vmem:[#allocation105_spill] sm:$0xff]  ;;  %v12121_v5 = vld [vmem:[#allocation106_spill] sm:$0xff] }
 0x27c   :  { %1261 = vmatpush2.msra.mxu0 %v12099_v19  ;;  %1332 = vmatpush2.msra.mxu1 %v12100_v59  ;;  %v12122_v19 = vld [vmem:[#allocation107_spill] sm:$0xff]  ;;  %v12123_v59 = vld [vmem:[#allocation108_spill] sm:$0xff] }
 0x27d   :  { %1262 = vmatprep.subr.mxu0 %v12101_v6  ;;  %1333 = vmatprep.subr.mxu1 %v12102_v7  ;;  %v12124_v6 = vld [vmem:[#allocation109_spill] sm:$0xff]  ;;  %v12125_v7 = vld [vmem:[#allocation110_spill] sm:$0xff] }
 0x27e   :  { %1263 = vmatpush2.msra.mxu0 %v12103_v61  ;;  %1334 = vmatpush2.msra.mxu1 %v12104_v8  ;;  %v12126_v61 = vld [vmem:[#allocation111_spill] sm:$0xff]  ;;  %v12127_v8 = vld [vmem:[#allocation112_spill] sm:$0xff] }
 0x27f   :  { %1264 = vmatprep.subr.mxu0 %v12105_v11  ;;  %1335 = vmatprep.subr.mxu1 %v12106_v27  ;;  %v12128_v11 = vld [vmem:[#allocation113_spill] sm:$0xff]  ;;  %v12129_v27 = vld [vmem:[#allocation114_spill] sm:$0xff] }
 0x280   :  { %1265 = vmatpush2.msra.mxu0 %v12107_v32  ;;  %1336 = vmatpush2.msra.mxu1 %v12108_v25  ;;  %v12130_v32 = vld [vmem:[#allocation115_spill] sm:$0xff]  ;;  %v12131_v25 = vld [vmem:[#allocation116_spill] sm:$0xff] }
 0x281   :  { %1266 = vmatprep.subr.mxu0 %v12109_v33  ;;  %1337 = vmatprep.subr.mxu1 %v12110_v36  ;;  %v12132_v33 = vld [vmem:[#allocation117_spill] sm:$0xff]  ;;  %v12133_v36 = vld [vmem:[#allocation118_spill] sm:$0xff] }
 0x282   :  { %1267 = vmatpush2.msra.mxu0 %v12111_v12  ;;  %1338 = vmatpush2.msra.mxu1 %v12112_v14  ;;  %v12134_v12 = vld [vmem:[#allocation119_spill] sm:$0xff]  ;;  %v12135_v14 = vld [vmem:[#allocation120_spill] sm:$0xff] }
 0x283   :  { %1268 = vmatprep.subr.mxu0 %v12113_v4  ;;  %1339 = vmatprep.subr.mxu1 %v12114_v2  ;;  %v12136_v4 = vld [vmem:[#allocation121_spill] sm:$0xff]  ;;  %v12137_v2 = vld [vmem:[#allocation122_spill] sm:$0xff] }
 0x284   :  { %1269 = vmatpush2.msra.mxu0 %v12115_v21  ;;  %1340 = vmatpush2.msra.mxu1 %v12116_v18  ;;  %v12138_v21 = vld [vmem:[#allocation123_spill] sm:$0xff]  ;;  %v12139_v18 = vld [vmem:[#allocation124_spill] sm:$0xff] }
 0x285   :  { %1270 = vmatprep.subr.mxu0 %v12117_v20  ;;  %1341 = vmatprep.subr.mxu1 %v12118_v22  ;;  %v12140_v20 = vld [vmem:[#allocation125_spill] sm:$0xff]  ;;  %v12141_v22 = vld [vmem:[#allocation126_spill] sm:$0xff] }
 0x286   :  { %1271 = vmatpush2.msra.mxu0 %v12119_v38  ;;  %1342 = vmatpush2.msra.mxu1 %v12120_v44  ;;  %v12142_v38 = vld [vmem:[#allocation127_spill] sm:$0xff]  ;;  %v12143_v44 = vld [vmem:[#allocation128_spill] sm:$0xff] }
 0x287   :  { %1272 = vmatprep.subr.mxu0 %v12121_v5  ;;  %1343 = vmatprep.subr.mxu1 %v12122_v19  ;;  %v12144_v5 = vld [vmem:[#allocation129_spill] sm:$0xff]  ;;  %v12145_v19 = vld [vmem:[#allocation130_spill] sm:$0xff] }
 0x288   :  { %1273 = vmatpush2.msra.mxu0 %v12123_v59  ;;  %1344 = vmatpush2.msra.mxu1 %v12124_v6  ;;  %v12146_v59 = vld [vmem:[#allocation131_spill] sm:$0xff]  ;;  %v12151_v6 = vld [vmem:[#allocation136_spill] sm:$0xff] }
 0x289   :  { %1274 = vmatprep.subr.mxu0 %v12125_v7  ;;  %1345 = vmatprep.subr.mxu1 %v12126_v61  ;;  %v12153_v7 = vld [vmem:[#allocation138_spill] sm:$0xff]  ;;  %v12154_v61 = vld [vmem:[#allocation139_spill] sm:$0xff] }
 0x28a   :  { %1275 = vmatpush2.msra.mxu0 %v12127_v8  ;;  %1346 = vmatpush2.msra.mxu1 %v12128_v11  ;;  %v12156_v8 = vld [vmem:[#allocation141_spill] sm:$0xff]  ;;  %v12158_v11 = vld [vmem:[#allocation143_spill] sm:$0xff] }
 0x28b   :  { %1276 = vmatprep.subr.mxu0 %v12129_v27  ;;  %1347 = vmatprep.subr.mxu1 %v12130_v32  ;;  %v12159_v27 = vld [vmem:[#allocation144_spill] sm:$0xff]  ;;  %v12160_v32 = vld [vmem:[#allocation145_spill] sm:$0xff] }
 0x28c   :  { %1277 = vmatpush2.msra.mxu0 %v12131_v25  ;;  %1348 = vmatpush2.msra.mxu1 %v12132_v33  ;;  %v12161_v25 = vld [vmem:[#allocation146_spill] sm:$0xff]  ;;  %v12162_v33 = vld [vmem:[#allocation147_spill] sm:$0xff] }
 0x28d   :  { %1278 = vmatprep.subr.mxu0 %v12133_v36  ;;  %1349 = vmatprep.subr.mxu1 %v12134_v12  ;;  %v12163_v36 = vld [vmem:[#allocation148_spill] sm:$0xff]  ;;  %v12164_v12 = vld [vmem:[#allocation149_spill] sm:$0xff] }
 0x28e   :  { %1279 = vmatpush2.msra.mxu0 %v12135_v14  ;;  %1350 = vmatpush2.msra.mxu1 %v12136_v4  ;;  %v12165_v14 = vld [vmem:[#allocation150_spill] sm:$0xff]  ;;  %v12166_v4 = vld [vmem:[#allocation151_spill] sm:$0xff] }
 0x28f   :  { %1280 = vmatprep.subr.mxu0 %v12137_v2  ;;  %1351 = vmatprep.subr.mxu1 %v12138_v21  ;;  %v12167_v2 = vld [vmem:[#allocation152_spill] sm:$0xff]  ;;  %v12168_v21 = vld [vmem:[#allocation153_spill] sm:$0xff] }
 0x290   :  { %1281 = vmatpush2.msra.mxu0 %v12139_v18  ;;  %1352 = vmatpush2.msra.mxu1 %v12140_v20  ;;  %v12169_v18 = vld [vmem:[#allocation154_spill] sm:$0xff]  ;;  %v12170_v20 = vld [vmem:[#allocation155_spill] sm:$0xff] }
 0x291   :  { %1282 = vmatprep.subr.mxu0 %v6382_v0  ;;  %1353 = vmatprep.subr.mxu1 %v12141_v22  ;;  %v12147_v0 = vld [vmem:[#allocation132_spill] sm:$0xff] }
 0x292   :  { %1283 = vmatpush2.msra.mxu0 %v6388_v28  ;;  %1354 = vmatpush2.msra.mxu1 %v12142_v38  ;;  %v12148_v28 = vld [vmem:[#allocation133_spill] sm:$0xff]  ;;  %v12171_v22 = vld [vmem:[#allocation156_spill] sm:$0xff] }
 0x293   :  { %1284 = vmatprep.subr.mxu0 %v6394_v37  ;;  %1355 = vmatprep.subr.mxu1 %v6396_v1  ;;  %v12149_v37 = vld [vmem:[#allocation134_spill] sm:$0xff]  ;;  %v12150_v1 = vld [vmem:[#allocation135_spill] sm:$0xff]  ;;  %v12172_v38 = vld [vmem:[#allocation157_spill] sm:$0xff] }
 0x294   :  { %1285 = vmatpush2.msra.mxu0 %v12143_v44  ;;  %1356 = vmatpush2.msra.mxu1 %v12144_v5  ;;  %v12173_v44 = vld [vmem:[#allocation158_spill] sm:$0xff]  ;;  %v12174_v5 = vld [vmem:[#allocation159_spill] sm:$0xff] }
 0x295   :  { %1286 = vmatprep.subr.mxu0 %v6406_v26  ;;  %1357 = vmatprep.subr.mxu1 %v12145_v19  ;;  %v12152_v26 = vld [vmem:[#allocation137_spill] sm:$0xff]  ;;  %v12175_v19 = vld [vmem:[#allocation160_spill] sm:$0xff] }
 0x296   :  { %1287 = vmatpush2.msra.mxu0 %v12146_v59  ;;  %1358 = vmatpush2.msra.mxu1 %v6416_v24  ;;  %v12155_v24 = vld [vmem:[#allocation140_spill] sm:$0xff]  ;;  %v12176_v59 = vld [vmem:[#allocation161_spill] sm:$0xff] }
 0x297   :  { %1289 = vmatmul.mubr.f32.vlgmr.msra.gmra.mxu0 %v6822_v42  ;;  %1360 = vmatmul.mubr.f32.vlgmr.msra.gmra.mxu1 %v6822_v42  ;;  %v12157_v42 = vld [vmem:[#allocation142_spill] sm:$0xff] }
 0x298   :  { %1426 = vmatprep.subr.mxu0 %v12147_v0  ;;  %1497 = vmatprep.subr.mxu1 %v12148_v28  ;;  %v12177_v0 = vld [vmem:[#allocation162_spill] sm:$0xff]  ;;  %v12178_v28 = vld [vmem:[#allocation163_spill] sm:$0xff] }
 0x299   :  { %1427 = vmatpush1.msra.mxu0 %v12149_v37  ;;  %1498 = vmatpush1.msra.mxu1 %v12150_v1  ;;  %v12179_v37 = vld [vmem:[#allocation164_spill] sm:$0xff]  ;;  %v12180_v1 = vld [vmem:[#allocation165_spill] sm:$0xff] }
 0x29a   :  { %1428 = vmatprep.subr.mxu0 %v12151_v6  ;;  %1499 = vmatprep.subr.mxu1 %v12152_v26  ;;  %v12181_v6 = vld [vmem:[#allocation166_spill] sm:$0xff]  ;;  %v12182_v26 = vld [vmem:[#allocation167_spill] sm:$0xff] }
 0x29b   :  { %1429 = vmatpush1.msra.mxu0 %v12153_v7  ;;  %1500 = vmatpush1.msra.mxu1 %v12154_v61  ;;  %v12183_v7 = vld [vmem:[#allocation168_spill] sm:$0xff]  ;;  %v12184_v61 = vld [vmem:[#allocation169_spill] sm:$0xff] }
 0x29c   :  { %1430 = vmatprep.subr.mxu0 %v12155_v24  ;;  %1501 = vmatprep.subr.mxu1 %v12156_v8  ;;  %v12185_v24 = vld [vmem:[#allocation170_spill] sm:$0xff]  ;;  %v12186_v8 = vld [vmem:[#allocation171_spill] sm:$0xff] }
 0x29d   :  { %1431 = vmatpush1.msra.mxu0 %v12157_v42  ;;  %1502 = vmatpush1.msra.mxu1 %v12158_v11  ;;  %v12187_v42 = vld [vmem:[#allocation172_spill] sm:$0xff]  ;;  %v12188_v11 = vld [vmem:[#allocation173_spill] sm:$0xff] }
 0x29e   :  { %1432 = vmatprep.subr.mxu0 %v12159_v27  ;;  %1503 = vmatprep.subr.mxu1 %v12160_v32  ;;  %v12189_v27 = vld [vmem:[#allocation174_spill] sm:$0xff]  ;;  %v12190_v32 = vld [vmem:[#allocation175_spill] sm:$0xff] }
 0x29f   :  { %1433 = vmatpush1.msra.mxu0 %v12161_v25  ;;  %1504 = vmatpush1.msra.mxu1 %v12162_v33  ;;  %v12191_v25 = vld [vmem:[#allocation176_spill] sm:$0xff]  ;;  %v12192_v33 = vld [vmem:[#allocation177_spill] sm:$0xff] }
 0x2a0   :  { %1434 = vmatprep.subr.mxu0 %v12163_v36  ;;  %1505 = vmatprep.subr.mxu1 %v12164_v12  ;;  %v12193_v36 = vld [vmem:[#allocation178_spill] sm:$0xff]  ;;  %v12194_v12 = vld [vmem:[#allocation179_spill] sm:$0xff] }
 0x2a1   :  { %1435 = vmatpush1.msra.mxu0 %v12165_v14  ;;  %1506 = vmatpush1.msra.mxu1 %v12166_v4  ;;  %v12195_v14 = vld [vmem:[#allocation180_spill] sm:$0xff]  ;;  %v12196_v4 = vld [vmem:[#allocation181_spill] sm:$0xff] }
 0x2a2   :  { %1436 = vmatprep.subr.mxu0 %v12167_v2  ;;  %1507 = vmatprep.subr.mxu1 %v12168_v21  ;;  %v12197_v2 = vld [vmem:[#allocation182_spill] sm:$0xff]  ;;  %v12198_v21 = vld [vmem:[#allocation183_spill] sm:$0xff] }
 0x2a3   :  { %1437 = vmatpush1.msra.mxu0 %v12169_v18  ;;  %1508 = vmatpush1.msra.mxu1 %v12170_v20  ;;  %v12199_v18 = vld [vmem:[#allocation184_spill] sm:$0xff]  ;;  %v12200_v20 = vld [vmem:[#allocation185_spill] sm:$0xff] }
 0x2a4   :  { %1438 = vmatprep.subr.mxu0 %v12171_v22  ;;  %1509 = vmatprep.subr.mxu1 %v12172_v38  ;;  %v12201_v22 = vld [vmem:[#allocation186_spill] sm:$0xff]  ;;  %v12202_v38 = vld [vmem:[#allocation187_spill] sm:$0xff] }
 0x2a5   :  { %1439 = vmatpush1.msra.mxu0 %v12173_v44  ;;  %1510 = vmatpush1.msra.mxu1 %v12174_v5  ;;  %v12203_v44 = vld [vmem:[#allocation188_spill] sm:$0xff]  ;;  %v12204_v5 = vld [vmem:[#allocation189_spill] sm:$0xff] }
 0x2a6   :  { %1440 = vmatprep.subr.mxu0 %v12175_v19  ;;  %1511 = vmatprep.subr.mxu1 %v12176_v59  ;;  %v12205_v19 = vld [vmem:[#allocation190_spill] sm:$0xff]  ;;  %v12206_v59 = vld [vmem:[#allocation191_spill] sm:$0xff] }
 0x2a7   :  { %1441 = vmatpush1.msra.mxu0 %v12177_v0  ;;  %1512 = vmatpush1.msra.mxu1 %v12178_v28  ;;  %v12207_v0 = vld [vmem:[#allocation192_spill] sm:$0xff]  ;;  %v12208_v28 = vld [vmem:[#allocation193_spill] sm:$0xff] }
 0x2a8   :  { %1442 = vmatprep.subr.mxu0 %v12179_v37  ;;  %1513 = vmatprep.subr.mxu1 %v12180_v1  ;;  %v12209_v37 = vld [vmem:[#allocation194_spill] sm:$0xff]  ;;  %v12210_v1 = vld [vmem:[#allocation195_spill] sm:$0xff] }
 0x2a9   :  { %1443 = vmatpush1.msra.mxu0 %v12181_v6  ;;  %1514 = vmatpush1.msra.mxu1 %v12182_v26  ;;  %v12211_v6 = vld [vmem:[#allocation196_spill] sm:$0xff]  ;;  %v12212_v26 = vld [vmem:[#allocation197_spill] sm:$0xff] }
 0x2aa   :  { %1444 = vmatprep.subr.mxu0 %v12183_v7  ;;  %1515 = vmatprep.subr.mxu1 %v12184_v61  ;;  %v12213_v7 = vld [vmem:[#allocation198_spill] sm:$0xff]  ;;  %v12214_v61 = vld [vmem:[#allocation199_spill] sm:$0xff] }
 0x2ab   :  { %1445 = vmatpush1.msra.mxu0 %v12185_v24  ;;  %1516 = vmatpush1.msra.mxu1 %v12186_v8  ;;  %v12215_v24 = vld [vmem:[#allocation200_spill] sm:$0xff]  ;;  %v12216_v8 = vld [vmem:[#allocation201_spill] sm:$0xff] }
 0x2ac   :  { %1446 = vmatprep.subr.mxu0 %v12187_v42  ;;  %1517 = vmatprep.subr.mxu1 %v12188_v11  ;;  %v12217_v42 = vld [vmem:[#allocation202_spill] sm:$0xff]  ;;  %v12218_v11 = vld [vmem:[#allocation203_spill] sm:$0xff] }
 0x2ad   :  { %1447 = vmatpush1.msra.mxu0 %v12189_v27  ;;  %1518 = vmatpush1.msra.mxu1 %v12190_v32  ;;  %v12219_v27 = vld [vmem:[#allocation204_spill] sm:$0xff]  ;;  %v12220_v32 = vld [vmem:[#allocation205_spill] sm:$0xff] }
 0x2ae   :  { %1448 = vmatprep.subr.mxu0 %v12191_v25  ;;  %1519 = vmatprep.subr.mxu1 %v12192_v33  ;;  %v12221_v25 = vld [vmem:[#allocation206_spill] sm:$0xff]  ;;  %v12222_v33 = vld [vmem:[#allocation207_spill] sm:$0xff] }
 0x2af   :  { %1449 = vmatpush1.msra.mxu0 %v12193_v36  ;;  %1520 = vmatpush1.msra.mxu1 %v12194_v12  ;;  %v12223_v36 = vld [vmem:[#allocation208_spill] sm:$0xff]  ;;  %v12224_v12 = vld [vmem:[#allocation209_spill] sm:$0xff] }
 0x2b0   :  { %1450 = vmatprep.subr.mxu0 %v12195_v14  ;;  %1521 = vmatprep.subr.mxu1 %v12196_v4  ;;  %v7038_v14 = vld [vmem:[#allocation4 + $0x688] sm:$0xff]  ;;  %v7041_v4 = vld [vmem:[#allocation4 + $0x698] sm:$0xff] }
 0x2b1   :  { %1451 = vmatpush1.msra.mxu0 %v12197_v2  ;;  %1522 = vmatpush1.msra.mxu1 %v12198_v21  ;;  %v7044_v2 = vld [vmem:[#allocation4 + $0x680] sm:$0xff]  ;;  %v7065_v21 = vld [vmem:[#allocation4 + $0x618] sm:$0xff] }
 0x2b2   :  { %1452 = vmatprep.subr.mxu0 %v12199_v18  ;;  %1523 = vmatprep.subr.mxu1 %v12200_v20  ;;  %v7068_v18 = vld [vmem:[#allocation4 + $0x600] sm:$0xff]  ;;  %v7071_v20 = vld [vmem:[#allocation4 + $0x610] sm:$0xff] }
 0x2b3   :  { %1453 = vmatpush1.msra.mxu0 %v12201_v22  ;;  %1524 = vmatpush1.msra.mxu1 %v12202_v38  ;;  %v7074_v22 = vld [vmem:[#allocation4 + $0x5c8] sm:$0xff]  ;;  %v7077_v38 = vld [vmem:[#allocation4 + $0x5d8] sm:$0xff] }
 0x2b4   :  { %1454 = vmatprep.subr.mxu0 %v12203_v44  ;;  %1525 = vmatprep.subr.mxu1 %v12204_v5  ;;  %v7080_v44 = vld [vmem:[#allocation4 + $0x5c0] sm:$0xff]  ;;  %v7083_v5 = vld [vmem:[#allocation4 + $0x5d0] sm:$0xff] }
 0x2b5   :  { %1455 = vmatpush1.msra.mxu0 %v12205_v19  ;;  %1526 = vmatpush1.msra.mxu1 %v12206_v59  ;;  %v7086_v19 = vld [vmem:[#allocation4 + $0x588] sm:$0xff]  ;;  %v7089_v59 = vld [vmem:[#allocation4 + $0x598] sm:$0xff] }
 0x2b6   :  { %1456 = vmatprep.subr.mxu0 %v12207_v0  ;;  %1527 = vmatprep.subr.mxu1 %v12208_v28  ;;  %v7092_v0 = vld [vmem:[#allocation4 + $0x580] sm:$0xff]  ;;  %v7095_v28 = vld [vmem:[#allocation4 + $0x590] sm:$0xff] }
 0x2b7   :  { %1457 = vmatpush1.msra.mxu0 %v12209_v37  ;;  %1528 = vmatpush1.msra.mxu1 %v12210_v1  ;;  %v7098_v37 = vld [vmem:[#allocation4 + $0x548] sm:$0xff]  ;;  %v7101_v1 = vld [vmem:[#allocation4 + $0x558] sm:$0xff] }
 0x2b8   :  { %1458 = vmatprep.subr.mxu0 %v12211_v6  ;;  %1529 = vmatprep.subr.mxu1 %v12212_v26  ;;  %v7104_v6 = vld [vmem:[#allocation4 + $0x540] sm:$0xff]  ;;  %v7107_v26 = vld [vmem:[#allocation4 + $0x550] sm:$0xff] }
 0x2b9   :  { %1459 = vmatpush2.msra.mxu0 %v12213_v7  ;;  %1530 = vmatpush2.msra.mxu1 %v12214_v61  ;;  %v7110_v7 = vld [vmem:[#allocation4 + $0x508] sm:$0xff]  ;;  %v7113_v61 = vld [vmem:[#allocation4 + $0x518] sm:$0xff] }
 0x2ba   :  { %1460 = vmatprep.subr.mxu0 %v12215_v24  ;;  %1531 = vmatprep.subr.mxu1 %v12216_v8  ;;  %v7116_v24 = vld [vmem:[#allocation4 + $0x500] sm:$0xff]  ;;  %v7119_v8 = vld [vmem:[#allocation4 + $0x510] sm:$0xff] }
 0x2bb   :  { %1461 = vmatpush2.msra.mxu0 %v12217_v42  ;;  %1532 = vmatpush2.msra.mxu1 %v12218_v11  ;;  %v7122_v42 = vld [vmem:[#allocation4 + $0x4c8] sm:$0xff]  ;;  %v7125_v11 = vld [vmem:[#allocation4 + $0x4d8] sm:$0xff] }
 0x2bc   :  { %1462 = vmatprep.subr.mxu0 %v12219_v27  ;;  %1533 = vmatprep.subr.mxu1 %v12220_v32  ;;  %v7128_v27 = vld [vmem:[#allocation4 + $0x4c0] sm:$0xff]  ;;  %v7131_v32 = vld [vmem:[#allocation4 + $0x4d0] sm:$0xff] }
 0x2bd   :  { %1463 = vmatpush2.msra.mxu0 %v12221_v25  ;;  %1534 = vmatpush2.msra.mxu1 %v12222_v33  ;;  %v7134_v25 = vld [vmem:[#allocation4 + $0x488] sm:$0xff]  ;;  %v7137_v33 = vld [vmem:[#allocation4 + $0x498] sm:$0xff] }
 0x2be   :  { %1464 = vmatprep.subr.mxu0 %v12223_v36  ;;  %1535 = vmatprep.subr.mxu1 %v12224_v12  ;;  %v7140_v36 = vld [vmem:[#allocation4 + $0x480] sm:$0xff]  ;;  %v7143_v12 = vld [vmem:[#allocation4 + $0x490] sm:$0xff] }
 0x2bf   :  { %1465 = vmatpush2.msra.mxu0 %v6660_v34  ;;  %1536 = vmatpush2.msra.mxu1 %v6663_v46  ;;  %v7047_v34 = vld [vmem:[#allocation4 + $0x690] sm:$0xff]  ;;  %v7050_v46 = vld [vmem:[#allocation4 + $0x648] sm:$0xff] }
 0x2c0   :  { %1466 = vmatprep.subr.mxu0 %v6666_v55  ;;  %1537 = vmatprep.subr.mxu1 %v6669_v23  ;;  %v7053_v55 = vld [vmem:[#allocation4 + $0x658] sm:$0xff]  ;;  %v7056_v23 = vld [vmem:[#allocation4 + $0x640] sm:$0xff] }
 0x2c1   :  { %1467 = vmatpush2.msra.mxu0 %v6672_v29  ;;  %1538 = vmatpush2.msra.mxu1 %v6675_v31  ;;  %v7059_v29 = vld [vmem:[#allocation4 + $0x650] sm:$0xff]  ;;  %v7062_v31 = vld [vmem:[#allocation4 + $0x608] sm:$0xff] }
 0x2c2   :  { %1468 = vmatprep.subr.mxu0 %v7038_v14  ;;  %1539 = vmatprep.subr.mxu1 %v7041_v4 }
 0x2c3   :  { %1469 = vmatpush2.msra.mxu0 %v7044_v2  ;;  %1540 = vmatpush2.msra.mxu1 %v7047_v34 }
 0x2c4   :  { %1470 = vmatprep.subr.mxu0 %v7050_v46  ;;  %1541 = vmatprep.subr.mxu1 %v7053_v55 }
 0x2c5   :  { %1471 = vmatpush2.msra.mxu0 %v7056_v23  ;;  %1542 = vmatpush2.msra.mxu1 %v7059_v29 }
 0x2c6   :  { %1472 = vmatprep.subr.mxu0 %v7062_v31  ;;  %1543 = vmatprep.subr.mxu1 %v7065_v21 }
 0x2c7   :  { %1473 = vmatpush2.msra.mxu0 %v7068_v18  ;;  %1544 = vmatpush2.msra.mxu1 %v7071_v20 }
 0x2c8   :  { %1474 = vmatprep.subr.mxu0 %v7074_v22  ;;  %1545 = vmatprep.subr.mxu1 %v7077_v38 }
 0x2c9   :  { %1475 = vmatpush2.msra.mxu0 %v7080_v44  ;;  %1546 = vmatpush2.msra.mxu1 %v7083_v5 }
 0x2ca   :  { %1476 = vmatprep.subr.mxu0 %v7086_v19  ;;  %1547 = vmatprep.subr.mxu1 %v7089_v59 }
 0x2cb   :  { %1477 = vmatpush2.msra.mxu0 %v7092_v0  ;;  %1548 = vmatpush2.msra.mxu1 %v7095_v28 }
 0x2cc   :  { %1478 = vmatprep.subr.mxu0 %v7098_v37  ;;  %1549 = vmatprep.subr.mxu1 %v7101_v1 }
 0x2cd   :  { %1479 = vmatpush2.msra.mxu0 %v7104_v6  ;;  %1550 = vmatpush2.msra.mxu1 %v7107_v26 }
 0x2ce   :  { %1480 = vmatprep.subr.mxu0 %v7110_v7  ;;  %1551 = vmatprep.subr.mxu1 %v7113_v61 }
 0x2cf   :  { %1481 = vmatpush2.msra.mxu0 %v7116_v24  ;;  %1552 = vmatpush2.msra.mxu1 %v7119_v8 }
 0x2d0   :  { %1482 = vmatprep.subr.mxu0 %v7122_v42  ;;  %1553 = vmatprep.subr.mxu1 %v7125_v11 }
 0x2d1   :  { %1483 = vmatpush2.msra.mxu0 %v7128_v27  ;;  %1554 = vmatpush2.msra.mxu1 %v7131_v32 }
 0x2d2   :  { %1484 = vmatprep.subr.mxu0 %v7134_v25  ;;  %1555 = vmatprep.subr.mxu1 %v7137_v33 }
 0x2d3   :  { %1485 = vmatpush2.msra.mxu0 %v7140_v36  ;;  %1556 = vmatpush2.msra.mxu1 %v7143_v12 }
 0x2d4   :  { %1486 = vmatprep.subr.mxu0 %v7146_v57  ;;  %1557 = vmatprep.subr.mxu1 %v7149_v54 }
 0x2d5   :  { %1487 = vmatpush2.msra.mxu0 %v7152_v62  ;;  %1558 = vmatpush2.msra.mxu1 %v7155_v60 }
 0x2d6   :  { %1488 = vmatprep.subr.mxu0 %v7158_v52  ;;  %1559 = vmatprep.subr.mxu1 %v7161_v50 }
 0x2d7   :  { %1489 = vmatpush2.msra.mxu0 %v7164_v58  ;;  %1560 = vmatpush2.msra.mxu1 %v7167_v56 }
 0x2d8   :  { %1568 = vmatprep.subr.mxu0 %v7170_v48  ;;  %1639 = vmatprep.subr.mxu1 %v7173_v45  ;;  %v342_v48 = vadd.f32 %v6734_v47, %v6033_v30 }
 0x316   :  { %v1148_v51 = vpop.f32.mrf.mxu0  ;;  %v1219_v60 = vpop.f32.mrf.mxu1 }
 0x317   :  { %v1398_v41 = vadd.f32 %v1148_v51, %v217_v53  ;;  %v1400_v62 = vadd.f32 %v1219_v60, %v342_v48  ;;  %v344_v60 = vadd.f32 %v6738_v49, %v6029_v10 }
 0x318   :  { %v1150_v58 = vpop.f32.mrf.mxu0  ;;  %v1221_v48 = vpop.f32.mrf.mxu1 }
 0x319   :  { %v4182_v50 = vmul.f32 -1.442695, %v1398_v41  ;;  %v1399_v52 = vadd.f32 %v1150_v58, %v219_v43 }
 0x31b   :  { %4381 = vpow2.f32 %v4182_v50  ;;  %v4183_v56 = vmul.f32 -1.442695, %v1399_v52 }
 0x31d   :  { %4383 = vpow2.f32 %v4183_v56 }
 0x31e   :  { %4385 = vtanh.f32 %v1400_v62 }
 0x328   :  { %v4382_v45 = vpop.eup %4381 }
 0x329   :  { %v1405_v54 = vadd.f32 1.0, %v4382_v45 }
 0x32a   :  { %v4384_v57 = vpop.eup %4383 }
 0x32b   :  { %4387 = vrcp.f32 %v1405_v54  ;;  %v1411_v39 = vadd.f32 1.0, %v4384_v57  ;;  %v4386_v40 = vpop.eup %4385 }
 0x32d   :  { %4389 = vrcp.f32 %v1411_v39  ;;  %v1401_v39 = vadd.f32 %v1221_v48, %v344_v60 }
 0x338   :  { %v4388_v51 = vpop.eup %4387 }
 0x339   :  { %v1422_v53 = vmul.f32 %v4388_v51, %v4386_v40  ;;  %v4184_v40 = vmul.f32 -1.442695, %v1401_v39 }
 0x33a   :  { %v4390_v41 = vpop.eup %4389 }
 0x33b   :  { %v1421_v43 = vmul.f32 %v4390_v41, %v6816_v16 }
 0x33d   :  { %v7183_v50 = vadd.f32 %v1422_v53, %v1421_v43 }
 0x357   :  { %v1290_v52 = vpop.f32.mrf.mxu0  ;;  %v1361_v54 = vpop.f32.mrf.mxu1 }
 0x358   :  { %v1366_v56 = vadd.f32 %v1290_v52, %v6795_v3  ;;  %v1368_v41 = vadd.f32 %v1361_v54, %v6812_v35 }
 0x359   :  { %v1292_v47 = vpop.f32.mrf.mxu0  ;;  %v1363_v62 = vpop.f32.mrf.mxu1 }
 0x35a   :  { %v4179_v58 = vmul.f32 -1.442695, %v1366_v56  ;;  %v1367_v45 = vadd.f32 %v1292_v47, %v6799_v9  ;;  %v1369_v16 = vadd.f32 %v1363_v62, %v6805_v63 }
 0x35c   :  { %4391 = vpow2.f32 %v4179_v58  ;;  %v4180_v57 = vmul.f32 -1.442695, %v1367_v45  ;;  %v4181_v51 = vmul.f32 -1.442695, %v1369_v16 }
 0x35e   :  { %4393 = vpow2.f32 %v4180_v57 }
 0x35f   :  { %4395 = vpow2.f32 %v4184_v40 }
 0x360   :  { %4397 = vpow2.f32 %v4181_v51 }
 0x369   :  { %v4392_v53 = vpop.eup %4391 }
 0x36a   :  { %v1373_v43 = vadd.f32 1.0, %v4392_v53 }
 0x36b   :  { %v4394_v52 = vpop.eup %4393 }
 0x36c   :  { %4399 = vrcp.f32 %v1373_v43  ;;  %v1379_v56 = vadd.f32 1.0, %v4394_v52  ;;  %v4396_v47 = vpop.eup %4395  ;;  %v7203_v52 = vld [vmem:[#allocation4 + $0x3f0] sm:$0xff] }
 0x36d   :  { %4401 = vtanh.f32 %v1368_v41  ;;  %v4398_v58 = vpop.eup %4397  ;;  %v1418_v39 = vadd.f32 1.0, %v4396_v47  ;;  %v7209_v47 = vld [vmem:[#allocation4 + $0x3b8] sm:$0xff] }
 0x36e   :  { %4403 = vrcp.f32 %v1379_v56  ;;  %v1386_v57 = vadd.f32 1.0, %v4398_v58  ;;  %v7206_v56 = vld [vmem:[#allocation4 + $0x3a8] sm:$0xff]  ;;  %v7212_v58 = vld [vmem:[#allocation4 + $0x3a0] sm:$0xff] }
 0x36f   :  { %4405 = vtanh.f32 %v7183_v50 }
 0x370   :  { %4407 = vrcp.f32 %v1386_v57  ;;  %v7224_v57 = vld [vmem:[#allocation4 + $0x360] sm:$0xff] }
 0x379   :  { %v4400_v49 = vpop.eup %4399 }
 0x37a   :  { %v4402_v45 = vpop.eup %4401 }
 0x37b   :  { %v4404_v48 = vpop.eup %4403  ;;  %v1390_v60 = vmul.f32 %v4402_v45, %v4400_v49  ;;  %v7215_v49 = vld [vmem:[#allocation4 + $0x3b0] sm:$0xff]  ;;  %v7218_v45 = vld [vmem:[#allocation4 + $0x368] sm:$0xff] }
 0x37c   :  { %v1389_v62 = vmul.f32 %v4404_v48, %v6818_v17  ;;  %v4406_v54 = vpop.eup %4405  ;;  %v7200_v17 = vld [vmem:[#allocation4 + $0x3e0] sm:$0xff]  ;;  %v7221_v48 = vld [vmem:[#allocation4 + $0x378] sm:$0xff] }
 0x37d   :  { %v4408_v40 = vpop.eup %4407 }
 0x37e   :  { %v7192_v16 = vadd.f32 %v1390_v60, %v1389_v62  ;;  %v7227_v60 = vld [vmem:[#allocation4 + $0x370] sm:$0xff]  ;;  %v7230_v62 = vld [vmem:[#allocation4 + $0x328] sm:$0xff] }
 0x380   :  { %4409 = vtanh.f32 %v7192_v16 }
 0x381   :  { %4411 = vrcp.f32 %v1418_v39  ;;  %v7233_v39 = vld [vmem:[#allocation4 + $0x338] sm:$0xff] }
 0x382   :  { %12235 = vst [vmem:[#allocation26_spill] sm:$0xff] %v7233_v39 }
 0x38d   :  { %v4410_v51 = vpop.eup %4409 }
 0x38e   :  { %v4412_v53 = vpop.eup %4411  ;;  %v1393_v41 = vmul.f32 %v4410_v51, %v4408_v40  ;;  %v7239_v40 = vld [vmem:[#allocation4 + $0x330] sm:$0xff]  ;;  %v7242_v51 = vld [vmem:[#allocation4 + $0x2e8] sm:$0xff] }
 0x38f   :  { %v7196_v43 = vmul.f32 %v4412_v53, %v4406_v54  ;;  %v7236_v54 = vld [vmem:[#allocation4 + $0x320] sm:$0xff]  ;;  %12237 = vst [vmem:[#allocation28_spill] sm:$0xff] %v7239_v40  ;;  %12238 = vst [vmem:[#allocation29_spill] sm:$0xff] %v7242_v51  ;;  %v7245_v53 = vld [vmem:[#allocation4 + $0x2f8] sm:$0xff] }
 0x390   :  { %1490 = vmatprep.mubr.f32.mxu0 %v1393_v41  ;;  %1561 = vmatprep.mubr.f32.mxu1 %v1393_v41  ;;  %12236 = vst [vmem:[#allocation27_spill] sm:$0xff] %v7236_v54  ;;  %12239 = vst [vmem:[#allocation30_spill] sm:$0xff] %v7245_v53 }
 0x391   :  { %1491 = vmatmul.mubr.f32.vlgmr.msra.gmra.mxu0 %v7196_v43  ;;  %1562 = vmatmul.mubr.f32.vlgmr.msra.gmra.mxu1 %v7196_v43 }
 0x392   :  { %1569 = vmatpush1.msra.mxu0 %v7200_v17  ;;  %1640 = vmatpush1.msra.mxu1 %v7203_v52 }
 0x393   :  { %1570 = vmatprep.subr.mxu0 %v7206_v56  ;;  %1632 = vmatprep.mubr.f32.mxu0 %v1393_v41 }
 0x394   :  { %1641 = vmatprep.subr.mxu1 %v7209_v47  ;;  %1703 = vmatprep.mubr.f32.mxu1 %v1393_v41  ;;  %v7248_v41 = vld [vmem:[#allocation4 + $0x2e0] sm:$0xff] }
 0x395   :  { %1571 = vmatpush1.msra.mxu0 %v7212_v58  ;;  %1642 = vmatpush1.msra.mxu1 %v7215_v49  ;;  %12240 = vst [vmem:[#allocation31_spill] sm:$0xff] %v7248_v41 }
 0x396   :  { %1572 = vmatprep.subr.mxu0 %v7218_v45  ;;  %1643 = vmatprep.subr.mxu1 %v7221_v48 }
 0x397   :  { %1573 = vmatpush1.msra.mxu0 %v7224_v57  ;;  %1644 = vmatpush1.msra.mxu1 %v7227_v60 }
 0x398   :  { %1574 = vmatprep.subr.mxu0 %v7230_v62  ;;  %1645 = vmatprep.subr.mxu1 %v7233_v39  ;;  %v7251_v39 = vld [vmem:[#allocation4 + $0x2f0] sm:$0xff] }
 0x399   :  { %1575 = vmatpush1.msra.mxu0 %v7236_v54  ;;  %1646 = vmatpush1.msra.mxu1 %v7239_v40  ;;  %12241 = vst [vmem:[#allocation32_spill] sm:$0xff] %v7251_v39  ;;  %v7254_v54 = vld [vmem:[#allocation4 + $0x2a8] sm:$0xff]  ;;  %v7257_v40 = vld [vmem:[#allocation4 + $0x2b8] sm:$0xff] }
 0x39a   :  { %1576 = vmatprep.subr.mxu0 %v7242_v51  ;;  %1647 = vmatprep.subr.mxu1 %v7245_v53  ;;  %12242 = vst [vmem:[#allocation33_spill] sm:$0xff] %v7254_v54  ;;  %12243 = vst [vmem:[#allocation34_spill] sm:$0xff] %v7257_v40  ;;  %v7260_v51 = vld [vmem:[#allocation4 + $0x2a0] sm:$0xff]  ;;  %v7263_v53 = vld [vmem:[#allocation4 + $0x2b0] sm:$0xff] }
 0x39b   :  { %1577 = vmatpush1.msra.mxu0 %v7248_v41  ;;  %1648 = vmatpush1.msra.mxu1 %v7251_v39  ;;  %12244 = vst [vmem:[#allocation35_spill] sm:$0xff] %v7260_v51  ;;  %12245 = vst [vmem:[#allocation36_spill] sm:$0xff] %v7263_v53  ;;  %v7266_v41 = vld [vmem:[#allocation4 + $0x268] sm:$0xff]  ;;  %v7269_v39 = vld [vmem:[#allocation4 + $0x278] sm:$0xff] }
 0x39c   :  { %1578 = vmatprep.subr.mxu0 %v7254_v54  ;;  %1649 = vmatprep.subr.mxu1 %v7257_v40  ;;  %12246 = vst [vmem:[#allocation37_spill] sm:$0xff] %v7266_v41  ;;  %12247 = vst [vmem:[#allocation38_spill] sm:$0xff] %v7269_v39  ;;  %v7272_v54 = vld [vmem:[#allocation4 + $0x260] sm:$0xff]  ;;  %v7275_v40 = vld [vmem:[#allocation4 + $0x270] sm:$0xff] }
 0x39d   :  { %1579 = vmatpush1.msra.mxu0 %v7260_v51  ;;  %1650 = vmatpush1.msra.mxu1 %v7263_v53  ;;  %12248 = vst [vmem:[#allocation39_spill] sm:$0xff] %v7272_v54  ;;  %12249 = vst [vmem:[#allocation40_spill] sm:$0xff] %v7275_v40  ;;  %v7278_v51 = vld [vmem:[#allocation4 + $0x228] sm:$0xff]  ;;  %v7281_v53 = vld [vmem:[#allocation4 + $0x238] sm:$0xff] }
 0x39e   :  { %1580 = vmatprep.subr.mxu0 %v7266_v41  ;;  %1651 = vmatprep.subr.mxu1 %v7269_v39  ;;  %12250 = vst [vmem:[#allocation41_spill] sm:$0xff] %v7278_v51  ;;  %12251 = vst [vmem:[#allocation42_spill] sm:$0xff] %v7281_v53  ;;  %v7284_v41 = vld [vmem:[#allocation4 + $0x220] sm:$0xff]  ;;  %v7287_v39 = vld [vmem:[#allocation4 + $0x230] sm:$0xff] }
 0x39f   :  { %1581 = vmatpush1.msra.mxu0 %v7272_v54  ;;  %1652 = vmatpush1.msra.mxu1 %v7275_v40  ;;  %12252 = vst [vmem:[#allocation43_spill] sm:$0xff] %v7284_v41  ;;  %12253 = vst [vmem:[#allocation44_spill] sm:$0xff] %v7287_v39  ;;  %v7290_v54 = vld [vmem:[#allocation4 + $0x1e8] sm:$0xff]  ;;  %v7293_v40 = vld [vmem:[#allocation4 + $0x1f8] sm:$0xff] }
 0x3a0   :  { %1582 = vmatprep.subr.mxu0 %v7278_v51  ;;  %1653 = vmatprep.subr.mxu1 %v7281_v53  ;;  %12254 = vst [vmem:[#allocation45_spill] sm:$0xff] %v7290_v54  ;;  %12255 = vst [vmem:[#allocation46_spill] sm:$0xff] %v7293_v40  ;;  %v7296_v51 = vld [vmem:[#allocation4 + $0x1e0] sm:$0xff]  ;;  %v7299_v53 = vld [vmem:[#allocation4 + $0x1f0] sm:$0xff] }
 0x3a1   :  { %1583 = vmatpush1.msra.mxu0 %v7284_v41  ;;  %1654 = vmatpush1.msra.mxu1 %v7287_v39  ;;  %12256 = vst [vmem:[#allocation47_spill] sm:$0xff] %v7296_v51  ;;  %12257 = vst [vmem:[#allocation48_spill] sm:$0xff] %v7299_v53  ;;  %v7302_v41 = vld [vmem:[#allocation4 + $0x1a8] sm:$0xff]  ;;  %v7305_v39 = vld [vmem:[#allocation4 + $0x1b8] sm:$0xff] }
 0x3a2   :  { %1584 = vmatprep.subr.mxu0 %v7290_v54  ;;  %1655 = vmatprep.subr.mxu1 %v7293_v40  ;;  %12258 = vst [vmem:[#allocation49_spill] sm:$0xff] %v7302_v41  ;;  %12259 = vst [vmem:[#allocation50_spill] sm:$0xff] %v7305_v39  ;;  %v7308_v54 = vld [vmem:[#allocation4 + $0x1a0] sm:$0xff]  ;;  %v7311_v40 = vld [vmem:[#allocation4 + $0x1b0] sm:$0xff] }
 0x3a3   :  { %1585 = vmatpush1.msra.mxu0 %v7296_v51  ;;  %1656 = vmatpush1.msra.mxu1 %v7299_v53  ;;  %12260 = vst [vmem:[#allocation51_spill] sm:$0xff] %v7308_v54  ;;  %12261 = vst [vmem:[#allocation52_spill] sm:$0xff] %v7311_v40  ;;  %v7314_v51 = vld [vmem:[#allocation4 + $0x168] sm:$0xff]  ;;  %v7317_v53 = vld [vmem:[#allocation4 + $0x178] sm:$0xff] }
 0x3a4   :  { %1586 = vmatprep.subr.mxu0 %v7302_v41  ;;  %1657 = vmatprep.subr.mxu1 %v7305_v39  ;;  %12262 = vst [vmem:[#allocation53_spill] sm:$0xff] %v7314_v51  ;;  %12263 = vst [vmem:[#allocation54_spill] sm:$0xff] %v7317_v53  ;;  %v7320_v41 = vld [vmem:[#allocation4 + $0x160] sm:$0xff]  ;;  %v7323_v39 = vld [vmem:[#allocation4 + $0x170] sm:$0xff] }
 0x3a5   :  { %1587 = vmatpush1.msra.mxu0 %v7308_v54  ;;  %1658 = vmatpush1.msra.mxu1 %v7311_v40  ;;  %12264 = vst [vmem:[#allocation55_spill] sm:$0xff] %v7320_v41  ;;  %12265 = vst [vmem:[#allocation56_spill] sm:$0xff] %v7323_v39  ;;  %v7326_v54 = vld [vmem:[#allocation4 + $0x128] sm:$0xff]  ;;  %v7329_v40 = vld [vmem:[#allocation4 + $0x138] sm:$0xff] }
 0x3a6   :  { %1588 = vmatprep.subr.mxu0 %v7314_v51  ;;  %1659 = vmatprep.subr.mxu1 %v7317_v53  ;;  %12266 = vst [vmem:[#allocation57_spill] sm:$0xff] %v7326_v54  ;;  %12267 = vst [vmem:[#allocation58_spill] sm:$0xff] %v7329_v40  ;;  %v7332_v51 = vld [vmem:[#allocation4 + $0x120] sm:$0xff]  ;;  %v7335_v53 = vld [vmem:[#allocation4 + $0x130] sm:$0xff] }
 0x3a7   :  { %1589 = vmatpush1.msra.mxu0 %v7320_v41  ;;  %1660 = vmatpush1.msra.mxu1 %v7323_v39  ;;  %12268 = vst [vmem:[#allocation59_spill] sm:$0xff] %v7332_v51  ;;  %12269 = vst [vmem:[#allocation60_spill] sm:$0xff] %v7335_v53  ;;  %v7338_v41 = vld [vmem:[#allocation4 + $0xe8] sm:$0xff]  ;;  %v7341_v39 = vld [vmem:[#allocation4 + $0xf8] sm:$0xff] }
 0x3a8   :  { %1590 = vmatprep.subr.mxu0 %v7326_v54  ;;  %1661 = vmatprep.subr.mxu1 %v7329_v40  ;;  %12270 = vst [vmem:[#allocation61_spill] sm:$0xff] %v7338_v41  ;;  %12271 = vst [vmem:[#allocation62_spill] sm:$0xff] %v7341_v39  ;;  %v7344_v54 = vld [vmem:[#allocation4 + $0xe0] sm:$0xff]  ;;  %v7347_v40 = vld [vmem:[#allocation4 + $0xf0] sm:$0xff] }
 0x3a9   :  { %1591 = vmatpush1.msra.mxu0 %v7332_v51  ;;  %1662 = vmatpush1.msra.mxu1 %v7335_v53  ;;  %12272 = vst [vmem:[#allocation63_spill] sm:$0xff] %v7344_v54  ;;  %12273 = vst [vmem:[#allocation64_spill] sm:$0xff] %v7347_v40  ;;  %v7350_v51 = vld [vmem:[#allocation4 + $0xa8] sm:$0xff]  ;;  %v7353_v53 = vld [vmem:[#allocation4 + $0xb8] sm:$0xff] }
 0x3aa   :  { %1592 = vmatprep.subr.mxu0 %v7338_v41  ;;  %1663 = vmatprep.subr.mxu1 %v7341_v39  ;;  %12274 = vst [vmem:[#allocation65_spill] sm:$0xff] %v7350_v51  ;;  %12275 = vst [vmem:[#allocation66_spill] sm:$0xff] %v7353_v53  ;;  %v7356_v41 = vld [vmem:[#allocation4 + $0xa0] sm:$0xff]  ;;  %v7359_v39 = vld [vmem:[#allocation4 + $0xb0] sm:$0xff] }
 0x3ab   :  { %1593 = vmatpush1.msra.mxu0 %v7344_v54  ;;  %1664 = vmatpush1.msra.mxu1 %v7347_v40  ;;  %12276 = vst [vmem:[#allocation67_spill] sm:$0xff] %v7356_v41  ;;  %12277 = vst [vmem:[#allocation68_spill] sm:$0xff] %v7359_v39  ;;  %v7362_v54 = vld [vmem:[#allocation4 + $0x68] sm:$0xff]  ;;  %v7365_v40 = vld [vmem:[#allocation4 + $0x78] sm:$0xff] }
 0x3ac   :  { %1594 = vmatprep.subr.mxu0 %v7350_v51  ;;  %1665 = vmatprep.subr.mxu1 %v7353_v53  ;;  %12278 = vst [vmem:[#allocation69_spill] sm:$0xff] %v7362_v54  ;;  %12279 = vst [vmem:[#allocation70_spill] sm:$0xff] %v7365_v40  ;;  %v7368_v51 = vld [vmem:[#allocation4 + $0x60] sm:$0xff]  ;;  %v7371_v53 = vld [vmem:[#allocation4 + $0x70] sm:$0xff] }
 0x3ad   :  { %1595 = vmatpush1.msra.mxu0 %v7356_v41  ;;  %1666 = vmatpush1.msra.mxu1 %v7359_v39  ;;  %12280 = vst [vmem:[#allocation71_spill] sm:$0xff] %v7368_v51  ;;  %12281 = vst [vmem:[#allocation72_spill] sm:$0xff] %v7371_v53  ;;  %v7374_v41 = vld [vmem:[#allocation4 + $0x28] sm:$0xff]  ;;  %v7377_v39 = vld [vmem:[#allocation4 + $0x38] sm:$0xff] }
 0x3ae   :  { %1596 = vmatprep.subr.mxu0 %v7362_v54  ;;  %1667 = vmatprep.subr.mxu1 %v7365_v40  ;;  %12282 = vst [vmem:[#allocation73_spill] sm:$0xff] %v7374_v41  ;;  %12283 = vst [vmem:[#allocation74_spill] sm:$0xff] %v7377_v39  ;;  %v7380_v54 = vld [vmem:[#allocation4 + $0x20] sm:$0xff]  ;;  %v7383_v40 = vld [vmem:[#allocation4 + $0x30] sm:$0xff] }
 0x3af   :  { %1597 = vmatpush1.msra.mxu0 %v7368_v51  ;;  %1668 = vmatpush1.msra.mxu1 %v7371_v53  ;;  %12284 = vst [vmem:[#allocation75_spill] sm:$0xff] %v7380_v54  ;;  %12285 = vst [vmem:[#allocation76_spill] sm:$0xff] %v7383_v40  ;;  %v7386_v51 = vld [vmem:[#allocation4 + $0x7e8] sm:$0xff]  ;;  %v7389_v53 = vld [vmem:[#allocation4 + $0x7f8] sm:$0xff] }
 0x3b0   :  { %1598 = vmatprep.subr.mxu0 %v7374_v41  ;;  %1669 = vmatprep.subr.mxu1 %v7377_v39  ;;  %12286 = vst [vmem:[#allocation77_spill] sm:$0xff] %v7386_v51  ;;  %12287 = vst [vmem:[#allocation78_spill] sm:$0xff] %v7389_v53  ;;  %v7392_v41 = vld [vmem:[#allocation4 + $0x7e0] sm:$0xff]  ;;  %v7395_v39 = vld [vmem:[#allocation4 + $0x7f0] sm:$0xff] }
 0x3b1   :  { %1599 = vmatpush1.msra.mxu0 %v7380_v54  ;;  %1670 = vmatpush1.msra.mxu1 %v7383_v40  ;;  %12288 = vst [vmem:[#allocation79_spill] sm:$0xff] %v7392_v41  ;;  %12289 = vst [vmem:[#allocation80_spill] sm:$0xff] %v7395_v39  ;;  %v7398_v54 = vld [vmem:[#allocation4 + $0x7a8] sm:$0xff]  ;;  %v7401_v40 = vld [vmem:[#allocation4 + $0x7b8] sm:$0xff] }
 0x3b2   :  { %1600 = vmatprep.subr.mxu0 %v7386_v51  ;;  %1671 = vmatprep.subr.mxu1 %v7389_v53  ;;  %12290 = vst [vmem:[#allocation81_spill] sm:$0xff] %v7398_v54  ;;  %12291 = vst [vmem:[#allocation82_spill] sm:$0xff] %v7401_v40  ;;  %v7404_v51 = vld [vmem:[#allocation4 + $0x7a0] sm:$0xff]  ;;  %v7407_v53 = vld [vmem:[#allocation4 + $0x7b0] sm:$0xff] }
 0x3b3   :  { %1601 = vmatpush2.msra.mxu0 %v7392_v41  ;;  %1672 = vmatpush2.msra.mxu1 %v7395_v39  ;;  %12292 = vst [vmem:[#allocation83_spill] sm:$0xff] %v7404_v51  ;;  %12293 = vst [vmem:[#allocation84_spill] sm:$0xff] %v7407_v53  ;;  %v7410_v41 = vld [vmem:[#allocation4 + $0x768] sm:$0xff]  ;;  %v7413_v39 = vld [vmem:[#allocation4 + $0x778] sm:$0xff] }
 0x3b4   :  { %1602 = vmatprep.subr.mxu0 %v7398_v54  ;;  %1673 = vmatprep.subr.mxu1 %v7401_v40  ;;  %12294 = vst [vmem:[#allocation85_spill] sm:$0xff] %v7410_v41  ;;  %12295 = vst [vmem:[#allocation86_spill] sm:$0xff] %v7413_v39  ;;  %v7416_v54 = vld [vmem:[#allocation4 + $0x760] sm:$0xff]  ;;  %v7419_v40 = vld [vmem:[#allocation4 + $0x770] sm:$0xff] }
 0x3b5   :  { %1603 = vmatpush2.msra.mxu0 %v7404_v51  ;;  %1674 = vmatpush2.msra.mxu1 %v7407_v53  ;;  %12296 = vst [vmem:[#allocation87_spill] sm:$0xff] %v7416_v54  ;;  %12297 = vst [vmem:[#allocation88_spill] sm:$0xff] %v7419_v40  ;;  %v7422_v51 = vld [vmem:[#allocation4 + $0x728] sm:$0xff]  ;;  %v7425_v53 = vld [vmem:[#allocation4 + $0x738] sm:$0xff] }
 0x3b6   :  { %1604 = vmatprep.subr.mxu0 %v7410_v41  ;;  %1675 = vmatprep.subr.mxu1 %v7413_v39  ;;  %12298 = vst [vmem:[#allocation89_spill] sm:$0xff] %v7422_v51  ;;  %12299 = vst [vmem:[#allocation90_spill] sm:$0xff] %v7425_v53  ;;  %v7428_v41 = vld [vmem:[#allocation4 + $0x720] sm:$0xff]  ;;  %v7431_v39 = vld [vmem:[#allocation4 + $0x730] sm:$0xff] }
 0x3b7   :  { %1605 = vmatpush2.msra.mxu0 %v7416_v54  ;;  %1676 = vmatpush2.msra.mxu1 %v7419_v40  ;;  %12300 = vst [vmem:[#allocation91_spill] sm:$0xff] %v7428_v41  ;;  %12301 = vst [vmem:[#allocation92_spill] sm:$0xff] %v7431_v39  ;;  %v7434_v54 = vld [vmem:[#allocation4 + $0x6e8] sm:$0xff]  ;;  %v7437_v40 = vld [vmem:[#allocation4 + $0x6f8] sm:$0xff] }
 0x3b8   :  { %1606 = vmatprep.subr.mxu0 %v7422_v51  ;;  %1677 = vmatprep.subr.mxu1 %v7425_v53  ;;  %12302 = vst [vmem:[#allocation93_spill] sm:$0xff] %v7434_v54  ;;  %12303 = vst [vmem:[#allocation94_spill] sm:$0xff] %v7437_v40  ;;  %v7440_v51 = vld [vmem:[#allocation4 + $0x6e0] sm:$0xff]  ;;  %v7443_v53 = vld [vmem:[#allocation4 + $0x6f0] sm:$0xff] }
 0x3b9   :  { %1607 = vmatpush2.msra.mxu0 %v7428_v41  ;;  %1678 = vmatpush2.msra.mxu1 %v7431_v39  ;;  %12304 = vst [vmem:[#allocation95_spill] sm:$0xff] %v7440_v51  ;;  %12305 = vst [vmem:[#allocation96_spill] sm:$0xff] %v7443_v53  ;;  %v7446_v41 = vld [vmem:[#allocation4 + $0x6a8] sm:$0xff]  ;;  %v7449_v39 = vld [vmem:[#allocation4 + $0x6b8] sm:$0xff] }
 0x3ba   :  { %1608 = vmatprep.subr.mxu0 %v7434_v54  ;;  %1679 = vmatprep.subr.mxu1 %v7437_v40  ;;  %12306 = vst [vmem:[#allocation97_spill] sm:$0xff] %v7446_v41  ;;  %12307 = vst [vmem:[#allocation98_spill] sm:$0xff] %v7449_v39  ;;  %v7452_v54 = vld [vmem:[#allocation4 + $0x6a0] sm:$0xff]  ;;  %v7455_v40 = vld [vmem:[#allocation4 + $0x6b0] sm:$0xff] }
 0x3bb   :  { %1609 = vmatpush2.msra.mxu0 %v7440_v51  ;;  %1680 = vmatpush2.msra.mxu1 %v7443_v53  ;;  %12308 = vst [vmem:[#allocation99_spill] sm:$0xff] %v7452_v54  ;;  %12309 = vst [vmem:[#allocation100_spill] sm:$0xff] %v7455_v40  ;;  %v7458_v51 = vld [vmem:[#allocation4 + $0x668] sm:$0xff]  ;;  %v7461_v53 = vld [vmem:[#allocation4 + $0x678] sm:$0xff] }
 0x3bc   :  { %1610 = vmatprep.subr.mxu0 %v7446_v41  ;;  %1681 = vmatprep.subr.mxu1 %v7449_v39  ;;  %12310 = vst [vmem:[#allocation101_spill] sm:$0xff] %v7458_v51  ;;  %12311 = vst [vmem:[#allocation102_spill] sm:$0xff] %v7461_v53  ;;  %v7464_v41 = vld [vmem:[#allocation4 + $0x660] sm:$0xff]  ;;  %v7467_v39 = vld [vmem:[#allocation4 + $0x670] sm:$0xff] }
 0x3bd   :  { %1611 = vmatpush2.msra.mxu0 %v7452_v54  ;;  %1682 = vmatpush2.msra.mxu1 %v7455_v40  ;;  %12312 = vst [vmem:[#allocation103_spill] sm:$0xff] %v7464_v41  ;;  %12313 = vst [vmem:[#allocation104_spill] sm:$0xff] %v7467_v39  ;;  %v7470_v54 = vld [vmem:[#allocation4 + $0x628] sm:$0xff]  ;;  %v7473_v40 = vld [vmem:[#allocation4 + $0x638] sm:$0xff] }
 0x3be   :  { %1612 = vmatprep.subr.mxu0 %v7458_v51  ;;  %1683 = vmatprep.subr.mxu1 %v7461_v53  ;;  %12314 = vst [vmem:[#allocation105_spill] sm:$0xff] %v7470_v54  ;;  %12315 = vst [vmem:[#allocation106_spill] sm:$0xff] %v7473_v40  ;;  %v7476_v51 = vld [vmem:[#allocation4 + $0x620] sm:$0xff]  ;;  %v7479_v53 = vld [vmem:[#allocation4 + $0x630] sm:$0xff] }
 0x3bf   :  { %1613 = vmatpush2.msra.mxu0 %v7464_v41  ;;  %1684 = vmatpush2.msra.mxu1 %v7467_v39  ;;  %12316 = vst [vmem:[#allocation107_spill] sm:$0xff] %v7476_v51  ;;  %12317 = vst [vmem:[#allocation108_spill] sm:$0xff] %v7479_v53  ;;  %v7482_v41 = vld [vmem:[#allocation4 + $0x5e8] sm:$0xff]  ;;  %v7485_v39 = vld [vmem:[#allocation4 + $0x5f8] sm:$0xff] }
 0x3c0   :  { %1614 = vmatprep.subr.mxu0 %v7470_v54  ;;  %1685 = vmatprep.subr.mxu1 %v7473_v40  ;;  %12318 = vst [vmem:[#allocation109_spill] sm:$0xff] %v7482_v41  ;;  %12319 = vst [vmem:[#allocation110_spill] sm:$0xff] %v7485_v39  ;;  %v7488_v54 = vld [vmem:[#allocation4 + $0x5e0] sm:$0xff]  ;;  %v7491_v40 = vld [vmem:[#allocation4 + $0x5f0] sm:$0xff] }
 0x3c1   :  { %1615 = vmatpush2.msra.mxu0 %v7476_v51  ;;  %1686 = vmatpush2.msra.mxu1 %v7479_v53  ;;  %12320 = vst [vmem:[#allocation111_spill] sm:$0xff] %v7488_v54  ;;  %12321 = vst [vmem:[#allocation112_spill] sm:$0xff] %v7491_v40  ;;  %v7494_v51 = vld [vmem:[#allocation4 + $0x5a8] sm:$0xff]  ;;  %v7497_v53 = vld [vmem:[#allocation4 + $0x5b8] sm:$0xff] }
 0x3c2   :  { %1616 = vmatprep.subr.mxu0 %v7482_v41  ;;  %1687 = vmatprep.subr.mxu1 %v7485_v39  ;;  %12322 = vst [vmem:[#allocation113_spill] sm:$0xff] %v7494_v51  ;;  %12323 = vst [vmem:[#allocation114_spill] sm:$0xff] %v7497_v53  ;;  %v7500_v41 = vld [vmem:[#allocation4 + $0x5a0] sm:$0xff]  ;;  %v7503_v39 = vld [vmem:[#allocation4 + $0x5b0] sm:$0xff] }
 0x3c3   :  { %1617 = vmatpush2.msra.mxu0 %v7488_v54  ;;  %1688 = vmatpush2.msra.mxu1 %v7491_v40  ;;  %12324 = vst [vmem:[#allocation115_spill] sm:$0xff] %v7500_v41  ;;  %12325 = vst [vmem:[#allocation116_spill] sm:$0xff] %v7503_v39  ;;  %v7506_v54 = vld [vmem:[#allocation4 + $0x568] sm:$0xff]  ;;  %v7509_v40 = vld [vmem:[#allocation4 + $0x578] sm:$0xff] }
 0x3c4   :  { %1618 = vmatprep.subr.mxu0 %v7494_v51  ;;  %1689 = vmatprep.subr.mxu1 %v7497_v53  ;;  %12326 = vst [vmem:[#allocation117_spill] sm:$0xff] %v7506_v54  ;;  %12327 = vst [vmem:[#allocation118_spill] sm:$0xff] %v7509_v40  ;;  %v7512_v51 = vld [vmem:[#allocation4 + $0x560] sm:$0xff]  ;;  %v7515_v53 = vld [vmem:[#allocation4 + $0x570] sm:$0xff] }
 0x3c5   :  { %1619 = vmatpush2.msra.mxu0 %v7500_v41  ;;  %1690 = vmatpush2.msra.mxu1 %v7503_v39  ;;  %12328 = vst [vmem:[#allocation119_spill] sm:$0xff] %v7512_v51  ;;  %12329 = vst [vmem:[#allocation120_spill] sm:$0xff] %v7515_v53  ;;  %v7518_v41 = vld [vmem:[#allocation4 + $0x528] sm:$0xff]  ;;  %v7521_v39 = vld [vmem:[#allocation4 + $0x538] sm:$0xff] }
 0x3c6   :  { %1620 = vmatprep.subr.mxu0 %v7506_v54  ;;  %1691 = vmatprep.subr.mxu1 %v7509_v40  ;;  %12330 = vst [vmem:[#allocation121_spill] sm:$0xff] %v7518_v41  ;;  %12331 = vst [vmem:[#allocation122_spill] sm:$0xff] %v7521_v39  ;;  %v7524_v54 = vld [vmem:[#allocation4 + $0x520] sm:$0xff]  ;;  %v7527_v40 = vld [vmem:[#allocation4 + $0x530] sm:$0xff] }
 0x3c7   :  { %1621 = vmatpush2.msra.mxu0 %v7512_v51  ;;  %1692 = vmatpush2.msra.mxu1 %v7515_v53  ;;  %12332 = vst [vmem:[#allocation123_spill] sm:$0xff] %v7524_v54  ;;  %12333 = vst [vmem:[#allocation124_spill] sm:$0xff] %v7527_v40  ;;  %v7530_v51 = vld [vmem:[#allocation4 + $0x4e8] sm:$0xff]  ;;  %v7533_v53 = vld [vmem:[#allocation4 + $0x4f8] sm:$0xff] }
 0x3c8   :  { %1622 = vmatprep.subr.mxu0 %v7518_v41  ;;  %1693 = vmatprep.subr.mxu1 %v7521_v39  ;;  %12334 = vst [vmem:[#allocation125_spill] sm:$0xff] %v7530_v51  ;;  %12335 = vst [vmem:[#allocation126_spill] sm:$0xff] %v7533_v53  ;;  %v7536_v41 = vld [vmem:[#allocation4 + $0x4e0] sm:$0xff]  ;;  %v7539_v39 = vld [vmem:[#allocation4 + $0x4f0] sm:$0xff] }
 0x3c9   :  { %1623 = vmatpush2.msra.mxu0 %v7524_v54  ;;  %1694 = vmatpush2.msra.mxu1 %v7527_v40  ;;  %12336 = vst [vmem:[#allocation127_spill] sm:$0xff] %v7536_v41  ;;  %12337 = vst [vmem:[#allocation128_spill] sm:$0xff] %v7539_v39  ;;  %v7542_v54 = vld [vmem:[#allocation4 + $0x4a8] sm:$0xff]  ;;  %v7545_v40 = vld [vmem:[#allocation4 + $0x4b8] sm:$0xff] }
 0x3ca   :  { %1624 = vmatprep.subr.mxu0 %v7530_v51  ;;  %1695 = vmatprep.subr.mxu1 %v7533_v53  ;;  %12338 = vst [vmem:[#allocation129_spill] sm:$0xff] %v7542_v54  ;;  %12339 = vst [vmem:[#allocation130_spill] sm:$0xff] %v7545_v40  ;;  %v7548_v51 = vld [vmem:[#allocation4 + $0x4a0] sm:$0xff]  ;;  %v7551_v53 = vld [vmem:[#allocation4 + $0x4b0] sm:$0xff] }
 0x3cb   :  { %1625 = vmatpush2.msra.mxu0 %v7536_v41  ;;  %1696 = vmatpush2.msra.mxu1 %v7539_v39  ;;  %12340 = vst [vmem:[#allocation131_spill] sm:$0xff] %v7548_v51  ;;  %12341 = vst [vmem:[#allocation132_spill] sm:$0xff] %v7551_v53  ;;  %v7554_v41 = vld [vmem:[#allocation4 + $0x468] sm:$0xff]  ;;  %v7557_v39 = vld [vmem:[#allocation4 + $0x478] sm:$0xff] }
 0x3cc   :  { %1626 = vmatprep.subr.mxu0 %v7542_v54  ;;  %1697 = vmatprep.subr.mxu1 %v7545_v40  ;;  %12342 = vst [vmem:[#allocation133_spill] sm:$0xff] %v7554_v41  ;;  %12343 = vst [vmem:[#allocation134_spill] sm:$0xff] %v7557_v39  ;;  %v7560_v54 = vld [vmem:[#allocation4 + $0x460] sm:$0xff]  ;;  %v7563_v40 = vld [vmem:[#allocation4 + $0x470] sm:$0xff] }
 0x3cd   :  { %1627 = vmatpush2.msra.mxu0 %v7548_v51  ;;  %1698 = vmatpush2.msra.mxu1 %v7551_v53  ;;  %12344 = vst [vmem:[#allocation135_spill] sm:$0xff] %v7563_v40  ;;  %v7566_v51 = vld [vmem:[#allocation4 + $0x428] sm:$0xff]  ;;  %v7569_v53 = vld [vmem:[#allocation4 + $0x438] sm:$0xff] }
 0x3ce   :  { %1628 = vmatprep.subr.mxu0 %v7554_v41  ;;  %1699 = vmatprep.subr.mxu1 %v7557_v39  ;;  %12345 = vst [vmem:[#allocation136_spill] sm:$0xff] %v7566_v51  ;;  %12346 = vst [vmem:[#allocation137_spill] sm:$0xff] %v7569_v53  ;;  %v7572_v41 = vld [vmem:[#allocation4 + $0x420] sm:$0xff]  ;;  %v7575_v39 = vld [vmem:[#allocation4 + $0x430] sm:$0xff] }
 0x3cf   :  { %1629 = vmatpush2.msra.mxu0 %v7560_v54  ;;  %1700 = vmatpush2.msra.mxu1 %v7563_v40  ;;  %12347 = vst [vmem:[#allocation138_spill] sm:$0xff] %v7572_v41  ;;  %12348 = vst [vmem:[#allocation139_spill] sm:$0xff] %v7575_v39  ;;  %v7580_v40 = vld [vmem:[#allocation4 + $0x3c8] sm:$0xff] }
 0x3d0   :  { %1630 = vmatprep.subr.mxu0 %v7566_v51  ;;  %1701 = vmatprep.subr.mxu1 %v7569_v53  ;;  %12349 = vst [vmem:[#allocation140_spill] sm:$0xff] %v7580_v40  ;;  %v7583_v51 = vld [vmem:[#allocation4 + $0x3d8] sm:$0xff]  ;;  %v7586_v53 = vld [vmem:[#allocation4 + $0x3c0] sm:$0xff] }
 0x3d1   :  { %1631 = vmatpush2.msra.mxu0 %v7572_v41  ;;  %1702 = vmatpush2.msra.mxu1 %v7575_v39  ;;  %12350 = vst [vmem:[#allocation141_spill] sm:$0xff] %v7583_v51  ;;  %12351 = vst [vmem:[#allocation142_spill] sm:$0xff] %v7586_v53  ;;  %v7589_v41 = vld [vmem:[#allocation4 + $0x3d0] sm:$0xff]  ;;  %v7592_v39 = vld [vmem:[#allocation4 + $0x388] sm:$0xff] }
 0x3d2   :  { %1633 = vmatmul.mubr.f32.vlgmr.msra.gmra.mxu0 %v7196_v43  ;;  %1704 = vmatmul.mubr.f32.vlgmr.msra.gmra.mxu1 %v7196_v43  ;;  %12352 = vst [vmem:[#allocation143_spill] sm:$0xff] %v7589_v41  ;;  %12353 = vst [vmem:[#allocation144_spill] sm:$0xff] %v7592_v39  ;;  %v7595_v43 = vld [vmem:[#allocation4 + $0x398] sm:$0xff] }
 0x3d3   :  { %1770 = vmatprep.subr.mxu0 %v7580_v40  ;;  %1841 = vmatprep.subr.mxu1 %v7583_v51  ;;  %12354 = vst [vmem:[#allocation145_spill] sm:$0xff] %v7595_v43  ;;  %v7598_v40 = vld [vmem:[#allocation4 + $0x380] sm:$0xff]  ;;  %v7601_v51 = vld [vmem:[#allocation4 + $0x390] sm:$0xff] }
 0x3d4   :  { %1771 = vmatpush1.msra.mxu0 %v7586_v53  ;;  %1842 = vmatpush1.msra.mxu1 %v7589_v41  ;;  %12355 = vst [vmem:[#allocation146_spill] sm:$0xff] %v7598_v40  ;;  %12356 = vst [vmem:[#allocation147_spill] sm:$0xff] %v7601_v51  ;;  %v7604_v53 = vld [vmem:[#allocation4 + $0x348] sm:$0xff]  ;;  %v7607_v41 = vld [vmem:[#allocation4 + $0x358] sm:$0xff] }
 0x3d5   :  { %1772 = vmatprep.subr.mxu0 %v7592_v39  ;;  %1843 = vmatprep.subr.mxu1 %v7595_v43  ;;  %12357 = vst [vmem:[#allocation148_spill] sm:$0xff] %v7604_v53  ;;  %12358 = vst [vmem:[#allocation149_spill] sm:$0xff] %v7607_v41  ;;  %v7610_v39 = vld [vmem:[#allocation4 + $0x340] sm:$0xff]  ;;  %v7613_v43 = vld [vmem:[#allocation4 + $0x350] sm:$0xff] }
 0x3d6   :  { %1773 = vmatpush1.msra.mxu0 %v7598_v40  ;;  %1844 = vmatpush1.msra.mxu1 %v7601_v51  ;;  %12359 = vst [vmem:[#allocation150_spill] sm:$0xff] %v7610_v39  ;;  %12360 = vst [vmem:[#allocation151_spill] sm:$0xff] %v7613_v43  ;;  %v7616_v40 = vld [vmem:[#allocation4 + $0x308] sm:$0xff]  ;;  %v7619_v51 = vld [vmem:[#allocation4 + $0x318] sm:$0xff] }
 0x3d7   :  { %1774 = vmatprep.subr.mxu0 %v7604_v53  ;;  %1845 = vmatprep.subr.mxu1 %v7607_v41  ;;  %12361 = vst [vmem:[#allocation152_spill] sm:$0xff] %v7616_v40  ;;  %12362 = vst [vmem:[#allocation153_spill] sm:$0xff] %v7619_v51  ;;  %v7622_v53 = vld [vmem:[#allocation4 + $0x300] sm:$0xff]  ;;  %v7625_v41 = vld [vmem:[#allocation4 + $0x310] sm:$0xff] }
 0x3d8   :  { %1775 = vmatpush1.msra.mxu0 %v7610_v39  ;;  %1846 = vmatpush1.msra.mxu1 %v7613_v43  ;;  %12363 = vst [vmem:[#allocation154_spill] sm:$0xff] %v7622_v53  ;;  %12364 = vst [vmem:[#allocation155_spill] sm:$0xff] %v7625_v41  ;;  %v7628_v39 = vld [vmem:[#allocation4 + $0x2c8] sm:$0xff]  ;;  %v7631_v43 = vld [vmem:[#allocation4 + $0x2d8] sm:$0xff] }
 0x3d9   :  { %1776 = vmatprep.subr.mxu0 %v7616_v40  ;;  %1847 = vmatprep.subr.mxu1 %v7619_v51  ;;  %12365 = vst [vmem:[#allocation156_spill] sm:$0xff] %v7628_v39  ;;  %12366 = vst [vmem:[#allocation157_spill] sm:$0xff] %v7631_v43  ;;  %v7634_v40 = vld [vmem:[#allocation4 + $0x2c0] sm:$0xff]  ;;  %v7637_v51 = vld [vmem:[#allocation4 + $0x2d0] sm:$0xff] }
 0x3da   :  { %1777 = vmatpush1.msra.mxu0 %v7622_v53  ;;  %1848 = vmatpush1.msra.mxu1 %v7625_v41  ;;  %12367 = vst [vmem:[#allocation158_spill] sm:$0xff] %v7634_v40  ;;  %12368 = vst [vmem:[#allocation159_spill] sm:$0xff] %v7637_v51  ;;  %v7640_v53 = vld [vmem:[#allocation4 + $0x288] sm:$0xff]  ;;  %v7643_v41 = vld [vmem:[#allocation4 + $0x298] sm:$0xff] }
 0x3db   :  { %1778 = vmatprep.subr.mxu0 %v7628_v39  ;;  %1849 = vmatprep.subr.mxu1 %v7631_v43  ;;  %12369 = vst [vmem:[#allocation160_spill] sm:$0xff] %v7640_v53  ;;  %12370 = vst [vmem:[#allocation161_spill] sm:$0xff] %v7643_v41  ;;  %v7646_v39 = vld [vmem:[#allocation4 + $0x280] sm:$0xff]  ;;  %v7649_v43 = vld [vmem:[#allocation4 + $0x290] sm:$0xff] }
 0x3dc   :  { %1779 = vmatpush1.msra.mxu0 %v7634_v40  ;;  %1850 = vmatpush1.msra.mxu1 %v7637_v51  ;;  %12371 = vst [vmem:[#allocation162_spill] sm:$0xff] %v7646_v39  ;;  %12372 = vst [vmem:[#allocation163_spill] sm:$0xff] %v7649_v43  ;;  %v7652_v40 = vld [vmem:[#allocation4 + $0x248] sm:$0xff]  ;;  %v7655_v51 = vld [vmem:[#allocation4 + $0x258] sm:$0xff] }
 0x3dd   :  { %1780 = vmatprep.subr.mxu0 %v7640_v53  ;;  %1851 = vmatprep.subr.mxu1 %v7643_v41  ;;  %12373 = vst [vmem:[#allocation164_spill] sm:$0xff] %v7652_v40  ;;  %12374 = vst [vmem:[#allocation165_spill] sm:$0xff] %v7655_v51  ;;  %v7658_v53 = vld [vmem:[#allocation4 + $0x240] sm:$0xff]  ;;  %v7661_v41 = vld [vmem:[#allocation4 + $0x250] sm:$0xff] }
 0x3de   :  { %1781 = vmatpush1.msra.mxu0 %v7646_v39  ;;  %1852 = vmatpush1.msra.mxu1 %v7649_v43  ;;  %12375 = vst [vmem:[#allocation166_spill] sm:$0xff] %v7658_v53  ;;  %12376 = vst [vmem:[#allocation167_spill] sm:$0xff] %v7661_v41  ;;  %v7664_v39 = vld [vmem:[#allocation4 + $0x208] sm:$0xff]  ;;  %v7667_v43 = vld [vmem:[#allocation4 + $0x218] sm:$0xff] }
 0x3df   :  { %1782 = vmatprep.subr.mxu0 %v7652_v40  ;;  %1853 = vmatprep.subr.mxu1 %v7655_v51  ;;  %12377 = vst [vmem:[#allocation168_spill] sm:$0xff] %v7664_v39  ;;  %12378 = vst [vmem:[#allocation169_spill] sm:$0xff] %v7667_v43  ;;  %v7670_v40 = vld [vmem:[#allocation4 + $0x200] sm:$0xff]  ;;  %v7673_v51 = vld [vmem:[#allocation4 + $0x210] sm:$0xff] }
 0x3e0   :  { %1783 = vmatpush1.msra.mxu0 %v7658_v53  ;;  %1854 = vmatpush1.msra.mxu1 %v7661_v41  ;;  %12379 = vst [vmem:[#allocation170_spill] sm:$0xff] %v7670_v40  ;;  %12380 = vst [vmem:[#allocation171_spill] sm:$0xff] %v7673_v51  ;;  %v7676_v53 = vld [vmem:[#allocation4 + $0x1c8] sm:$0xff]  ;;  %v7679_v41 = vld [vmem:[#allocation4 + $0x1d8] sm:$0xff] }
 0x3e1   :  { %1784 = vmatprep.subr.mxu0 %v7664_v39  ;;  %1855 = vmatprep.subr.mxu1 %v7667_v43  ;;  %12381 = vst [vmem:[#allocation172_spill] sm:$0xff] %v7676_v53  ;;  %12382 = vst [vmem:[#allocation173_spill] sm:$0xff] %v7679_v41  ;;  %v7682_v39 = vld [vmem:[#allocation4 + $0x1c0] sm:$0xff]  ;;  %v7685_v43 = vld [vmem:[#allocation4 + $0x1d0] sm:$0xff] }
 0x3e2   :  { %1785 = vmatpush1.msra.mxu0 %v7670_v40  ;;  %1856 = vmatpush1.msra.mxu1 %v7673_v51  ;;  %12383 = vst [vmem:[#allocation174_spill] sm:$0xff] %v7682_v39  ;;  %12384 = vst [vmem:[#allocation175_spill] sm:$0xff] %v7685_v43  ;;  %v7688_v40 = vld [vmem:[#allocation4 + $0x188] sm:$0xff]  ;;  %v7691_v51 = vld [vmem:[#allocation4 + $0x198] sm:$0xff] }
 0x3e3   :  { %1786 = vmatprep.subr.mxu0 %v7676_v53  ;;  %1857 = vmatprep.subr.mxu1 %v7679_v41  ;;  %12385 = vst [vmem:[#allocation176_spill] sm:$0xff] %v7688_v40  ;;  %12386 = vst [vmem:[#allocation177_spill] sm:$0xff] %v7691_v51  ;;  %v7694_v53 = vld [vmem:[#allocation4 + $0x180] sm:$0xff]  ;;  %v7697_v41 = vld [vmem:[#allocation4 + $0x190] sm:$0xff] }
 0x3e4   :  { %1787 = vmatpush1.msra.mxu0 %v7682_v39  ;;  %1858 = vmatpush1.msra.mxu1 %v7685_v43  ;;  %12387 = vst [vmem:[#allocation178_spill] sm:$0xff] %v7694_v53  ;;  %12388 = vst [vmem:[#allocation179_spill] sm:$0xff] %v7697_v41  ;;  %v7700_v39 = vld [vmem:[#allocation4 + $0x148] sm:$0xff]  ;;  %v7703_v43 = vld [vmem:[#allocation4 + $0x158] sm:$0xff] }
 0x3e5   :  { %1788 = vmatprep.subr.mxu0 %v7688_v40  ;;  %1859 = vmatprep.subr.mxu1 %v7691_v51  ;;  %12389 = vst [vmem:[#allocation180_spill] sm:$0xff] %v7700_v39  ;;  %12390 = vst [vmem:[#allocation181_spill] sm:$0xff] %v7703_v43  ;;  %v7706_v40 = vld [vmem:[#allocation4 + $0x140] sm:$0xff]  ;;  %v7709_v51 = vld [vmem:[#allocation4 + $0x150] sm:$0xff] }
 0x3e6   :  { %1789 = vmatpush1.msra.mxu0 %v7694_v53  ;;  %1860 = vmatpush1.msra.mxu1 %v7697_v41  ;;  %12391 = vst [vmem:[#allocation182_spill] sm:$0xff] %v7706_v40  ;;  %12392 = vst [vmem:[#allocation183_spill] sm:$0xff] %v7709_v51  ;;  %v7712_v53 = vld [vmem:[#allocation4 + $0x108] sm:$0xff]  ;;  %v7715_v41 = vld [vmem:[#allocation4 + $0x118] sm:$0xff] }
 0x3e7   :  { %1790 = vmatprep.subr.mxu0 %v7700_v39  ;;  %1861 = vmatprep.subr.mxu1 %v7703_v43  ;;  %12393 = vst [vmem:[#allocation184_spill] sm:$0xff] %v7712_v53  ;;  %12394 = vst [vmem:[#allocation185_spill] sm:$0xff] %v7715_v41  ;;  %v7718_v39 = vld [vmem:[#allocation4 + $0x100] sm:$0xff]  ;;  %v7721_v43 = vld [vmem:[#allocation4 + $0x110] sm:$0xff] }
 0x3e8   :  { %1791 = vmatpush1.msra.mxu0 %v7706_v40  ;;  %1862 = vmatpush1.msra.mxu1 %v7709_v51  ;;  %12395 = vst [vmem:[#allocation186_spill] sm:$0xff] %v7718_v39  ;;  %12396 = vst [vmem:[#allocation187_spill] sm:$0xff] %v7721_v43  ;;  %v7724_v40 = vld [vmem:[#allocation4 + $0xc8] sm:$0xff]  ;;  %v7727_v51 = vld [vmem:[#allocation4 + $0xd8] sm:$0xff] }
 0x3e9   :  { %1792 = vmatprep.subr.mxu0 %v7712_v53  ;;  %1863 = vmatprep.subr.mxu1 %v7715_v41  ;;  %12397 = vst [vmem:[#allocation188_spill] sm:$0xff] %v7724_v40  ;;  %12398 = vst [vmem:[#allocation189_spill] sm:$0xff] %v7727_v51  ;;  %v7730_v53 = vld [vmem:[#allocation4 + $0xc0] sm:$0xff]  ;;  %v7733_v41 = vld [vmem:[#allocation4 + $0xd0] sm:$0xff] }
 0x3ea   :  { %1793 = vmatpush1.msra.mxu0 %v7718_v39  ;;  %1864 = vmatpush1.msra.mxu1 %v7721_v43  ;;  %12399 = vst [vmem:[#allocation190_spill] sm:$0xff] %v7730_v53  ;;  %12400 = vst [vmem:[#allocation191_spill] sm:$0xff] %v7733_v41  ;;  %v7736_v39 = vld [vmem:[#allocation4 + $0x88] sm:$0xff]  ;;  %v7739_v43 = vld [vmem:[#allocation4 + $0x98] sm:$0xff] }
 0x3eb   :  { %1794 = vmatprep.subr.mxu0 %v7724_v40  ;;  %1865 = vmatprep.subr.mxu1 %v7727_v51  ;;  %12401 = vst [vmem:[#allocation192_spill] sm:$0xff] %v7736_v39  ;;  %12402 = vst [vmem:[#allocation193_spill] sm:$0xff] %v7739_v43  ;;  %v7742_v40 = vld [vmem:[#allocation4 + $0x80] sm:$0xff]  ;;  %v7745_v51 = vld [vmem:[#allocation4 + $0x90] sm:$0xff] }
 0x3ec   :  { %1795 = vmatpush1.msra.mxu0 %v7730_v53  ;;  %1866 = vmatpush1.msra.mxu1 %v7733_v41  ;;  %12403 = vst [vmem:[#allocation194_spill] sm:$0xff] %v7742_v40  ;;  %12404 = vst [vmem:[#allocation195_spill] sm:$0xff] %v7745_v51  ;;  %v7748_v53 = vld [vmem:[#allocation4 + $0x48] sm:$0xff]  ;;  %v7751_v41 = vld [vmem:[#allocation4 + $0x58] sm:$0xff] }
 0x3ed   :  { %1796 = vmatprep.subr.mxu0 %v7736_v39  ;;  %1867 = vmatprep.subr.mxu1 %v7739_v43  ;;  %12405 = vst [vmem:[#allocation196_spill] sm:$0xff] %v7748_v53  ;;  %12406 = vst [vmem:[#allocation197_spill] sm:$0xff] %v7751_v41  ;;  %v7754_v39 = vld [vmem:[#allocation4 + $0x40] sm:$0xff]  ;;  %v7757_v43 = vld [vmem:[#allocation4 + $0x50] sm:$0xff] }
 0x3ee   :  { %1797 = vmatpush1.msra.mxu0 %v7742_v40  ;;  %1868 = vmatpush1.msra.mxu1 %v7745_v51  ;;  %12407 = vst [vmem:[#allocation198_spill] sm:$0xff] %v7754_v39  ;;  %12408 = vst [vmem:[#allocation199_spill] sm:$0xff] %v7757_v43  ;;  %v7760_v40 = vld [vmem:[#allocation4 + $0x8] sm:$0xff]  ;;  %v7763_v51 = vld [vmem:[#allocation4 + $0x18] sm:$0xff] }
 0x3ef   :  { %1798 = vmatprep.subr.mxu0 %v7748_v53  ;;  %1869 = vmatprep.subr.mxu1 %v7751_v41  ;;  %12409 = vst [vmem:[#allocation200_spill] sm:$0xff] %v7760_v40  ;;  %12410 = vst [vmem:[#allocation201_spill] sm:$0xff] %v7763_v51  ;;  %v7766_v53 = vld [vmem:[#allocation4] sm:$0xff]  ;;  %v7769_v41 = vld [vmem:[#allocation4 + $0x10] sm:$0xff] }
 0x3f0   :  { %1799 = vmatpush1.msra.mxu0 %v7754_v39  ;;  %1870 = vmatpush1.msra.mxu1 %v7757_v43  ;;  %12411 = vst [vmem:[#allocation202_spill] sm:$0xff] %v7766_v53  ;;  %12412 = vst [vmem:[#allocation203_spill] sm:$0xff] %v7769_v41  ;;  %v7772_v39 = vld [vmem:[#allocation4 + $0x7c8] sm:$0xff]  ;;  %v7775_v43 = vld [vmem:[#allocation4 + $0x7d8] sm:$0xff] }
 0x3f1   :  { %1800 = vmatprep.subr.mxu0 %v7760_v40  ;;  %1871 = vmatprep.subr.mxu1 %v7763_v51  ;;  %12413 = vst [vmem:[#allocation204_spill] sm:$0xff] %v7772_v39  ;;  %12414 = vst [vmem:[#allocation205_spill] sm:$0xff] %v7775_v43  ;;  %v7778_v40 = vld [vmem:[#allocation4 + $0x7c0] sm:$0xff]  ;;  %v7781_v51 = vld [vmem:[#allocation4 + $0x7d0] sm:$0xff] }
 0x3f2   :  { %1801 = vmatpush1.msra.mxu0 %v7766_v53  ;;  %1872 = vmatpush1.msra.mxu1 %v7769_v41  ;;  %12415 = vst [vmem:[#allocation206_spill] sm:$0xff] %v7778_v40  ;;  %12416 = vst [vmem:[#allocation207_spill] sm:$0xff] %v7781_v51  ;;  %v7784_v53 = vld [vmem:[#allocation4 + $0x788] sm:$0xff]  ;;  %v7787_v41 = vld [vmem:[#allocation4 + $0x798] sm:$0xff] }
 0x3f3   :  { %1802 = vmatprep.subr.mxu0 %v7772_v39  ;;  %1873 = vmatprep.subr.mxu1 %v7775_v43  ;;  %12417 = vst [vmem:[#allocation208_spill] sm:$0xff] %v7784_v53  ;;  %12418 = vst [vmem:[#allocation209_spill] sm:$0xff] %v7787_v41  ;;  %v7790_v39 = vld [vmem:[#allocation4 + $0x780] sm:$0xff]  ;;  %v7793_v43 = vld [vmem:[#allocation4 + $0x790] sm:$0xff] }
 0x3f4   :  { %1803 = vmatpush2.msra.mxu0 %v7778_v40  ;;  %1874 = vmatpush2.msra.mxu1 %v7781_v51  ;;  %12419 = vst [vmem:[#allocation240_spill] sm:$0xff] %v7790_v39  ;;  %12420 = vst [vmem:[#allocation241_spill] sm:$0xff] %v7793_v43  ;;  %v7796_v40 = vld [vmem:[#allocation4 + $0x748] sm:$0xff]  ;;  %v7799_v51 = vld [vmem:[#allocation4 + $0x758] sm:$0xff] }
 0x3f5   :  { %1804 = vmatprep.subr.mxu0 %v7784_v53  ;;  %1875 = vmatprep.subr.mxu1 %v7787_v41  ;;  %12421 = vst [vmem:[#allocation242_spill] sm:$0xff] %v7796_v40  ;;  %12422 = vst [vmem:[#allocation243_spill] sm:$0xff] %v7799_v51  ;;  %v7802_v53 = vld [vmem:[#allocation4 + $0x740] sm:$0xff]  ;;  %v7805_v41 = vld [vmem:[#allocation4 + $0x750] sm:$0xff] }
 0x3f6   :  { %1805 = vmatpush2.msra.mxu0 %v7790_v39  ;;  %1876 = vmatpush2.msra.mxu1 %v7793_v43  ;;  %12423 = vst [vmem:[#allocation244_spill] sm:$0xff] %v7802_v53  ;;  %12424 = vst [vmem:[#allocation245_spill] sm:$0xff] %v7805_v41  ;;  %v7808_v39 = vld [vmem:[#allocation4 + $0x708] sm:$0xff]  ;;  %v7811_v43 = vld [vmem:[#allocation4 + $0x718] sm:$0xff] }
 0x3f7   :  { %1806 = vmatprep.subr.mxu0 %v7796_v40  ;;  %1877 = vmatprep.subr.mxu1 %v7799_v51  ;;  %12425 = vst [vmem:[#allocation246_spill] sm:$0xff] %v7808_v39  ;;  %12426 = vst [vmem:[#allocation247_spill] sm:$0xff] %v7811_v43  ;;  %v7814_v40 = vld [vmem:[#allocation4 + $0x700] sm:$0xff]  ;;  %v7817_v51 = vld [vmem:[#allocation4 + $0x710] sm:$0xff] }
 0x3f8   :  { %1807 = vmatpush2.msra.mxu0 %v7802_v53  ;;  %1878 = vmatpush2.msra.mxu1 %v7805_v41  ;;  %v7820_v53 = vld [vmem:[#allocation4 + $0x6c8] sm:$0xff]  ;;  %v7823_v41 = vld [vmem:[#allocation4 + $0x6d8] sm:$0xff] }
 0x3f9   :  { %1808 = vmatprep.subr.mxu0 %v7808_v39  ;;  %1879 = vmatprep.subr.mxu1 %v7811_v43  ;;  %v7826_v39 = vld [vmem:[#allocation4 + $0x6c0] sm:$0xff]  ;;  %v7829_v43 = vld [vmem:[#allocation4 + $0x6d0] sm:$0xff] }
 0x3fa   :  { %1809 = vmatpush2.msra.mxu0 %v7814_v40  ;;  %1880 = vmatpush2.msra.mxu1 %v7817_v51 }
 0x3fb   :  { %1810 = vmatprep.subr.mxu0 %v7820_v53  ;;  %1881 = vmatprep.subr.mxu1 %v7823_v41 }
 0x3fc   :  { %1811 = vmatpush2.msra.mxu0 %v7826_v39  ;;  %1882 = vmatpush2.msra.mxu1 %v7829_v43 }
 0x3fd   :  { %1812 = vmatprep.subr.mxu0 %v7038_v14  ;;  %1883 = vmatprep.subr.mxu1 %v7041_v4  ;;  %v12427_v14 = vld [vmem:[#allocation16_spill] sm:$0xff]  ;;  %v12428_v4 = vld [vmem:[#allocation17_spill] sm:$0xff] }
 0x3fe   :  { %1813 = vmatpush2.msra.mxu0 %v7044_v2  ;;  %1884 = vmatpush2.msra.mxu1 %v7047_v34  ;;  %v12429_v2 = vld [vmem:[#allocation18_spill] sm:$0xff]  ;;  %v12430_v34 = vld [vmem:[#allocation19_spill] sm:$0xff] }
 0x3ff   :  { %1814 = vmatprep.subr.mxu0 %v7050_v46  ;;  %1885 = vmatprep.subr.mxu1 %v7053_v55  ;;  %v12431_v46 = vld [vmem:[#allocation20_spill] sm:$0xff]  ;;  %v12432_v55 = vld [vmem:[#allocation21_spill] sm:$0xff] }
 0x400   :  { %1815 = vmatpush2.msra.mxu0 %v7056_v23  ;;  %1886 = vmatpush2.msra.mxu1 %v7059_v29  ;;  %v12433_v23 = vld [vmem:[#allocation22_spill] sm:$0xff]  ;;  %v12434_v29 = vld [vmem:[#allocation23_spill] sm:$0xff] }
 0x401   :  { %1816 = vmatprep.subr.mxu0 %v7062_v31  ;;  %1887 = vmatprep.subr.mxu1 %v7065_v21  ;;  %v12435_v31 = vld [vmem:[#allocation24_spill] sm:$0xff]  ;;  %v12436_v21 = vld [vmem:[#allocation25_spill] sm:$0xff] }
 0x402   :  { %1817 = vmatpush2.msra.mxu0 %v7068_v18  ;;  %1888 = vmatpush2.msra.mxu1 %v7071_v20  ;;  %v12437_v18 = vld [vmem:[#allocation10_spill] sm:$0xff] }
 0x403   :  { %1818 = vmatprep.subr.mxu0 %v7074_v22  ;;  %1889 = vmatprep.subr.mxu1 %v7077_v38  ;;  %v223_v20 = vadd.f32 %v12437_v18, %v12018_v15  ;;  %v12438_v38 = vld [vmem:[#allocation210_spill] sm:$0xff] }
 0x404   :  { %1819 = vmatpush2.msra.mxu0 %v7080_v44  ;;  %1890 = vmatpush2.msra.mxu1 %v7083_v5  ;;  %v225_v44 = vadd.f32 %v12438_v38, %v12017_v13 }
 0x405   :  { %1820 = vmatprep.subr.mxu0 %v7086_v19  ;;  %1891 = vmatprep.subr.mxu1 %v7089_v59 }
 0x406   :  { %1821 = vmatpush2.msra.mxu0 %v7092_v0  ;;  %1892 = vmatpush2.msra.mxu1 %v7095_v28 }
 0x407   :  { %1822 = vmatprep.subr.mxu0 %v7098_v37  ;;  %1893 = vmatprep.subr.mxu1 %v7101_v1  ;;  %v12439_v1 = vld [vmem:[#allocation214_spill] sm:$0xff] }
 0x408   :  { %1823 = vmatpush2.msra.mxu0 %v7104_v6  ;;  %1894 = vmatpush2.msra.mxu1 %v7107_v26  ;;  %v348_v6 = vadd.f32 %v12439_v1, %v6033_v30 }
 0x409   :  { %1824 = vmatprep.subr.mxu0 %v7110_v7  ;;  %1895 = vmatprep.subr.mxu1 %v7113_v61 }
 0x40a   :  { %1825 = vmatpush2.msra.mxu0 %v7116_v24  ;;  %1896 = vmatpush2.msra.mxu1 %v7119_v8 }
 0x40b   :  { %1826 = vmatprep.subr.mxu0 %v7122_v42  ;;  %1897 = vmatprep.subr.mxu1 %v7125_v11 }
 0x40c   :  { %1827 = vmatpush2.msra.mxu0 %v7128_v27  ;;  %1898 = vmatpush2.msra.mxu1 %v7131_v32 }
 0x40d   :  { %1828 = vmatprep.subr.mxu0 %v7134_v25  ;;  %1899 = vmatprep.subr.mxu1 %v7137_v33 }
 0x40e   :  { %1829 = vmatpush2.msra.mxu0 %v7140_v36  ;;  %1900 = vmatpush2.msra.mxu1 %v7143_v12 }
 0x40f   :  { %1830 = vmatprep.subr.mxu0 %v12427_v14  ;;  %1901 = vmatprep.subr.mxu1 %v12428_v4 }
 0x410   :  { %1831 = vmatpush2.msra.mxu0 %v12429_v2  ;;  %1902 = vmatpush2.msra.mxu1 %v12430_v34 }
 0x411   :  { %1832 = vmatprep.subr.mxu0 %v12431_v46  ;;  %1903 = vmatprep.subr.mxu1 %v12432_v55 }
 0x412   :  { %1833 = vmatpush2.msra.mxu0 %v12433_v23  ;;  %1904 = vmatpush2.msra.mxu1 %v12434_v29  ;;  %v12440_v23 = vld [vmem:[#allocation216_spill] sm:$0xff] }
 0x413   :  { %1912 = vmatprep.subr.mxu0 %v12435_v31  ;;  %1983 = vmatprep.subr.mxu1 %v12436_v21  ;;  %v350_v29 = vadd.f32 %v12440_v23, %v6029_v10  ;;  %v12461_v23 = vld [vmem:[#allocation46_spill] sm:$0xff] }
 0x451   :  { %v1492_v22 = vpop.f32.mrf.mxu0  ;;  %v1563_v37 = vpop.f32.mrf.mxu1 }
 0x452   :  { %v1742_v5 = vadd.f32 %v1492_v22, %v223_v20  ;;  %v1744_v26 = vadd.f32 %v1563_v37, %v348_v6 }
 0x453   :  { %v1494_v19 = vpop.f32.mrf.mxu0  ;;  %v1565_v4 = vpop.f32.mrf.mxu1 }
 0x454   :  { %v4188_v59 = vmul.f32 -1.442695, %v1742_v5  ;;  %v1743_v0 = vadd.f32 %v1494_v19, %v225_v44  ;;  %v1745_v21 = vadd.f32 %v1565_v4, %v350_v29  ;;  %v12456_v4 = vld [vmem:[#allocation41_spill] sm:$0xff]  ;;  %v12462_v29 = vld [vmem:[#allocation47_spill] sm:$0xff] }
 0x456   :  { %4413 = vpow2.f32 %v4188_v59  ;;  %v4189_v28 = vmul.f32 -1.442695, %v1743_v0  ;;  %v4190_v18 = vmul.f32 -1.442695, %v1745_v21  ;;  %v12464_v21 = vld [vmem:[#allocation49_spill] sm:$0xff] }
 0x458   :  { %4415 = vpow2.f32 %v4189_v28 }
 0x459   :  { %4417 = vtanh.f32 %v1744_v26 }
 0x463   :  { %v4414_v7 = vpop.eup %4413 }
 0x464   :  { %v1749_v61 = vadd.f32 1.0, %v4414_v7 }
 0x465   :  { %v4416_v24 = vpop.eup %4415 }
 0x466   :  { %4419 = vrcp.f32 %v1749_v61  ;;  %v1755_v8 = vadd.f32 1.0, %v4416_v24  ;;  %v4418_v42 = vpop.eup %4417 }
 0x468   :  { %4421 = vrcp.f32 %v1755_v8 }
 0x473   :  { %v4420_v11 = vpop.eup %4419 }
 0x474   :  { %v1766_v27 = vmul.f32 %v4420_v11, %v4418_v42 }
 0x475   :  { %v4422_v32 = vpop.eup %4421 }
 0x476   :  { %v1765_v25 = vmul.f32 %v4422_v32, %v7183_v50 }
 0x478   :  { %v7885_v33 = vadd.f32 %v1766_v27, %v1765_v25 }
 0x492   :  { %v1634_v36 = vpop.f32.mrf.mxu0  ;;  %v1705_v46 = vpop.f32.mrf.mxu1 }
 0x493   :  { %v1710_v12 = vadd.f32 %v1634_v36, %v6795_v3  ;;  %v1712_v38 = vadd.f32 %v1705_v46, %v6812_v35  ;;  %v12453_v36 = vld [vmem:[#allocation38_spill] sm:$0xff]  ;;  %v12459_v46 = vld [vmem:[#allocation44_spill] sm:$0xff] }
 0x494   :  { %v1636_v14 = vpop.f32.mrf.mxu0  ;;  %v1707_v31 = vpop.f32.mrf.mxu1 }
 0x495   :  { %v4185_v2 = vmul.f32 -1.442695, %v1710_v12  ;;  %v1711_v34 = vadd.f32 %v1636_v14, %v6799_v9  ;;  %v1713_v50 = vadd.f32 %v1707_v31, %v6805_v63  ;;  %v12454_v12 = vld [vmem:[#allocation39_spill] sm:$0xff]  ;;  %v12455_v14 = vld [vmem:[#allocation40_spill] sm:$0xff] }
 0x496   :  { %v12463_v31 = vld [vmem:[#allocation48_spill] sm:$0xff] }
 0x497   :  { %4423 = vpow2.f32 %v4185_v2  ;;  %v4186_v55 = vmul.f32 -1.442695, %v1711_v34  ;;  %v4187_v20 = vmul.f32 -1.442695, %v1713_v50  ;;  %v12457_v2 = vld [vmem:[#allocation42_spill] sm:$0xff]  ;;  %v12458_v34 = vld [vmem:[#allocation43_spill] sm:$0xff] }
 0x498   :  { %v12465_v50 = vld [vmem:[#allocation50_spill] sm:$0xff] }
 0x499   :  { %4425 = vpow2.f32 %v4186_v55  ;;  %v12460_v55 = vld [vmem:[#allocation45_spill] sm:$0xff] }
 0x49a   :  { %4427 = vpow2.f32 %v4190_v18  ;;  %v12466_v18 = vld [vmem:[#allocation51_spill] sm:$0xff] }
 0x49b   :  { %4429 = vpow2.f32 %v4187_v20  ;;  %v12467_v20 = vld [vmem:[#allocation52_spill] sm:$0xff] }
 0x4a4   :  { %v4424_v22 = vpop.eup %4423 }
 0x4a5   :  { %v1717_v44 = vadd.f32 1.0, %v4424_v22  ;;  %v12468_v22 = vld [vmem:[#allocation53_spill] sm:$0xff] }
 0x4a6   :  { %v4426_v5 = vpop.eup %4425 }
 0x4a7   :  { %4431 = vrcp.f32 %v1717_v44  ;;  %v1723_v19 = vadd.f32 1.0, %v4426_v5  ;;  %v4428_v59 = vpop.eup %4427  ;;  %v12470_v44 = vld [vmem:[#allocation55_spill] sm:$0xff]  ;;  %v12471_v5 = vld [vmem:[#allocation56_spill] sm:$0xff] }
 0x4a8   :  { %4433 = vtanh.f32 %v1712_v38  ;;  %v4430_v0 = vpop.eup %4429  ;;  %v1762_v61 = vadd.f32 1.0, %v4428_v59  ;;  %v12469_v38 = vld [vmem:[#allocation54_spill] sm:$0xff] }
 0x4a9   :  { %4435 = vrcp.f32 %v1723_v19  ;;  %v1730_v6 = vadd.f32 1.0, %v4430_v0  ;;  %v12472_v19 = vld [vmem:[#allocation57_spill] sm:$0xff]  ;;  %v12473_v59 = vld [vmem:[#allocation58_spill] sm:$0xff]  ;;  %v12474_v0 = vld [vmem:[#allocation59_spill] sm:$0xff] }
 0x4aa   :  { %4437 = vtanh.f32 %v7885_v33 }
 0x4ab   :  { %4439 = vrcp.f32 %v1730_v6  ;;  %v12478_v6 = vld [vmem:[#allocation63_spill] sm:$0xff] }
 0x4b4   :  { %v4432_v28 = vpop.eup %4431 }
 0x4b5   :  { %v4434_v37 = vpop.eup %4433 }
 0x4b6   :  { %v4436_v1 = vpop.eup %4435  ;;  %v1734_v26 = vmul.f32 %v4434_v37, %v4432_v28  ;;  %v12475_v28 = vld [vmem:[#allocation60_spill] sm:$0xff]  ;;  %v12476_v37 = vld [vmem:[#allocation61_spill] sm:$0xff] }
 0x4b7   :  { %v1733_v7 = vmul.f32 %v4436_v1, %v7192_v16  ;;  %v4438_v8 = vpop.eup %4437  ;;  %v12441_v16 = vld [vmem:[#allocation26_spill] sm:$0xff] }
 0x4b8   :  { %v4440_v42 = vpop.eup %4439  ;;  %v12477_v1 = vld [vmem:[#allocation62_spill] sm:$0xff] }
 0x4b9   :  { %v7894_v24 = vadd.f32 %v1734_v26, %v1733_v7  ;;  %v12479_v26 = vld [vmem:[#allocation64_spill] sm:$0xff]  ;;  %v12480_v7 = vld [vmem:[#allocation65_spill] sm:$0xff] }
 0x4bb   :  { %4441 = vtanh.f32 %v7894_v24 }
 0x4bc   :  { %4443 = vrcp.f32 %v1762_v61  ;;  %v12481_v61 = vld [vmem:[#allocation66_spill] sm:$0xff] }
 0x4c8   :  { %v4442_v11 = vpop.eup %4441 }
 0x4c9   :  { %v4444_v27 = vpop.eup %4443  ;;  %v1737_v32 = vmul.f32 %v4442_v11, %v4440_v42  ;;  %v12483_v42 = vld [vmem:[#allocation68_spill] sm:$0xff]  ;;  %v12484_v11 = vld [vmem:[#allocation69_spill] sm:$0xff] }
 0x4ca   :  { %v7898_v25 = vmul.f32 %v4444_v27, %v4438_v8  ;;  %v12482_v8 = vld [vmem:[#allocation67_spill] sm:$0xff]  ;;  %v12485_v27 = vld [vmem:[#allocation70_spill] sm:$0xff] }
 0x4cb   :  { %1834 = vmatprep.mubr.f32.mxu0 %v1737_v32  ;;  %1905 = vmatprep.mubr.f32.mxu1 %v1737_v32 }
 0x4cc   :  { %1835 = vmatmul.mubr.f32.vlgmr.msra.gmra.mxu0 %v7898_v25  ;;  %1906 = vmatmul.mubr.f32.vlgmr.msra.gmra.mxu1 %v7898_v25 }
 0x4cd   :  { %1913 = vmatpush1.msra.mxu0 %v7200_v17  ;;  %1984 = vmatpush1.msra.mxu1 %v7203_v52  ;;  %v12442_v17 = vld [vmem:[#allocation27_spill] sm:$0xff]  ;;  %v12443_v52 = vld [vmem:[#allocation28_spill] sm:$0xff] }
 0x4ce   :  { %1914 = vmatprep.subr.mxu0 %v7206_v56  ;;  %1976 = vmatprep.mubr.f32.mxu0 %v1737_v32  ;;  %v12444_v56 = vld [vmem:[#allocation29_spill] sm:$0xff] }
 0x4cf   :  { %1985 = vmatprep.subr.mxu1 %v7209_v47  ;;  %2047 = vmatprep.mubr.f32.mxu1 %v1737_v32  ;;  %v12445_v47 = vld [vmem:[#allocation30_spill] sm:$0xff]  ;;  %v12486_v32 = vld [vmem:[#allocation71_spill] sm:$0xff] }
 0x4d0   :  { %1915 = vmatpush1.msra.mxu0 %v7212_v58  ;;  %1986 = vmatpush1.msra.mxu1 %v7215_v49  ;;  %v12446_v58 = vld [vmem:[#allocation31_spill] sm:$0xff]  ;;  %v12447_v49 = vld [vmem:[#allocation32_spill] sm:$0xff] }
 0x4d1   :  { %1916 = vmatprep.subr.mxu0 %v7218_v45  ;;  %1987 = vmatprep.subr.mxu1 %v7221_v48  ;;  %v12448_v45 = vld [vmem:[#allocation33_spill] sm:$0xff]  ;;  %v12449_v48 = vld [vmem:[#allocation34_spill] sm:$0xff] }
 0x4d2   :  { %1917 = vmatpush1.msra.mxu0 %v7224_v57  ;;  %1988 = vmatpush1.msra.mxu1 %v7227_v60  ;;  %v12450_v57 = vld [vmem:[#allocation35_spill] sm:$0xff]  ;;  %v12451_v60 = vld [vmem:[#allocation36_spill] sm:$0xff] }
 0x4d3   :  { %1918 = vmatprep.subr.mxu0 %v7230_v62  ;;  %1989 = vmatprep.subr.mxu1 %v12441_v16  ;;  %v12452_v62 = vld [vmem:[#allocation37_spill] sm:$0xff]  ;;  %v12487_v16 = vld [vmem:[#allocation72_spill] sm:$0xff] }
 0x4d4   :  { %1919 = vmatpush1.msra.mxu0 %v12442_v17  ;;  %1990 = vmatpush1.msra.mxu1 %v12443_v52  ;;  %v12488_v17 = vld [vmem:[#allocation73_spill] sm:$0xff]  ;;  %v12489_v52 = vld [vmem:[#allocation74_spill] sm:$0xff] }
 0x4d5   :  { %1920 = vmatprep.subr.mxu0 %v12444_v56  ;;  %1991 = vmatprep.subr.mxu1 %v12445_v47  ;;  %v12490_v56 = vld [vmem:[#allocation75_spill] sm:$0xff]  ;;  %v12491_v47 = vld [vmem:[#allocation76_spill] sm:$0xff] }
 0x4d6   :  { %1921 = vmatpush1.msra.mxu0 %v12446_v58  ;;  %1992 = vmatpush1.msra.mxu1 %v12447_v49  ;;  %v12492_v58 = vld [vmem:[#allocation77_spill] sm:$0xff]  ;;  %v12493_v49 = vld [vmem:[#allocation78_spill] sm:$0xff] }
 0x4d7   :  { %1922 = vmatprep.subr.mxu0 %v12448_v45  ;;  %1993 = vmatprep.subr.mxu1 %v12449_v48  ;;  %v12494_v45 = vld [vmem:[#allocation79_spill] sm:$0xff]  ;;  %v12495_v48 = vld [vmem:[#allocation80_spill] sm:$0xff] }
 0x4d8   :  { %1923 = vmatpush1.msra.mxu0 %v12450_v57  ;;  %1994 = vmatpush1.msra.mxu1 %v12451_v60  ;;  %v12496_v57 = vld [vmem:[#allocation81_spill] sm:$0xff]  ;;  %v12497_v60 = vld [vmem:[#allocation82_spill] sm:$0xff] }
 0x4d9   :  { %1924 = vmatprep.subr.mxu0 %v12452_v62  ;;  %1995 = vmatprep.subr.mxu1 %v12453_v36  ;;  %v12498_v62 = vld [vmem:[#allocation83_spill] sm:$0xff]  ;;  %v12499_v36 = vld [vmem:[#allocation84_spill] sm:$0xff] }
 0x4da   :  { %1925 = vmatpush1.msra.mxu0 %v12454_v12  ;;  %1996 = vmatpush1.msra.mxu1 %v12455_v14  ;;  %v12500_v12 = vld [vmem:[#allocation85_spill] sm:$0xff]  ;;  %v12501_v14 = vld [vmem:[#allocation86_spill] sm:$0xff] }
 0x4db   :  { %1926 = vmatprep.subr.mxu0 %v12456_v4  ;;  %1997 = vmatprep.subr.mxu1 %v12457_v2  ;;  %v12502_v4 = vld [vmem:[#allocation87_spill] sm:$0xff]  ;;  %v12503_v2 = vld [vmem:[#allocation88_spill] sm:$0xff] }
 0x4dc   :  { %1927 = vmatpush1.msra.mxu0 %v12458_v34  ;;  %1998 = vmatpush1.msra.mxu1 %v12459_v46  ;;  %v12504_v34 = vld [vmem:[#allocation89_spill] sm:$0xff]  ;;  %v12505_v46 = vld [vmem:[#allocation90_spill] sm:$0xff] }
 0x4dd   :  { %1928 = vmatprep.subr.mxu0 %v12460_v55  ;;  %1999 = vmatprep.subr.mxu1 %v12461_v23  ;;  %v12506_v55 = vld [vmem:[#allocation91_spill] sm:$0xff]  ;;  %v12507_v23 = vld [vmem:[#allocation92_spill] sm:$0xff] }
 0x4de   :  { %1929 = vmatpush1.msra.mxu0 %v12462_v29  ;;  %2000 = vmatpush1.msra.mxu1 %v12463_v31  ;;  %v12508_v29 = vld [vmem:[#allocation93_spill] sm:$0xff]  ;;  %v12509_v31 = vld [vmem:[#allocation94_spill] sm:$0xff] }
 0x4df   :  { %1930 = vmatprep.subr.mxu0 %v12464_v21  ;;  %2001 = vmatprep.subr.mxu1 %v12465_v50  ;;  %v12510_v21 = vld [vmem:[#allocation95_spill] sm:$0xff]  ;;  %v12511_v50 = vld [vmem:[#allocation96_spill] sm:$0xff] }
 0x4e0   :  { %1931 = vmatpush1.msra.mxu0 %v12466_v18  ;;  %2002 = vmatpush1.msra.mxu1 %v12467_v20  ;;  %v12512_v18 = vld [vmem:[#allocation97_spill] sm:$0xff]  ;;  %v12513_v20 = vld [vmem:[#allocation98_spill] sm:$0xff] }
 0x4e1   :  { %1932 = vmatprep.subr.mxu0 %v12468_v22  ;;  %2003 = vmatprep.subr.mxu1 %v12469_v38  ;;  %v12514_v22 = vld [vmem:[#allocation99_spill] sm:$0xff]  ;;  %v12515_v38 = vld [vmem:[#allocation100_spill] sm:$0xff] }
 0x4e2   :  { %1933 = vmatpush1.msra.mxu0 %v12470_v44  ;;  %2004 = vmatpush1.msra.mxu1 %v12471_v5  ;;  %v12516_v44 = vld [vmem:[#allocation101_spill] sm:$0xff]  ;;  %v12517_v5 = vld [vmem:[#allocation102_spill] sm:$0xff] }
 0x4e3   :  { %1934 = vmatprep.subr.mxu0 %v12472_v19  ;;  %2005 = vmatprep.subr.mxu1 %v12473_v59  ;;  %v12518_v19 = vld [vmem:[#allocation103_spill] sm:$0xff]  ;;  %v12519_v59 = vld [vmem:[#allocation104_spill] sm:$0xff] }
 0x4e4   :  { %1935 = vmatpush1.msra.mxu0 %v12474_v0  ;;  %2006 = vmatpush1.msra.mxu1 %v12475_v28  ;;  %v12520_v0 = vld [vmem:[#allocation105_spill] sm:$0xff]  ;;  %v12521_v28 = vld [vmem:[#allocation106_spill] sm:$0xff] }
 0x4e5   :  { %1936 = vmatprep.subr.mxu0 %v12476_v37  ;;  %2007 = vmatprep.subr.mxu1 %v12477_v1  ;;  %v12522_v37 = vld [vmem:[#allocation107_spill] sm:$0xff]  ;;  %v12523_v1 = vld [vmem:[#allocation108_spill] sm:$0xff] }
 0x4e6   :  { %1937 = vmatpush1.msra.mxu0 %v12478_v6  ;;  %2008 = vmatpush1.msra.mxu1 %v12479_v26  ;;  %v12524_v6 = vld [vmem:[#allocation109_spill] sm:$0xff]  ;;  %v12525_v26 = vld [vmem:[#allocation110_spill] sm:$0xff] }
 0x4e7   :  { %1938 = vmatprep.subr.mxu0 %v12480_v7  ;;  %2009 = vmatprep.subr.mxu1 %v12481_v61  ;;  %v12526_v7 = vld [vmem:[#allocation111_spill] sm:$0xff]  ;;  %v12527_v61 = vld [vmem:[#allocation112_spill] sm:$0xff] }
 0x4e8   :  { %1939 = vmatpush1.msra.mxu0 %v12482_v8  ;;  %2010 = vmatpush1.msra.mxu1 %v12483_v42  ;;  %v12528_v8 = vld [vmem:[#allocation113_spill] sm:$0xff]  ;;  %v12529_v42 = vld [vmem:[#allocation114_spill] sm:$0xff] }
 0x4e9   :  { %1940 = vmatprep.subr.mxu0 %v12484_v11  ;;  %2011 = vmatprep.subr.mxu1 %v12485_v27  ;;  %v12530_v11 = vld [vmem:[#allocation115_spill] sm:$0xff]  ;;  %v12531_v27 = vld [vmem:[#allocation116_spill] sm:$0xff] }
 0x4ea   :  { %1941 = vmatpush1.msra.mxu0 %v12486_v32  ;;  %2012 = vmatpush1.msra.mxu1 %v12487_v16  ;;  %v12532_v32 = vld [vmem:[#allocation117_spill] sm:$0xff]  ;;  %v12533_v16 = vld [vmem:[#allocation118_spill] sm:$0xff] }
 0x4eb   :  { %1942 = vmatprep.subr.mxu0 %v12488_v17  ;;  %2013 = vmatprep.subr.mxu1 %v12489_v52  ;;  %v12534_v17 = vld [vmem:[#allocation119_spill] sm:$0xff]  ;;  %v12535_v52 = vld [vmem:[#allocation120_spill] sm:$0xff] }
 0x4ec   :  { %1943 = vmatpush1.msra.mxu0 %v12490_v56  ;;  %2014 = vmatpush1.msra.mxu1 %v12491_v47  ;;  %v12536_v56 = vld [vmem:[#allocation121_spill] sm:$0xff]  ;;  %v12537_v47 = vld [vmem:[#allocation122_spill] sm:$0xff] }
 0x4ed   :  { %1944 = vmatprep.subr.mxu0 %v12492_v58  ;;  %2015 = vmatprep.subr.mxu1 %v12493_v49  ;;  %v12538_v58 = vld [vmem:[#allocation123_spill] sm:$0xff]  ;;  %v12539_v49 = vld [vmem:[#allocation124_spill] sm:$0xff] }
 0x4ee   :  { %1945 = vmatpush2.msra.mxu0 %v12494_v45  ;;  %2016 = vmatpush2.msra.mxu1 %v12495_v48  ;;  %v12540_v45 = vld [vmem:[#allocation125_spill] sm:$0xff]  ;;  %v12541_v48 = vld [vmem:[#allocation126_spill] sm:$0xff] }
 0x4ef   :  { %1946 = vmatprep.subr.mxu0 %v12496_v57  ;;  %2017 = vmatprep.subr.mxu1 %v12497_v60  ;;  %v12542_v57 = vld [vmem:[#allocation127_spill] sm:$0xff]  ;;  %v12543_v60 = vld [vmem:[#allocation128_spill] sm:$0xff] }
 0x4f0   :  { %1947 = vmatpush2.msra.mxu0 %v12498_v62  ;;  %2018 = vmatpush2.msra.mxu1 %v12499_v36  ;;  %v12544_v62 = vld [vmem:[#allocation129_spill] sm:$0xff]  ;;  %v12545_v36 = vld [vmem:[#allocation130_spill] sm:$0xff] }
 0x4f1   :  { %1948 = vmatprep.subr.mxu0 %v12500_v12  ;;  %2019 = vmatprep.subr.mxu1 %v12501_v14  ;;  %v12546_v12 = vld [vmem:[#allocation131_spill] sm:$0xff]  ;;  %v12547_v14 = vld [vmem:[#allocation132_spill] sm:$0xff] }
 0x4f2   :  { %1949 = vmatpush2.msra.mxu0 %v12502_v4  ;;  %2020 = vmatpush2.msra.mxu1 %v12503_v2  ;;  %v12548_v4 = vld [vmem:[#allocation133_spill] sm:$0xff]  ;;  %v12549_v2 = vld [vmem:[#allocation134_spill] sm:$0xff] }
 0x4f3   :  { %1950 = vmatprep.subr.mxu0 %v12504_v34  ;;  %2021 = vmatprep.subr.mxu1 %v12505_v46  ;;  %v12550_v34 = vld [vmem:[#allocation135_spill] sm:$0xff]  ;;  %v12551_v46 = vld [vmem:[#allocation136_spill] sm:$0xff] }
 0x4f4   :  { %1951 = vmatpush2.msra.mxu0 %v12506_v55  ;;  %2022 = vmatpush2.msra.mxu1 %v12507_v23  ;;  %v12552_v55 = vld [vmem:[#allocation137_spill] sm:$0xff]  ;;  %v12553_v23 = vld [vmem:[#allocation138_spill] sm:$0xff] }
 0x4f5   :  { %1952 = vmatprep.subr.mxu0 %v12508_v29  ;;  %2023 = vmatprep.subr.mxu1 %v12509_v31  ;;  %v12554_v29 = vld [vmem:[#allocation139_spill] sm:$0xff]  ;;  %v12555_v31 = vld [vmem:[#allocation140_spill] sm:$0xff] }
 0x4f6   :  { %1953 = vmatpush2.msra.mxu0 %v12510_v21  ;;  %2024 = vmatpush2.msra.mxu1 %v12511_v50  ;;  %v12556_v21 = vld [vmem:[#allocation141_spill] sm:$0xff]  ;;  %v12557_v50 = vld [vmem:[#allocation142_spill] sm:$0xff] }
 0x4f7   :  { %1954 = vmatprep.subr.mxu0 %v12512_v18  ;;  %2025 = vmatprep.subr.mxu1 %v12513_v20  ;;  %v12559_v18 = vld [vmem:[#allocation144_spill] sm:$0xff]  ;;  %v12560_v20 = vld [vmem:[#allocation145_spill] sm:$0xff] }
 0x4f8   :  { %1955 = vmatpush2.msra.mxu0 %v12514_v22  ;;  %2026 = vmatpush2.msra.mxu1 %v12515_v38  ;;  %v12561_v22 = vld [vmem:[#allocation146_spill] sm:$0xff]  ;;  %v12562_v38 = vld [vmem:[#allocation147_spill] sm:$0xff] }
 0x4f9   :  { %1956 = vmatprep.subr.mxu0 %v12516_v44  ;;  %2027 = vmatprep.subr.mxu1 %v12517_v5  ;;  %v12563_v44 = vld [vmem:[#allocation148_spill] sm:$0xff]  ;;  %v12564_v5 = vld [vmem:[#allocation149_spill] sm:$0xff] }
 0x4fa   :  { %1957 = vmatpush2.msra.mxu0 %v12518_v19  ;;  %2028 = vmatpush2.msra.mxu1 %v12519_v59  ;;  %v12566_v19 = vld [vmem:[#allocation151_spill] sm:$0xff]  ;;  %v12567_v59 = vld [vmem:[#allocation152_spill] sm:$0xff] }
 0x4fb   :  { %1958 = vmatprep.subr.mxu0 %v12520_v0  ;;  %2029 = vmatprep.subr.mxu1 %v12521_v28  ;;  %v12568_v0 = vld [vmem:[#allocation153_spill] sm:$0xff]  ;;  %v12569_v28 = vld [vmem:[#allocation154_spill] sm:$0xff] }
 0x4fc   :  { %1959 = vmatpush2.msra.mxu0 %v12522_v37  ;;  %2030 = vmatpush2.msra.mxu1 %v12523_v1  ;;  %v12570_v37 = vld [vmem:[#allocation155_spill] sm:$0xff]  ;;  %v12571_v1 = vld [vmem:[#allocation156_spill] sm:$0xff] }
 0x4fd   :  { %1960 = vmatprep.subr.mxu0 %v12524_v6  ;;  %2031 = vmatprep.subr.mxu1 %v12525_v26  ;;  %v12572_v6 = vld [vmem:[#allocation157_spill] sm:$0xff]  ;;  %v12573_v26 = vld [vmem:[#allocation158_spill] sm:$0xff] }
 0x4fe   :  { %1961 = vmatpush2.msra.mxu0 %v12526_v7  ;;  %2032 = vmatpush2.msra.mxu1 %v12527_v61  ;;  %v12574_v7 = vld [vmem:[#allocation159_spill] sm:$0xff]  ;;  %v12575_v61 = vld [vmem:[#allocation160_spill] sm:$0xff] }
 0x4ff   :  { %1962 = vmatprep.subr.mxu0 %v12528_v8  ;;  %2033 = vmatprep.subr.mxu1 %v12529_v42  ;;  %v12576_v8 = vld [vmem:[#allocation161_spill] sm:$0xff]  ;;  %v12577_v42 = vld [vmem:[#allocation162_spill] sm:$0xff] }
 0x500   :  { %1963 = vmatpush2.msra.mxu0 %v12530_v11  ;;  %2034 = vmatpush2.msra.mxu1 %v12531_v27  ;;  %v12578_v11 = vld [vmem:[#allocation163_spill] sm:$0xff]  ;;  %v12579_v27 = vld [vmem:[#allocation164_spill] sm:$0xff] }
 0x501   :  { %1964 = vmatprep.subr.mxu0 %v12532_v32  ;;  %2035 = vmatprep.subr.mxu1 %v12533_v16  ;;  %v12580_v32 = vld [vmem:[#allocation165_spill] sm:$0xff]  ;;  %v12581_v16 = vld [vmem:[#allocation166_spill] sm:$0xff] }
 0x502   :  { %1965 = vmatpush2.msra.mxu0 %v12534_v17  ;;  %2036 = vmatpush2.msra.mxu1 %v12535_v52  ;;  %v12582_v17 = vld [vmem:[#allocation167_spill] sm:$0xff]  ;;  %v12583_v52 = vld [vmem:[#allocation168_spill] sm:$0xff] }
 0x503   :  { %1966 = vmatprep.subr.mxu0 %v12536_v56  ;;  %2037 = vmatprep.subr.mxu1 %v12537_v47  ;;  %v12584_v56 = vld [vmem:[#allocation169_spill] sm:$0xff]  ;;  %v12585_v47 = vld [vmem:[#allocation170_spill] sm:$0xff] }
 0x504   :  { %1967 = vmatpush2.msra.mxu0 %v12538_v58  ;;  %2038 = vmatpush2.msra.mxu1 %v12539_v49  ;;  %v12586_v58 = vld [vmem:[#allocation171_spill] sm:$0xff]  ;;  %v12587_v49 = vld [vmem:[#allocation172_spill] sm:$0xff] }
 0x505   :  { %1968 = vmatprep.subr.mxu0 %v12540_v45  ;;  %2039 = vmatprep.subr.mxu1 %v12541_v48  ;;  %v12588_v45 = vld [vmem:[#allocation173_spill] sm:$0xff]  ;;  %v12589_v48 = vld [vmem:[#allocation174_spill] sm:$0xff] }
 0x506   :  { %1969 = vmatpush2.msra.mxu0 %v12542_v57  ;;  %2040 = vmatpush2.msra.mxu1 %v12543_v60  ;;  %v12590_v57 = vld [vmem:[#allocation175_spill] sm:$0xff]  ;;  %v12591_v60 = vld [vmem:[#allocation176_spill] sm:$0xff] }
 0x507   :  { %1970 = vmatprep.subr.mxu0 %v12544_v62  ;;  %2041 = vmatprep.subr.mxu1 %v12545_v36  ;;  %v12592_v62 = vld [vmem:[#allocation177_spill] sm:$0xff]  ;;  %v12593_v36 = vld [vmem:[#allocation178_spill] sm:$0xff] }
 0x508   :  { %1971 = vmatpush2.msra.mxu0 %v12546_v12  ;;  %2042 = vmatpush2.msra.mxu1 %v12547_v14  ;;  %v12594_v12 = vld [vmem:[#allocation179_spill] sm:$0xff]  ;;  %v12595_v14 = vld [vmem:[#allocation180_spill] sm:$0xff] }
 0x509   :  { %1972 = vmatprep.subr.mxu0 %v12548_v4  ;;  %2043 = vmatprep.subr.mxu1 %v12549_v2  ;;  %v12596_v4 = vld [vmem:[#allocation181_spill] sm:$0xff]  ;;  %v12597_v2 = vld [vmem:[#allocation182_spill] sm:$0xff] }
 0x50a   :  { %1973 = vmatpush2.msra.mxu0 %v7560_v54  ;;  %2044 = vmatpush2.msra.mxu1 %v12550_v34  ;;  %v12558_v54 = vld [vmem:[#allocation143_spill] sm:$0xff] }
 0x50b   :  { %1974 = vmatprep.subr.mxu0 %v12551_v46  ;;  %2045 = vmatprep.subr.mxu1 %v12552_v55  ;;  %v12598_v34 = vld [vmem:[#allocation183_spill] sm:$0xff]  ;;  %v12599_v46 = vld [vmem:[#allocation184_spill] sm:$0xff]  ;;  %v12600_v55 = vld [vmem:[#allocation185_spill] sm:$0xff] }
 0x50c   :  { %1975 = vmatpush2.msra.mxu0 %v12553_v23  ;;  %2046 = vmatpush2.msra.mxu1 %v12554_v29  ;;  %v12601_v23 = vld [vmem:[#allocation186_spill] sm:$0xff]  ;;  %v12602_v29 = vld [vmem:[#allocation187_spill] sm:$0xff] }
 0x50d   :  { %1977 = vmatmul.mubr.f32.vlgmr.msra.gmra.mxu0 %v7898_v25  ;;  %2048 = vmatmul.mubr.f32.vlgmr.msra.gmra.mxu1 %v7898_v25  ;;  %v12565_v25 = vld [vmem:[#allocation150_spill] sm:$0xff] }
 0x50e   :  { %2114 = vmatprep.subr.mxu0 %v12555_v31  ;;  %2185 = vmatprep.subr.mxu1 %v12556_v21  ;;  %v12603_v31 = vld [vmem:[#allocation188_spill] sm:$0xff]  ;;  %v12604_v21 = vld [vmem:[#allocation189_spill] sm:$0xff] }
 0x50f   :  { %2115 = vmatpush1.msra.mxu0 %v12557_v50  ;;  %2186 = vmatpush1.msra.mxu1 %v12558_v54  ;;  %v12605_v50 = vld [vmem:[#allocation190_spill] sm:$0xff]  ;;  %v12606_v54 = vld [vmem:[#allocation191_spill] sm:$0xff] }
 0x510   :  { %2116 = vmatprep.subr.mxu0 %v12559_v18  ;;  %2187 = vmatprep.subr.mxu1 %v12560_v20  ;;  %v12607_v18 = vld [vmem:[#allocation192_spill] sm:$0xff]  ;;  %v12608_v20 = vld [vmem:[#allocation193_spill] sm:$0xff] }
 0x511   :  { %2117 = vmatpush1.msra.mxu0 %v12561_v22  ;;  %2188 = vmatpush1.msra.mxu1 %v12562_v38  ;;  %v12609_v22 = vld [vmem:[#allocation194_spill] sm:$0xff]  ;;  %v12610_v38 = vld [vmem:[#allocation195_spill] sm:$0xff] }
 0x512   :  { %2118 = vmatprep.subr.mxu0 %v12563_v44  ;;  %2189 = vmatprep.subr.mxu1 %v12564_v5  ;;  %v12611_v44 = vld [vmem:[#allocation196_spill] sm:$0xff]  ;;  %v12612_v5 = vld [vmem:[#allocation197_spill] sm:$0xff] }
 0x513   :  { %2119 = vmatpush1.msra.mxu0 %v12565_v25  ;;  %2190 = vmatpush1.msra.mxu1 %v12566_v19  ;;  %v12613_v25 = vld [vmem:[#allocation198_spill] sm:$0xff]  ;;  %v12614_v19 = vld [vmem:[#allocation199_spill] sm:$0xff] }
 0x514   :  { %2120 = vmatprep.subr.mxu0 %v12567_v59  ;;  %2191 = vmatprep.subr.mxu1 %v12568_v0  ;;  %v12615_v59 = vld [vmem:[#allocation200_spill] sm:$0xff]  ;;  %v12616_v0 = vld [vmem:[#allocation201_spill] sm:$0xff] }
 0x515   :  { %2121 = vmatpush1.msra.mxu0 %v12569_v28  ;;  %2192 = vmatpush1.msra.mxu1 %v12570_v37  ;;  %v12617_v28 = vld [vmem:[#allocation202_spill] sm:$0xff]  ;;  %v12618_v37 = vld [vmem:[#allocation203_spill] sm:$0xff] }
 0x516   :  { %2122 = vmatprep.subr.mxu0 %v12571_v1  ;;  %2193 = vmatprep.subr.mxu1 %v12572_v6  ;;  %v12619_v1 = vld [vmem:[#allocation204_spill] sm:$0xff]  ;;  %v12620_v6 = vld [vmem:[#allocation205_spill] sm:$0xff] }
 0x517   :  { %2123 = vmatpush1.msra.mxu0 %v12573_v26  ;;  %2194 = vmatpush1.msra.mxu1 %v12574_v7  ;;  %v12621_v26 = vld [vmem:[#allocation206_spill] sm:$0xff]  ;;  %v12622_v7 = vld [vmem:[#allocation207_spill] sm:$0xff] }
 0x518   :  { %2124 = vmatprep.subr.mxu0 %v12575_v61  ;;  %2195 = vmatprep.subr.mxu1 %v12576_v8  ;;  %v12623_v61 = vld [vmem:[#allocation208_spill] sm:$0xff]  ;;  %v12624_v8 = vld [vmem:[#allocation209_spill] sm:$0xff] }
 0x519   :  { %2125 = vmatpush1.msra.mxu0 %v12577_v42  ;;  %2196 = vmatpush1.msra.mxu1 %v12578_v11  ;;  %v12625_v42 = vld [vmem:[#allocation240_spill] sm:$0xff]  ;;  %v12626_v11 = vld [vmem:[#allocation241_spill] sm:$0xff] }
 0x51a   :  { %2126 = vmatprep.subr.mxu0 %v12579_v27  ;;  %2197 = vmatprep.subr.mxu1 %v12580_v32  ;;  %v12627_v27 = vld [vmem:[#allocation242_spill] sm:$0xff]  ;;  %v12628_v32 = vld [vmem:[#allocation243_spill] sm:$0xff] }
 0x51b   :  { %2127 = vmatpush1.msra.mxu0 %v12581_v16  ;;  %2198 = vmatpush1.msra.mxu1 %v12582_v17  ;;  %v12629_v16 = vld [vmem:[#allocation244_spill] sm:$0xff]  ;;  %v12630_v17 = vld [vmem:[#allocation245_spill] sm:$0xff] }
 0x51c   :  { %2128 = vmatprep.subr.mxu0 %v12583_v52  ;;  %2199 = vmatprep.subr.mxu1 %v12584_v56  ;;  %v12631_v52 = vld [vmem:[#allocation246_spill] sm:$0xff]  ;;  %v12632_v56 = vld [vmem:[#allocation247_spill] sm:$0xff] }
 0x51d   :  { %2129 = vmatpush1.msra.mxu0 %v12585_v47  ;;  %2200 = vmatpush1.msra.mxu1 %v12586_v58  ;;  %v8114_v47 = vld [vmem:[#allocation4 + $0x688] sm:$0xff]  ;;  %v8117_v58 = vld [vmem:[#allocation4 + $0x698] sm:$0xff] }
 0x51e   :  { %2130 = vmatprep.subr.mxu0 %v12587_v49  ;;  %2201 = vmatprep.subr.mxu1 %v12588_v45  ;;  %v8120_v49 = vld [vmem:[#allocation4 + $0x680] sm:$0xff]  ;;  %v8141_v45 = vld [vmem:[#allocation4 + $0x618] sm:$0xff] }
 0x51f   :  { %2131 = vmatpush1.msra.mxu0 %v12589_v48  ;;  %2202 = vmatpush1.msra.mxu1 %v12590_v57  ;;  %v8144_v48 = vld [vmem:[#allocation4 + $0x600] sm:$0xff]  ;;  %v8147_v57 = vld [vmem:[#allocation4 + $0x610] sm:$0xff] }
 0x520   :  { %2132 = vmatprep.subr.mxu0 %v12591_v60  ;;  %2203 = vmatprep.subr.mxu1 %v12592_v62  ;;  %v8150_v60 = vld [vmem:[#allocation4 + $0x5c8] sm:$0xff]  ;;  %v8153_v62 = vld [vmem:[#allocation4 + $0x5d8] sm:$0xff] }
 0x521   :  { %2133 = vmatpush1.msra.mxu0 %v12593_v36  ;;  %2204 = vmatpush1.msra.mxu1 %v12594_v12  ;;  %v8156_v36 = vld [vmem:[#allocation4 + $0x5c0] sm:$0xff]  ;;  %v8159_v12 = vld [vmem:[#allocation4 + $0x5d0] sm:$0xff] }
 0x522   :  { %2134 = vmatprep.subr.mxu0 %v12595_v14  ;;  %2205 = vmatprep.subr.mxu1 %v12596_v4  ;;  %v8162_v14 = vld [vmem:[#allocation4 + $0x588] sm:$0xff]  ;;  %v8165_v4 = vld [vmem:[#allocation4 + $0x598] sm:$0xff] }
 0x523   :  { %2135 = vmatpush1.msra.mxu0 %v12597_v2  ;;  %2206 = vmatpush1.msra.mxu1 %v12598_v34  ;;  %v8168_v2 = vld [vmem:[#allocation4 + $0x580] sm:$0xff]  ;;  %v8171_v34 = vld [vmem:[#allocation4 + $0x590] sm:$0xff] }
 0x524   :  { %2136 = vmatprep.subr.mxu0 %v12599_v46  ;;  %2207 = vmatprep.subr.mxu1 %v12600_v55  ;;  %v8174_v46 = vld [vmem:[#allocation4 + $0x548] sm:$0xff]  ;;  %v8177_v55 = vld [vmem:[#allocation4 + $0x558] sm:$0xff] }
 0x525   :  { %2137 = vmatpush1.msra.mxu0 %v12601_v23  ;;  %2208 = vmatpush1.msra.mxu1 %v12602_v29  ;;  %v8180_v23 = vld [vmem:[#allocation4 + $0x540] sm:$0xff]  ;;  %v8183_v29 = vld [vmem:[#allocation4 + $0x550] sm:$0xff] }
 0x526   :  { %2138 = vmatprep.subr.mxu0 %v12603_v31  ;;  %2209 = vmatprep.subr.mxu1 %v12604_v21  ;;  %v8186_v31 = vld [vmem:[#allocation4 + $0x508] sm:$0xff]  ;;  %v8189_v21 = vld [vmem:[#allocation4 + $0x518] sm:$0xff] }
 0x527   :  { %2139 = vmatpush1.msra.mxu0 %v12605_v50  ;;  %2210 = vmatpush1.msra.mxu1 %v12606_v54  ;;  %v8192_v50 = vld [vmem:[#allocation4 + $0x500] sm:$0xff]  ;;  %v8195_v54 = vld [vmem:[#allocation4 + $0x510] sm:$0xff] }
 0x528   :  { %2140 = vmatprep.subr.mxu0 %v12607_v18  ;;  %2211 = vmatprep.subr.mxu1 %v12608_v20  ;;  %v8198_v18 = vld [vmem:[#allocation4 + $0x4c8] sm:$0xff]  ;;  %v8201_v20 = vld [vmem:[#allocation4 + $0x4d8] sm:$0xff] }
 0x529   :  { %2141 = vmatpush1.msra.mxu0 %v12609_v22  ;;  %2212 = vmatpush1.msra.mxu1 %v12610_v38  ;;  %v8204_v22 = vld [vmem:[#allocation4 + $0x4c0] sm:$0xff]  ;;  %v8207_v38 = vld [vmem:[#allocation4 + $0x4d0] sm:$0xff] }
 0x52a   :  { %2142 = vmatprep.subr.mxu0 %v12611_v44  ;;  %2213 = vmatprep.subr.mxu1 %v12612_v5  ;;  %v8210_v44 = vld [vmem:[#allocation4 + $0x488] sm:$0xff]  ;;  %v8213_v5 = vld [vmem:[#allocation4 + $0x498] sm:$0xff] }
 0x52b   :  { %2143 = vmatpush1.msra.mxu0 %v12613_v25  ;;  %2214 = vmatpush1.msra.mxu1 %v12614_v19  ;;  %v8216_v25 = vld [vmem:[#allocation4 + $0x480] sm:$0xff]  ;;  %v8219_v19 = vld [vmem:[#allocation4 + $0x490] sm:$0xff] }
 0x52c   :  { %2144 = vmatprep.subr.mxu0 %v12615_v59  ;;  %2215 = vmatprep.subr.mxu1 %v12616_v0  ;;  %v8222_v59 = vld [vmem:[#allocation4 + $0x448] sm:$0xff]  ;;  %v8225_v0 = vld [vmem:[#allocation4 + $0x458] sm:$0xff] }
 0x52d   :  { %2145 = vmatpush1.msra.mxu0 %v12617_v28  ;;  %2216 = vmatpush1.msra.mxu1 %v12618_v37  ;;  %12633 = vst [vmem:[#allocation16_spill] sm:$0xff] %v8225_v0  ;;  %v8228_v28 = vld [vmem:[#allocation4 + $0x440] sm:$0xff]  ;;  %v8231_v37 = vld [vmem:[#allocation4 + $0x450] sm:$0xff] }
 0x52e   :  { %2146 = vmatprep.subr.mxu0 %v12619_v1  ;;  %2217 = vmatprep.subr.mxu1 %v12620_v6  ;;  %12634 = vst [vmem:[#allocation17_spill] sm:$0xff] %v8228_v28  ;;  %12635 = vst [vmem:[#allocation18_spill] sm:$0xff] %v8231_v37  ;;  %v8234_v1 = vld [vmem:[#allocation4 + $0x408] sm:$0xff]  ;;  %v8237_v6 = vld [vmem:[#allocation4 + $0x418] sm:$0xff] }
 0x52f   :  { %2147 = vmatpush2.msra.mxu0 %v12621_v26  ;;  %2218 = vmatpush2.msra.mxu1 %v12622_v7  ;;  %12636 = vst [vmem:[#allocation19_spill] sm:$0xff] %v8234_v1  ;;  %12637 = vst [vmem:[#allocation20_spill] sm:$0xff] %v8237_v6  ;;  %v8240_v26 = vld [vmem:[#allocation4 + $0x400] sm:$0xff]  ;;  %v8243_v7 = vld [vmem:[#allocation4 + $0x410] sm:$0xff] }
 0x530   :  { %2148 = vmatprep.subr.mxu0 %v12623_v61  ;;  %2219 = vmatprep.subr.mxu1 %v12624_v8  ;;  %12638 = vst [vmem:[#allocation21_spill] sm:$0xff] %v8240_v26  ;;  %12639 = vst [vmem:[#allocation22_spill] sm:$0xff] %v8243_v7  ;;  %v8246_v61 = vld [vmem:[#allocation4 + $0x3e8] sm:$0xff]  ;;  %v8249_v8 = vld [vmem:[#allocation4 + $0x3f8] sm:$0xff] }
 0x531   :  { %2149 = vmatpush2.msra.mxu0 %v12625_v42  ;;  %2220 = vmatpush2.msra.mxu1 %v12626_v11  ;;  %12640 = vst [vmem:[#allocation23_spill] sm:$0xff] %v8246_v61  ;;  %12641 = vst [vmem:[#allocation24_spill] sm:$0xff] %v8249_v8  ;;  %v12642_v42 = vld [vmem:[#allocation211_spill] sm:$0xff] }
 0x532   :  { %2150 = vmatprep.subr.mxu0 %v12627_v27  ;;  %2221 = vmatprep.subr.mxu1 %v12628_v32  ;;  %v229_v11 = vadd.f32 %v12642_v42, %v12018_v15  ;;  %v12643_v32 = vld [vmem:[#allocation212_spill] sm:$0xff] }
 0x533   :  { %2151 = vmatpush2.msra.mxu0 %v12629_v16  ;;  %2222 = vmatpush2.msra.mxu1 %v12630_v17  ;;  %v231_v16 = vadd.f32 %v12643_v32, %v12017_v13 }
 0x534   :  { %2152 = vmatprep.subr.mxu0 %v12631_v52  ;;  %2223 = vmatprep.subr.mxu1 %v12632_v56 }
 0x535   :  { %2153 = vmatpush2.msra.mxu0 %v7814_v40  ;;  %2224 = vmatpush2.msra.mxu1 %v7817_v51  ;;  %v8123_v40 = vld [vmem:[#allocation4 + $0x690] sm:$0xff]  ;;  %v8126_v51 = vld [vmem:[#allocation4 + $0x648] sm:$0xff] }
 0x536   :  { %2154 = vmatprep.subr.mxu0 %v7820_v53  ;;  %2225 = vmatprep.subr.mxu1 %v7823_v41  ;;  %v8132_v53 = vld [vmem:[#allocation4 + $0x640] sm:$0xff]  ;;  %v8135_v41 = vld [vmem:[#allocation4 + $0x650] sm:$0xff] }
 0x537   :  { %2155 = vmatpush2.msra.mxu0 %v7826_v39  ;;  %2226 = vmatpush2.msra.mxu1 %v7829_v43  ;;  %v8129_v39 = vld [vmem:[#allocation4 + $0x658] sm:$0xff]  ;;  %v8138_v43 = vld [vmem:[#allocation4 + $0x608] sm:$0xff] }
 0x538   :  { %2156 = vmatprep.subr.mxu0 %v8114_v47  ;;  %2227 = vmatprep.subr.mxu1 %v8117_v58 }
 0x539   :  { %2157 = vmatpush2.msra.mxu0 %v8120_v49  ;;  %2228 = vmatpush2.msra.mxu1 %v8123_v40 }
 0x53a   :  { %2158 = vmatprep.subr.mxu0 %v8126_v51  ;;  %2229 = vmatprep.subr.mxu1 %v8129_v39 }
 0x53b   :  { %2159 = vmatpush2.msra.mxu0 %v8132_v53  ;;  %2230 = vmatpush2.msra.mxu1 %v8135_v41 }
 0x53c   :  { %2160 = vmatprep.subr.mxu0 %v8138_v43  ;;  %2231 = vmatprep.subr.mxu1 %v8141_v45 }
 0x53d   :  { %2161 = vmatpush2.msra.mxu0 %v8144_v48  ;;  %2232 = vmatpush2.msra.mxu1 %v8147_v57 }
 0x53e   :  { %2162 = vmatprep.subr.mxu0 %v8150_v60  ;;  %2233 = vmatprep.subr.mxu1 %v8153_v62 }
 0x53f   :  { %2163 = vmatpush2.msra.mxu0 %v8156_v36  ;;  %2234 = vmatpush2.msra.mxu1 %v8159_v12 }
 0x540   :  { %2164 = vmatprep.subr.mxu0 %v8162_v14  ;;  %2235 = vmatprep.subr.mxu1 %v8165_v4 }
 0x541   :  { %2165 = vmatpush2.msra.mxu0 %v8168_v2  ;;  %2236 = vmatpush2.msra.mxu1 %v8171_v34 }
 0x542   :  { %2166 = vmatprep.subr.mxu0 %v8174_v46  ;;  %2237 = vmatprep.subr.mxu1 %v8177_v55 }
 0x543   :  { %2167 = vmatpush2.msra.mxu0 %v8180_v23  ;;  %2238 = vmatpush2.msra.mxu1 %v8183_v29 }
 0x544   :  { %2168 = vmatprep.subr.mxu0 %v8186_v31  ;;  %2239 = vmatprep.subr.mxu1 %v8189_v21 }
 0x545   :  { %2169 = vmatpush2.msra.mxu0 %v8192_v50  ;;  %2240 = vmatpush2.msra.mxu1 %v8195_v54 }
 0x546   :  { %2170 = vmatprep.subr.mxu0 %v8198_v18  ;;  %2241 = vmatprep.subr.mxu1 %v8201_v20 }
 0x547   :  { %2171 = vmatpush2.msra.mxu0 %v8204_v22  ;;  %2242 = vmatpush2.msra.mxu1 %v8207_v38 }
 0x548   :  { %2172 = vmatprep.subr.mxu0 %v8210_v44  ;;  %2243 = vmatprep.subr.mxu1 %v8213_v5 }
 0x549   :  { %2173 = vmatpush2.msra.mxu0 %v8216_v25  ;;  %2244 = vmatpush2.msra.mxu1 %v8219_v19 }
 0x54a   :  { %2174 = vmatprep.subr.mxu0 %v8222_v59  ;;  %2245 = vmatprep.subr.mxu1 %v8225_v0 }
 0x54b   :  { %2175 = vmatpush2.msra.mxu0 %v8228_v28  ;;  %2246 = vmatpush2.msra.mxu1 %v8231_v37 }
 0x54c   :  { %2176 = vmatprep.subr.mxu0 %v8234_v1  ;;  %2247 = vmatprep.subr.mxu1 %v8237_v6 }
 0x54d   :  { %2177 = vmatpush2.msra.mxu0 %v8240_v26  ;;  %2248 = vmatpush2.msra.mxu1 %v8243_v7 }
 0x54e   :  { %2256 = vmatprep.subr.mxu0 %v8246_v61  ;;  %2327 = vmatprep.subr.mxu1 %v8249_v8  ;;  %v12644_v61 = vld [vmem:[#allocation218_spill] sm:$0xff] }
 0x54f   :  { %v354_v1 = vadd.f32 %v12644_v61, %v6033_v30 }
 0x58c   :  { %v1836_v27 = vpop.f32.mrf.mxu0  ;;  %v1907_v6 = vpop.f32.mrf.mxu1 }
 0x58d   :  { %v2086_v17 = vadd.f32 %v1836_v27, %v229_v11  ;;  %v2088_v37 = vadd.f32 %v1907_v6, %v354_v1 }
 0x58e   :  { %v1838_v52 = vpop.f32.mrf.mxu0  ;;  %v1909_v1 = vpop.f32.mrf.mxu1 }
 0x58f   :  { %v4194_v56 = vmul.f32 -1.442695, %v2086_v17  ;;  %v2087_v26 = vadd.f32 %v1838_v52, %v231_v16 }
 0x591   :  { %4445 = vpow2.f32 %v4194_v56  ;;  %v4195_v7 = vmul.f32 -1.442695, %v2087_v26 }
 0x593   :  { %4447 = vpow2.f32 %v4195_v7 }
 0x594   :  { %4449 = vtanh.f32 %v2088_v37  ;;  %v12645_v37 = vld [vmem:[#allocation220_spill] sm:$0xff] }
 0x595   :  { %v356_v56 = vadd.f32 %v12645_v37, %v6029_v10 }
 0x59e   :  { %v4446_v8 = vpop.eup %4445 }
 0x59f   :  { %v2093_v28 = vadd.f32 1.0, %v4446_v8 }
 0x5a0   :  { %v4448_v0 = vpop.eup %4447 }
 0x5a1   :  { %4451 = vrcp.f32 %v2093_v28  ;;  %v2099_v42 = vadd.f32 1.0, %v4448_v0  ;;  %v4450_v32 = vpop.eup %4449 }
 0x5a3   :  { %4453 = vrcp.f32 %v2099_v42 }
 0x5ae   :  { %v4452_v11 = vpop.eup %4451 }
 0x5af   :  { %v2110_v27 = vmul.f32 %v4452_v11, %v4450_v32  ;;  %v2089_v32 = vadd.f32 %v1909_v1, %v356_v56 }
 0x5b0   :  { %v4454_v17 = vpop.eup %4453 }
 0x5b1   :  { %v2109_v16 = vmul.f32 %v4454_v17, %v7885_v33  ;;  %v4196_v11 = vmul.f32 -1.442695, %v2089_v32 }
 0x5b3   :  { %v8259_v26 = vadd.f32 %v2110_v27, %v2109_v16 }
 0x5cd   :  { %v1978_v7 = vpop.f32.mrf.mxu0  ;;  %v2049_v28 = vpop.f32.mrf.mxu1 }
 0x5ce   :  { %v2054_v52 = vadd.f32 %v1978_v7, %v6795_v3  ;;  %v2056_v16 = vadd.f32 %v2049_v28, %v6812_v35 }
 0x5cf   :  { %v1980_v61 = vpop.f32.mrf.mxu0  ;;  %v2051_v42 = vpop.f32.mrf.mxu1 }
 0x5d0   :  { %v4191_v6 = vmul.f32 -1.442695, %v2054_v52  ;;  %v2055_v8 = vadd.f32 %v1980_v61, %v6799_v9  ;;  %v2057_v33 = vadd.f32 %v2051_v42, %v6805_v63 }
 0x5d2   :  { %4455 = vpow2.f32 %v4191_v6  ;;  %v4192_v0 = vmul.f32 -1.442695, %v2055_v8  ;;  %v4193_v27 = vmul.f32 -1.442695, %v2057_v33 }
 0x5d4   :  { %4457 = vpow2.f32 %v4192_v0 }
 0x5d5   :  { %4459 = vpow2.f32 %v4196_v11 }
 0x5d6   :  { %4461 = vpow2.f32 %v4193_v27 }
 0x5df   :  { %v4456_v17 = vpop.eup %4455 }
 0x5e0   :  { %v2061_v7 = vadd.f32 1.0, %v4456_v17 }
 0x5e1   :  { %v4458_v52 = vpop.eup %4457 }
 0x5e2   :  { %4463 = vrcp.f32 %v2061_v7  ;;  %v2067_v61 = vadd.f32 1.0, %v4458_v52  ;;  %v4460_v6 = vpop.eup %4459  ;;  %v8279_v52 = vld [vmem:[#allocation4 + $0x3f0] sm:$0xff] }
 0x5e3   :  { %4465 = vtanh.f32 %v2056_v16  ;;  %v4462_v8 = vpop.eup %4461  ;;  %v2106_v33 = vadd.f32 1.0, %v4460_v6  ;;  %v8285_v6 = vld [vmem:[#allocation4 + $0x3b8] sm:$0xff] }
 0x5e4   :  { %4467 = vrcp.f32 %v2067_v61  ;;  %v2074_v56 = vadd.f32 1.0, %v4462_v8  ;;  %v8282_v61 = vld [vmem:[#allocation4 + $0x3a8] sm:$0xff]  ;;  %v8288_v8 = vld [vmem:[#allocation4 + $0x3a0] sm:$0xff] }
 0x5e5   :  { %4469 = vtanh.f32 %v8259_v26 }
 0x5e6   :  { %4471 = vrcp.f32 %v2074_v56  ;;  %v8300_v56 = vld [vmem:[#allocation4 + $0x360] sm:$0xff] }
 0x5ef   :  { %v4464_v0 = vpop.eup %4463 }
 0x5f0   :  { %v4466_v37 = vpop.eup %4465 }
 0x5f1   :  { %v4468_v1 = vpop.eup %4467  ;;  %v2078_v42 = vmul.f32 %v4466_v37, %v4464_v0  ;;  %v8291_v0 = vld [vmem:[#allocation4 + $0x3b0] sm:$0xff]  ;;  %v8294_v37 = vld [vmem:[#allocation4 + $0x368] sm:$0xff] }
 0x5f2   :  { %v2077_v32 = vmul.f32 %v4468_v1, %v7894_v24  ;;  %v4470_v28 = vpop.eup %4469  ;;  %v8276_v24 = vld [vmem:[#allocation4 + $0x3e0] sm:$0xff]  ;;  %v8297_v1 = vld [vmem:[#allocation4 + $0x378] sm:$0xff] }
 0x5f3   :  { %v4472_v11 = vpop.eup %4471 }
 0x5f4   :  { %v8268_v63 = vadd.f32 %v2078_v42, %v2077_v32  ;;  %v8303_v42 = vld [vmem:[#allocation4 + $0x370] sm:$0xff]  ;;  %v8306_v32 = vld [vmem:[#allocation4 + $0x328] sm:$0xff] }
 0x5f6   :  { %4473 = vtanh.f32 %v8268_v63 }
 0x5f7   :  { %4475 = vrcp.f32 %v2106_v33  ;;  %v8309_v33 = vld [vmem:[#allocation4 + $0x338] sm:$0xff] }
 0x5f8   :  { %12646 = vst [vmem:[#allocation25_spill] sm:$0xff] %v8309_v33 }
 0x603   :  { %v4474_v27 = vpop.eup %4473 }
 0x604   :  { %v4476_v17 = vpop.eup %4475  ;;  %v2081_v16 = vmul.f32 %v4474_v27, %v4472_v11  ;;  %v8315_v11 = vld [vmem:[#allocation4 + $0x330] sm:$0xff]  ;;  %v8318_v27 = vld [vmem:[#allocation4 + $0x2e8] sm:$0xff] }
 0x605   :  { %v8272_v7 = vmul.f32 %v4476_v17, %v4470_v28  ;;  %v8312_v28 = vld [vmem:[#allocation4 + $0x320] sm:$0xff]  ;;  %12648 = vst [vmem:[#allocation210_spill] sm:$0xff] %v8315_v11  ;;  %12649 = vst [vmem:[#allocation214_spill] sm:$0xff] %v8318_v27  ;;  %v8321_v17 = vld [vmem:[#allocation4 + $0x2f8] sm:$0xff] }
 0x606   :  { %2178 = vmatprep.mubr.f32.mxu0 %v2081_v16  ;;  %2249 = vmatprep.mubr.f32.mxu1 %v2081_v16  ;;  %12647 = vst [vmem:[#allocation10_spill] sm:$0xff] %v8312_v28  ;;  %12650 = vst [vmem:[#allocation216_spill] sm:$0xff] %v8321_v17 }
 0x607   :  { %2179 = vmatmul.mubr.f32.vlgmr.msra.gmra.mxu0 %v8272_v7  ;;  %2250 = vmatmul.mubr.f32.vlgmr.msra.gmra.mxu1 %v8272_v7 }
 0x608   :  { %2257 = vmatpush1.msra.mxu0 %v8276_v24  ;;  %2328 = vmatpush1.msra.mxu1 %v8279_v52 }
 0x609   :  { %2258 = vmatprep.subr.mxu0 %v8282_v61  ;;  %2320 = vmatprep.mubr.f32.mxu0 %v2081_v16 }
 0x60a   :  { %2329 = vmatprep.subr.mxu1 %v8285_v6  ;;  %2391 = vmatprep.mubr.f32.mxu1 %v2081_v16  ;;  %v8324_v16 = vld [vmem:[#allocation4 + $0x2e0] sm:$0xff] }
 0x60b   :  { %2259 = vmatpush1.msra.mxu0 %v8288_v8  ;;  %2330 = vmatpush1.msra.mxu1 %v8291_v0  ;;  %12651 = vst [vmem:[#allocation26_spill] sm:$0xff] %v8324_v16 }
 0x60c   :  { %2260 = vmatprep.subr.mxu0 %v8294_v37  ;;  %2331 = vmatprep.subr.mxu1 %v8297_v1 }
 0x60d   :  { %2261 = vmatpush1.msra.mxu0 %v8300_v56  ;;  %2332 = vmatpush1.msra.mxu1 %v8303_v42 }
 0x60e   :  { %2262 = vmatprep.subr.mxu0 %v8306_v32  ;;  %2333 = vmatprep.subr.mxu1 %v8309_v33  ;;  %v8327_v33 = vld [vmem:[#allocation4 + $0x2f0] sm:$0xff] }
 0x60f   :  { %2263 = vmatpush1.msra.mxu0 %v8312_v28  ;;  %2334 = vmatpush1.msra.mxu1 %v8315_v11  ;;  %12652 = vst [vmem:[#allocation27_spill] sm:$0xff] %v8327_v33  ;;  %v8330_v28 = vld [vmem:[#allocation4 + $0x2a8] sm:$0xff]  ;;  %v8333_v11 = vld [vmem:[#allocation4 + $0x2b8] sm:$0xff] }
 0x610   :  { %2264 = vmatprep.subr.mxu0 %v8318_v27  ;;  %2335 = vmatprep.subr.mxu1 %v8321_v17  ;;  %12653 = vst [vmem:[#allocation28_spill] sm:$0xff] %v8330_v28  ;;  %12654 = vst [vmem:[#allocation29_spill] sm:$0xff] %v8333_v11  ;;  %v8336_v27 = vld [vmem:[#allocation4 + $0x2a0] sm:$0xff]  ;;  %v8339_v17 = vld [vmem:[#allocation4 + $0x2b0] sm:$0xff] }
 0x611   :  { %2265 = vmatpush1.msra.mxu0 %v8324_v16  ;;  %2336 = vmatpush1.msra.mxu1 %v8327_v33  ;;  %12655 = vst [vmem:[#allocation30_spill] sm:$0xff] %v8336_v27  ;;  %12656 = vst [vmem:[#allocation31_spill] sm:$0xff] %v8339_v17  ;;  %v8342_v16 = vld [vmem:[#allocation4 + $0x268] sm:$0xff]  ;;  %v8345_v33 = vld [vmem:[#allocation4 + $0x278] sm:$0xff] }
 0x612   :  { %2266 = vmatprep.subr.mxu0 %v8330_v28  ;;  %2337 = vmatprep.subr.mxu1 %v8333_v11  ;;  %12657 = vst [vmem:[#allocation32_spill] sm:$0xff] %v8342_v16  ;;  %12658 = vst [vmem:[#allocation33_spill] sm:$0xff] %v8345_v33  ;;  %v8348_v28 = vld [vmem:[#allocation4 + $0x260] sm:$0xff]  ;;  %v8351_v11 = vld [vmem:[#allocation4 + $0x270] sm:$0xff] }
 0x613   :  { %2267 = vmatpush1.msra.mxu0 %v8336_v27  ;;  %2338 = vmatpush1.msra.mxu1 %v8339_v17  ;;  %12659 = vst [vmem:[#allocation34_spill] sm:$0xff] %v8348_v28  ;;  %12660 = vst [vmem:[#allocation35_spill] sm:$0xff] %v8351_v11  ;;  %v8354_v27 = vld [vmem:[#allocation4 + $0x228] sm:$0xff]  ;;  %v8357_v17 = vld [vmem:[#allocation4 + $0x238] sm:$0xff] }
 0x614   :  { %2268 = vmatprep.subr.mxu0 %v8342_v16  ;;  %2339 = vmatprep.subr.mxu1 %v8345_v33  ;;  %12661 = vst [vmem:[#allocation36_spill] sm:$0xff] %v8354_v27  ;;  %12662 = vst [vmem:[#allocation37_spill] sm:$0xff] %v8357_v17  ;;  %v8360_v16 = vld [vmem:[#allocation4 + $0x220] sm:$0xff]  ;;  %v8363_v33 = vld [vmem:[#allocation4 + $0x230] sm:$0xff] }
 0x615   :  { %2269 = vmatpush1.msra.mxu0 %v8348_v28  ;;  %2340 = vmatpush1.msra.mxu1 %v8351_v11  ;;  %12663 = vst [vmem:[#allocation38_spill] sm:$0xff] %v8360_v16  ;;  %12664 = vst [vmem:[#allocation39_spill] sm:$0xff] %v8363_v33  ;;  %v8366_v28 = vld [vmem:[#allocation4 + $0x1e8] sm:$0xff]  ;;  %v8369_v11 = vld [vmem:[#allocation4 + $0x1f8] sm:$0xff] }
 0x616   :  { %2270 = vmatprep.subr.mxu0 %v8354_v27  ;;  %2341 = vmatprep.subr.mxu1 %v8357_v17  ;;  %12665 = vst [vmem:[#allocation40_spill] sm:$0xff] %v8366_v28  ;;  %12666 = vst [vmem:[#allocation41_spill] sm:$0xff] %v8369_v11  ;;  %v8372_v27 = vld [vmem:[#allocation4 + $0x1e0] sm:$0xff]  ;;  %v8375_v17 = vld [vmem:[#allocation4 + $0x1f0] sm:$0xff] }
 0x617   :  { %2271 = vmatpush1.msra.mxu0 %v8360_v16  ;;  %2342 = vmatpush1.msra.mxu1 %v8363_v33  ;;  %12667 = vst [vmem:[#allocation42_spill] sm:$0xff] %v8372_v27  ;;  %12668 = vst [vmem:[#allocation43_spill] sm:$0xff] %v8375_v17  ;;  %v8378_v16 = vld [vmem:[#allocation4 + $0x1a8] sm:$0xff]  ;;  %v8381_v33 = vld [vmem:[#allocation4 + $0x1b8] sm:$0xff] }
 0x618   :  { %2272 = vmatprep.subr.mxu0 %v8366_v28  ;;  %2343 = vmatprep.subr.mxu1 %v8369_v11  ;;  %12669 = vst [vmem:[#allocation44_spill] sm:$0xff] %v8378_v16  ;;  %12670 = vst [vmem:[#allocation45_spill] sm:$0xff] %v8381_v33  ;;  %v8384_v28 = vld [vmem:[#allocation4 + $0x1a0] sm:$0xff]  ;;  %v8387_v11 = vld [vmem:[#allocation4 + $0x1b0] sm:$0xff] }
 0x619   :  { %2273 = vmatpush1.msra.mxu0 %v8372_v27  ;;  %2344 = vmatpush1.msra.mxu1 %v8375_v17  ;;  %12671 = vst [vmem:[#allocation46_spill] sm:$0xff] %v8384_v28  ;;  %12672 = vst [vmem:[#allocation47_spill] sm:$0xff] %v8387_v11  ;;  %v8390_v27 = vld [vmem:[#allocation4 + $0x168] sm:$0xff]  ;;  %v8393_v17 = vld [vmem:[#allocation4 + $0x178] sm:$0xff] }
 0x61a   :  { %2274 = vmatprep.subr.mxu0 %v8378_v16  ;;  %2345 = vmatprep.subr.mxu1 %v8381_v33  ;;  %12673 = vst [vmem:[#allocation48_spill] sm:$0xff] %v8390_v27  ;;  %12674 = vst [vmem:[#allocation49_spill] sm:$0xff] %v8393_v17  ;;  %v8396_v16 = vld [vmem:[#allocation4 + $0x160] sm:$0xff]  ;;  %v8399_v33 = vld [vmem:[#allocation4 + $0x170] sm:$0xff] }
 0x61b   :  { %2275 = vmatpush1.msra.mxu0 %v8384_v28  ;;  %2346 = vmatpush1.msra.mxu1 %v8387_v11  ;;  %12675 = vst [vmem:[#allocation50_spill] sm:$0xff] %v8396_v16  ;;  %12676 = vst [vmem:[#allocation51_spill] sm:$0xff] %v8399_v33  ;;  %v8402_v28 = vld [vmem:[#allocation4 + $0x128] sm:$0xff]  ;;  %v8405_v11 = vld [vmem:[#allocation4 + $0x138] sm:$0xff] }
 0x61c   :  { %2276 = vmatprep.subr.mxu0 %v8390_v27  ;;  %2347 = vmatprep.subr.mxu1 %v8393_v17  ;;  %12677 = vst [vmem:[#allocation52_spill] sm:$0xff] %v8402_v28  ;;  %12678 = vst [vmem:[#allocation53_spill] sm:$0xff] %v8405_v11  ;;  %v8408_v27 = vld [vmem:[#allocation4 + $0x120] sm:$0xff]  ;;  %v8411_v17 = vld [vmem:[#allocation4 + $0x130] sm:$0xff] }
 0x61d   :  { %2277 = vmatpush1.msra.mxu0 %v8396_v16  ;;  %2348 = vmatpush1.msra.mxu1 %v8399_v33  ;;  %12679 = vst [vmem:[#allocation54_spill] sm:$0xff] %v8408_v27  ;;  %12680 = vst [vmem:[#allocation55_spill] sm:$0xff] %v8411_v17  ;;  %v8414_v16 = vld [vmem:[#allocation4 + $0xe8] sm:$0xff]  ;;  %v8417_v33 = vld [vmem:[#allocation4 + $0xf8] sm:$0xff] }
 0x61e   :  { %2278 = vmatprep.subr.mxu0 %v8402_v28  ;;  %2349 = vmatprep.subr.mxu1 %v8405_v11  ;;  %12681 = vst [vmem:[#allocation56_spill] sm:$0xff] %v8414_v16  ;;  %12682 = vst [vmem:[#allocation57_spill] sm:$0xff] %v8417_v33  ;;  %v8420_v28 = vld [vmem:[#allocation4 + $0xe0] sm:$0xff]  ;;  %v8423_v11 = vld [vmem:[#allocation4 + $0xf0] sm:$0xff] }
 0x61f   :  { %2279 = vmatpush1.msra.mxu0 %v8408_v27  ;;  %2350 = vmatpush1.msra.mxu1 %v8411_v17  ;;  %12683 = vst [vmem:[#allocation58_spill] sm:$0xff] %v8420_v28  ;;  %12684 = vst [vmem:[#allocation59_spill] sm:$0xff] %v8423_v11  ;;  %v8426_v27 = vld [vmem:[#allocation4 + $0xa8] sm:$0xff]  ;;  %v8429_v17 = vld [vmem:[#allocation4 + $0xb8] sm:$0xff] }
 0x620   :  { %2280 = vmatprep.subr.mxu0 %v8414_v16  ;;  %2351 = vmatprep.subr.mxu1 %v8417_v33  ;;  %12685 = vst [vmem:[#allocation60_spill] sm:$0xff] %v8426_v27  ;;  %12686 = vst [vmem:[#allocation61_spill] sm:$0xff] %v8429_v17  ;;  %v8432_v16 = vld [vmem:[#allocation4 + $0xa0] sm:$0xff]  ;;  %v8435_v33 = vld [vmem:[#allocation4 + $0xb0] sm:$0xff] }
 0x621   :  { %2281 = vmatpush1.msra.mxu0 %v8420_v28  ;;  %2352 = vmatpush1.msra.mxu1 %v8423_v11  ;;  %12687 = vst [vmem:[#allocation62_spill] sm:$0xff] %v8432_v16  ;;  %12688 = vst [vmem:[#allocation63_spill] sm:$0xff] %v8435_v33  ;;  %v8438_v28 = vld [vmem:[#allocation4 + $0x68] sm:$0xff]  ;;  %v8441_v11 = vld [vmem:[#allocation4 + $0x78] sm:$0xff] }
 0x622   :  { %2282 = vmatprep.subr.mxu0 %v8426_v27  ;;  %2353 = vmatprep.subr.mxu1 %v8429_v17  ;;  %12689 = vst [vmem:[#allocation64_spill] sm:$0xff] %v8438_v28  ;;  %12690 = vst [vmem:[#allocation65_spill] sm:$0xff] %v8441_v11  ;;  %v8444_v27 = vld [vmem:[#allocation4 + $0x60] sm:$0xff]  ;;  %v8447_v17 = vld [vmem:[#allocation4 + $0x70] sm:$0xff] }
 0x623   :  { %2283 = vmatpush1.msra.mxu0 %v8432_v16  ;;  %2354 = vmatpush1.msra.mxu1 %v8435_v33  ;;  %12691 = vst [vmem:[#allocation66_spill] sm:$0xff] %v8444_v27  ;;  %12692 = vst [vmem:[#allocation67_spill] sm:$0xff] %v8447_v17  ;;  %v8450_v16 = vld [vmem:[#allocation4 + $0x28] sm:$0xff]  ;;  %v8453_v33 = vld [vmem:[#allocation4 + $0x38] sm:$0xff] }
 0x624   :  { %2284 = vmatprep.subr.mxu0 %v8438_v28  ;;  %2355 = vmatprep.subr.mxu1 %v8441_v11  ;;  %12693 = vst [vmem:[#allocation68_spill] sm:$0xff] %v8450_v16  ;;  %12694 = vst [vmem:[#allocation69_spill] sm:$0xff] %v8453_v33  ;;  %v8456_v28 = vld [vmem:[#allocation4 + $0x20] sm:$0xff]  ;;  %v8459_v11 = vld [vmem:[#allocation4 + $0x30] sm:$0xff] }
 0x625   :  { %2285 = vmatpush1.msra.mxu0 %v8444_v27  ;;  %2356 = vmatpush1.msra.mxu1 %v8447_v17  ;;  %12695 = vst [vmem:[#allocation70_spill] sm:$0xff] %v8456_v28  ;;  %12696 = vst [vmem:[#allocation71_spill] sm:$0xff] %v8459_v11  ;;  %v8462_v27 = vld [vmem:[#allocation4 + $0x7e8] sm:$0xff]  ;;  %v8465_v17 = vld [vmem:[#allocation4 + $0x7f8] sm:$0xff] }
 0x626   :  { %2286 = vmatprep.subr.mxu0 %v8450_v16  ;;  %2357 = vmatprep.subr.mxu1 %v8453_v33  ;;  %12697 = vst [vmem:[#allocation72_spill] sm:$0xff] %v8462_v27  ;;  %12698 = vst [vmem:[#allocation73_spill] sm:$0xff] %v8465_v17  ;;  %v8468_v16 = vld [vmem:[#allocation4 + $0x7e0] sm:$0xff]  ;;  %v8471_v33 = vld [vmem:[#allocation4 + $0x7f0] sm:$0xff] }
 0x627   :  { %2287 = vmatpush1.msra.mxu0 %v8456_v28  ;;  %2358 = vmatpush1.msra.mxu1 %v8459_v11  ;;  %12699 = vst [vmem:[#allocation74_spill] sm:$0xff] %v8468_v16  ;;  %12700 = vst [vmem:[#allocation75_spill] sm:$0xff] %v8471_v33  ;;  %v8474_v28 = vld [vmem:[#allocation4 + $0x7a8] sm:$0xff]  ;;  %v8477_v11 = vld [vmem:[#allocation4 + $0x7b8] sm:$0xff] }
 0x628   :  { %2288 = vmatprep.subr.mxu0 %v8462_v27  ;;  %2359 = vmatprep.subr.mxu1 %v8465_v17  ;;  %12701 = vst [vmem:[#allocation76_spill] sm:$0xff] %v8474_v28  ;;  %12702 = vst [vmem:[#allocation77_spill] sm:$0xff] %v8477_v11  ;;  %v8480_v27 = vld [vmem:[#allocation4 + $0x7a0] sm:$0xff]  ;;  %v8483_v17 = vld [vmem:[#allocation4 + $0x7b0] sm:$0xff] }
 0x629   :  { %2289 = vmatpush2.msra.mxu0 %v8468_v16  ;;  %2360 = vmatpush2.msra.mxu1 %v8471_v33  ;;  %12703 = vst [vmem:[#allocation78_spill] sm:$0xff] %v8480_v27  ;;  %12704 = vst [vmem:[#allocation79_spill] sm:$0xff] %v8483_v17  ;;  %v8486_v16 = vld [vmem:[#allocation4 + $0x768] sm:$0xff]  ;;  %v8489_v33 = vld [vmem:[#allocation4 + $0x778] sm:$0xff] }
 0x62a   :  { %2290 = vmatprep.subr.mxu0 %v8474_v28  ;;  %2361 = vmatprep.subr.mxu1 %v8477_v11  ;;  %12705 = vst [vmem:[#allocation80_spill] sm:$0xff] %v8486_v16  ;;  %12706 = vst [vmem:[#allocation81_spill] sm:$0xff] %v8489_v33  ;;  %v8492_v28 = vld [vmem:[#allocation4 + $0x760] sm:$0xff]  ;;  %v8495_v11 = vld [vmem:[#allocation4 + $0x770] sm:$0xff] }
 0x62b   :  { %2291 = vmatpush2.msra.mxu0 %v8480_v27  ;;  %2362 = vmatpush2.msra.mxu1 %v8483_v17  ;;  %12707 = vst [vmem:[#allocation82_spill] sm:$0xff] %v8492_v28  ;;  %12708 = vst [vmem:[#allocation83_spill] sm:$0xff] %v8495_v11  ;;  %v8498_v27 = vld [vmem:[#allocation4 + $0x728] sm:$0xff]  ;;  %v8501_v17 = vld [vmem:[#allocation4 + $0x738] sm:$0xff] }
 0x62c   :  { %2292 = vmatprep.subr.mxu0 %v8486_v16  ;;  %2363 = vmatprep.subr.mxu1 %v8489_v33  ;;  %12709 = vst [vmem:[#allocation84_spill] sm:$0xff] %v8498_v27  ;;  %12710 = vst [vmem:[#allocation85_spill] sm:$0xff] %v8501_v17  ;;  %v8504_v16 = vld [vmem:[#allocation4 + $0x720] sm:$0xff]  ;;  %v8507_v33 = vld [vmem:[#allocation4 + $0x730] sm:$0xff] }
 0x62d   :  { %2293 = vmatpush2.msra.mxu0 %v8492_v28  ;;  %2364 = vmatpush2.msra.mxu1 %v8495_v11  ;;  %12711 = vst [vmem:[#allocation86_spill] sm:$0xff] %v8504_v16  ;;  %12712 = vst [vmem:[#allocation87_spill] sm:$0xff] %v8507_v33  ;;  %v8510_v28 = vld [vmem:[#allocation4 + $0x6e8] sm:$0xff]  ;;  %v8513_v11 = vld [vmem:[#allocation4 + $0x6f8] sm:$0xff] }
 0x62e   :  { %2294 = vmatprep.subr.mxu0 %v8498_v27  ;;  %2365 = vmatprep.subr.mxu1 %v8501_v17  ;;  %12713 = vst [vmem:[#allocation88_spill] sm:$0xff] %v8510_v28  ;;  %12714 = vst [vmem:[#allocation89_spill] sm:$0xff] %v8513_v11  ;;  %v8516_v27 = vld [vmem:[#allocation4 + $0x6e0] sm:$0xff]  ;;  %v8519_v17 = vld [vmem:[#allocation4 + $0x6f0] sm:$0xff] }
 0x62f   :  { %2295 = vmatpush2.msra.mxu0 %v8504_v16  ;;  %2366 = vmatpush2.msra.mxu1 %v8507_v33  ;;  %12715 = vst [vmem:[#allocation90_spill] sm:$0xff] %v8516_v27  ;;  %12716 = vst [vmem:[#allocation91_spill] sm:$0xff] %v8519_v17  ;;  %v8522_v16 = vld [vmem:[#allocation4 + $0x6a8] sm:$0xff]  ;;  %v8525_v33 = vld [vmem:[#allocation4 + $0x6b8] sm:$0xff] }
 0x630   :  { %2296 = vmatprep.subr.mxu0 %v8510_v28  ;;  %2367 = vmatprep.subr.mxu1 %v8513_v11  ;;  %12717 = vst [vmem:[#allocation92_spill] sm:$0xff] %v8522_v16  ;;  %12718 = vst [vmem:[#allocation93_spill] sm:$0xff] %v8525_v33  ;;  %v8528_v28 = vld [vmem:[#allocation4 + $0x6a0] sm:$0xff]  ;;  %v8531_v11 = vld [vmem:[#allocation4 + $0x6b0] sm:$0xff] }
 0x631   :  { %2297 = vmatpush2.msra.mxu0 %v8516_v27  ;;  %2368 = vmatpush2.msra.mxu1 %v8519_v17  ;;  %12719 = vst [vmem:[#allocation94_spill] sm:$0xff] %v8528_v28  ;;  %12720 = vst [vmem:[#allocation95_spill] sm:$0xff] %v8531_v11  ;;  %v8534_v27 = vld [vmem:[#allocation4 + $0x668] sm:$0xff]  ;;  %v8537_v17 = vld [vmem:[#allocation4 + $0x678] sm:$0xff] }
 0x632   :  { %2298 = vmatprep.subr.mxu0 %v8522_v16  ;;  %2369 = vmatprep.subr.mxu1 %v8525_v33  ;;  %12721 = vst [vmem:[#allocation96_spill] sm:$0xff] %v8534_v27  ;;  %12722 = vst [vmem:[#allocation97_spill] sm:$0xff] %v8537_v17  ;;  %v8540_v16 = vld [vmem:[#allocation4 + $0x660] sm:$0xff]  ;;  %v8543_v33 = vld [vmem:[#allocation4 + $0x670] sm:$0xff] }
 0x633   :  { %2299 = vmatpush2.msra.mxu0 %v8528_v28  ;;  %2370 = vmatpush2.msra.mxu1 %v8531_v11  ;;  %12723 = vst [vmem:[#allocation98_spill] sm:$0xff] %v8540_v16  ;;  %12724 = vst [vmem:[#allocation99_spill] sm:$0xff] %v8543_v33  ;;  %v8546_v28 = vld [vmem:[#allocation4 + $0x628] sm:$0xff]  ;;  %v8549_v11 = vld [vmem:[#allocation4 + $0x638] sm:$0xff] }
 0x634   :  { %2300 = vmatprep.subr.mxu0 %v8534_v27  ;;  %2371 = vmatprep.subr.mxu1 %v8537_v17  ;;  %12725 = vst [vmem:[#allocation100_spill] sm:$0xff] %v8546_v28  ;;  %12726 = vst [vmem:[#allocation101_spill] sm:$0xff] %v8549_v11  ;;  %v8552_v27 = vld [vmem:[#allocation4 + $0x620] sm:$0xff]  ;;  %v8555_v17 = vld [vmem:[#allocation4 + $0x630] sm:$0xff] }
 0x635   :  { %2301 = vmatpush2.msra.mxu0 %v8540_v16  ;;  %2372 = vmatpush2.msra.mxu1 %v8543_v33  ;;  %12727 = vst [vmem:[#allocation102_spill] sm:$0xff] %v8552_v27  ;;  %12728 = vst [vmem:[#allocation103_spill] sm:$0xff] %v8555_v17  ;;  %v8558_v16 = vld [vmem:[#allocation4 + $0x5e8] sm:$0xff]  ;;  %v8561_v33 = vld [vmem:[#allocation4 + $0x5f8] sm:$0xff] }
 0x636   :  { %2302 = vmatprep.subr.mxu0 %v8546_v28  ;;  %2373 = vmatprep.subr.mxu1 %v8549_v11  ;;  %12729 = vst [vmem:[#allocation104_spill] sm:$0xff] %v8558_v16  ;;  %12730 = vst [vmem:[#allocation105_spill] sm:$0xff] %v8561_v33  ;;  %v8564_v28 = vld [vmem:[#allocation4 + $0x5e0] sm:$0xff]  ;;  %v8567_v11 = vld [vmem:[#allocation4 + $0x5f0] sm:$0xff] }
 0x637   :  { %2303 = vmatpush2.msra.mxu0 %v8552_v27  ;;  %2374 = vmatpush2.msra.mxu1 %v8555_v17  ;;  %12731 = vst [vmem:[#allocation106_spill] sm:$0xff] %v8564_v28  ;;  %12732 = vst [vmem:[#allocation107_spill] sm:$0xff] %v8567_v11  ;;  %v8570_v27 = vld [vmem:[#allocation4 + $0x5a8] sm:$0xff]  ;;  %v8573_v17 = vld [vmem:[#allocation4 + $0x5b8] sm:$0xff] }
 0x638   :  { %2304 = vmatprep.subr.mxu0 %v8558_v16  ;;  %2375 = vmatprep.subr.mxu1 %v8561_v33  ;;  %12733 = vst [vmem:[#allocation108_spill] sm:$0xff] %v8570_v27  ;;  %12734 = vst [vmem:[#allocation109_spill] sm:$0xff] %v8573_v17  ;;  %v8576_v16 = vld [vmem:[#allocation4 + $0x5a0] sm:$0xff]  ;;  %v8579_v33 = vld [vmem:[#allocation4 + $0x5b0] sm:$0xff] }
 0x639   :  { %2305 = vmatpush2.msra.mxu0 %v8564_v28  ;;  %2376 = vmatpush2.msra.mxu1 %v8567_v11  ;;  %12735 = vst [vmem:[#allocation110_spill] sm:$0xff] %v8576_v16  ;;  %12736 = vst [vmem:[#allocation111_spill] sm:$0xff] %v8579_v33  ;;  %v8582_v28 = vld [vmem:[#allocation4 + $0x568] sm:$0xff]  ;;  %v8585_v11 = vld [vmem:[#allocation4 + $0x578] sm:$0xff] }
 0x63a   :  { %2306 = vmatprep.subr.mxu0 %v8570_v27  ;;  %2377 = vmatprep.subr.mxu1 %v8573_v17  ;;  %12737 = vst [vmem:[#allocation112_spill] sm:$0xff] %v8582_v28  ;;  %12738 = vst [vmem:[#allocation113_spill] sm:$0xff] %v8585_v11  ;;  %v8588_v27 = vld [vmem:[#allocation4 + $0x560] sm:$0xff]  ;;  %v8591_v17 = vld [vmem:[#allocation4 + $0x570] sm:$0xff] }
 0x63b   :  { %2307 = vmatpush2.msra.mxu0 %v8576_v16  ;;  %2378 = vmatpush2.msra.mxu1 %v8579_v33  ;;  %12739 = vst [vmem:[#allocation114_spill] sm:$0xff] %v8588_v27  ;;  %12740 = vst [vmem:[#allocation115_spill] sm:$0xff] %v8591_v17  ;;  %v8594_v16 = vld [vmem:[#allocation4 + $0x528] sm:$0xff]  ;;  %v8597_v33 = vld [vmem:[#allocation4 + $0x538] sm:$0xff] }
 0x63c   :  { %2308 = vmatprep.subr.mxu0 %v8582_v28  ;;  %2379 = vmatprep.subr.mxu1 %v8585_v11  ;;  %12741 = vst [vmem:[#allocation116_spill] sm:$0xff] %v8594_v16  ;;  %12742 = vst [vmem:[#allocation117_spill] sm:$0xff] %v8597_v33  ;;  %v8600_v28 = vld [vmem:[#allocation4 + $0x520] sm:$0xff]  ;;  %v8603_v11 = vld [vmem:[#allocation4 + $0x530] sm:$0xff] }
 0x63d   :  { %2309 = vmatpush2.msra.mxu0 %v8588_v27  ;;  %2380 = vmatpush2.msra.mxu1 %v8591_v17  ;;  %12743 = vst [vmem:[#allocation118_spill] sm:$0xff] %v8600_v28  ;;  %12744 = vst [vmem:[#allocation119_spill] sm:$0xff] %v8603_v11  ;;  %v8606_v27 = vld [vmem:[#allocation4 + $0x4e8] sm:$0xff]  ;;  %v8609_v17 = vld [vmem:[#allocation4 + $0x4f8] sm:$0xff] }
 0x63e   :  { %2310 = vmatprep.subr.mxu0 %v8594_v16  ;;  %2381 = vmatprep.subr.mxu1 %v8597_v33  ;;  %12745 = vst [vmem:[#allocation120_spill] sm:$0xff] %v8606_v27  ;;  %12746 = vst [vmem:[#allocation121_spill] sm:$0xff] %v8609_v17  ;;  %v8612_v16 = vld [vmem:[#allocation4 + $0x4e0] sm:$0xff]  ;;  %v8615_v33 = vld [vmem:[#allocation4 + $0x4f0] sm:$0xff] }
 0x63f   :  { %2311 = vmatpush2.msra.mxu0 %v8600_v28  ;;  %2382 = vmatpush2.msra.mxu1 %v8603_v11  ;;  %12747 = vst [vmem:[#allocation122_spill] sm:$0xff] %v8612_v16  ;;  %12748 = vst [vmem:[#allocation123_spill] sm:$0xff] %v8615_v33  ;;  %v8618_v28 = vld [vmem:[#allocation4 + $0x4a8] sm:$0xff]  ;;  %v8621_v11 = vld [vmem:[#allocation4 + $0x4b8] sm:$0xff] }
 0x640   :  { %2312 = vmatprep.subr.mxu0 %v8606_v27  ;;  %2383 = vmatprep.subr.mxu1 %v8609_v17  ;;  %12749 = vst [vmem:[#allocation124_spill] sm:$0xff] %v8618_v28  ;;  %12750 = vst [vmem:[#allocation125_spill] sm:$0xff] %v8621_v11  ;;  %v8624_v27 = vld [vmem:[#allocation4 + $0x4a0] sm:$0xff]  ;;  %v8627_v17 = vld [vmem:[#allocation4 + $0x4b0] sm:$0xff] }
 0x641   :  { %2313 = vmatpush2.msra.mxu0 %v8612_v16  ;;  %2384 = vmatpush2.msra.mxu1 %v8615_v33  ;;  %12751 = vst [vmem:[#allocation126_spill] sm:$0xff] %v8624_v27  ;;  %12752 = vst [vmem:[#allocation127_spill] sm:$0xff] %v8627_v17  ;;  %v8630_v16 = vld [vmem:[#allocation4 + $0x468] sm:$0xff]  ;;  %v8633_v33 = vld [vmem:[#allocation4 + $0x478] sm:$0xff] }
 0x642   :  { %2314 = vmatprep.subr.mxu0 %v8618_v28  ;;  %2385 = vmatprep.subr.mxu1 %v8621_v11  ;;  %12753 = vst [vmem:[#allocation128_spill] sm:$0xff] %v8630_v16  ;;  %12754 = vst [vmem:[#allocation129_spill] sm:$0xff] %v8633_v33  ;;  %v8636_v28 = vld [vmem:[#allocation4 + $0x460] sm:$0xff]  ;;  %v8639_v11 = vld [vmem:[#allocation4 + $0x470] sm:$0xff] }
 0x643   :  { %2315 = vmatpush2.msra.mxu0 %v8624_v27  ;;  %2386 = vmatpush2.msra.mxu1 %v8627_v17  ;;  %12755 = vst [vmem:[#allocation130_spill] sm:$0xff] %v8639_v11  ;;  %v8642_v27 = vld [vmem:[#allocation4 + $0x428] sm:$0xff]  ;;  %v8645_v17 = vld [vmem:[#allocation4 + $0x438] sm:$0xff] }
 0x644   :  { %2316 = vmatprep.subr.mxu0 %v8630_v16  ;;  %2387 = vmatprep.subr.mxu1 %v8633_v33  ;;  %12756 = vst [vmem:[#allocation131_spill] sm:$0xff] %v8642_v27  ;;  %12757 = vst [vmem:[#allocation132_spill] sm:$0xff] %v8645_v17  ;;  %v8648_v16 = vld [vmem:[#allocation4 + $0x420] sm:$0xff]  ;;  %v8651_v33 = vld [vmem:[#allocation4 + $0x430] sm:$0xff] }
 0x645   :  { %2317 = vmatpush2.msra.mxu0 %v8636_v28  ;;  %2388 = vmatpush2.msra.mxu1 %v8639_v11  ;;  %12758 = vst [vmem:[#allocation133_spill] sm:$0xff] %v8648_v16  ;;  %12759 = vst [vmem:[#allocation134_spill] sm:$0xff] %v8651_v33  ;;  %v8656_v11 = vld [vmem:[#allocation4 + $0x3c8] sm:$0xff] }
 0x646   :  { %2318 = vmatprep.subr.mxu0 %v8642_v27  ;;  %2389 = vmatprep.subr.mxu1 %v8645_v17  ;;  %12760 = vst [vmem:[#allocation135_spill] sm:$0xff] %v8656_v11  ;;  %v8659_v27 = vld [vmem:[#allocation4 + $0x3d8] sm:$0xff]  ;;  %v8662_v17 = vld [vmem:[#allocation4 + $0x3c0] sm:$0xff] }
 0x647   :  { %2319 = vmatpush2.msra.mxu0 %v8648_v16  ;;  %2390 = vmatpush2.msra.mxu1 %v8651_v33  ;;  %12761 = vst [vmem:[#allocation136_spill] sm:$0xff] %v8659_v27  ;;  %12762 = vst [vmem:[#allocation137_spill] sm:$0xff] %v8662_v17  ;;  %v8665_v16 = vld [vmem:[#allocation4 + $0x3d0] sm:$0xff]  ;;  %v8668_v33 = vld [vmem:[#allocation4 + $0x388] sm:$0xff] }
 0x648   :  { %2321 = vmatmul.mubr.f32.vlgmr.msra.gmra.mxu0 %v8272_v7  ;;  %2392 = vmatmul.mubr.f32.vlgmr.msra.gmra.mxu1 %v8272_v7  ;;  %12763 = vst [vmem:[#allocation138_spill] sm:$0xff] %v8665_v16  ;;  %12764 = vst [vmem:[#allocation139_spill] sm:$0xff] %v8668_v33  ;;  %v8671_v7 = vld [vmem:[#allocation4 + $0x398] sm:$0xff] }
 0x649   :  { %2459 = vmatprep.subr.mxu0 %v8656_v11  ;;  %2530 = vmatprep.subr.mxu1 %v8659_v27  ;;  %12765 = vst [vmem:[#allocation140_spill] sm:$0xff] %v8671_v7  ;;  %v8674_v11 = vld [vmem:[#allocation4 + $0x380] sm:$0xff]  ;;  %v8677_v27 = vld [vmem:[#allocation4 + $0x390] sm:$0xff] }
 0x64a   :  { %2460 = vmatpush1.msra.mxu0 %v8662_v17  ;;  %2531 = vmatpush1.msra.mxu1 %v8665_v16  ;;  %12766 = vst [vmem:[#allocation141_spill] sm:$0xff] %v8674_v11  ;;  %12767 = vst [vmem:[#allocation142_spill] sm:$0xff] %v8677_v27  ;;  %v8680_v17 = vld [vmem:[#allocation4 + $0x348] sm:$0xff]  ;;  %v8683_v16 = vld [vmem:[#allocation4 + $0x358] sm:$0xff] }
 0x64b   :  { %2461 = vmatprep.subr.mxu0 %v8668_v33  ;;  %2532 = vmatprep.subr.mxu1 %v8671_v7  ;;  %12768 = vst [vmem:[#allocation143_spill] sm:$0xff] %v8680_v17  ;;  %12769 = vst [vmem:[#allocation144_spill] sm:$0xff] %v8683_v16  ;;  %v8686_v33 = vld [vmem:[#allocation4 + $0x340] sm:$0xff]  ;;  %v8689_v7 = vld [vmem:[#allocation4 + $0x350] sm:$0xff] }
 0x64c   :  { %2462 = vmatpush1.msra.mxu0 %v8674_v11  ;;  %2533 = vmatpush1.msra.mxu1 %v8677_v27  ;;  %12770 = vst [vmem:[#allocation145_spill] sm:$0xff] %v8686_v33  ;;  %12771 = vst [vmem:[#allocation146_spill] sm:$0xff] %v8689_v7  ;;  %v8692_v11 = vld [vmem:[#allocation4 + $0x308] sm:$0xff]  ;;  %v8695_v27 = vld [vmem:[#allocation4 + $0x318] sm:$0xff] }
 0x64d   :  { %2463 = vmatprep.subr.mxu0 %v8680_v17  ;;  %2534 = vmatprep.subr.mxu1 %v8683_v16  ;;  %12772 = vst [vmem:[#allocation147_spill] sm:$0xff] %v8692_v11  ;;  %12773 = vst [vmem:[#allocation148_spill] sm:$0xff] %v8695_v27  ;;  %v8698_v17 = vld [vmem:[#allocation4 + $0x300] sm:$0xff]  ;;  %v8701_v16 = vld [vmem:[#allocation4 + $0x310] sm:$0xff] }
 0x64e   :  { %2464 = vmatpush1.msra.mxu0 %v8686_v33  ;;  %2535 = vmatpush1.msra.mxu1 %v8689_v7  ;;  %12774 = vst [vmem:[#allocation149_spill] sm:$0xff] %v8698_v17  ;;  %12775 = vst [vmem:[#allocation150_spill] sm:$0xff] %v8701_v16  ;;  %v8704_v33 = vld [vmem:[#allocation4 + $0x2c8] sm:$0xff]  ;;  %v8707_v7 = vld [vmem:[#allocation4 + $0x2d8] sm:$0xff] }
 0x64f   :  { %2465 = vmatprep.subr.mxu0 %v8692_v11  ;;  %2536 = vmatprep.subr.mxu1 %v8695_v27  ;;  %12776 = vst [vmem:[#allocation151_spill] sm:$0xff] %v8704_v33  ;;  %12777 = vst [vmem:[#allocation152_spill] sm:$0xff] %v8707_v7  ;;  %v8710_v11 = vld [vmem:[#allocation4 + $0x2c0] sm:$0xff]  ;;  %v8713_v27 = vld [vmem:[#allocation4 + $0x2d0] sm:$0xff] }
 0x650   :  { %2466 = vmatpush1.msra.mxu0 %v8698_v17  ;;  %2537 = vmatpush1.msra.mxu1 %v8701_v16  ;;  %12778 = vst [vmem:[#allocation153_spill] sm:$0xff] %v8710_v11  ;;  %12779 = vst [vmem:[#allocation154_spill] sm:$0xff] %v8713_v27  ;;  %v8716_v17 = vld [vmem:[#allocation4 + $0x288] sm:$0xff]  ;;  %v8719_v16 = vld [vmem:[#allocation4 + $0x298] sm:$0xff] }
 0x651   :  { %2467 = vmatprep.subr.mxu0 %v8704_v33  ;;  %2538 = vmatprep.subr.mxu1 %v8707_v7  ;;  %12780 = vst [vmem:[#allocation155_spill] sm:$0xff] %v8716_v17  ;;  %12781 = vst [vmem:[#allocation156_spill] sm:$0xff] %v8719_v16  ;;  %v8722_v33 = vld [vmem:[#allocation4 + $0x280] sm:$0xff]  ;;  %v8725_v7 = vld [vmem:[#allocation4 + $0x290] sm:$0xff] }
 0x652   :  { %2468 = vmatpush1.msra.mxu0 %v8710_v11  ;;  %2539 = vmatpush1.msra.mxu1 %v8713_v27  ;;  %12782 = vst [vmem:[#allocation157_spill] sm:$0xff] %v8722_v33  ;;  %12783 = vst [vmem:[#allocation158_spill] sm:$0xff] %v8725_v7  ;;  %v8728_v11 = vld [vmem:[#allocation4 + $0x248] sm:$0xff]  ;;  %v8731_v27 = vld [vmem:[#allocation4 + $0x258] sm:$0xff] }
 0x653   :  { %2469 = vmatprep.subr.mxu0 %v8716_v17  ;;  %2540 = vmatprep.subr.mxu1 %v8719_v16  ;;  %12784 = vst [vmem:[#allocation159_spill] sm:$0xff] %v8728_v11  ;;  %12785 = vst [vmem:[#allocation160_spill] sm:$0xff] %v8731_v27  ;;  %v8734_v17 = vld [vmem:[#allocation4 + $0x240] sm:$0xff]  ;;  %v8737_v16 = vld [vmem:[#allocation4 + $0x250] sm:$0xff] }
 0x654   :  { %2470 = vmatpush1.msra.mxu0 %v8722_v33  ;;  %2541 = vmatpush1.msra.mxu1 %v8725_v7  ;;  %12786 = vst [vmem:[#allocation161_spill] sm:$0xff] %v8734_v17  ;;  %12787 = vst [vmem:[#allocation162_spill] sm:$0xff] %v8737_v16  ;;  %v8740_v33 = vld [vmem:[#allocation4 + $0x208] sm:$0xff]  ;;  %v8743_v7 = vld [vmem:[#allocation4 + $0x218] sm:$0xff] }
 0x655   :  { %2471 = vmatprep.subr.mxu0 %v8728_v11  ;;  %2542 = vmatprep.subr.mxu1 %v8731_v27  ;;  %12788 = vst [vmem:[#allocation163_spill] sm:$0xff] %v8740_v33  ;;  %12789 = vst [vmem:[#allocation164_spill] sm:$0xff] %v8743_v7  ;;  %v8746_v11 = vld [vmem:[#allocation4 + $0x200] sm:$0xff]  ;;  %v8749_v27 = vld [vmem:[#allocation4 + $0x210] sm:$0xff] }
 0x656   :  { %2472 = vmatpush1.msra.mxu0 %v8734_v17  ;;  %2543 = vmatpush1.msra.mxu1 %v8737_v16  ;;  %12790 = vst [vmem:[#allocation165_spill] sm:$0xff] %v8746_v11  ;;  %12791 = vst [vmem:[#allocation166_spill] sm:$0xff] %v8749_v27  ;;  %v8752_v17 = vld [vmem:[#allocation4 + $0x1c8] sm:$0xff]  ;;  %v8755_v16 = vld [vmem:[#allocation4 + $0x1d8] sm:$0xff] }
 0x657   :  { %2473 = vmatprep.subr.mxu0 %v8740_v33  ;;  %2544 = vmatprep.subr.mxu1 %v8743_v7  ;;  %12792 = vst [vmem:[#allocation167_spill] sm:$0xff] %v8752_v17  ;;  %12793 = vst [vmem:[#allocation168_spill] sm:$0xff] %v8755_v16  ;;  %v8758_v33 = vld [vmem:[#allocation4 + $0x1c0] sm:$0xff]  ;;  %v8761_v7 = vld [vmem:[#allocation4 + $0x1d0] sm:$0xff] }
 0x658   :  { %2474 = vmatpush1.msra.mxu0 %v8746_v11  ;;  %2545 = vmatpush1.msra.mxu1 %v8749_v27  ;;  %12794 = vst [vmem:[#allocation169_spill] sm:$0xff] %v8758_v33  ;;  %12795 = vst [vmem:[#allocation170_spill] sm:$0xff] %v8761_v7  ;;  %v8764_v11 = vld [vmem:[#allocation4 + $0x188] sm:$0xff]  ;;  %v8767_v27 = vld [vmem:[#allocation4 + $0x198] sm:$0xff] }
 0x659   :  { %2475 = vmatprep.subr.mxu0 %v8752_v17  ;;  %2546 = vmatprep.subr.mxu1 %v8755_v16  ;;  %12796 = vst [vmem:[#allocation171_spill] sm:$0xff] %v8764_v11  ;;  %12797 = vst [vmem:[#allocation172_spill] sm:$0xff] %v8767_v27  ;;  %v8770_v17 = vld [vmem:[#allocation4 + $0x180] sm:$0xff]  ;;  %v8773_v16 = vld [vmem:[#allocation4 + $0x190] sm:$0xff] }
 0x65a   :  { %2476 = vmatpush1.msra.mxu0 %v8758_v33  ;;  %2547 = vmatpush1.msra.mxu1 %v8761_v7  ;;  %12798 = vst [vmem:[#allocation173_spill] sm:$0xff] %v8770_v17  ;;  %12799 = vst [vmem:[#allocation174_spill] sm:$0xff] %v8773_v16  ;;  %v8776_v33 = vld [vmem:[#allocation4 + $0x148] sm:$0xff]  ;;  %v8779_v7 = vld [vmem:[#allocation4 + $0x158] sm:$0xff] }
 0x65b   :  { %2477 = vmatprep.subr.mxu0 %v8764_v11  ;;  %2548 = vmatprep.subr.mxu1 %v8767_v27  ;;  %12800 = vst [vmem:[#allocation175_spill] sm:$0xff] %v8776_v33  ;;  %12801 = vst [vmem:[#allocation176_spill] sm:$0xff] %v8779_v7  ;;  %v8782_v11 = vld [vmem:[#allocation4 + $0x140] sm:$0xff]  ;;  %v8785_v27 = vld [vmem:[#allocation4 + $0x150] sm:$0xff] }
 0x65c   :  { %2478 = vmatpush1.msra.mxu0 %v8770_v17  ;;  %2549 = vmatpush1.msra.mxu1 %v8773_v16  ;;  %12802 = vst [vmem:[#allocation177_spill] sm:$0xff] %v8782_v11  ;;  %12803 = vst [vmem:[#allocation178_spill] sm:$0xff] %v8785_v27  ;;  %v8788_v17 = vld [vmem:[#allocation4 + $0x108] sm:$0xff]  ;;  %v8791_v16 = vld [vmem:[#allocation4 + $0x118] sm:$0xff] }
 0x65d   :  { %2479 = vmatprep.subr.mxu0 %v8776_v33  ;;  %2550 = vmatprep.subr.mxu1 %v8779_v7  ;;  %12804 = vst [vmem:[#allocation179_spill] sm:$0xff] %v8788_v17  ;;  %12805 = vst [vmem:[#allocation180_spill] sm:$0xff] %v8791_v16  ;;  %v8794_v33 = vld [vmem:[#allocation4 + $0x100] sm:$0xff]  ;;  %v8797_v7 = vld [vmem:[#allocation4 + $0x110] sm:$0xff] }
 0x65e   :  { %2480 = vmatpush1.msra.mxu0 %v8782_v11  ;;  %2551 = vmatpush1.msra.mxu1 %v8785_v27  ;;  %12806 = vst [vmem:[#allocation181_spill] sm:$0xff] %v8794_v33  ;;  %12807 = vst [vmem:[#allocation182_spill] sm:$0xff] %v8797_v7  ;;  %v8800_v11 = vld [vmem:[#allocation4 + $0xc8] sm:$0xff]  ;;  %v8803_v27 = vld [vmem:[#allocation4 + $0xd8] sm:$0xff] }
 0x65f   :  { %2481 = vmatprep.subr.mxu0 %v8788_v17  ;;  %2552 = vmatprep.subr.mxu1 %v8791_v16  ;;  %12808 = vst [vmem:[#allocation183_spill] sm:$0xff] %v8800_v11  ;;  %12809 = vst [vmem:[#allocation184_spill] sm:$0xff] %v8803_v27  ;;  %v8806_v17 = vld [vmem:[#allocation4 + $0xc0] sm:$0xff]  ;;  %v8809_v16 = vld [vmem:[#allocation4 + $0xd0] sm:$0xff] }
 0x660   :  { %2482 = vmatpush1.msra.mxu0 %v8794_v33  ;;  %2553 = vmatpush1.msra.mxu1 %v8797_v7  ;;  %12810 = vst [vmem:[#allocation185_spill] sm:$0xff] %v8806_v17  ;;  %12811 = vst [vmem:[#allocation186_spill] sm:$0xff] %v8809_v16  ;;  %v8812_v33 = vld [vmem:[#allocation4 + $0x88] sm:$0xff]  ;;  %v8815_v7 = vld [vmem:[#allocation4 + $0x98] sm:$0xff] }
 0x661   :  { %2483 = vmatprep.subr.mxu0 %v8800_v11  ;;  %2554 = vmatprep.subr.mxu1 %v8803_v27  ;;  %12812 = vst [vmem:[#allocation187_spill] sm:$0xff] %v8812_v33  ;;  %12813 = vst [vmem:[#allocation188_spill] sm:$0xff] %v8815_v7  ;;  %v8818_v11 = vld [vmem:[#allocation4 + $0x80] sm:$0xff]  ;;  %v8821_v27 = vld [vmem:[#allocation4 + $0x90] sm:$0xff] }
 0x662   :  { %2484 = vmatpush1.msra.mxu0 %v8806_v17  ;;  %2555 = vmatpush1.msra.mxu1 %v8809_v16  ;;  %12814 = vst [vmem:[#allocation189_spill] sm:$0xff] %v8818_v11  ;;  %12815 = vst [vmem:[#allocation190_spill] sm:$0xff] %v8821_v27  ;;  %v8824_v17 = vld [vmem:[#allocation4 + $0x48] sm:$0xff]  ;;  %v8827_v16 = vld [vmem:[#allocation4 + $0x58] sm:$0xff] }
 0x663   :  { %2485 = vmatprep.subr.mxu0 %v8812_v33  ;;  %2556 = vmatprep.subr.mxu1 %v8815_v7  ;;  %12816 = vst [vmem:[#allocation191_spill] sm:$0xff] %v8824_v17  ;;  %12817 = vst [vmem:[#allocation192_spill] sm:$0xff] %v8827_v16  ;;  %v8830_v33 = vld [vmem:[#allocation4 + $0x40] sm:$0xff]  ;;  %v8833_v7 = vld [vmem:[#allocation4 + $0x50] sm:$0xff] }
 0x664   :  { %2486 = vmatpush1.msra.mxu0 %v8818_v11  ;;  %2557 = vmatpush1.msra.mxu1 %v8821_v27  ;;  %12818 = vst [vmem:[#allocation193_spill] sm:$0xff] %v8830_v33  ;;  %12819 = vst [vmem:[#allocation194_spill] sm:$0xff] %v8833_v7  ;;  %v8836_v11 = vld [vmem:[#allocation4 + $0x8] sm:$0xff]  ;;  %v8839_v27 = vld [vmem:[#allocation4 + $0x18] sm:$0xff] }
 0x665   :  { %2487 = vmatprep.subr.mxu0 %v8824_v17  ;;  %2558 = vmatprep.subr.mxu1 %v8827_v16  ;;  %12820 = vst [vmem:[#allocation195_spill] sm:$0xff] %v8836_v11  ;;  %12821 = vst [vmem:[#allocation196_spill] sm:$0xff] %v8839_v27  ;;  %v8842_v17 = vld [vmem:[#allocation4] sm:$0xff]  ;;  %v8845_v16 = vld [vmem:[#allocation4 + $0x10] sm:$0xff] }
 0x666   :  { %2488 = vmatpush1.msra.mxu0 %v8830_v33  ;;  %2559 = vmatpush1.msra.mxu1 %v8833_v7  ;;  %12822 = vst [vmem:[#allocation197_spill] sm:$0xff] %v8842_v17  ;;  %12823 = vst [vmem:[#allocation198_spill] sm:$0xff] %v8845_v16  ;;  %v8848_v33 = vld [vmem:[#allocation4 + $0x7c8] sm:$0xff]  ;;  %v8851_v7 = vld [vmem:[#allocation4 + $0x7d8] sm:$0xff] }
 0x667   :  { %2489 = vmatprep.subr.mxu0 %v8836_v11  ;;  %2560 = vmatprep.subr.mxu1 %v8839_v27  ;;  %12824 = vst [vmem:[#allocation199_spill] sm:$0xff] %v8848_v33  ;;  %12825 = vst [vmem:[#allocation200_spill] sm:$0xff] %v8851_v7  ;;  %v8854_v11 = vld [vmem:[#allocation4 + $0x7c0] sm:$0xff]  ;;  %v8857_v27 = vld [vmem:[#allocation4 + $0x7d0] sm:$0xff] }
 0x668   :  { %2490 = vmatpush1.msra.mxu0 %v8842_v17  ;;  %2561 = vmatpush1.msra.mxu1 %v8845_v16  ;;  %12826 = vst [vmem:[#allocation201_spill] sm:$0xff] %v8854_v11  ;;  %12827 = vst [vmem:[#allocation202_spill] sm:$0xff] %v8857_v27  ;;  %v8860_v17 = vld [vmem:[#allocation4 + $0x788] sm:$0xff]  ;;  %v8863_v16 = vld [vmem:[#allocation4 + $0x798] sm:$0xff] }
 0x669   :  { %2491 = vmatprep.subr.mxu0 %v8848_v33  ;;  %2562 = vmatprep.subr.mxu1 %v8851_v7  ;;  %12828 = vst [vmem:[#allocation203_spill] sm:$0xff] %v8860_v17  ;;  %12829 = vst [vmem:[#allocation204_spill] sm:$0xff] %v8863_v16  ;;  %v8866_v33 = vld [vmem:[#allocation4 + $0x780] sm:$0xff]  ;;  %v8869_v7 = vld [vmem:[#allocation4 + $0x790] sm:$0xff] }
 0x66a   :  { %2492 = vmatpush2.msra.mxu0 %v8854_v11  ;;  %2563 = vmatpush2.msra.mxu1 %v8857_v27  ;;  %12830 = vst [vmem:[#allocation205_spill] sm:$0xff] %v8866_v33  ;;  %12831 = vst [vmem:[#allocation206_spill] sm:$0xff] %v8869_v7  ;;  %v8872_v11 = vld [vmem:[#allocation4 + $0x748] sm:$0xff]  ;;  %v8875_v27 = vld [vmem:[#allocation4 + $0x758] sm:$0xff] }
 0x66b   :  { %2493 = vmatprep.subr.mxu0 %v8860_v17  ;;  %2564 = vmatprep.subr.mxu1 %v8863_v16  ;;  %12832 = vst [vmem:[#allocation207_spill] sm:$0xff] %v8872_v11  ;;  %12833 = vst [vmem:[#allocation208_spill] sm:$0xff] %v8875_v27  ;;  %v8878_v17 = vld [vmem:[#allocation4 + $0x740] sm:$0xff]  ;;  %v8881_v16 = vld [vmem:[#allocation4 + $0x750] sm:$0xff] }
 0x66c   :  { %2494 = vmatpush2.msra.mxu0 %v8866_v33  ;;  %2565 = vmatpush2.msra.mxu1 %v8869_v7  ;;  %12834 = vst [vmem:[#allocation209_spill] sm:$0xff] %v8878_v17  ;;  %12835 = vst [vmem:[#allocation240_spill] sm:$0xff] %v8881_v16  ;;  %v8884_v33 = vld [vmem:[#allocation4 + $0x708] sm:$0xff]  ;;  %v8887_v7 = vld [vmem:[#allocation4 + $0x718] sm:$0xff] }
 0x66d   :  { %2495 = vmatprep.subr.mxu0 %v8872_v11  ;;  %2566 = vmatprep.subr.mxu1 %v8875_v27  ;;  %12836 = vst [vmem:[#allocation241_spill] sm:$0xff] %v8884_v33  ;;  %12837 = vst [vmem:[#allocation242_spill] sm:$0xff] %v8887_v7  ;;  %v8890_v11 = vld [vmem:[#allocation4 + $0x700] sm:$0xff]  ;;  %v8893_v27 = vld [vmem:[#allocation4 + $0x710] sm:$0xff] }
 0x66e   :  { %2496 = vmatpush2.msra.mxu0 %v8878_v17  ;;  %2567 = vmatpush2.msra.mxu1 %v8881_v16  ;;  %v8896_v17 = vld [vmem:[#allocation4 + $0x6c8] sm:$0xff]  ;;  %v8899_v16 = vld [vmem:[#allocation4 + $0x6d8] sm:$0xff] }
 0x66f   :  { %2497 = vmatprep.subr.mxu0 %v8884_v33  ;;  %2568 = vmatprep.subr.mxu1 %v8887_v7  ;;  %v8902_v33 = vld [vmem:[#allocation4 + $0x6c0] sm:$0xff]  ;;  %v8905_v7 = vld [vmem:[#allocation4 + $0x6d0] sm:$0xff] }
 0x670   :  { %2498 = vmatpush2.msra.mxu0 %v8890_v11  ;;  %2569 = vmatpush2.msra.mxu1 %v8893_v27 }
 0x671   :  { %2499 = vmatprep.subr.mxu0 %v8896_v17  ;;  %2570 = vmatprep.subr.mxu1 %v8899_v16 }
 0x672   :  { %2500 = vmatpush2.msra.mxu0 %v8902_v33  ;;  %2571 = vmatpush2.msra.mxu1 %v8905_v7 }
 0x673   :  { %2501 = vmatprep.subr.mxu0 %v8114_v47  ;;  %2572 = vmatprep.subr.mxu1 %v8117_v58  ;;  %v12838_v47 = vld [vmem:[#allocation16_spill] sm:$0xff]  ;;  %v12839_v58 = vld [vmem:[#allocation17_spill] sm:$0xff] }
 0x674   :  { %2502 = vmatpush2.msra.mxu0 %v8120_v49  ;;  %2573 = vmatpush2.msra.mxu1 %v8123_v40  ;;  %v12840_v49 = vld [vmem:[#allocation18_spill] sm:$0xff]  ;;  %v12841_v40 = vld [vmem:[#allocation19_spill] sm:$0xff] }
 0x675   :  { %2503 = vmatprep.subr.mxu0 %v8126_v51  ;;  %2574 = vmatprep.subr.mxu1 %v8129_v39  ;;  %v12842_v51 = vld [vmem:[#allocation20_spill] sm:$0xff]  ;;  %v12843_v39 = vld [vmem:[#allocation21_spill] sm:$0xff] }
 0x676   :  { %2504 = vmatpush2.msra.mxu0 %v8132_v53  ;;  %2575 = vmatpush2.msra.mxu1 %v8135_v41  ;;  %v12844_v53 = vld [vmem:[#allocation22_spill] sm:$0xff]  ;;  %v12845_v41 = vld [vmem:[#allocation23_spill] sm:$0xff] }
 0x677   :  { %2505 = vmatprep.subr.mxu0 %v8138_v43  ;;  %2576 = vmatprep.subr.mxu1 %v8141_v45  ;;  %v12846_v43 = vld [vmem:[#allocation24_spill] sm:$0xff]  ;;  %v12847_v45 = vld [vmem:[#allocation213_spill] sm:$0xff] }
 0x678   :  { %2506 = vmatpush2.msra.mxu0 %v8144_v48  ;;  %2577 = vmatpush2.msra.mxu1 %v8147_v57  ;;  %v235_v48 = vadd.f32 %v12847_v45, %v12018_v15 }
 0x679   :  { %2507 = vmatprep.subr.mxu0 %v8150_v60  ;;  %2578 = vmatprep.subr.mxu1 %v8153_v62  ;;  %v12848_v60 = vld [vmem:[#allocation215_spill] sm:$0xff] }
 0x67a   :  { %2508 = vmatpush2.msra.mxu0 %v8156_v36  ;;  %2579 = vmatpush2.msra.mxu1 %v8159_v12  ;;  %v237_v62 = vadd.f32 %v12848_v60, %v12017_v13 }
 0x67b   :  { %2509 = vmatprep.subr.mxu0 %v8162_v14  ;;  %2580 = vmatprep.subr.mxu1 %v8165_v4 }
 0x67c   :  { %2510 = vmatpush2.msra.mxu0 %v8168_v2  ;;  %2581 = vmatpush2.msra.mxu1 %v8171_v34 }
 0x67d   :  { %2511 = vmatprep.subr.mxu0 %v8174_v46  ;;  %2582 = vmatprep.subr.mxu1 %v8177_v55  ;;  %v12849_v46 = vld [vmem:[#allocation222_spill] sm:$0xff] }
 0x67e   :  { %2512 = vmatpush2.msra.mxu0 %v8180_v23  ;;  %2583 = vmatpush2.msra.mxu1 %v8183_v29  ;;  %v360_v55 = vadd.f32 %v12849_v46, %v6033_v30 }
 0x67f   :  { %2513 = vmatprep.subr.mxu0 %v8186_v31  ;;  %2584 = vmatprep.subr.mxu1 %v8189_v21 }
 0x680   :  { %2514 = vmatpush2.msra.mxu0 %v8192_v50  ;;  %2585 = vmatpush2.msra.mxu1 %v8195_v54 }
 0x681   :  { %2515 = vmatprep.subr.mxu0 %v8198_v18  ;;  %2586 = vmatprep.subr.mxu1 %v8201_v20 }
 0x682   :  { %2516 = vmatpush2.msra.mxu0 %v8204_v22  ;;  %2587 = vmatpush2.msra.mxu1 %v8207_v38 }
 0x683   :  { %2517 = vmatprep.subr.mxu0 %v8210_v44  ;;  %2588 = vmatprep.subr.mxu1 %v8213_v5 }
 0x684   :  { %2518 = vmatpush2.msra.mxu0 %v8216_v25  ;;  %2589 = vmatpush2.msra.mxu1 %v8219_v19 }
 0x685   :  { %2519 = vmatprep.subr.mxu0 %v8222_v59  ;;  %2590 = vmatprep.subr.mxu1 %v12838_v47 }
 0x686   :  { %2520 = vmatpush2.msra.mxu0 %v12839_v58  ;;  %2591 = vmatpush2.msra.mxu1 %v12840_v49 }
 0x687   :  { %2521 = vmatprep.subr.mxu0 %v12841_v40  ;;  %2592 = vmatprep.subr.mxu1 %v12842_v51  ;;  %v12850_v51 = vld [vmem:[#allocation224_spill] sm:$0xff] }
 0x688   :  { %2522 = vmatpush2.msra.mxu0 %v12843_v39  ;;  %2593 = vmatpush2.msra.mxu1 %v12844_v53  ;;  %v362_v39 = vadd.f32 %v12850_v51, %v6029_v10  ;;  %v12873_v51 = vld [vmem:[#allocation41_spill] sm:$0xff] }
 0x689   :  { %2601 = vmatprep.subr.mxu0 %v12845_v41  ;;  %2672 = vmatprep.subr.mxu1 %v12846_v43 }
 0x6c7   :  { %v2180_v57 = vpop.f32.mrf.mxu0  ;;  %v2251_v34 = vpop.f32.mrf.mxu1 }
 0x6c8   :  { %v2431_v36 = vadd.f32 %v2180_v57, %v235_v48  ;;  %v2433_v23 = vadd.f32 %v2251_v34, %v360_v55 }
 0x6c9   :  { %v2182_v12 = vpop.f32.mrf.mxu0  ;;  %v2253_v59 = vpop.f32.mrf.mxu1 }
 0x6ca   :  { %v4200_v14 = vmul.f32 -1.442695, %v2431_v36  ;;  %v2432_v4 = vadd.f32 %v2182_v12, %v237_v62  ;;  %v2434_v41 = vadd.f32 %v2253_v59, %v362_v39  ;;  %v12868_v59 = vld [vmem:[#allocation36_spill] sm:$0xff]  ;;  %v12874_v39 = vld [vmem:[#allocation42_spill] sm:$0xff] }
 0x6cc   :  { %4477 = vpow2.f32 %v4200_v14  ;;  %v4201_v2 = vmul.f32 -1.442695, %v2432_v4  ;;  %v4202_v45 = vmul.f32 -1.442695, %v2434_v41  ;;  %v12876_v41 = vld [vmem:[#allocation44_spill] sm:$0xff] }
 0x6ce   :  { %4479 = vpow2.f32 %v4201_v2 }
 0x6cf   :  { %4481 = vtanh.f32 %v2433_v23 }
 0x6d9   :  { %v4478_v29 = vpop.eup %4477 }
 0x6da   :  { %v2438_v31 = vadd.f32 1.0, %v4478_v29 }
 0x6db   :  { %v4480_v21 = vpop.eup %4479 }
 0x6dc   :  { %4483 = vrcp.f32 %v2438_v31  ;;  %v2444_v50 = vadd.f32 1.0, %v4480_v21  ;;  %v4482_v54 = vpop.eup %4481 }
 0x6de   :  { %4485 = vrcp.f32 %v2444_v50 }
 0x6e9   :  { %v4484_v18 = vpop.eup %4483 }
 0x6ea   :  { %v2455_v20 = vmul.f32 %v4484_v18, %v4482_v54 }
 0x6eb   :  { %v4486_v22 = vpop.eup %4485 }
 0x6ec   :  { %v2454_v38 = vmul.f32 %v4486_v22, %v8259_v26  ;;  %v12851_v26 = vld [vmem:[#allocation238_spill] sm:$0xff] }
 0x6ee   :  { %v8961_v44 = vadd.f32 %v2455_v20, %v2454_v38 }
 0x708   :  { %v2322_v5 = vpop.f32.mrf.mxu0  ;;  %v2393_v49 = vpop.f32.mrf.mxu1 }
 0x709   :  { %v2398_v25 = vadd.f32 %v2322_v5, %v6795_v3  ;;  %v2400_v60 = vadd.f32 %v2393_v49, %v6812_v35  ;;  %v12865_v5 = vld [vmem:[#allocation33_spill] sm:$0xff]  ;;  %v12871_v49 = vld [vmem:[#allocation39_spill] sm:$0xff] }
 0x70a   :  { %v2324_v19 = vpop.f32.mrf.mxu0  ;;  %v2395_v53 = vpop.f32.mrf.mxu1 }
 0x70b   :  { %v4197_v47 = vmul.f32 -1.442695, %v2398_v25  ;;  %v2399_v58 = vadd.f32 %v2324_v19, %v6799_v9  ;;  %v2401_v43 = vadd.f32 %v2395_v53, %v12851_v26  ;;  %v12866_v25 = vld [vmem:[#allocation34_spill] sm:$0xff]  ;;  %v12867_v19 = vld [vmem:[#allocation35_spill] sm:$0xff] }
 0x70c   :  { %v12875_v53 = vld [vmem:[#allocation43_spill] sm:$0xff] }
 0x70d   :  { %4487 = vpow2.f32 %v4197_v47  ;;  %v4198_v40 = vmul.f32 -1.442695, %v2399_v58  ;;  %v4199_v48 = vmul.f32 -1.442695, %v2401_v43  ;;  %v12869_v47 = vld [vmem:[#allocation37_spill] sm:$0xff]  ;;  %v12870_v58 = vld [vmem:[#allocation38_spill] sm:$0xff] }
 0x70e   :  { %v12877_v43 = vld [vmem:[#allocation45_spill] sm:$0xff] }
 0x70f   :  { %4489 = vpow2.f32 %v4198_v40  ;;  %v12872_v40 = vld [vmem:[#allocation40_spill] sm:$0xff] }
 0x710   :  { %4491 = vpow2.f32 %v4202_v45  ;;  %v12878_v45 = vld [vmem:[#allocation46_spill] sm:$0xff] }
 0x711   :  { %4493 = vpow2.f32 %v4199_v48  ;;  %v12879_v48 = vld [vmem:[#allocation47_spill] sm:$0xff] }
 0x71a   :  { %v4488_v57 = vpop.eup %4487 }
 0x71b   :  { %v2405_v62 = vadd.f32 1.0, %v4488_v57  ;;  %v12880_v57 = vld [vmem:[#allocation48_spill] sm:$0xff] }
 0x71c   :  { %v4490_v36 = vpop.eup %4489 }
 0x71d   :  { %4495 = vrcp.f32 %v2405_v62  ;;  %v2411_v12 = vadd.f32 1.0, %v4490_v36  ;;  %v4492_v14 = vpop.eup %4491  ;;  %v12882_v62 = vld [vmem:[#allocation50_spill] sm:$0xff]  ;;  %v12883_v36 = vld [vmem:[#allocation51_spill] sm:$0xff] }
 0x71e   :  { %4497 = vtanh.f32 %v2400_v60  ;;  %v4494_v4 = vpop.eup %4493  ;;  %v2451_v31 = vadd.f32 1.0, %v4492_v14  ;;  %v12881_v60 = vld [vmem:[#allocation49_spill] sm:$0xff] }
 0x71f   :  { %4499 = vrcp.f32 %v2411_v12  ;;  %v2418_v55 = vadd.f32 1.0, %v4494_v4  ;;  %v12884_v12 = vld [vmem:[#allocation52_spill] sm:$0xff]  ;;  %v12885_v14 = vld [vmem:[#allocation53_spill] sm:$0xff]  ;;  %v12886_v4 = vld [vmem:[#allocation54_spill] sm:$0xff] }
 0x720   :  { %4501 = vtanh.f32 %v8961_v44 }
 0x721   :  { %4503 = vrcp.f32 %v2418_v55  ;;  %v12890_v55 = vld [vmem:[#allocation58_spill] sm:$0xff] }
 0x72a   :  { %v4496_v2 = vpop.eup %4495 }
 0x72b   :  { %v4498_v34 = vpop.eup %4497 }
 0x72c   :  { %v4500_v46 = vpop.eup %4499  ;;  %v2422_v23 = vmul.f32 %v4498_v34, %v4496_v2  ;;  %v12887_v2 = vld [vmem:[#allocation55_spill] sm:$0xff]  ;;  %v12888_v34 = vld [vmem:[#allocation56_spill] sm:$0xff] }
 0x72d   :  { %v2421_v29 = vmul.f32 %v4500_v46, %v8268_v63  ;;  %v4502_v50 = vpop.eup %4501  ;;  %v12853_v63 = vld [vmem:[#allocation25_spill] sm:$0xff] }
 0x72e   :  { %v4504_v54 = vpop.eup %4503  ;;  %v12889_v46 = vld [vmem:[#allocation57_spill] sm:$0xff] }
 0x72f   :  { %v8970_v21 = vadd.f32 %v2422_v23, %v2421_v29  ;;  %v12891_v23 = vld [vmem:[#allocation59_spill] sm:$0xff]  ;;  %v12892_v29 = vld [vmem:[#allocation60_spill] sm:$0xff] }
 0x731   :  { %4505 = vtanh.f32 %v8970_v21 }
 0x732   :  { %4507 = vrcp.f32 %v2451_v31  ;;  %v12893_v31 = vld [vmem:[#allocation61_spill] sm:$0xff] }
 0x73e   :  { %v4506_v18 = vpop.eup %4505 }
 0x73f   :  { %v4508_v20 = vpop.eup %4507  ;;  %v8974_v22 = vmul.f32 %v4506_v18, %v4504_v54  ;;  %v12895_v54 = vld [vmem:[#allocation63_spill] sm:$0xff]  ;;  %v12896_v18 = vld [vmem:[#allocation64_spill] sm:$0xff] }
 0x740   :  { %v8976_v38 = vmul.f32 %v4508_v20, %v4502_v50  ;;  %v12894_v50 = vld [vmem:[#allocation62_spill] sm:$0xff]  ;;  %v12897_v20 = vld [vmem:[#allocation65_spill] sm:$0xff] }
 0x741   :  { %12852 = vst [vmem:[#allocation243_spill] sm:$0xff] %v8974_v22  ;;  %2523 = vmatprep.mubr.f32.mxu0 %v8974_v22  ;;  %2594 = vmatprep.mubr.f32.mxu1 %v8974_v22 }
 0x742   :  { %2524 = vmatmul.mubr.f32.vlgmr.msra.gmra.mxu0 %v8976_v38  ;;  %2595 = vmatmul.mubr.f32.vlgmr.msra.gmra.mxu1 %v8976_v38 }
 0x743   :  { %2602 = vmatpush1.msra.mxu0 %v8276_v24  ;;  %2673 = vmatpush1.msra.mxu1 %v8279_v52  ;;  %v12854_v24 = vld [vmem:[#allocation10_spill] sm:$0xff] }
 0x744   :  { %2603 = vmatprep.subr.mxu0 %v8282_v61  ;;  %2665 = vmatprep.mubr.f32.mxu0 %v8974_v22  ;;  %v12855_v52 = vld [vmem:[#allocation210_spill] sm:$0xff] }
 0x745   :  { %2674 = vmatprep.subr.mxu1 %v8285_v6  ;;  %2736 = vmatprep.mubr.f32.mxu1 %v8974_v22  ;;  %v12856_v61 = vld [vmem:[#allocation214_spill] sm:$0xff]  ;;  %v12857_v6 = vld [vmem:[#allocation216_spill] sm:$0xff] }
 0x746   :  { %2604 = vmatpush1.msra.mxu0 %v8288_v8  ;;  %2675 = vmatpush1.msra.mxu1 %v8291_v0  ;;  %v12858_v8 = vld [vmem:[#allocation26_spill] sm:$0xff]  ;;  %v12859_v0 = vld [vmem:[#allocation27_spill] sm:$0xff] }
 0x747   :  { %2605 = vmatprep.subr.mxu0 %v8294_v37  ;;  %2676 = vmatprep.subr.mxu1 %v8297_v1  ;;  %v12860_v37 = vld [vmem:[#allocation28_spill] sm:$0xff]  ;;  %v12861_v1 = vld [vmem:[#allocation29_spill] sm:$0xff] }
 0x748   :  { %2606 = vmatpush1.msra.mxu0 %v8300_v56  ;;  %2677 = vmatpush1.msra.mxu1 %v8303_v42  ;;  %v12862_v56 = vld [vmem:[#allocation30_spill] sm:$0xff]  ;;  %v12863_v42 = vld [vmem:[#allocation31_spill] sm:$0xff] }
 0x749   :  { %2607 = vmatprep.subr.mxu0 %v8306_v32  ;;  %2678 = vmatprep.subr.mxu1 %v12853_v63  ;;  %v12864_v32 = vld [vmem:[#allocation32_spill] sm:$0xff]  ;;  %v12898_v63 = vld [vmem:[#allocation66_spill] sm:$0xff] }
 0x74a   :  { %2608 = vmatpush1.msra.mxu0 %v12854_v24  ;;  %2679 = vmatpush1.msra.mxu1 %v12855_v52  ;;  %v12899_v24 = vld [vmem:[#allocation67_spill] sm:$0xff]  ;;  %v12900_v52 = vld [vmem:[#allocation68_spill] sm:$0xff] }
 0x74b   :  { %2609 = vmatprep.subr.mxu0 %v12856_v61  ;;  %2680 = vmatprep.subr.mxu1 %v12857_v6  ;;  %v12901_v61 = vld [vmem:[#allocation69_spill] sm:$0xff]  ;;  %v12902_v6 = vld [vmem:[#allocation70_spill] sm:$0xff] }
 0x74c   :  { %2610 = vmatpush1.msra.mxu0 %v12858_v8  ;;  %2681 = vmatpush1.msra.mxu1 %v12859_v0  ;;  %v12903_v8 = vld [vmem:[#allocation71_spill] sm:$0xff]  ;;  %v12904_v0 = vld [vmem:[#allocation72_spill] sm:$0xff] }
 0x74d   :  { %2611 = vmatprep.subr.mxu0 %v12860_v37  ;;  %2682 = vmatprep.subr.mxu1 %v12861_v1  ;;  %v12905_v37 = vld [vmem:[#allocation73_spill] sm:$0xff]  ;;  %v12906_v1 = vld [vmem:[#allocation74_spill] sm:$0xff] }
 0x74e   :  { %2612 = vmatpush1.msra.mxu0 %v12862_v56  ;;  %2683 = vmatpush1.msra.mxu1 %v12863_v42  ;;  %v12907_v56 = vld [vmem:[#allocation75_spill] sm:$0xff]  ;;  %v12908_v42 = vld [vmem:[#allocation76_spill] sm:$0xff] }
 0x74f   :  { %2613 = vmatprep.subr.mxu0 %v12864_v32  ;;  %2684 = vmatprep.subr.mxu1 %v12865_v5  ;;  %v12909_v32 = vld [vmem:[#allocation77_spill] sm:$0xff]  ;;  %v12910_v5 = vld [vmem:[#allocation78_spill] sm:$0xff] }
 0x750   :  { %2614 = vmatpush1.msra.mxu0 %v12866_v25  ;;  %2685 = vmatpush1.msra.mxu1 %v12867_v19  ;;  %v12911_v25 = vld [vmem:[#allocation79_spill] sm:$0xff]  ;;  %v12912_v19 = vld [vmem:[#allocation80_spill] sm:$0xff] }
 0x751   :  { %2615 = vmatprep.subr.mxu0 %v12868_v59  ;;  %2686 = vmatprep.subr.mxu1 %v12869_v47  ;;  %v12913_v59 = vld [vmem:[#allocation81_spill] sm:$0xff]  ;;  %v12914_v47 = vld [vmem:[#allocation82_spill] sm:$0xff] }
 0x752   :  { %2616 = vmatpush1.msra.mxu0 %v12870_v58  ;;  %2687 = vmatpush1.msra.mxu1 %v12871_v49  ;;  %v12915_v58 = vld [vmem:[#allocation83_spill] sm:$0xff]  ;;  %v12916_v49 = vld [vmem:[#allocation84_spill] sm:$0xff] }
 0x753   :  { %2617 = vmatprep.subr.mxu0 %v12872_v40  ;;  %2688 = vmatprep.subr.mxu1 %v12873_v51  ;;  %v12917_v40 = vld [vmem:[#allocation85_spill] sm:$0xff]  ;;  %v12918_v51 = vld [vmem:[#allocation86_spill] sm:$0xff] }
 0x754   :  { %2618 = vmatpush1.msra.mxu0 %v12874_v39  ;;  %2689 = vmatpush1.msra.mxu1 %v12875_v53  ;;  %v12919_v39 = vld [vmem:[#allocation87_spill] sm:$0xff]  ;;  %v12920_v53 = vld [vmem:[#allocation88_spill] sm:$0xff] }
 0x755   :  { %2619 = vmatprep.subr.mxu0 %v12876_v41  ;;  %2690 = vmatprep.subr.mxu1 %v12877_v43  ;;  %v12921_v41 = vld [vmem:[#allocation89_spill] sm:$0xff]  ;;  %v12922_v43 = vld [vmem:[#allocation90_spill] sm:$0xff] }
 0x756   :  { %2620 = vmatpush1.msra.mxu0 %v12878_v45  ;;  %2691 = vmatpush1.msra.mxu1 %v12879_v48  ;;  %v12923_v45 = vld [vmem:[#allocation91_spill] sm:$0xff]  ;;  %v12924_v48 = vld [vmem:[#allocation92_spill] sm:$0xff] }
 0x757   :  { %2621 = vmatprep.subr.mxu0 %v12880_v57  ;;  %2692 = vmatprep.subr.mxu1 %v12881_v60  ;;  %v12925_v57 = vld [vmem:[#allocation93_spill] sm:$0xff]  ;;  %v12926_v60 = vld [vmem:[#allocation94_spill] sm:$0xff] }
 0x758   :  { %2622 = vmatpush1.msra.mxu0 %v12882_v62  ;;  %2693 = vmatpush1.msra.mxu1 %v12883_v36  ;;  %v12927_v62 = vld [vmem:[#allocation95_spill] sm:$0xff]  ;;  %v12928_v36 = vld [vmem:[#allocation96_spill] sm:$0xff] }
 0x759   :  { %2623 = vmatprep.subr.mxu0 %v12884_v12  ;;  %2694 = vmatprep.subr.mxu1 %v12885_v14  ;;  %v12929_v12 = vld [vmem:[#allocation97_spill] sm:$0xff]  ;;  %v12930_v14 = vld [vmem:[#allocation98_spill] sm:$0xff] }
 0x75a   :  { %2624 = vmatpush1.msra.mxu0 %v12886_v4  ;;  %2695 = vmatpush1.msra.mxu1 %v12887_v2  ;;  %v12931_v4 = vld [vmem:[#allocation99_spill] sm:$0xff]  ;;  %v12932_v2 = vld [vmem:[#allocation100_spill] sm:$0xff] }
 0x75b   :  { %2625 = vmatprep.subr.mxu0 %v12888_v34  ;;  %2696 = vmatprep.subr.mxu1 %v12889_v46  ;;  %v12933_v34 = vld [vmem:[#allocation101_spill] sm:$0xff]  ;;  %v12934_v46 = vld [vmem:[#allocation102_spill] sm:$0xff] }
 0x75c   :  { %2626 = vmatpush1.msra.mxu0 %v12890_v55  ;;  %2697 = vmatpush1.msra.mxu1 %v12891_v23  ;;  %v12935_v55 = vld [vmem:[#allocation103_spill] sm:$0xff]  ;;  %v12936_v23 = vld [vmem:[#allocation104_spill] sm:$0xff] }
 0x75d   :  { %2627 = vmatprep.subr.mxu0 %v12892_v29  ;;  %2698 = vmatprep.subr.mxu1 %v12893_v31  ;;  %v12937_v29 = vld [vmem:[#allocation105_spill] sm:$0xff]  ;;  %v12938_v31 = vld [vmem:[#allocation106_spill] sm:$0xff] }
 0x75e   :  { %2628 = vmatpush1.msra.mxu0 %v12894_v50  ;;  %2699 = vmatpush1.msra.mxu1 %v12895_v54  ;;  %v12939_v50 = vld [vmem:[#allocation107_spill] sm:$0xff]  ;;  %v12940_v54 = vld [vmem:[#allocation108_spill] sm:$0xff] }
 0x75f   :  { %2629 = vmatprep.subr.mxu0 %v12896_v18  ;;  %2700 = vmatprep.subr.mxu1 %v12897_v20  ;;  %v12941_v18 = vld [vmem:[#allocation109_spill] sm:$0xff]  ;;  %v12942_v20 = vld [vmem:[#allocation110_spill] sm:$0xff] }
 0x760   :  { %2630 = vmatpush1.msra.mxu0 %v12898_v63  ;;  %2701 = vmatpush1.msra.mxu1 %v12899_v24  ;;  %v12943_v63 = vld [vmem:[#allocation111_spill] sm:$0xff]  ;;  %v12944_v24 = vld [vmem:[#allocation112_spill] sm:$0xff] }
 0x761   :  { %2631 = vmatprep.subr.mxu0 %v12900_v52  ;;  %2702 = vmatprep.subr.mxu1 %v12901_v61  ;;  %v12945_v52 = vld [vmem:[#allocation113_spill] sm:$0xff]  ;;  %v12946_v61 = vld [vmem:[#allocation114_spill] sm:$0xff] }
 0x762   :  { %2632 = vmatpush1.msra.mxu0 %v12902_v6  ;;  %2703 = vmatpush1.msra.mxu1 %v12903_v8  ;;  %v12947_v6 = vld [vmem:[#allocation115_spill] sm:$0xff]  ;;  %v12948_v8 = vld [vmem:[#allocation116_spill] sm:$0xff] }
 0x763   :  { %2633 = vmatprep.subr.mxu0 %v12904_v0  ;;  %2704 = vmatprep.subr.mxu1 %v12905_v37  ;;  %v12949_v0 = vld [vmem:[#allocation117_spill] sm:$0xff]  ;;  %v12950_v37 = vld [vmem:[#allocation118_spill] sm:$0xff] }
 0x764   :  { %2634 = vmatpush2.msra.mxu0 %v12906_v1  ;;  %2705 = vmatpush2.msra.mxu1 %v12907_v56  ;;  %v12951_v1 = vld [vmem:[#allocation119_spill] sm:$0xff]  ;;  %v12952_v56 = vld [vmem:[#allocation120_spill] sm:$0xff] }
 0x765   :  { %2635 = vmatprep.subr.mxu0 %v12908_v42  ;;  %2706 = vmatprep.subr.mxu1 %v12909_v32  ;;  %v12953_v42 = vld [vmem:[#allocation121_spill] sm:$0xff]  ;;  %v12954_v32 = vld [vmem:[#allocation122_spill] sm:$0xff] }
 0x766   :  { %2636 = vmatpush2.msra.mxu0 %v12910_v5  ;;  %2707 = vmatpush2.msra.mxu1 %v12911_v25  ;;  %v12955_v5 = vld [vmem:[#allocation123_spill] sm:$0xff]  ;;  %v12956_v25 = vld [vmem:[#allocation124_spill] sm:$0xff] }
 0x767   :  { %2637 = vmatprep.subr.mxu0 %v12912_v19  ;;  %2708 = vmatprep.subr.mxu1 %v12913_v59  ;;  %v12957_v19 = vld [vmem:[#allocation125_spill] sm:$0xff]  ;;  %v12958_v59 = vld [vmem:[#allocation126_spill] sm:$0xff] }
 0x768   :  { %2638 = vmatpush2.msra.mxu0 %v12914_v47  ;;  %2709 = vmatpush2.msra.mxu1 %v12915_v58  ;;  %v12959_v47 = vld [vmem:[#allocation127_spill] sm:$0xff]  ;;  %v12960_v58 = vld [vmem:[#allocation128_spill] sm:$0xff] }
 0x769   :  { %2639 = vmatprep.subr.mxu0 %v12916_v49  ;;  %2710 = vmatprep.subr.mxu1 %v12917_v40  ;;  %v12961_v49 = vld [vmem:[#allocation129_spill] sm:$0xff]  ;;  %v12962_v40 = vld [vmem:[#allocation130_spill] sm:$0xff] }
 0x76a   :  { %2640 = vmatpush2.msra.mxu0 %v12918_v51  ;;  %2711 = vmatpush2.msra.mxu1 %v12919_v39  ;;  %v12963_v51 = vld [vmem:[#allocation131_spill] sm:$0xff]  ;;  %v12964_v39 = vld [vmem:[#allocation132_spill] sm:$0xff] }
 0x76b   :  { %2641 = vmatprep.subr.mxu0 %v12920_v53  ;;  %2712 = vmatprep.subr.mxu1 %v12921_v41  ;;  %v12965_v53 = vld [vmem:[#allocation133_spill] sm:$0xff]  ;;  %v12966_v41 = vld [vmem:[#allocation134_spill] sm:$0xff] }
 0x76c   :  { %2642 = vmatpush2.msra.mxu0 %v12922_v43  ;;  %2713 = vmatpush2.msra.mxu1 %v12923_v45  ;;  %v12967_v43 = vld [vmem:[#allocation135_spill] sm:$0xff]  ;;  %v12968_v45 = vld [vmem:[#allocation136_spill] sm:$0xff] }
 0x76d   :  { %2643 = vmatprep.subr.mxu0 %v12924_v48  ;;  %2714 = vmatprep.subr.mxu1 %v12925_v57  ;;  %v12969_v48 = vld [vmem:[#allocation137_spill] sm:$0xff]  ;;  %v12971_v57 = vld [vmem:[#allocation139_spill] sm:$0xff] }
 0x76e   :  { %2644 = vmatpush2.msra.mxu0 %v12926_v60  ;;  %2715 = vmatpush2.msra.mxu1 %v12927_v62  ;;  %v12972_v60 = vld [vmem:[#allocation140_spill] sm:$0xff]  ;;  %v12973_v62 = vld [vmem:[#allocation141_spill] sm:$0xff] }
 0x76f   :  { %2645 = vmatprep.subr.mxu0 %v12928_v36  ;;  %2716 = vmatprep.subr.mxu1 %v12929_v12  ;;  %v12974_v36 = vld [vmem:[#allocation142_spill] sm:$0xff]  ;;  %v12975_v12 = vld [vmem:[#allocation143_spill] sm:$0xff] }
 0x770   :  { %2646 = vmatpush2.msra.mxu0 %v12930_v14  ;;  %2717 = vmatpush2.msra.mxu1 %v12931_v4  ;;  %v12976_v14 = vld [vmem:[#allocation144_spill] sm:$0xff]  ;;  %v12978_v4 = vld [vmem:[#allocation146_spill] sm:$0xff] }
 0x771   :  { %2647 = vmatprep.subr.mxu0 %v12932_v2  ;;  %2718 = vmatprep.subr.mxu1 %v12933_v34  ;;  %v12979_v2 = vld [vmem:[#allocation147_spill] sm:$0xff]  ;;  %v12980_v34 = vld [vmem:[#allocation148_spill] sm:$0xff] }
 0x772   :  { %2648 = vmatpush2.msra.mxu0 %v12934_v46  ;;  %2719 = vmatpush2.msra.mxu1 %v12935_v55  ;;  %v12981_v46 = vld [vmem:[#allocation149_spill] sm:$0xff]  ;;  %v12982_v55 = vld [vmem:[#allocation150_spill] sm:$0xff] }
 0x773   :  { %2649 = vmatprep.subr.mxu0 %v12936_v23  ;;  %2720 = vmatprep.subr.mxu1 %v12937_v29  ;;  %v12983_v23 = vld [vmem:[#allocation151_spill] sm:$0xff]  ;;  %v12984_v29 = vld [vmem:[#allocation152_spill] sm:$0xff] }
 0x774   :  { %2650 = vmatpush2.msra.mxu0 %v12938_v31  ;;  %2721 = vmatpush2.msra.mxu1 %v12939_v50  ;;  %v12985_v31 = vld [vmem:[#allocation153_spill] sm:$0xff]  ;;  %v12986_v50 = vld [vmem:[#allocation154_spill] sm:$0xff] }
 0x775   :  { %2651 = vmatprep.subr.mxu0 %v12940_v54  ;;  %2722 = vmatprep.subr.mxu1 %v12941_v18  ;;  %v12987_v54 = vld [vmem:[#allocation155_spill] sm:$0xff]  ;;  %v12988_v18 = vld [vmem:[#allocation156_spill] sm:$0xff] }
 0x776   :  { %2652 = vmatpush2.msra.mxu0 %v12942_v20  ;;  %2723 = vmatpush2.msra.mxu1 %v12943_v63  ;;  %v12989_v20 = vld [vmem:[#allocation157_spill] sm:$0xff]  ;;  %v12990_v63 = vld [vmem:[#allocation158_spill] sm:$0xff] }
 0x777   :  { %2653 = vmatprep.subr.mxu0 %v12944_v24  ;;  %2724 = vmatprep.subr.mxu1 %v12945_v52  ;;  %v12991_v24 = vld [vmem:[#allocation159_spill] sm:$0xff]  ;;  %v12992_v52 = vld [vmem:[#allocation160_spill] sm:$0xff] }
 0x778   :  { %2654 = vmatpush2.msra.mxu0 %v12946_v61  ;;  %2725 = vmatpush2.msra.mxu1 %v12947_v6  ;;  %v12993_v61 = vld [vmem:[#allocation161_spill] sm:$0xff]  ;;  %v12994_v6 = vld [vmem:[#allocation162_spill] sm:$0xff] }
 0x779   :  { %2655 = vmatprep.subr.mxu0 %v12948_v8  ;;  %2726 = vmatprep.subr.mxu1 %v12949_v0  ;;  %v12995_v8 = vld [vmem:[#allocation163_spill] sm:$0xff]  ;;  %v12996_v0 = vld [vmem:[#allocation164_spill] sm:$0xff] }
 0x77a   :  { %2656 = vmatpush2.msra.mxu0 %v12950_v37  ;;  %2727 = vmatpush2.msra.mxu1 %v12951_v1  ;;  %v12997_v37 = vld [vmem:[#allocation165_spill] sm:$0xff]  ;;  %v12998_v1 = vld [vmem:[#allocation166_spill] sm:$0xff] }
 0x77b   :  { %2657 = vmatprep.subr.mxu0 %v12952_v56  ;;  %2728 = vmatprep.subr.mxu1 %v12953_v42  ;;  %v12999_v56 = vld [vmem:[#allocation167_spill] sm:$0xff]  ;;  %v13000_v42 = vld [vmem:[#allocation168_spill] sm:$0xff] }
 0x77c   :  { %2658 = vmatpush2.msra.mxu0 %v12954_v32  ;;  %2729 = vmatpush2.msra.mxu1 %v12955_v5  ;;  %v13001_v32 = vld [vmem:[#allocation169_spill] sm:$0xff]  ;;  %v13002_v5 = vld [vmem:[#allocation170_spill] sm:$0xff] }
 0x77d   :  { %2659 = vmatprep.subr.mxu0 %v12956_v25  ;;  %2730 = vmatprep.subr.mxu1 %v12957_v19  ;;  %v13003_v25 = vld [vmem:[#allocation171_spill] sm:$0xff]  ;;  %v13004_v19 = vld [vmem:[#allocation172_spill] sm:$0xff] }
 0x77e   :  { %2660 = vmatpush2.msra.mxu0 %v12958_v59  ;;  %2731 = vmatpush2.msra.mxu1 %v12959_v47  ;;  %v13005_v59 = vld [vmem:[#allocation173_spill] sm:$0xff]  ;;  %v13006_v47 = vld [vmem:[#allocation174_spill] sm:$0xff] }
 0x77f   :  { %2661 = vmatprep.subr.mxu0 %v12960_v58  ;;  %2732 = vmatprep.subr.mxu1 %v12961_v49  ;;  %v13007_v58 = vld [vmem:[#allocation175_spill] sm:$0xff]  ;;  %v13008_v49 = vld [vmem:[#allocation176_spill] sm:$0xff] }
 0x780   :  { %2662 = vmatpush2.msra.mxu0 %v8636_v28  ;;  %2733 = vmatpush2.msra.mxu1 %v12962_v40  ;;  %v12970_v28 = vld [vmem:[#allocation138_spill] sm:$0xff]  ;;  %v13009_v40 = vld [vmem:[#allocation177_spill] sm:$0xff] }
 0x781   :  { %2663 = vmatprep.subr.mxu0 %v12963_v51  ;;  %2734 = vmatprep.subr.mxu1 %v12964_v39  ;;  %v13010_v51 = vld [vmem:[#allocation178_spill] sm:$0xff]  ;;  %v13011_v39 = vld [vmem:[#allocation179_spill] sm:$0xff] }
 0x782   :  { %2664 = vmatpush2.msra.mxu0 %v12965_v53  ;;  %2735 = vmatpush2.msra.mxu1 %v12966_v41  ;;  %v13012_v53 = vld [vmem:[#allocation180_spill] sm:$0xff]  ;;  %v13013_v41 = vld [vmem:[#allocation181_spill] sm:$0xff] }
 0x783   :  { %2666 = vmatmul.mubr.f32.vlgmr.msra.gmra.mxu0 %v8976_v38  ;;  %2737 = vmatmul.mubr.f32.vlgmr.msra.gmra.mxu1 %v8976_v38  ;;  %v12977_v38 = vld [vmem:[#allocation145_spill] sm:$0xff] }
 0x784   :  { %2804 = vmatprep.subr.mxu0 %v12967_v43  ;;  %2875 = vmatprep.subr.mxu1 %v12968_v45  ;;  %v13014_v43 = vld [vmem:[#allocation182_spill] sm:$0xff]  ;;  %v13015_v45 = vld [vmem:[#allocation183_spill] sm:$0xff] }
 0x785   :  { %2805 = vmatpush1.msra.mxu0 %v12969_v48  ;;  %2876 = vmatpush1.msra.mxu1 %v12970_v28  ;;  %v13016_v48 = vld [vmem:[#allocation184_spill] sm:$0xff]  ;;  %v13017_v28 = vld [vmem:[#allocation185_spill] sm:$0xff] }
 0x786   :  { %2806 = vmatprep.subr.mxu0 %v12971_v57  ;;  %2877 = vmatprep.subr.mxu1 %v12972_v60  ;;  %v13018_v57 = vld [vmem:[#allocation186_spill] sm:$0xff]  ;;  %v13019_v60 = vld [vmem:[#allocation187_spill] sm:$0xff] }
 0x787   :  { %2807 = vmatpush1.msra.mxu0 %v12973_v62  ;;  %2878 = vmatpush1.msra.mxu1 %v12974_v36  ;;  %v13020_v62 = vld [vmem:[#allocation188_spill] sm:$0xff]  ;;  %v13021_v36 = vld [vmem:[#allocation189_spill] sm:$0xff] }
 0x788   :  { %2808 = vmatprep.subr.mxu0 %v12975_v12  ;;  %2879 = vmatprep.subr.mxu1 %v12976_v14  ;;  %v13022_v12 = vld [vmem:[#allocation190_spill] sm:$0xff]  ;;  %v13023_v14 = vld [vmem:[#allocation191_spill] sm:$0xff] }
 0x789   :  { %2809 = vmatpush1.msra.mxu0 %v12977_v38  ;;  %2880 = vmatpush1.msra.mxu1 %v12978_v4  ;;  %v13024_v38 = vld [vmem:[#allocation192_spill] sm:$0xff]  ;;  %v13025_v4 = vld [vmem:[#allocation193_spill] sm:$0xff] }
 0x78a   :  { %2810 = vmatprep.subr.mxu0 %v12979_v2  ;;  %2881 = vmatprep.subr.mxu1 %v12980_v34  ;;  %v13026_v2 = vld [vmem:[#allocation194_spill] sm:$0xff]  ;;  %v13027_v34 = vld [vmem:[#allocation195_spill] sm:$0xff] }
 0x78b   :  { %2811 = vmatpush1.msra.mxu0 %v12981_v46  ;;  %2882 = vmatpush1.msra.mxu1 %v12982_v55  ;;  %v13028_v46 = vld [vmem:[#allocation196_spill] sm:$0xff]  ;;  %v13029_v55 = vld [vmem:[#allocation197_spill] sm:$0xff] }
 0x78c   :  { %2812 = vmatprep.subr.mxu0 %v12983_v23  ;;  %2883 = vmatprep.subr.mxu1 %v12984_v29  ;;  %v13030_v23 = vld [vmem:[#allocation198_spill] sm:$0xff]  ;;  %v13031_v29 = vld [vmem:[#allocation199_spill] sm:$0xff] }
 0x78d   :  { %2813 = vmatpush1.msra.mxu0 %v12985_v31  ;;  %2884 = vmatpush1.msra.mxu1 %v12986_v50  ;;  %v13032_v31 = vld [vmem:[#allocation200_spill] sm:$0xff]  ;;  %v13033_v50 = vld [vmem:[#allocation201_spill] sm:$0xff] }
 0x78e   :  { %2814 = vmatprep.subr.mxu0 %v12987_v54  ;;  %2885 = vmatprep.subr.mxu1 %v12988_v18  ;;  %v13034_v54 = vld [vmem:[#allocation202_spill] sm:$0xff]  ;;  %v13035_v18 = vld [vmem:[#allocation203_spill] sm:$0xff] }
 0x78f   :  { %2815 = vmatpush1.msra.mxu0 %v12989_v20  ;;  %2886 = vmatpush1.msra.mxu1 %v12990_v63  ;;  %v13036_v20 = vld [vmem:[#allocation204_spill] sm:$0xff]  ;;  %v13037_v63 = vld [vmem:[#allocation205_spill] sm:$0xff] }
 0x790   :  { %2816 = vmatprep.subr.mxu0 %v12991_v24  ;;  %2887 = vmatprep.subr.mxu1 %v12992_v52  ;;  %v13038_v24 = vld [vmem:[#allocation206_spill] sm:$0xff]  ;;  %v13039_v52 = vld [vmem:[#allocation207_spill] sm:$0xff] }
 0x791   :  { %2817 = vmatpush1.msra.mxu0 %v12993_v61  ;;  %2888 = vmatpush1.msra.mxu1 %v12994_v6  ;;  %v13040_v61 = vld [vmem:[#allocation208_spill] sm:$0xff]  ;;  %v13041_v6 = vld [vmem:[#allocation209_spill] sm:$0xff] }
 0x792   :  { %2818 = vmatprep.subr.mxu0 %v12995_v8  ;;  %2889 = vmatprep.subr.mxu1 %v12996_v0  ;;  %v13042_v8 = vld [vmem:[#allocation240_spill] sm:$0xff]  ;;  %v13043_v0 = vld [vmem:[#allocation241_spill] sm:$0xff] }
 0x793   :  { %2819 = vmatpush1.msra.mxu0 %v12997_v37  ;;  %2890 = vmatpush1.msra.mxu1 %v12998_v1  ;;  %v13044_v37 = vld [vmem:[#allocation242_spill] sm:$0xff]  ;;  %v9196_v1 = vld [vmem:[#allocation4 + $0x688] sm:$0xff] }
 0x794   :  { %2820 = vmatprep.subr.mxu0 %v12999_v56  ;;  %2891 = vmatprep.subr.mxu1 %v13000_v42  ;;  %v9199_v56 = vld [vmem:[#allocation4 + $0x698] sm:$0xff]  ;;  %v9202_v42 = vld [vmem:[#allocation4 + $0x680] sm:$0xff] }
 0x795   :  { %2821 = vmatpush1.msra.mxu0 %v13001_v32  ;;  %2892 = vmatpush1.msra.mxu1 %v13002_v5  ;;  %v9223_v32 = vld [vmem:[#allocation4 + $0x618] sm:$0xff]  ;;  %v9226_v5 = vld [vmem:[#allocation4 + $0x600] sm:$0xff] }
 0x796   :  { %2822 = vmatprep.subr.mxu0 %v13003_v25  ;;  %2893 = vmatprep.subr.mxu1 %v13004_v19  ;;  %v9229_v25 = vld [vmem:[#allocation4 + $0x610] sm:$0xff]  ;;  %v9232_v19 = vld [vmem:[#allocation4 + $0x5c8] sm:$0xff] }
 0x797   :  { %2823 = vmatpush1.msra.mxu0 %v13005_v59  ;;  %2894 = vmatpush1.msra.mxu1 %v13006_v47  ;;  %v9235_v59 = vld [vmem:[#allocation4 + $0x5d8] sm:$0xff]  ;;  %v9238_v47 = vld [vmem:[#allocation4 + $0x5c0] sm:$0xff] }
 0x798   :  { %2824 = vmatprep.subr.mxu0 %v13007_v58  ;;  %2895 = vmatprep.subr.mxu1 %v13008_v49  ;;  %v9241_v58 = vld [vmem:[#allocation4 + $0x5d0] sm:$0xff]  ;;  %v9244_v49 = vld [vmem:[#allocation4 + $0x588] sm:$0xff] }
 0x799   :  { %2825 = vmatpush1.msra.mxu0 %v13009_v40  ;;  %2896 = vmatpush1.msra.mxu1 %v13010_v51  ;;  %v9247_v40 = vld [vmem:[#allocation4 + $0x598] sm:$0xff]  ;;  %v9250_v51 = vld [vmem:[#allocation4 + $0x580] sm:$0xff] }
 0x79a   :  { %2826 = vmatprep.subr.mxu0 %v13011_v39  ;;  %2897 = vmatprep.subr.mxu1 %v13012_v53  ;;  %v9253_v39 = vld [vmem:[#allocation4 + $0x590] sm:$0xff]  ;;  %v9256_v53 = vld [vmem:[#allocation4 + $0x548] sm:$0xff] }
 0x79b   :  { %2827 = vmatpush1.msra.mxu0 %v13013_v41  ;;  %2898 = vmatpush1.msra.mxu1 %v13014_v43  ;;  %v9259_v41 = vld [vmem:[#allocation4 + $0x558] sm:$0xff]  ;;  %v9262_v43 = vld [vmem:[#allocation4 + $0x540] sm:$0xff] }
 0x79c   :  { %2828 = vmatprep.subr.mxu0 %v13015_v45  ;;  %2899 = vmatprep.subr.mxu1 %v13016_v48  ;;  %v9265_v45 = vld [vmem:[#allocation4 + $0x550] sm:$0xff]  ;;  %v9268_v48 = vld [vmem:[#allocation4 + $0x508] sm:$0xff] }
 0x79d   :  { %2829 = vmatpush1.msra.mxu0 %v13017_v28  ;;  %2900 = vmatpush1.msra.mxu1 %v13018_v57  ;;  %v9271_v28 = vld [vmem:[#allocation4 + $0x518] sm:$0xff]  ;;  %v9274_v57 = vld [vmem:[#allocation4 + $0x500] sm:$0xff] }
 0x79e   :  { %2830 = vmatprep.subr.mxu0 %v13019_v60  ;;  %2901 = vmatprep.subr.mxu1 %v13020_v62  ;;  %v9277_v60 = vld [vmem:[#allocation4 + $0x510] sm:$0xff]  ;;  %v9280_v62 = vld [vmem:[#allocation4 + $0x4c8] sm:$0xff] }
 0x79f   :  { %2831 = vmatpush1.msra.mxu0 %v13021_v36  ;;  %2902 = vmatpush1.msra.mxu1 %v13022_v12  ;;  %v9283_v36 = vld [vmem:[#allocation4 + $0x4d8] sm:$0xff]  ;;  %v9286_v12 = vld [vmem:[#allocation4 + $0x4c0] sm:$0xff] }
 0x7a0   :  { %2832 = vmatprep.subr.mxu0 %v13023_v14  ;;  %2903 = vmatprep.subr.mxu1 %v13024_v38  ;;  %v9289_v14 = vld [vmem:[#allocation4 + $0x4d0] sm:$0xff]  ;;  %v9292_v38 = vld [vmem:[#allocation4 + $0x488] sm:$0xff] }
 0x7a1   :  { %2833 = vmatpush1.msra.mxu0 %v13025_v4  ;;  %2904 = vmatpush1.msra.mxu1 %v13026_v2  ;;  %v9295_v4 = vld [vmem:[#allocation4 + $0x498] sm:$0xff]  ;;  %v9298_v2 = vld [vmem:[#allocation4 + $0x480] sm:$0xff] }
 0x7a2   :  { %2834 = vmatprep.subr.mxu0 %v13027_v34  ;;  %2905 = vmatprep.subr.mxu1 %v13028_v46  ;;  %v9301_v34 = vld [vmem:[#allocation4 + $0x490] sm:$0xff]  ;;  %v9304_v46 = vld [vmem:[#allocation4 + $0x448] sm:$0xff] }
 0x7a3   :  { %2835 = vmatpush1.msra.mxu0 %v13029_v55  ;;  %2906 = vmatpush1.msra.mxu1 %v13030_v23  ;;  %v9307_v55 = vld [vmem:[#allocation4 + $0x458] sm:$0xff]  ;;  %v9310_v23 = vld [vmem:[#allocation4 + $0x440] sm:$0xff] }
 0x7a4   :  { %2836 = vmatprep.subr.mxu0 %v13031_v29  ;;  %2907 = vmatprep.subr.mxu1 %v13032_v31  ;;  %13045 = vst [vmem:[#allocation244_spill] sm:$0xff] %v9307_v55  ;;  %13046 = vst [vmem:[#allocation245_spill] sm:$0xff] %v9310_v23  ;;  %v9313_v29 = vld [vmem:[#allocation4 + $0x450] sm:$0xff]  ;;  %v9316_v31 = vld [vmem:[#allocation4 + $0x408] sm:$0xff] }
 0x7a5   :  { %2837 = vmatpush2.msra.mxu0 %v13033_v50  ;;  %2908 = vmatpush2.msra.mxu1 %v13034_v54  ;;  %13047 = vst [vmem:[#allocation246_spill] sm:$0xff] %v9313_v29  ;;  %13048 = vst [vmem:[#allocation247_spill] sm:$0xff] %v9316_v31  ;;  %v9319_v50 = vld [vmem:[#allocation4 + $0x418] sm:$0xff]  ;;  %v9322_v54 = vld [vmem:[#allocation4 + $0x400] sm:$0xff] }
 0x7a6   :  { %2838 = vmatprep.subr.mxu0 %v13035_v18  ;;  %2909 = vmatprep.subr.mxu1 %v13036_v20  ;;  %13049 = vst [vmem:[#allocation211_spill] sm:$0xff] %v9319_v50  ;;  %13050 = vst [vmem:[#allocation212_spill] sm:$0xff] %v9322_v54  ;;  %v9325_v18 = vld [vmem:[#allocation4 + $0x410] sm:$0xff]  ;;  %v9328_v20 = vld [vmem:[#allocation4 + $0x3e8] sm:$0xff] }
 0x7a7   :  { %2839 = vmatpush2.msra.mxu0 %v13037_v63  ;;  %2910 = vmatpush2.msra.mxu1 %v13038_v24  ;;  %13051 = vst [vmem:[#allocation218_spill] sm:$0xff] %v9325_v18  ;;  %13052 = vst [vmem:[#allocation220_spill] sm:$0xff] %v9328_v20  ;;  %v9331_v63 = vld [vmem:[#allocation4 + $0x3f8] sm:$0xff] }
 0x7a8   :  { %2840 = vmatprep.subr.mxu0 %v13039_v52  ;;  %2911 = vmatprep.subr.mxu1 %v13040_v61  ;;  %13053 = vst [vmem:[#allocation16_spill] sm:$0xff] %v9331_v63  ;;  %v13054_v24 = vld [vmem:[#allocation217_spill] sm:$0xff] }
 0x7a9   :  { %2841 = vmatpush2.msra.mxu0 %v13041_v6  ;;  %2912 = vmatpush2.msra.mxu1 %v13042_v8  ;;  %v241_v52 = vadd.f32 %v13054_v24, %v12018_v15  ;;  %v13055_v6 = vld [vmem:[#allocation219_spill] sm:$0xff] }
 0x7aa   :  { %2842 = vmatprep.subr.mxu0 %v13043_v0  ;;  %2913 = vmatprep.subr.mxu1 %v13044_v37  ;;  %v243_v8 = vadd.f32 %v13055_v6, %v12017_v13 }
 0x7ab   :  { %2843 = vmatpush2.msra.mxu0 %v8890_v11  ;;  %2914 = vmatpush2.msra.mxu1 %v8893_v27  ;;  %v9205_v11 = vld [vmem:[#allocation4 + $0x690] sm:$0xff]  ;;  %v9208_v27 = vld [vmem:[#allocation4 + $0x648] sm:$0xff] }
 0x7ac   :  { %2844 = vmatprep.subr.mxu0 %v8896_v17  ;;  %2915 = vmatprep.subr.mxu1 %v8899_v16  ;;  %v9214_v17 = vld [vmem:[#allocation4 + $0x640] sm:$0xff]  ;;  %v9217_v16 = vld [vmem:[#allocation4 + $0x650] sm:$0xff] }
 0x7ad   :  { %2845 = vmatpush2.msra.mxu0 %v8902_v33  ;;  %2916 = vmatpush2.msra.mxu1 %v8905_v7  ;;  %v9211_v33 = vld [vmem:[#allocation4 + $0x658] sm:$0xff]  ;;  %v9220_v7 = vld [vmem:[#allocation4 + $0x608] sm:$0xff] }
 0x7ae   :  { %2846 = vmatprep.subr.mxu0 %v9196_v1  ;;  %2917 = vmatprep.subr.mxu1 %v9199_v56 }
 0x7af   :  { %2847 = vmatpush2.msra.mxu0 %v9202_v42  ;;  %2918 = vmatpush2.msra.mxu1 %v9205_v11 }
 0x7b0   :  { %2848 = vmatprep.subr.mxu0 %v9208_v27  ;;  %2919 = vmatprep.subr.mxu1 %v9211_v33 }
 0x7b1   :  { %2849 = vmatpush2.msra.mxu0 %v9214_v17  ;;  %2920 = vmatpush2.msra.mxu1 %v9217_v16 }
 0x7b2   :  { %2850 = vmatprep.subr.mxu0 %v9220_v7  ;;  %2921 = vmatprep.subr.mxu1 %v9223_v32 }
 0x7b3   :  { %2851 = vmatpush2.msra.mxu0 %v9226_v5  ;;  %2922 = vmatpush2.msra.mxu1 %v9229_v25 }
 0x7b4   :  { %2852 = vmatprep.subr.mxu0 %v9232_v19  ;;  %2923 = vmatprep.subr.mxu1 %v9235_v59 }
 0x7b5   :  { %2853 = vmatpush2.msra.mxu0 %v9238_v47  ;;  %2924 = vmatpush2.msra.mxu1 %v9241_v58 }
 0x7b6   :  { %2854 = vmatprep.subr.mxu0 %v9244_v49  ;;  %2925 = vmatprep.subr.mxu1 %v9247_v40 }
 0x7b7   :  { %2855 = vmatpush2.msra.mxu0 %v9250_v51  ;;  %2926 = vmatpush2.msra.mxu1 %v9253_v39 }
 0x7b8   :  { %2856 = vmatprep.subr.mxu0 %v9256_v53  ;;  %2927 = vmatprep.subr.mxu1 %v9259_v41 }
 0x7b9   :  { %2857 = vmatpush2.msra.mxu0 %v9262_v43  ;;  %2928 = vmatpush2.msra.mxu1 %v9265_v45 }
 0x7ba   :  { %2858 = vmatprep.subr.mxu0 %v9268_v48  ;;  %2929 = vmatprep.subr.mxu1 %v9271_v28 }
 0x7bb   :  { %2859 = vmatpush2.msra.mxu0 %v9274_v57  ;;  %2930 = vmatpush2.msra.mxu1 %v9277_v60 }
 0x7bc   :  { %2860 = vmatprep.subr.mxu0 %v9280_v62  ;;  %2931 = vmatprep.subr.mxu1 %v9283_v36 }
 0x7bd   :  { %2861 = vmatpush2.msra.mxu0 %v9286_v12  ;;  %2932 = vmatpush2.msra.mxu1 %v9289_v14 }
 0x7be   :  { %2862 = vmatprep.subr.mxu0 %v9292_v38  ;;  %2933 = vmatprep.subr.mxu1 %v9295_v4 }
 0x7bf   :  { %2863 = vmatpush2.msra.mxu0 %v9298_v2  ;;  %2934 = vmatpush2.msra.mxu1 %v9301_v34 }
 0x7c0   :  { %2864 = vmatprep.subr.mxu0 %v9304_v46  ;;  %2935 = vmatprep.subr.mxu1 %v9307_v55 }
 0x7c1   :  { %2865 = vmatpush2.msra.mxu0 %v9310_v23  ;;  %2936 = vmatpush2.msra.mxu1 %v9313_v29 }
 0x7c2   :  { %2866 = vmatprep.subr.mxu0 %v9316_v31  ;;  %2937 = vmatprep.subr.mxu1 %v9319_v50 }
 0x7c3   :  { %2867 = vmatpush2.msra.mxu0 %v9322_v54  ;;  %2938 = vmatpush2.msra.mxu1 %v9325_v18 }
 0x7c4   :  { %2946 = vmatprep.subr.mxu0 %v9328_v20  ;;  %3017 = vmatprep.subr.mxu1 %v9331_v63  ;;  %v13056_v20 = vld [vmem:[#allocation226_spill] sm:$0xff] }
 0x7c5   :  { %v366_v31 = vadd.f32 %v13056_v20, %v6033_v30 }
 0x802   :  { %v2525_v61 = vpop.f32.mrf.mxu0  ;;  %v2596_v50 = vpop.f32.mrf.mxu1 }
 0x803   :  { %v2776_v0 = vadd.f32 %v2525_v61, %v241_v52  ;;  %v2778_v29 = vadd.f32 %v2596_v50, %v366_v31 }
 0x804   :  { %v2527_v37 = vpop.f32.mrf.mxu0  ;;  %v2598_v31 = vpop.f32.mrf.mxu1 }
 0x805   :  { %v4206_v22 = vmul.f32 -1.442695, %v2776_v0  ;;  %v2777_v54 = vadd.f32 %v2527_v37, %v243_v8 }
 0x807   :  { %4509 = vpow2.f32 %v4206_v22  ;;  %v4207_v18 = vmul.f32 -1.442695, %v2777_v54 }
 0x809   :  { %4511 = vpow2.f32 %v4207_v18 }
 0x80a   :  { %4513 = vtanh.f32 %v2778_v29  ;;  %v13057_v29 = vld [vmem:[#allocation228_spill] sm:$0xff] }
 0x80b   :  { %v368_v37 = vadd.f32 %v13057_v29, %v6029_v10 }
 0x814   :  { %v4510_v63 = vpop.eup %4509 }
 0x815   :  { %v2783_v23 = vadd.f32 1.0, %v4510_v63 }
 0x816   :  { %v4512_v55 = vpop.eup %4511 }
 0x817   :  { %4515 = vrcp.f32 %v2783_v23  ;;  %v2789_v24 = vadd.f32 1.0, %v4512_v55  ;;  %v4514_v6 = vpop.eup %4513 }
 0x819   :  { %4517 = vrcp.f32 %v2789_v24 }
 0x824   :  { %v4516_v52 = vpop.eup %4515 }
 0x825   :  { %v2800_v61 = vmul.f32 %v4516_v52, %v4514_v6  ;;  %v2779_v6 = vadd.f32 %v2598_v31, %v368_v37 }
 0x826   :  { %v4518_v0 = vpop.eup %4517 }
 0x827   :  { %v2799_v22 = vmul.f32 %v4518_v0, %v8961_v44  ;;  %v4208_v52 = vmul.f32 -1.442695, %v2779_v6 }
 0x829   :  { %v9341_v54 = vadd.f32 %v2800_v61, %v2799_v22 }
 0x843   :  { %v2667_v18 = vpop.f32.mrf.mxu0  ;;  %v2738_v23 = vpop.f32.mrf.mxu1 }
 0x844   :  { %v2743_v8 = vadd.f32 %v2667_v18, %v6795_v3  ;;  %v2745_v22 = vadd.f32 %v2738_v23, %v6812_v35 }
 0x845   :  { %v2669_v20 = vpop.f32.mrf.mxu0  ;;  %v2740_v24 = vpop.f32.mrf.mxu1 }
 0x846   :  { %v4203_v50 = vmul.f32 -1.442695, %v2743_v8  ;;  %v2744_v63 = vadd.f32 %v2669_v20, %v6799_v9  ;;  %v2746_v44 = vadd.f32 %v2740_v24, %v12851_v26 }
 0x848   :  { %4519 = vpow2.f32 %v4203_v50  ;;  %v4204_v55 = vmul.f32 -1.442695, %v2744_v63  ;;  %v4205_v61 = vmul.f32 -1.442695, %v2746_v44 }
 0x84a   :  { %4521 = vpow2.f32 %v4204_v55 }
 0x84b   :  { %4523 = vpow2.f32 %v4208_v52 }
 0x84c   :  { %4525 = vpow2.f32 %v4205_v61 }
 0x855   :  { %v4520_v0 = vpop.eup %4519 }
 0x856   :  { %v2750_v18 = vadd.f32 1.0, %v4520_v0 }
 0x857   :  { %v4522_v8 = vpop.eup %4521 }
 0x858   :  { %4527 = vrcp.f32 %v2750_v18  ;;  %v2756_v20 = vadd.f32 1.0, %v4522_v8  ;;  %v4524_v50 = vpop.eup %4523  ;;  %v9365_v8 = vld [vmem:[#allocation4 + $0x3f0] sm:$0xff] }
 0x859   :  { %4529 = vtanh.f32 %v2745_v22  ;;  %v4526_v63 = vpop.eup %4525  ;;  %v2796_v44 = vadd.f32 1.0, %v4524_v50  ;;  %v9372_v50 = vld [vmem:[#allocation4 + $0x3b8] sm:$0xff] }
 0x85a   :  { %4531 = vrcp.f32 %v2756_v20  ;;  %v2763_v37 = vadd.f32 1.0, %v4526_v63  ;;  %v9368_v20 = vld [vmem:[#allocation4 + $0x3a8] sm:$0xff]  ;;  %v9376_v63 = vld [vmem:[#allocation4 + $0x3a0] sm:$0xff] }
 0x85b   :  { %4533 = vtanh.f32 %v9341_v54 }
 0x85c   :  { %4535 = vrcp.f32 %v2763_v37  ;;  %v9388_v37 = vld [vmem:[#allocation4 + $0x360] sm:$0xff] }
 0x865   :  { %v4528_v55 = vpop.eup %4527 }
 0x866   :  { %v4530_v29 = vpop.eup %4529 }
 0x867   :  { %v4532_v31 = vpop.eup %4531  ;;  %v2767_v24 = vmul.f32 %v4530_v29, %v4528_v55  ;;  %v9379_v55 = vld [vmem:[#allocation4 + $0x3b0] sm:$0xff]  ;;  %v9382_v29 = vld [vmem:[#allocation4 + $0x368] sm:$0xff] }
 0x868   :  { %v2766_v6 = vmul.f32 %v4532_v31, %v8970_v21  ;;  %v4534_v23 = vpop.eup %4533  ;;  %v9362_v21 = vld [vmem:[#allocation4 + $0x3e0] sm:$0xff]  ;;  %v9385_v31 = vld [vmem:[#allocation4 + $0x378] sm:$0xff] }
 0x869   :  { %v4536_v52 = vpop.eup %4535 }
 0x86a   :  { %v9350_v26 = vadd.f32 %v2767_v24, %v2766_v6  ;;  %v9391_v24 = vld [vmem:[#allocation4 + $0x370] sm:$0xff]  ;;  %v9394_v6 = vld [vmem:[#allocation4 + $0x328] sm:$0xff] }
 0x86c   :  { %4537 = vtanh.f32 %v9350_v26 }
 0x86d   :  { %4539 = vrcp.f32 %v2796_v44  ;;  %v9397_v44 = vld [vmem:[#allocation4 + $0x338] sm:$0xff] }
 0x86e   :  { %13059 = vst [vmem:[#allocation18_spill] sm:$0xff] %v9397_v44 }
 0x879   :  { %v4538_v61 = vpop.eup %4537 }
 0x87a   :  { %v4540_v0 = vpop.eup %4539  ;;  %v9354_v22 = vmul.f32 %v4538_v61, %v4536_v52  ;;  %v9403_v52 = vld [vmem:[#allocation4 + $0x330] sm:$0xff]  ;;  %v9406_v61 = vld [vmem:[#allocation4 + $0x2e8] sm:$0xff] }
 0x87b   :  { %v9356_v18 = vmul.f32 %v4540_v0, %v4534_v23  ;;  %v9400_v23 = vld [vmem:[#allocation4 + $0x320] sm:$0xff]  ;;  %13061 = vst [vmem:[#allocation20_spill] sm:$0xff] %v9403_v52  ;;  %13062 = vst [vmem:[#allocation21_spill] sm:$0xff] %v9406_v61  ;;  %v9409_v0 = vld [vmem:[#allocation4 + $0x2f8] sm:$0xff] }
 0x87c   :  { %13058 = vst [vmem:[#allocation17_spill] sm:$0xff] %v9354_v22  ;;  %2868 = vmatprep.mubr.f32.mxu0 %v9354_v22  ;;  %2939 = vmatprep.mubr.f32.mxu1 %v9354_v22  ;;  %13060 = vst [vmem:[#allocation19_spill] sm:$0xff] %v9400_v23 }
 0x87d   :  { %2869 = vmatmul.mubr.f32.vlgmr.msra.gmra.mxu0 %v9356_v18  ;;  %2940 = vmatmul.mubr.f32.vlgmr.msra.gmra.mxu1 %v9356_v18  ;;  %13063 = vst [vmem:[#allocation22_spill] sm:$0xff] %v9409_v0 }
 0x87e   :  { %2947 = vmatpush1.msra.mxu0 %v9362_v21  ;;  %3018 = vmatpush1.msra.mxu1 %v9365_v8 }
 0x87f   :  { %2948 = vmatprep.subr.mxu0 %v9368_v20  ;;  %3010 = vmatprep.mubr.f32.mxu0 %v9354_v22 }
 0x880   :  { %3019 = vmatprep.subr.mxu1 %v9372_v50  ;;  %3081 = vmatprep.mubr.f32.mxu1 %v9354_v22  ;;  %v9412_v22 = vld [vmem:[#allocation4 + $0x2e0] sm:$0xff] }
 0x881   :  { %2949 = vmatpush1.msra.mxu0 %v9376_v63  ;;  %3020 = vmatpush1.msra.mxu1 %v9379_v55  ;;  %13064 = vst [vmem:[#allocation23_spill] sm:$0xff] %v9412_v22 }
 0x882   :  { %2950 = vmatprep.subr.mxu0 %v9382_v29  ;;  %3021 = vmatprep.subr.mxu1 %v9385_v31 }
 0x883   :  { %2951 = vmatpush1.msra.mxu0 %v9388_v37  ;;  %3022 = vmatpush1.msra.mxu1 %v9391_v24 }
 0x884   :  { %2952 = vmatprep.subr.mxu0 %v9394_v6  ;;  %3023 = vmatprep.subr.mxu1 %v9397_v44  ;;  %v9415_v44 = vld [vmem:[#allocation4 + $0x2f0] sm:$0xff] }
 0x885   :  { %2953 = vmatpush1.msra.mxu0 %v9400_v23  ;;  %3024 = vmatpush1.msra.mxu1 %v9403_v52  ;;  %13065 = vst [vmem:[#allocation24_spill] sm:$0xff] %v9415_v44  ;;  %v9418_v23 = vld [vmem:[#allocation4 + $0x2a8] sm:$0xff]  ;;  %v9421_v52 = vld [vmem:[#allocation4 + $0x2b8] sm:$0xff] }
 0x886   :  { %2954 = vmatprep.subr.mxu0 %v9406_v61  ;;  %3025 = vmatprep.subr.mxu1 %v9409_v0  ;;  %13066 = vst [vmem:[#allocation213_spill] sm:$0xff] %v9418_v23  ;;  %13067 = vst [vmem:[#allocation215_spill] sm:$0xff] %v9421_v52  ;;  %v9424_v61 = vld [vmem:[#allocation4 + $0x2a0] sm:$0xff]  ;;  %v9427_v0 = vld [vmem:[#allocation4 + $0x2b0] sm:$0xff] }
 0x887   :  { %2955 = vmatpush1.msra.mxu0 %v9412_v22  ;;  %3026 = vmatpush1.msra.mxu1 %v9415_v44  ;;  %13068 = vst [vmem:[#allocation222_spill] sm:$0xff] %v9424_v61  ;;  %13069 = vst [vmem:[#allocation224_spill] sm:$0xff] %v9427_v0  ;;  %v9430_v22 = vld [vmem:[#allocation4 + $0x268] sm:$0xff]  ;;  %v9433_v44 = vld [vmem:[#allocation4 + $0x278] sm:$0xff] }
 0x888   :  { %2956 = vmatprep.subr.mxu0 %v9418_v23  ;;  %3027 = vmatprep.subr.mxu1 %v9421_v52  ;;  %13070 = vst [vmem:[#allocation25_spill] sm:$0xff] %v9430_v22  ;;  %13071 = vst [vmem:[#allocation10_spill] sm:$0xff] %v9433_v44  ;;  %v9436_v23 = vld [vmem:[#allocation4 + $0x260] sm:$0xff]  ;;  %v9439_v52 = vld [vmem:[#allocation4 + $0x270] sm:$0xff] }
 0x889   :  { %2957 = vmatpush1.msra.mxu0 %v9424_v61  ;;  %3028 = vmatpush1.msra.mxu1 %v9427_v0  ;;  %13072 = vst [vmem:[#allocation210_spill] sm:$0xff] %v9436_v23  ;;  %13073 = vst [vmem:[#allocation214_spill] sm:$0xff] %v9439_v52  ;;  %v9442_v61 = vld [vmem:[#allocation4 + $0x228] sm:$0xff]  ;;  %v9445_v0 = vld [vmem:[#allocation4 + $0x238] sm:$0xff] }
 0x88a   :  { %2958 = vmatprep.subr.mxu0 %v9430_v22  ;;  %3029 = vmatprep.subr.mxu1 %v9433_v44  ;;  %13074 = vst [vmem:[#allocation216_spill] sm:$0xff] %v9442_v61  ;;  %13075 = vst [vmem:[#allocation26_spill] sm:$0xff] %v9445_v0  ;;  %v9448_v22 = vld [vmem:[#allocation4 + $0x220] sm:$0xff]  ;;  %v9451_v44 = vld [vmem:[#allocation4 + $0x230] sm:$0xff] }
 0x88b   :  { %2959 = vmatpush1.msra.mxu0 %v9436_v23  ;;  %3030 = vmatpush1.msra.mxu1 %v9439_v52  ;;  %13076 = vst [vmem:[#allocation27_spill] sm:$0xff] %v9448_v22  ;;  %13077 = vst [vmem:[#allocation28_spill] sm:$0xff] %v9451_v44  ;;  %v9454_v23 = vld [vmem:[#allocation4 + $0x1e8] sm:$0xff]  ;;  %v9457_v52 = vld [vmem:[#allocation4 + $0x1f8] sm:$0xff] }
 0x88c   :  { %2960 = vmatprep.subr.mxu0 %v9442_v61  ;;  %3031 = vmatprep.subr.mxu1 %v9445_v0  ;;  %13078 = vst [vmem:[#allocation29_spill] sm:$0xff] %v9454_v23  ;;  %13079 = vst [vmem:[#allocation30_spill] sm:$0xff] %v9457_v52  ;;  %v9460_v61 = vld [vmem:[#allocation4 + $0x1e0] sm:$0xff]  ;;  %v9463_v0 = vld [vmem:[#allocation4 + $0x1f0] sm:$0xff] }
 0x88d   :  { %2961 = vmatpush1.msra.mxu0 %v9448_v22  ;;  %3032 = vmatpush1.msra.mxu1 %v9451_v44  ;;  %13080 = vst [vmem:[#allocation31_spill] sm:$0xff] %v9460_v61  ;;  %13081 = vst [vmem:[#allocation32_spill] sm:$0xff] %v9463_v0  ;;  %v9466_v22 = vld [vmem:[#allocation4 + $0x1a8] sm:$0xff]  ;;  %v9469_v44 = vld [vmem:[#allocation4 + $0x1b8] sm:$0xff] }
 0x88e   :  { %2962 = vmatprep.subr.mxu0 %v9454_v23  ;;  %3033 = vmatprep.subr.mxu1 %v9457_v52  ;;  %13082 = vst [vmem:[#allocation33_spill] sm:$0xff] %v9466_v22  ;;  %13083 = vst [vmem:[#allocation34_spill] sm:$0xff] %v9469_v44  ;;  %v9472_v23 = vld [vmem:[#allocation4 + $0x1a0] sm:$0xff]  ;;  %v9475_v52 = vld [vmem:[#allocation4 + $0x1b0] sm:$0xff] }
 0x88f   :  { %2963 = vmatpush1.msra.mxu0 %v9460_v61  ;;  %3034 = vmatpush1.msra.mxu1 %v9463_v0  ;;  %13084 = vst [vmem:[#allocation35_spill] sm:$0xff] %v9472_v23  ;;  %13085 = vst [vmem:[#allocation36_spill] sm:$0xff] %v9475_v52  ;;  %v9478_v61 = vld [vmem:[#allocation4 + $0x168] sm:$0xff]  ;;  %v9481_v0 = vld [vmem:[#allocation4 + $0x178] sm:$0xff] }
 0x890   :  { %2964 = vmatprep.subr.mxu0 %v9466_v22  ;;  %3035 = vmatprep.subr.mxu1 %v9469_v44  ;;  %13086 = vst [vmem:[#allocation37_spill] sm:$0xff] %v9478_v61  ;;  %13087 = vst [vmem:[#allocation38_spill] sm:$0xff] %v9481_v0  ;;  %v9484_v22 = vld [vmem:[#allocation4 + $0x160] sm:$0xff]  ;;  %v9487_v44 = vld [vmem:[#allocation4 + $0x170] sm:$0xff] }
 0x891   :  { %2965 = vmatpush1.msra.mxu0 %v9472_v23  ;;  %3036 = vmatpush1.msra.mxu1 %v9475_v52  ;;  %13088 = vst [vmem:[#allocation39_spill] sm:$0xff] %v9484_v22  ;;  %13089 = vst [vmem:[#allocation40_spill] sm:$0xff] %v9487_v44  ;;  %v9490_v23 = vld [vmem:[#allocation4 + $0x128] sm:$0xff]  ;;  %v9493_v52 = vld [vmem:[#allocation4 + $0x138] sm:$0xff] }
 0x892   :  { %2966 = vmatprep.subr.mxu0 %v9478_v61  ;;  %3037 = vmatprep.subr.mxu1 %v9481_v0  ;;  %13090 = vst [vmem:[#allocation41_spill] sm:$0xff] %v9490_v23  ;;  %13091 = vst [vmem:[#allocation42_spill] sm:$0xff] %v9493_v52  ;;  %v9496_v61 = vld [vmem:[#allocation4 + $0x120] sm:$0xff]  ;;  %v9499_v0 = vld [vmem:[#allocation4 + $0x130] sm:$0xff] }
 0x893   :  { %2967 = vmatpush1.msra.mxu0 %v9484_v22  ;;  %3038 = vmatpush1.msra.mxu1 %v9487_v44  ;;  %13092 = vst [vmem:[#allocation43_spill] sm:$0xff] %v9496_v61  ;;  %13093 = vst [vmem:[#allocation44_spill] sm:$0xff] %v9499_v0  ;;  %v9502_v22 = vld [vmem:[#allocation4 + $0xe8] sm:$0xff]  ;;  %v9505_v44 = vld [vmem:[#allocation4 + $0xf8] sm:$0xff] }
 0x894   :  { %2968 = vmatprep.subr.mxu0 %v9490_v23  ;;  %3039 = vmatprep.subr.mxu1 %v9493_v52  ;;  %13094 = vst [vmem:[#allocation45_spill] sm:$0xff] %v9502_v22  ;;  %13095 = vst [vmem:[#allocation46_spill] sm:$0xff] %v9505_v44  ;;  %v9508_v23 = vld [vmem:[#allocation4 + $0xe0] sm:$0xff]  ;;  %v9511_v52 = vld [vmem:[#allocation4 + $0xf0] sm:$0xff] }
 0x895   :  { %2969 = vmatpush1.msra.mxu0 %v9496_v61  ;;  %3040 = vmatpush1.msra.mxu1 %v9499_v0  ;;  %13096 = vst [vmem:[#allocation47_spill] sm:$0xff] %v9508_v23  ;;  %13097 = vst [vmem:[#allocation48_spill] sm:$0xff] %v9511_v52  ;;  %v9514_v61 = vld [vmem:[#allocation4 + $0xa8] sm:$0xff]  ;;  %v9517_v0 = vld [vmem:[#allocation4 + $0xb8] sm:$0xff] }
 0x896   :  { %2970 = vmatprep.subr.mxu0 %v9502_v22  ;;  %3041 = vmatprep.subr.mxu1 %v9505_v44  ;;  %13098 = vst [vmem:[#allocation49_spill] sm:$0xff] %v9514_v61  ;;  %13099 = vst [vmem:[#allocation50_spill] sm:$0xff] %v9517_v0  ;;  %v9520_v22 = vld [vmem:[#allocation4 + $0xa0] sm:$0xff]  ;;  %v9523_v44 = vld [vmem:[#allocation4 + $0xb0] sm:$0xff] }
 0x897   :  { %2971 = vmatpush1.msra.mxu0 %v9508_v23  ;;  %3042 = vmatpush1.msra.mxu1 %v9511_v52  ;;  %13100 = vst [vmem:[#allocation51_spill] sm:$0xff] %v9520_v22  ;;  %13101 = vst [vmem:[#allocation52_spill] sm:$0xff] %v9523_v44  ;;  %v9526_v23 = vld [vmem:[#allocation4 + $0x68] sm:$0xff]  ;;  %v9529_v52 = vld [vmem:[#allocation4 + $0x78] sm:$0xff] }
 0x898   :  { %2972 = vmatprep.subr.mxu0 %v9514_v61  ;;  %3043 = vmatprep.subr.mxu1 %v9517_v0  ;;  %13102 = vst [vmem:[#allocation53_spill] sm:$0xff] %v9526_v23  ;;  %13103 = vst [vmem:[#allocation54_spill] sm:$0xff] %v9529_v52  ;;  %v9532_v61 = vld [vmem:[#allocation4 + $0x60] sm:$0xff]  ;;  %v9535_v0 = vld [vmem:[#allocation4 + $0x70] sm:$0xff] }
 0x899   :  { %2973 = vmatpush1.msra.mxu0 %v9520_v22  ;;  %3044 = vmatpush1.msra.mxu1 %v9523_v44  ;;  %13104 = vst [vmem:[#allocation55_spill] sm:$0xff] %v9532_v61  ;;  %13105 = vst [vmem:[#allocation56_spill] sm:$0xff] %v9535_v0  ;;  %v9538_v22 = vld [vmem:[#allocation4 + $0x28] sm:$0xff]  ;;  %v9541_v44 = vld [vmem:[#allocation4 + $0x38] sm:$0xff] }
 0x89a   :  { %2974 = vmatprep.subr.mxu0 %v9526_v23  ;;  %3045 = vmatprep.subr.mxu1 %v9529_v52  ;;  %13106 = vst [vmem:[#allocation57_spill] sm:$0xff] %v9538_v22  ;;  %13107 = vst [vmem:[#allocation58_spill] sm:$0xff] %v9541_v44  ;;  %v9544_v23 = vld [vmem:[#allocation4 + $0x20] sm:$0xff]  ;;  %v9547_v52 = vld [vmem:[#allocation4 + $0x30] sm:$0xff] }
 0x89b   :  { %2975 = vmatpush1.msra.mxu0 %v9532_v61  ;;  %3046 = vmatpush1.msra.mxu1 %v9535_v0  ;;  %13108 = vst [vmem:[#allocation59_spill] sm:$0xff] %v9544_v23  ;;  %13109 = vst [vmem:[#allocation60_spill] sm:$0xff] %v9547_v52  ;;  %v9550_v61 = vld [vmem:[#allocation4 + $0x7e8] sm:$0xff]  ;;  %v9553_v0 = vld [vmem:[#allocation4 + $0x7f8] sm:$0xff] }
 0x89c   :  { %2976 = vmatprep.subr.mxu0 %v9538_v22  ;;  %3047 = vmatprep.subr.mxu1 %v9541_v44  ;;  %13110 = vst [vmem:[#allocation61_spill] sm:$0xff] %v9550_v61  ;;  %13111 = vst [vmem:[#allocation62_spill] sm:$0xff] %v9553_v0  ;;  %v9556_v22 = vld [vmem:[#allocation4 + $0x7e0] sm:$0xff]  ;;  %v9559_v44 = vld [vmem:[#allocation4 + $0x7f0] sm:$0xff] }
 0x89d   :  { %2977 = vmatpush1.msra.mxu0 %v9544_v23  ;;  %3048 = vmatpush1.msra.mxu1 %v9547_v52  ;;  %13112 = vst [vmem:[#allocation63_spill] sm:$0xff] %v9556_v22  ;;  %13113 = vst [vmem:[#allocation64_spill] sm:$0xff] %v9559_v44  ;;  %v9562_v23 = vld [vmem:[#allocation4 + $0x7a8] sm:$0xff]  ;;  %v9565_v52 = vld [vmem:[#allocation4 + $0x7b8] sm:$0xff] }
 0x89e   :  { %2978 = vmatprep.subr.mxu0 %v9550_v61  ;;  %3049 = vmatprep.subr.mxu1 %v9553_v0  ;;  %13114 = vst [vmem:[#allocation65_spill] sm:$0xff] %v9562_v23  ;;  %13115 = vst [vmem:[#allocation66_spill] sm:$0xff] %v9565_v52  ;;  %v9568_v61 = vld [vmem:[#allocation4 + $0x7a0] sm:$0xff]  ;;  %v9571_v0 = vld [vmem:[#allocation4 + $0x7b0] sm:$0xff] }
 0x89f   :  { %2979 = vmatpush2.msra.mxu0 %v9556_v22  ;;  %3050 = vmatpush2.msra.mxu1 %v9559_v44  ;;  %13116 = vst [vmem:[#allocation67_spill] sm:$0xff] %v9568_v61  ;;  %13117 = vst [vmem:[#allocation68_spill] sm:$0xff] %v9571_v0  ;;  %v9574_v22 = vld [vmem:[#allocation4 + $0x768] sm:$0xff]  ;;  %v9577_v44 = vld [vmem:[#allocation4 + $0x778] sm:$0xff] }
 0x8a0   :  { %2980 = vmatprep.subr.mxu0 %v9562_v23  ;;  %3051 = vmatprep.subr.mxu1 %v9565_v52  ;;  %13118 = vst [vmem:[#allocation69_spill] sm:$0xff] %v9574_v22  ;;  %13119 = vst [vmem:[#allocation70_spill] sm:$0xff] %v9577_v44  ;;  %v9580_v23 = vld [vmem:[#allocation4 + $0x760] sm:$0xff]  ;;  %v9583_v52 = vld [vmem:[#allocation4 + $0x770] sm:$0xff] }
 0x8a1   :  { %2981 = vmatpush2.msra.mxu0 %v9568_v61  ;;  %3052 = vmatpush2.msra.mxu1 %v9571_v0  ;;  %13120 = vst [vmem:[#allocation71_spill] sm:$0xff] %v9580_v23  ;;  %13121 = vst [vmem:[#allocation72_spill] sm:$0xff] %v9583_v52  ;;  %v9586_v61 = vld [vmem:[#allocation4 + $0x728] sm:$0xff]  ;;  %v9589_v0 = vld [vmem:[#allocation4 + $0x738] sm:$0xff] }
 0x8a2   :  { %2982 = vmatprep.subr.mxu0 %v9574_v22  ;;  %3053 = vmatprep.subr.mxu1 %v9577_v44  ;;  %13122 = vst [vmem:[#allocation73_spill] sm:$0xff] %v9586_v61  ;;  %13123 = vst [vmem:[#allocation74_spill] sm:$0xff] %v9589_v0  ;;  %v9592_v22 = vld [vmem:[#allocation4 + $0x720] sm:$0xff]  ;;  %v9595_v44 = vld [vmem:[#allocation4 + $0x730] sm:$0xff] }
 0x8a3   :  { %2983 = vmatpush2.msra.mxu0 %v9580_v23  ;;  %3054 = vmatpush2.msra.mxu1 %v9583_v52  ;;  %13124 = vst [vmem:[#allocation75_spill] sm:$0xff] %v9592_v22  ;;  %13125 = vst [vmem:[#allocation76_spill] sm:$0xff] %v9595_v44  ;;  %v9598_v23 = vld [vmem:[#allocation4 + $0x6e8] sm:$0xff]  ;;  %v9601_v52 = vld [vmem:[#allocation4 + $0x6f8] sm:$0xff] }
 0x8a4   :  { %2984 = vmatprep.subr.mxu0 %v9586_v61  ;;  %3055 = vmatprep.subr.mxu1 %v9589_v0  ;;  %13126 = vst [vmem:[#allocation77_spill] sm:$0xff] %v9598_v23  ;;  %13127 = vst [vmem:[#allocation78_spill] sm:$0xff] %v9601_v52  ;;  %v9604_v61 = vld [vmem:[#allocation4 + $0x6e0] sm:$0xff]  ;;  %v9607_v0 = vld [vmem:[#allocation4 + $0x6f0] sm:$0xff] }
 0x8a5   :  { %2985 = vmatpush2.msra.mxu0 %v9592_v22  ;;  %3056 = vmatpush2.msra.mxu1 %v9595_v44  ;;  %13128 = vst [vmem:[#allocation79_spill] sm:$0xff] %v9604_v61  ;;  %13129 = vst [vmem:[#allocation80_spill] sm:$0xff] %v9607_v0  ;;  %v9610_v22 = vld [vmem:[#allocation4 + $0x6a8] sm:$0xff]  ;;  %v9613_v44 = vld [vmem:[#allocation4 + $0x6b8] sm:$0xff] }
 0x8a6   :  { %2986 = vmatprep.subr.mxu0 %v9598_v23  ;;  %3057 = vmatprep.subr.mxu1 %v9601_v52  ;;  %13130 = vst [vmem:[#allocation81_spill] sm:$0xff] %v9610_v22  ;;  %13131 = vst [vmem:[#allocation82_spill] sm:$0xff] %v9613_v44  ;;  %v9616_v23 = vld [vmem:[#allocation4 + $0x6a0] sm:$0xff]  ;;  %v9619_v52 = vld [vmem:[#allocation4 + $0x6b0] sm:$0xff] }
 0x8a7   :  { %2987 = vmatpush2.msra.mxu0 %v9604_v61  ;;  %3058 = vmatpush2.msra.mxu1 %v9607_v0  ;;  %13132 = vst [vmem:[#allocation83_spill] sm:$0xff] %v9616_v23  ;;  %13133 = vst [vmem:[#allocation84_spill] sm:$0xff] %v9619_v52  ;;  %v9622_v61 = vld [vmem:[#allocation4 + $0x668] sm:$0xff]  ;;  %v9625_v0 = vld [vmem:[#allocation4 + $0x678] sm:$0xff] }
 0x8a8   :  { %2988 = vmatprep.subr.mxu0 %v9610_v22  ;;  %3059 = vmatprep.subr.mxu1 %v9613_v44  ;;  %13134 = vst [vmem:[#allocation85_spill] sm:$0xff] %v9622_v61  ;;  %13135 = vst [vmem:[#allocation86_spill] sm:$0xff] %v9625_v0  ;;  %v9628_v22 = vld [vmem:[#allocation4 + $0x660] sm:$0xff]  ;;  %v9631_v44 = vld [vmem:[#allocation4 + $0x670] sm:$0xff] }
 0x8a9   :  { %2989 = vmatpush2.msra.mxu0 %v9616_v23  ;;  %3060 = vmatpush2.msra.mxu1 %v9619_v52  ;;  %13136 = vst [vmem:[#allocation87_spill] sm:$0xff] %v9628_v22  ;;  %13137 = vst [vmem:[#allocation88_spill] sm:$0xff] %v9631_v44  ;;  %v9634_v23 = vld [vmem:[#allocation4 + $0x628] sm:$0xff]  ;;  %v9637_v52 = vld [vmem:[#allocation4 + $0x638] sm:$0xff] }
 0x8aa   :  { %2990 = vmatprep.subr.mxu0 %v9622_v61  ;;  %3061 = vmatprep.subr.mxu1 %v9625_v0  ;;  %13138 = vst [vmem:[#allocation89_spill] sm:$0xff] %v9634_v23  ;;  %13139 = vst [vmem:[#allocation90_spill] sm:$0xff] %v9637_v52  ;;  %v9640_v61 = vld [vmem:[#allocation4 + $0x620] sm:$0xff]  ;;  %v9643_v0 = vld [vmem:[#allocation4 + $0x630] sm:$0xff] }
 0x8ab   :  { %2991 = vmatpush2.msra.mxu0 %v9628_v22  ;;  %3062 = vmatpush2.msra.mxu1 %v9631_v44  ;;  %13140 = vst [vmem:[#allocation91_spill] sm:$0xff] %v9640_v61  ;;  %13141 = vst [vmem:[#allocation92_spill] sm:$0xff] %v9643_v0  ;;  %v9646_v22 = vld [vmem:[#allocation4 + $0x5e8] sm:$0xff]  ;;  %v9649_v44 = vld [vmem:[#allocation4 + $0x5f8] sm:$0xff] }
 0x8ac   :  { %2992 = vmatprep.subr.mxu0 %v9634_v23  ;;  %3063 = vmatprep.subr.mxu1 %v9637_v52  ;;  %13142 = vst [vmem:[#allocation93_spill] sm:$0xff] %v9646_v22  ;;  %13143 = vst [vmem:[#allocation94_spill] sm:$0xff] %v9649_v44  ;;  %v9652_v23 = vld [vmem:[#allocation4 + $0x5e0] sm:$0xff]  ;;  %v9655_v52 = vld [vmem:[#allocation4 + $0x5f0] sm:$0xff] }
 0x8ad   :  { %2993 = vmatpush2.msra.mxu0 %v9640_v61  ;;  %3064 = vmatpush2.msra.mxu1 %v9643_v0  ;;  %13144 = vst [vmem:[#allocation95_spill] sm:$0xff] %v9652_v23  ;;  %13145 = vst [vmem:[#allocation96_spill] sm:$0xff] %v9655_v52  ;;  %v9658_v61 = vld [vmem:[#allocation4 + $0x5a8] sm:$0xff]  ;;  %v9661_v0 = vld [vmem:[#allocation4 + $0x5b8] sm:$0xff] }
 0x8ae   :  { %2994 = vmatprep.subr.mxu0 %v9646_v22  ;;  %3065 = vmatprep.subr.mxu1 %v9649_v44  ;;  %13146 = vst [vmem:[#allocation97_spill] sm:$0xff] %v9658_v61  ;;  %13147 = vst [vmem:[#allocation98_spill] sm:$0xff] %v9661_v0  ;;  %v9664_v22 = vld [vmem:[#allocation4 + $0x5a0] sm:$0xff]  ;;  %v9667_v44 = vld [vmem:[#allocation4 + $0x5b0] sm:$0xff] }
 0x8af   :  { %2995 = vmatpush2.msra.mxu0 %v9652_v23  ;;  %3066 = vmatpush2.msra.mxu1 %v9655_v52  ;;  %13148 = vst [vmem:[#allocation99_spill] sm:$0xff] %v9664_v22  ;;  %13149 = vst [vmem:[#allocation100_spill] sm:$0xff] %v9667_v44  ;;  %v9670_v23 = vld [vmem:[#allocation4 + $0x568] sm:$0xff]  ;;  %v9673_v52 = vld [vmem:[#allocation4 + $0x578] sm:$0xff] }
 0x8b0   :  { %2996 = vmatprep.subr.mxu0 %v9658_v61  ;;  %3067 = vmatprep.subr.mxu1 %v9661_v0  ;;  %13150 = vst [vmem:[#allocation101_spill] sm:$0xff] %v9670_v23  ;;  %13151 = vst [vmem:[#allocation102_spill] sm:$0xff] %v9673_v52  ;;  %v9676_v61 = vld [vmem:[#allocation4 + $0x560] sm:$0xff]  ;;  %v9679_v0 = vld [vmem:[#allocation4 + $0x570] sm:$0xff] }
 0x8b1   :  { %2997 = vmatpush2.msra.mxu0 %v9664_v22  ;;  %3068 = vmatpush2.msra.mxu1 %v9667_v44  ;;  %13152 = vst [vmem:[#allocation103_spill] sm:$0xff] %v9676_v61  ;;  %13153 = vst [vmem:[#allocation104_spill] sm:$0xff] %v9679_v0  ;;  %v9682_v22 = vld [vmem:[#allocation4 + $0x528] sm:$0xff]  ;;  %v9685_v44 = vld [vmem:[#allocation4 + $0x538] sm:$0xff] }
 0x8b2   :  { %2998 = vmatprep.subr.mxu0 %v9670_v23  ;;  %3069 = vmatprep.subr.mxu1 %v9673_v52  ;;  %13154 = vst [vmem:[#allocation105_spill] sm:$0xff] %v9682_v22  ;;  %13155 = vst [vmem:[#allocation106_spill] sm:$0xff] %v9685_v44  ;;  %v9688_v23 = vld [vmem:[#allocation4 + $0x520] sm:$0xff]  ;;  %v9691_v52 = vld [vmem:[#allocation4 + $0x530] sm:$0xff] }
 0x8b3   :  { %2999 = vmatpush2.msra.mxu0 %v9676_v61  ;;  %3070 = vmatpush2.msra.mxu1 %v9679_v0  ;;  %13156 = vst [vmem:[#allocation107_spill] sm:$0xff] %v9688_v23  ;;  %13157 = vst [vmem:[#allocation108_spill] sm:$0xff] %v9691_v52  ;;  %v9694_v61 = vld [vmem:[#allocation4 + $0x4e8] sm:$0xff]  ;;  %v9697_v0 = vld [vmem:[#allocation4 + $0x4f8] sm:$0xff] }
 0x8b4   :  { %3000 = vmatprep.subr.mxu0 %v9682_v22  ;;  %3071 = vmatprep.subr.mxu1 %v9685_v44  ;;  %13158 = vst [vmem:[#allocation109_spill] sm:$0xff] %v9694_v61  ;;  %13159 = vst [vmem:[#allocation110_spill] sm:$0xff] %v9697_v0  ;;  %v9700_v22 = vld [vmem:[#allocation4 + $0x4e0] sm:$0xff]  ;;  %v9703_v44 = vld [vmem:[#allocation4 + $0x4f0] sm:$0xff] }
 0x8b5   :  { %3001 = vmatpush2.msra.mxu0 %v9688_v23  ;;  %3072 = vmatpush2.msra.mxu1 %v9691_v52  ;;  %13160 = vst [vmem:[#allocation111_spill] sm:$0xff] %v9700_v22  ;;  %13161 = vst [vmem:[#allocation112_spill] sm:$0xff] %v9703_v44  ;;  %v9706_v23 = vld [vmem:[#allocation4 + $0x4a8] sm:$0xff]  ;;  %v9709_v52 = vld [vmem:[#allocation4 + $0x4b8] sm:$0xff] }
 0x8b6   :  { %3002 = vmatprep.subr.mxu0 %v9694_v61  ;;  %3073 = vmatprep.subr.mxu1 %v9697_v0  ;;  %13162 = vst [vmem:[#allocation113_spill] sm:$0xff] %v9706_v23  ;;  %13163 = vst [vmem:[#allocation114_spill] sm:$0xff] %v9709_v52  ;;  %v9712_v61 = vld [vmem:[#allocation4 + $0x4a0] sm:$0xff]  ;;  %v9715_v0 = vld [vmem:[#allocation4 + $0x4b0] sm:$0xff] }
 0x8b7   :  { %3003 = vmatpush2.msra.mxu0 %v9700_v22  ;;  %3074 = vmatpush2.msra.mxu1 %v9703_v44  ;;  %13164 = vst [vmem:[#allocation115_spill] sm:$0xff] %v9712_v61  ;;  %13165 = vst [vmem:[#allocation116_spill] sm:$0xff] %v9715_v0  ;;  %v9718_v22 = vld [vmem:[#allocation4 + $0x468] sm:$0xff]  ;;  %v9721_v44 = vld [vmem:[#allocation4 + $0x478] sm:$0xff] }
 0x8b8   :  { %3004 = vmatprep.subr.mxu0 %v9706_v23  ;;  %3075 = vmatprep.subr.mxu1 %v9709_v52  ;;  %13166 = vst [vmem:[#allocation117_spill] sm:$0xff] %v9718_v22  ;;  %13167 = vst [vmem:[#allocation118_spill] sm:$0xff] %v9721_v44  ;;  %v9724_v23 = vld [vmem:[#allocation4 + $0x460] sm:$0xff]  ;;  %v9727_v52 = vld [vmem:[#allocation4 + $0x470] sm:$0xff] }
 0x8b9   :  { %3005 = vmatpush2.msra.mxu0 %v9712_v61  ;;  %3076 = vmatpush2.msra.mxu1 %v9715_v0  ;;  %13168 = vst [vmem:[#allocation119_spill] sm:$0xff] %v9727_v52  ;;  %v9730_v61 = vld [vmem:[#allocation4 + $0x428] sm:$0xff]  ;;  %v9733_v0 = vld [vmem:[#allocation4 + $0x438] sm:$0xff] }
 0x8ba   :  { %3006 = vmatprep.subr.mxu0 %v9718_v22  ;;  %3077 = vmatprep.subr.mxu1 %v9721_v44  ;;  %13169 = vst [vmem:[#allocation120_spill] sm:$0xff] %v9730_v61  ;;  %13170 = vst [vmem:[#allocation121_spill] sm:$0xff] %v9733_v0  ;;  %v9736_v22 = vld [vmem:[#allocation4 + $0x420] sm:$0xff]  ;;  %v9739_v44 = vld [vmem:[#allocation4 + $0x430] sm:$0xff] }
 0x8bb   :  { %3007 = vmatpush2.msra.mxu0 %v9724_v23  ;;  %3078 = vmatpush2.msra.mxu1 %v9727_v52  ;;  %13171 = vst [vmem:[#allocation122_spill] sm:$0xff] %v9736_v22  ;;  %13172 = vst [vmem:[#allocation123_spill] sm:$0xff] %v9739_v44  ;;  %v9744_v52 = vld [vmem:[#allocation4 + $0x3c8] sm:$0xff] }
 0x8bc   :  { %3008 = vmatprep.subr.mxu0 %v9730_v61  ;;  %3079 = vmatprep.subr.mxu1 %v9733_v0  ;;  %13173 = vst [vmem:[#allocation124_spill] sm:$0xff] %v9744_v52  ;;  %v9747_v61 = vld [vmem:[#allocation4 + $0x3d8] sm:$0xff]  ;;  %v9750_v0 = vld [vmem:[#allocation4 + $0x3c0] sm:$0xff] }
 0x8bd   :  { %3009 = vmatpush2.msra.mxu0 %v9736_v22  ;;  %3080 = vmatpush2.msra.mxu1 %v9739_v44  ;;  %13174 = vst [vmem:[#allocation125_spill] sm:$0xff] %v9747_v61  ;;  %13175 = vst [vmem:[#allocation126_spill] sm:$0xff] %v9750_v0  ;;  %v9753_v22 = vld [vmem:[#allocation4 + $0x3d0] sm:$0xff]  ;;  %v9756_v44 = vld [vmem:[#allocation4 + $0x388] sm:$0xff] }
 0x8be   :  { %3011 = vmatmul.mubr.f32.vlgmr.msra.gmra.mxu0 %v9356_v18  ;;  %3082 = vmatmul.mubr.f32.vlgmr.msra.gmra.mxu1 %v9356_v18  ;;  %13176 = vst [vmem:[#allocation127_spill] sm:$0xff] %v9753_v22  ;;  %13177 = vst [vmem:[#allocation128_spill] sm:$0xff] %v9756_v44  ;;  %v9759_v18 = vld [vmem:[#allocation4 + $0x398] sm:$0xff] }
 0x8bf   :  { %3149 = vmatprep.subr.mxu0 %v9744_v52  ;;  %3220 = vmatprep.subr.mxu1 %v9747_v61  ;;  %13178 = vst [vmem:[#allocation129_spill] sm:$0xff] %v9759_v18  ;;  %v9762_v52 = vld [vmem:[#allocation4 + $0x380] sm:$0xff]  ;;  %v9765_v61 = vld [vmem:[#allocation4 + $0x390] sm:$0xff] }
 0x8c0   :  { %3150 = vmatpush1.msra.mxu0 %v9750_v0  ;;  %3221 = vmatpush1.msra.mxu1 %v9753_v22  ;;  %13179 = vst [vmem:[#allocation130_spill] sm:$0xff] %v9762_v52  ;;  %13180 = vst [vmem:[#allocation131_spill] sm:$0xff] %v9765_v61  ;;  %v9768_v0 = vld [vmem:[#allocation4 + $0x348] sm:$0xff]  ;;  %v9771_v22 = vld [vmem:[#allocation4 + $0x358] sm:$0xff] }
 0x8c1   :  { %3151 = vmatprep.subr.mxu0 %v9756_v44  ;;  %3222 = vmatprep.subr.mxu1 %v9759_v18  ;;  %13181 = vst [vmem:[#allocation132_spill] sm:$0xff] %v9768_v0  ;;  %13182 = vst [vmem:[#allocation133_spill] sm:$0xff] %v9771_v22  ;;  %v9774_v44 = vld [vmem:[#allocation4 + $0x340] sm:$0xff]  ;;  %v9777_v18 = vld [vmem:[#allocation4 + $0x350] sm:$0xff] }
 0x8c2   :  { %3152 = vmatpush1.msra.mxu0 %v9762_v52  ;;  %3223 = vmatpush1.msra.mxu1 %v9765_v61  ;;  %13183 = vst [vmem:[#allocation134_spill] sm:$0xff] %v9774_v44  ;;  %13184 = vst [vmem:[#allocation135_spill] sm:$0xff] %v9777_v18  ;;  %v9780_v52 = vld [vmem:[#allocation4 + $0x308] sm:$0xff]  ;;  %v9783_v61 = vld [vmem:[#allocation4 + $0x318] sm:$0xff] }
 0x8c3   :  { %3153 = vmatprep.subr.mxu0 %v9768_v0  ;;  %3224 = vmatprep.subr.mxu1 %v9771_v22  ;;  %13185 = vst [vmem:[#allocation136_spill] sm:$0xff] %v9780_v52  ;;  %13186 = vst [vmem:[#allocation137_spill] sm:$0xff] %v9783_v61  ;;  %v9786_v0 = vld [vmem:[#allocation4 + $0x300] sm:$0xff]  ;;  %v9789_v22 = vld [vmem:[#allocation4 + $0x310] sm:$0xff] }
 0x8c4   :  { %3154 = vmatpush1.msra.mxu0 %v9774_v44  ;;  %3225 = vmatpush1.msra.mxu1 %v9777_v18  ;;  %13187 = vst [vmem:[#allocation138_spill] sm:$0xff] %v9786_v0  ;;  %13188 = vst [vmem:[#allocation139_spill] sm:$0xff] %v9789_v22  ;;  %v9792_v44 = vld [vmem:[#allocation4 + $0x2c8] sm:$0xff]  ;;  %v9795_v18 = vld [vmem:[#allocation4 + $0x2d8] sm:$0xff] }
 0x8c5   :  { %3155 = vmatprep.subr.mxu0 %v9780_v52  ;;  %3226 = vmatprep.subr.mxu1 %v9783_v61  ;;  %13189 = vst [vmem:[#allocation140_spill] sm:$0xff] %v9792_v44  ;;  %13190 = vst [vmem:[#allocation141_spill] sm:$0xff] %v9795_v18  ;;  %v9798_v52 = vld [vmem:[#allocation4 + $0x2c0] sm:$0xff]  ;;  %v9801_v61 = vld [vmem:[#allocation4 + $0x2d0] sm:$0xff] }
 0x8c6   :  { %3156 = vmatpush1.msra.mxu0 %v9786_v0  ;;  %3227 = vmatpush1.msra.mxu1 %v9789_v22  ;;  %13191 = vst [vmem:[#allocation142_spill] sm:$0xff] %v9798_v52  ;;  %13192 = vst [vmem:[#allocation143_spill] sm:$0xff] %v9801_v61  ;;  %v9804_v0 = vld [vmem:[#allocation4 + $0x288] sm:$0xff]  ;;  %v9807_v22 = vld [vmem:[#allocation4 + $0x298] sm:$0xff] }
 0x8c7   :  { %3157 = vmatprep.subr.mxu0 %v9792_v44  ;;  %3228 = vmatprep.subr.mxu1 %v9795_v18  ;;  %13193 = vst [vmem:[#allocation144_spill] sm:$0xff] %v9804_v0  ;;  %13194 = vst [vmem:[#allocation145_spill] sm:$0xff] %v9807_v22  ;;  %v9810_v44 = vld [vmem:[#allocation4 + $0x280] sm:$0xff]  ;;  %v9813_v18 = vld [vmem:[#allocation4 + $0x290] sm:$0xff] }
 0x8c8   :  { %3158 = vmatpush1.msra.mxu0 %v9798_v52  ;;  %3229 = vmatpush1.msra.mxu1 %v9801_v61  ;;  %13195 = vst [vmem:[#allocation146_spill] sm:$0xff] %v9810_v44  ;;  %13196 = vst [vmem:[#allocation147_spill] sm:$0xff] %v9813_v18  ;;  %v9816_v52 = vld [vmem:[#allocation4 + $0x248] sm:$0xff]  ;;  %v9819_v61 = vld [vmem:[#allocation4 + $0x258] sm:$0xff] }
 0x8c9   :  { %3159 = vmatprep.subr.mxu0 %v9804_v0  ;;  %3230 = vmatprep.subr.mxu1 %v9807_v22  ;;  %13197 = vst [vmem:[#allocation148_spill] sm:$0xff] %v9816_v52  ;;  %13198 = vst [vmem:[#allocation149_spill] sm:$0xff] %v9819_v61  ;;  %v9822_v0 = vld [vmem:[#allocation4 + $0x240] sm:$0xff]  ;;  %v9825_v22 = vld [vmem:[#allocation4 + $0x250] sm:$0xff] }
 0x8ca   :  { %3160 = vmatpush1.msra.mxu0 %v9810_v44  ;;  %3231 = vmatpush1.msra.mxu1 %v9813_v18  ;;  %13199 = vst [vmem:[#allocation150_spill] sm:$0xff] %v9822_v0  ;;  %13200 = vst [vmem:[#allocation151_spill] sm:$0xff] %v9825_v22  ;;  %v9828_v44 = vld [vmem:[#allocation4 + $0x208] sm:$0xff]  ;;  %v9831_v18 = vld [vmem:[#allocation4 + $0x218] sm:$0xff] }
 0x8cb   :  { %3161 = vmatprep.subr.mxu0 %v9816_v52  ;;  %3232 = vmatprep.subr.mxu1 %v9819_v61  ;;  %13201 = vst [vmem:[#allocation152_spill] sm:$0xff] %v9828_v44  ;;  %13202 = vst [vmem:[#allocation153_spill] sm:$0xff] %v9831_v18  ;;  %v9834_v52 = vld [vmem:[#allocation4 + $0x200] sm:$0xff]  ;;  %v9837_v61 = vld [vmem:[#allocation4 + $0x210] sm:$0xff] }
 0x8cc   :  { %3162 = vmatpush1.msra.mxu0 %v9822_v0  ;;  %3233 = vmatpush1.msra.mxu1 %v9825_v22  ;;  %13203 = vst [vmem:[#allocation154_spill] sm:$0xff] %v9834_v52  ;;  %13204 = vst [vmem:[#allocation155_spill] sm:$0xff] %v9837_v61  ;;  %v9840_v0 = vld [vmem:[#allocation4 + $0x1c8] sm:$0xff]  ;;  %v9843_v22 = vld [vmem:[#allocation4 + $0x1d8] sm:$0xff] }
 0x8cd   :  { %3163 = vmatprep.subr.mxu0 %v9828_v44  ;;  %3234 = vmatprep.subr.mxu1 %v9831_v18  ;;  %13205 = vst [vmem:[#allocation156_spill] sm:$0xff] %v9840_v0  ;;  %13206 = vst [vmem:[#allocation157_spill] sm:$0xff] %v9843_v22  ;;  %v9846_v44 = vld [vmem:[#allocation4 + $0x1c0] sm:$0xff]  ;;  %v9849_v18 = vld [vmem:[#allocation4 + $0x1d0] sm:$0xff] }
 0x8ce   :  { %3164 = vmatpush1.msra.mxu0 %v9834_v52  ;;  %3235 = vmatpush1.msra.mxu1 %v9837_v61  ;;  %13207 = vst [vmem:[#allocation158_spill] sm:$0xff] %v9846_v44  ;;  %13208 = vst [vmem:[#allocation159_spill] sm:$0xff] %v9849_v18  ;;  %v9852_v52 = vld [vmem:[#allocation4 + $0x188] sm:$0xff]  ;;  %v9855_v61 = vld [vmem:[#allocation4 + $0x198] sm:$0xff] }
 0x8cf   :  { %3165 = vmatprep.subr.mxu0 %v9840_v0  ;;  %3236 = vmatprep.subr.mxu1 %v9843_v22  ;;  %13209 = vst [vmem:[#allocation160_spill] sm:$0xff] %v9852_v52  ;;  %13210 = vst [vmem:[#allocation161_spill] sm:$0xff] %v9855_v61  ;;  %v9858_v0 = vld [vmem:[#allocation4 + $0x180] sm:$0xff]  ;;  %v9861_v22 = vld [vmem:[#allocation4 + $0x190] sm:$0xff] }
 0x8d0   :  { %3166 = vmatpush1.msra.mxu0 %v9846_v44  ;;  %3237 = vmatpush1.msra.mxu1 %v9849_v18  ;;  %13211 = vst [vmem:[#allocation162_spill] sm:$0xff] %v9858_v0  ;;  %13212 = vst [vmem:[#allocation163_spill] sm:$0xff] %v9861_v22  ;;  %v9864_v44 = vld [vmem:[#allocation4 + $0x148] sm:$0xff]  ;;  %v9867_v18 = vld [vmem:[#allocation4 + $0x158] sm:$0xff] }
 0x8d1   :  { %3167 = vmatprep.subr.mxu0 %v9852_v52  ;;  %3238 = vmatprep.subr.mxu1 %v9855_v61  ;;  %13213 = vst [vmem:[#allocation164_spill] sm:$0xff] %v9864_v44  ;;  %13214 = vst [vmem:[#allocation165_spill] sm:$0xff] %v9867_v18  ;;  %v9870_v52 = vld [vmem:[#allocation4 + $0x140] sm:$0xff]  ;;  %v9873_v61 = vld [vmem:[#allocation4 + $0x150] sm:$0xff] }
 0x8d2   :  { %3168 = vmatpush1.msra.mxu0 %v9858_v0  ;;  %3239 = vmatpush1.msra.mxu1 %v9861_v22  ;;  %13215 = vst [vmem:[#allocation166_spill] sm:$0xff] %v9870_v52  ;;  %13216 = vst [vmem:[#allocation167_spill] sm:$0xff] %v9873_v61  ;;  %v9876_v0 = vld [vmem:[#allocation4 + $0x108] sm:$0xff]  ;;  %v9879_v22 = vld [vmem:[#allocation4 + $0x118] sm:$0xff] }
 0x8d3   :  { %3169 = vmatprep.subr.mxu0 %v9864_v44  ;;  %3240 = vmatprep.subr.mxu1 %v9867_v18  ;;  %13217 = vst [vmem:[#allocation168_spill] sm:$0xff] %v9876_v0  ;;  %13218 = vst [vmem:[#allocation169_spill] sm:$0xff] %v9879_v22  ;;  %v9882_v44 = vld [vmem:[#allocation4 + $0x100] sm:$0xff]  ;;  %v9885_v18 = vld [vmem:[#allocation4 + $0x110] sm:$0xff] }
 0x8d4   :  { %3170 = vmatpush1.msra.mxu0 %v9870_v52  ;;  %3241 = vmatpush1.msra.mxu1 %v9873_v61  ;;  %13219 = vst [vmem:[#allocation170_spill] sm:$0xff] %v9882_v44  ;;  %13220 = vst [vmem:[#allocation171_spill] sm:$0xff] %v9885_v18  ;;  %v9888_v52 = vld [vmem:[#allocation4 + $0xc8] sm:$0xff]  ;;  %v9891_v61 = vld [vmem:[#allocation4 + $0xd8] sm:$0xff] }
 0x8d5   :  { %3171 = vmatprep.subr.mxu0 %v9876_v0  ;;  %3242 = vmatprep.subr.mxu1 %v9879_v22  ;;  %13221 = vst [vmem:[#allocation172_spill] sm:$0xff] %v9888_v52  ;;  %13222 = vst [vmem:[#allocation173_spill] sm:$0xff] %v9891_v61  ;;  %v9894_v0 = vld [vmem:[#allocation4 + $0xc0] sm:$0xff]  ;;  %v9897_v22 = vld [vmem:[#allocation4 + $0xd0] sm:$0xff] }
 0x8d6   :  { %3172 = vmatpush1.msra.mxu0 %v9882_v44  ;;  %3243 = vmatpush1.msra.mxu1 %v9885_v18  ;;  %13223 = vst [vmem:[#allocation174_spill] sm:$0xff] %v9894_v0  ;;  %13224 = vst [vmem:[#allocation175_spill] sm:$0xff] %v9897_v22  ;;  %v9900_v44 = vld [vmem:[#allocation4 + $0x88] sm:$0xff]  ;;  %v9903_v18 = vld [vmem:[#allocation4 + $0x98] sm:$0xff] }
 0x8d7   :  { %3173 = vmatprep.subr.mxu0 %v9888_v52  ;;  %3244 = vmatprep.subr.mxu1 %v9891_v61  ;;  %13225 = vst [vmem:[#allocation176_spill] sm:$0xff] %v9900_v44  ;;  %13226 = vst [vmem:[#allocation177_spill] sm:$0xff] %v9903_v18  ;;  %v9906_v52 = vld [vmem:[#allocation4 + $0x80] sm:$0xff]  ;;  %v9909_v61 = vld [vmem:[#allocation4 + $0x90] sm:$0xff] }
 0x8d8   :  { %3174 = vmatpush1.msra.mxu0 %v9894_v0  ;;  %3245 = vmatpush1.msra.mxu1 %v9897_v22  ;;  %13227 = vst [vmem:[#allocation178_spill] sm:$0xff] %v9906_v52  ;;  %13228 = vst [vmem:[#allocation179_spill] sm:$0xff] %v9909_v61  ;;  %v9912_v0 = vld [vmem:[#allocation4 + $0x48] sm:$0xff]  ;;  %v9915_v22 = vld [vmem:[#allocation4 + $0x58] sm:$0xff] }
 0x8d9   :  { %3175 = vmatprep.subr.mxu0 %v9900_v44  ;;  %3246 = vmatprep.subr.mxu1 %v9903_v18  ;;  %13229 = vst [vmem:[#allocation180_spill] sm:$0xff] %v9912_v0  ;;  %13230 = vst [vmem:[#allocation181_spill] sm:$0xff] %v9915_v22  ;;  %v9918_v44 = vld [vmem:[#allocation4 + $0x40] sm:$0xff]  ;;  %v9921_v18 = vld [vmem:[#allocation4 + $0x50] sm:$0xff] }
 0x8da   :  { %3176 = vmatpush1.msra.mxu0 %v9906_v52  ;;  %3247 = vmatpush1.msra.mxu1 %v9909_v61  ;;  %13231 = vst [vmem:[#allocation182_spill] sm:$0xff] %v9918_v44  ;;  %13232 = vst [vmem:[#allocation183_spill] sm:$0xff] %v9921_v18  ;;  %v9924_v52 = vld [vmem:[#allocation4 + $0x8] sm:$0xff]  ;;  %v9927_v61 = vld [vmem:[#allocation4 + $0x18] sm:$0xff] }
 0x8db   :  { %3177 = vmatprep.subr.mxu0 %v9912_v0  ;;  %3248 = vmatprep.subr.mxu1 %v9915_v22  ;;  %13233 = vst [vmem:[#allocation184_spill] sm:$0xff] %v9924_v52  ;;  %13234 = vst [vmem:[#allocation185_spill] sm:$0xff] %v9927_v61  ;;  %v9930_v0 = vld [vmem:[#allocation4] sm:$0xff]  ;;  %v9933_v22 = vld [vmem:[#allocation4 + $0x10] sm:$0xff] }
 0x8dc   :  { %3178 = vmatpush1.msra.mxu0 %v9918_v44  ;;  %3249 = vmatpush1.msra.mxu1 %v9921_v18  ;;  %13235 = vst [vmem:[#allocation186_spill] sm:$0xff] %v9930_v0  ;;  %13236 = vst [vmem:[#allocation187_spill] sm:$0xff] %v9933_v22  ;;  %v9936_v44 = vld [vmem:[#allocation4 + $0x7c8] sm:$0xff]  ;;  %v9939_v18 = vld [vmem:[#allocation4 + $0x7d8] sm:$0xff] }
 0x8dd   :  { %3179 = vmatprep.subr.mxu0 %v9924_v52  ;;  %3250 = vmatprep.subr.mxu1 %v9927_v61  ;;  %13237 = vst [vmem:[#allocation188_spill] sm:$0xff] %v9936_v44  ;;  %13238 = vst [vmem:[#allocation189_spill] sm:$0xff] %v9939_v18  ;;  %v9942_v52 = vld [vmem:[#allocation4 + $0x7c0] sm:$0xff]  ;;  %v9945_v61 = vld [vmem:[#allocation4 + $0x7d0] sm:$0xff] }
 0x8de   :  { %3180 = vmatpush1.msra.mxu0 %v9930_v0  ;;  %3251 = vmatpush1.msra.mxu1 %v9933_v22  ;;  %13239 = vst [vmem:[#allocation190_spill] sm:$0xff] %v9942_v52  ;;  %13240 = vst [vmem:[#allocation191_spill] sm:$0xff] %v9945_v61  ;;  %v9948_v0 = vld [vmem:[#allocation4 + $0x788] sm:$0xff]  ;;  %v9951_v22 = vld [vmem:[#allocation4 + $0x798] sm:$0xff] }
 0x8df   :  { %3181 = vmatprep.subr.mxu0 %v9936_v44  ;;  %3252 = vmatprep.subr.mxu1 %v9939_v18  ;;  %13241 = vst [vmem:[#allocation192_spill] sm:$0xff] %v9948_v0  ;;  %13242 = vst [vmem:[#allocation193_spill] sm:$0xff] %v9951_v22  ;;  %v9954_v44 = vld [vmem:[#allocation4 + $0x780] sm:$0xff]  ;;  %v9957_v18 = vld [vmem:[#allocation4 + $0x790] sm:$0xff] }
 0x8e0   :  { %3182 = vmatpush2.msra.mxu0 %v9942_v52  ;;  %3253 = vmatpush2.msra.mxu1 %v9945_v61  ;;  %13243 = vst [vmem:[#allocation194_spill] sm:$0xff] %v9954_v44  ;;  %13244 = vst [vmem:[#allocation195_spill] sm:$0xff] %v9957_v18  ;;  %v9960_v52 = vld [vmem:[#allocation4 + $0x748] sm:$0xff]  ;;  %v9963_v61 = vld [vmem:[#allocation4 + $0x758] sm:$0xff] }
 0x8e1   :  { %3183 = vmatprep.subr.mxu0 %v9948_v0  ;;  %3254 = vmatprep.subr.mxu1 %v9951_v22  ;;  %13245 = vst [vmem:[#allocation196_spill] sm:$0xff] %v9960_v52  ;;  %13246 = vst [vmem:[#allocation197_spill] sm:$0xff] %v9963_v61  ;;  %v9966_v0 = vld [vmem:[#allocation4 + $0x740] sm:$0xff]  ;;  %v9969_v22 = vld [vmem:[#allocation4 + $0x750] sm:$0xff] }
 0x8e2   :  { %3184 = vmatpush2.msra.mxu0 %v9954_v44  ;;  %3255 = vmatpush2.msra.mxu1 %v9957_v18  ;;  %13247 = vst [vmem:[#allocation198_spill] sm:$0xff] %v9966_v0  ;;  %13248 = vst [vmem:[#allocation199_spill] sm:$0xff] %v9969_v22  ;;  %v9972_v44 = vld [vmem:[#allocation4 + $0x708] sm:$0xff]  ;;  %v9975_v18 = vld [vmem:[#allocation4 + $0x718] sm:$0xff] }
 0x8e3   :  { %3185 = vmatprep.subr.mxu0 %v9960_v52  ;;  %3256 = vmatprep.subr.mxu1 %v9963_v61  ;;  %13249 = vst [vmem:[#allocation200_spill] sm:$0xff] %v9972_v44  ;;  %13250 = vst [vmem:[#allocation201_spill] sm:$0xff] %v9975_v18  ;;  %v9978_v52 = vld [vmem:[#allocation4 + $0x700] sm:$0xff]  ;;  %v9981_v61 = vld [vmem:[#allocation4 + $0x710] sm:$0xff] }
 0x8e4   :  { %3186 = vmatpush2.msra.mxu0 %v9966_v0  ;;  %3257 = vmatpush2.msra.mxu1 %v9969_v22  ;;  %v9984_v0 = vld [vmem:[#allocation4 + $0x6c8] sm:$0xff]  ;;  %v9987_v22 = vld [vmem:[#allocation4 + $0x6d8] sm:$0xff] }
 0x8e5   :  { %3187 = vmatprep.subr.mxu0 %v9972_v44  ;;  %3258 = vmatprep.subr.mxu1 %v9975_v18  ;;  %v9990_v44 = vld [vmem:[#allocation4 + $0x6c0] sm:$0xff]  ;;  %v9993_v18 = vld [vmem:[#allocation4 + $0x6d0] sm:$0xff] }
 0x8e6   :  { %3188 = vmatpush2.msra.mxu0 %v9978_v52  ;;  %3259 = vmatpush2.msra.mxu1 %v9981_v61 }
 0x8e7   :  { %3189 = vmatprep.subr.mxu0 %v9984_v0  ;;  %3260 = vmatprep.subr.mxu1 %v9987_v22 }
 0x8e8   :  { %3190 = vmatpush2.msra.mxu0 %v9990_v44  ;;  %3261 = vmatpush2.msra.mxu1 %v9993_v18 }
 0x8e9   :  { %3191 = vmatprep.subr.mxu0 %v9196_v1  ;;  %3262 = vmatprep.subr.mxu1 %v9199_v56  ;;  %v13251_v1 = vld [vmem:[#allocation244_spill] sm:$0xff]  ;;  %v13252_v56 = vld [vmem:[#allocation245_spill] sm:$0xff] }
 0x8ea   :  { %3192 = vmatpush2.msra.mxu0 %v9202_v42  ;;  %3263 = vmatpush2.msra.mxu1 %v9205_v11  ;;  %v13253_v42 = vld [vmem:[#allocation246_spill] sm:$0xff]  ;;  %v13254_v11 = vld [vmem:[#allocation247_spill] sm:$0xff] }
 0x8eb   :  { %3193 = vmatprep.subr.mxu0 %v9208_v27  ;;  %3264 = vmatprep.subr.mxu1 %v9211_v33  ;;  %v13255_v27 = vld [vmem:[#allocation211_spill] sm:$0xff]  ;;  %v13256_v33 = vld [vmem:[#allocation212_spill] sm:$0xff] }
 0x8ec   :  { %3194 = vmatpush2.msra.mxu0 %v9214_v17  ;;  %3265 = vmatpush2.msra.mxu1 %v9217_v16  ;;  %v13257_v17 = vld [vmem:[#allocation218_spill] sm:$0xff]  ;;  %v13258_v16 = vld [vmem:[#allocation220_spill] sm:$0xff] }
 0x8ed   :  { %3195 = vmatprep.subr.mxu0 %v9220_v7  ;;  %3266 = vmatprep.subr.mxu1 %v9223_v32  ;;  %v13259_v7 = vld [vmem:[#allocation16_spill] sm:$0xff]  ;;  %v13260_v32 = vld [vmem:[#allocation221_spill] sm:$0xff] }
 0x8ee   :  { %3196 = vmatpush2.msra.mxu0 %v9226_v5  ;;  %3267 = vmatpush2.msra.mxu1 %v9229_v25  ;;  %v247_v5 = vadd.f32 %v13260_v32, %v12018_v15 }
 0x8ef   :  { %3197 = vmatprep.subr.mxu0 %v9232_v19  ;;  %3268 = vmatprep.subr.mxu1 %v9235_v59  ;;  %v13261_v19 = vld [vmem:[#allocation223_spill] sm:$0xff] }
 0x8f0   :  { %3198 = vmatpush2.msra.mxu0 %v9238_v47  ;;  %3269 = vmatpush2.msra.mxu1 %v9241_v58  ;;  %v249_v59 = vadd.f32 %v13261_v19, %v12017_v13 }
 0x8f1   :  { %3199 = vmatprep.subr.mxu0 %v9244_v49  ;;  %3270 = vmatprep.subr.mxu1 %v9247_v40 }
 0x8f2   :  { %3200 = vmatpush2.msra.mxu0 %v9250_v51  ;;  %3271 = vmatpush2.msra.mxu1 %v9253_v39 }
 0x8f3   :  { %3201 = vmatprep.subr.mxu0 %v9256_v53  ;;  %3272 = vmatprep.subr.mxu1 %v9259_v41  ;;  %v13262_v53 = vld [vmem:[#allocation230_spill] sm:$0xff] }
 0x8f4   :  { %3202 = vmatpush2.msra.mxu0 %v9262_v43  ;;  %3273 = vmatpush2.msra.mxu1 %v9265_v45  ;;  %v372_v41 = vadd.f32 %v13262_v53, %v6033_v30 }
 0x8f5   :  { %3203 = vmatprep.subr.mxu0 %v9268_v48  ;;  %3274 = vmatprep.subr.mxu1 %v9271_v28 }
 0x8f6   :  { %3204 = vmatpush2.msra.mxu0 %v9274_v57  ;;  %3275 = vmatpush2.msra.mxu1 %v9277_v60 }
 0x8f7   :  { %3205 = vmatprep.subr.mxu0 %v9280_v62  ;;  %3276 = vmatprep.subr.mxu1 %v9283_v36 }
 0x8f8   :  { %3206 = vmatpush2.msra.mxu0 %v9286_v12  ;;  %3277 = vmatpush2.msra.mxu1 %v9289_v14 }
 0x8f9   :  { %3207 = vmatprep.subr.mxu0 %v9292_v38  ;;  %3278 = vmatprep.subr.mxu1 %v9295_v4 }
 0x8fa   :  { %3208 = vmatpush2.msra.mxu0 %v9298_v2  ;;  %3279 = vmatpush2.msra.mxu1 %v9301_v34 }
 0x8fb   :  { %3209 = vmatprep.subr.mxu0 %v9304_v46  ;;  %3280 = vmatprep.subr.mxu1 %v13251_v1 }
 0x8fc   :  { %3210 = vmatpush2.msra.mxu0 %v13252_v56  ;;  %3281 = vmatpush2.msra.mxu1 %v13253_v42 }
 0x8fd   :  { %3211 = vmatprep.subr.mxu0 %v13254_v11  ;;  %3282 = vmatprep.subr.mxu1 %v13255_v27  ;;  %v13263_v27 = vld [vmem:[#allocation232_spill] sm:$0xff] }
 0x8fe   :  { %3212 = vmatpush2.msra.mxu0 %v13256_v33  ;;  %3283 = vmatpush2.msra.mxu1 %v13257_v17  ;;  %v374_v33 = vadd.f32 %v13263_v27, %v6029_v10  ;;  %v13286_v27 = vld [vmem:[#allocation30_spill] sm:$0xff] }
 0x8ff   :  { %3291 = vmatprep.subr.mxu0 %v13258_v16  ;;  %3362 = vmatprep.subr.mxu1 %v13259_v7 }
 0x93d   :  { %v2870_v25 = vpop.f32.mrf.mxu0  ;;  %v2941_v39 = vpop.f32.mrf.mxu1 }
 0x93e   :  { %v3121_v47 = vadd.f32 %v2870_v25, %v247_v5  ;;  %v3123_v43 = vadd.f32 %v2941_v39, %v372_v41 }
 0x93f   :  { %v2872_v58 = vpop.f32.mrf.mxu0  ;;  %v2943_v46 = vpop.f32.mrf.mxu1 }
 0x940   :  { %v4212_v49 = vmul.f32 -1.442695, %v3121_v47  ;;  %v3122_v40 = vadd.f32 %v2872_v58, %v249_v59  ;;  %v3124_v16 = vadd.f32 %v2943_v46, %v374_v33  ;;  %v13281_v46 = vld [vmem:[#allocation216_spill] sm:$0xff]  ;;  %v13287_v33 = vld [vmem:[#allocation31_spill] sm:$0xff] }
 0x942   :  { %4541 = vpow2.f32 %v4212_v49  ;;  %v4213_v51 = vmul.f32 -1.442695, %v3122_v40  ;;  %v4214_v32 = vmul.f32 -1.442695, %v3124_v16  ;;  %v13289_v16 = vld [vmem:[#allocation33_spill] sm:$0xff] }
 0x944   :  { %4543 = vpow2.f32 %v4213_v51 }
 0x945   :  { %4545 = vtanh.f32 %v3123_v43 }
 0x94f   :  { %v4542_v45 = vpop.eup %4541 }
 0x950   :  { %v3128_v48 = vadd.f32 1.0, %v4542_v45 }
 0x951   :  { %v4544_v28 = vpop.eup %4543 }
 0x952   :  { %4547 = vrcp.f32 %v3128_v48  ;;  %v3134_v57 = vadd.f32 1.0, %v4544_v28  ;;  %v4546_v60 = vpop.eup %4545 }
 0x954   :  { %4549 = vrcp.f32 %v3134_v57 }
 0x95f   :  { %v4548_v62 = vpop.eup %4547 }
 0x960   :  { %v3145_v36 = vmul.f32 %v4548_v62, %v4546_v60 }
 0x961   :  { %v4550_v12 = vpop.eup %4549 }
 0x962   :  { %v3144_v14 = vmul.f32 %v4550_v12, %v9341_v54  ;;  %v13264_v54 = vld [vmem:[#allocation238_spill] sm:$0xff] }
 0x964   :  { %v10049_v38 = vadd.f32 %v3145_v36, %v3144_v14 }
 0x97e   :  { %v3012_v4 = vpop.f32.mrf.mxu0  ;;  %v3083_v42 = vpop.f32.mrf.mxu1 }
 0x97f   :  { %v3088_v2 = vadd.f32 %v3012_v4, %v6795_v3  ;;  %v3090_v19 = vadd.f32 %v3083_v42, %v6812_v35  ;;  %v13278_v4 = vld [vmem:[#allocation10_spill] sm:$0xff]  ;;  %v13284_v42 = vld [vmem:[#allocation28_spill] sm:$0xff] }
 0x980   :  { %v3014_v34 = vpop.f32.mrf.mxu0  ;;  %v3085_v17 = vpop.f32.mrf.mxu1 }
 0x981   :  { %v4209_v1 = vmul.f32 -1.442695, %v3088_v2  ;;  %v3089_v56 = vadd.f32 %v3014_v34, %v6799_v9  ;;  %v3091_v7 = vadd.f32 %v3085_v17, %v13264_v54  ;;  %v13279_v2 = vld [vmem:[#allocation210_spill] sm:$0xff]  ;;  %v13288_v17 = vld [vmem:[#allocation32_spill] sm:$0xff] }
 0x982   :  { %v13280_v34 = vld [vmem:[#allocation214_spill] sm:$0xff] }
 0x983   :  { %4551 = vpow2.f32 %v4209_v1  ;;  %v4210_v11 = vmul.f32 -1.442695, %v3089_v56  ;;  %v4211_v5 = vmul.f32 -1.442695, %v3091_v7  ;;  %v13282_v1 = vld [vmem:[#allocation26_spill] sm:$0xff]  ;;  %v13283_v56 = vld [vmem:[#allocation27_spill] sm:$0xff] }
 0x984   :  { %v13290_v7 = vld [vmem:[#allocation34_spill] sm:$0xff] }
 0x985   :  { %4553 = vpow2.f32 %v4210_v11  ;;  %v13285_v11 = vld [vmem:[#allocation29_spill] sm:$0xff] }
 0x986   :  { %4555 = vpow2.f32 %v4214_v32  ;;  %v13291_v32 = vld [vmem:[#allocation35_spill] sm:$0xff] }
 0x987   :  { %4557 = vpow2.f32 %v4211_v5  ;;  %v13292_v5 = vld [vmem:[#allocation36_spill] sm:$0xff] }
 0x990   :  { %v4552_v25 = vpop.eup %4551 }
 0x991   :  { %v3095_v59 = vadd.f32 1.0, %v4552_v25  ;;  %v13293_v25 = vld [vmem:[#allocation37_spill] sm:$0xff] }
 0x992   :  { %v4554_v47 = vpop.eup %4553 }
 0x993   :  { %4559 = vrcp.f32 %v3095_v59  ;;  %v3101_v58 = vadd.f32 1.0, %v4554_v47  ;;  %v4556_v49 = vpop.eup %4555  ;;  %v13295_v59 = vld [vmem:[#allocation39_spill] sm:$0xff]  ;;  %v13296_v47 = vld [vmem:[#allocation40_spill] sm:$0xff] }
 0x994   :  { %4561 = vtanh.f32 %v3090_v19  ;;  %v4558_v40 = vpop.eup %4557  ;;  %v3141_v48 = vadd.f32 1.0, %v4556_v49  ;;  %v13294_v19 = vld [vmem:[#allocation38_spill] sm:$0xff] }
 0x995   :  { %4563 = vrcp.f32 %v3101_v58  ;;  %v3108_v41 = vadd.f32 1.0, %v4558_v40  ;;  %v13297_v58 = vld [vmem:[#allocation41_spill] sm:$0xff]  ;;  %v13298_v49 = vld [vmem:[#allocation42_spill] sm:$0xff]  ;;  %v13299_v40 = vld [vmem:[#allocation43_spill] sm:$0xff] }
 0x996   :  { %4565 = vtanh.f32 %v10049_v38 }
 0x997   :  { %4567 = vrcp.f32 %v3108_v41  ;;  %v13303_v41 = vld [vmem:[#allocation47_spill] sm:$0xff] }
 0x9a0   :  { %v4560_v51 = vpop.eup %4559 }
 0x9a1   :  { %v4562_v39 = vpop.eup %4561 }
 0x9a2   :  { %v4564_v53 = vpop.eup %4563  ;;  %v3112_v43 = vmul.f32 %v4562_v39, %v4560_v51  ;;  %v13300_v51 = vld [vmem:[#allocation44_spill] sm:$0xff]  ;;  %v13301_v39 = vld [vmem:[#allocation45_spill] sm:$0xff] }
 0x9a3   :  { %v3111_v45 = vmul.f32 %v4564_v53, %v9350_v26  ;;  %v4566_v57 = vpop.eup %4565  ;;  %v13266_v26 = vld [vmem:[#allocation18_spill] sm:$0xff] }
 0x9a4   :  { %v4568_v60 = vpop.eup %4567  ;;  %v13302_v53 = vld [vmem:[#allocation46_spill] sm:$0xff] }
 0x9a5   :  { %v10058_v28 = vadd.f32 %v3112_v43, %v3111_v45  ;;  %v13304_v43 = vld [vmem:[#allocation48_spill] sm:$0xff]  ;;  %v13305_v45 = vld [vmem:[#allocation49_spill] sm:$0xff] }
 0x9a7   :  { %4569 = vtanh.f32 %v10058_v28 }
 0x9a8   :  { %4571 = vrcp.f32 %v3141_v48  ;;  %v13306_v48 = vld [vmem:[#allocation50_spill] sm:$0xff] }
 0x9b4   :  { %v4570_v62 = vpop.eup %4569 }
 0x9b5   :  { %v4572_v36 = vpop.eup %4571  ;;  %v10062_v12 = vmul.f32 %v4570_v62, %v4568_v60  ;;  %v13308_v60 = vld [vmem:[#allocation52_spill] sm:$0xff]  ;;  %v13309_v62 = vld [vmem:[#allocation53_spill] sm:$0xff] }
 0x9b6   :  { %v10064_v14 = vmul.f32 %v4572_v36, %v4566_v57  ;;  %v13307_v57 = vld [vmem:[#allocation51_spill] sm:$0xff]  ;;  %v13310_v36 = vld [vmem:[#allocation54_spill] sm:$0xff] }
 0x9b7   :  { %13265 = vst [vmem:[#allocation202_spill] sm:$0xff] %v10062_v12  ;;  %3213 = vmatprep.mubr.f32.mxu0 %v10062_v12  ;;  %3284 = vmatprep.mubr.f32.mxu1 %v10062_v12 }
 0x9b8   :  { %3214 = vmatmul.mubr.f32.vlgmr.msra.gmra.mxu0 %v10064_v14  ;;  %3285 = vmatmul.mubr.f32.vlgmr.msra.gmra.mxu1 %v10064_v14 }
 0x9b9   :  { %3292 = vmatpush1.msra.mxu0 %v9362_v21  ;;  %3363 = vmatpush1.msra.mxu1 %v9365_v8  ;;  %v13267_v21 = vld [vmem:[#allocation19_spill] sm:$0xff]  ;;  %v13268_v8 = vld [vmem:[#allocation20_spill] sm:$0xff] }
 0x9ba   :  { %3293 = vmatprep.subr.mxu0 %v9368_v20  ;;  %3355 = vmatprep.mubr.f32.mxu0 %v10062_v12  ;;  %v13269_v20 = vld [vmem:[#allocation21_spill] sm:$0xff] }
 0x9bb   :  { %3364 = vmatprep.subr.mxu1 %v9372_v50  ;;  %3426 = vmatprep.mubr.f32.mxu1 %v10062_v12  ;;  %v13270_v50 = vld [vmem:[#allocation22_spill] sm:$0xff]  ;;  %v10470_v12 = vld [vmem:[#allocation4 + $0xa8] sm:$0xff] }
 0x9bc   :  { %3294 = vmatpush1.msra.mxu0 %v9376_v63  ;;  %3365 = vmatpush1.msra.mxu1 %v9379_v55  ;;  %v13271_v63 = vld [vmem:[#allocation23_spill] sm:$0xff]  ;;  %v13272_v55 = vld [vmem:[#allocation24_spill] sm:$0xff] }
 0x9bd   :  { %3295 = vmatprep.subr.mxu0 %v9382_v29  ;;  %3366 = vmatprep.subr.mxu1 %v9385_v31  ;;  %v13273_v29 = vld [vmem:[#allocation213_spill] sm:$0xff]  ;;  %v13274_v31 = vld [vmem:[#allocation215_spill] sm:$0xff] }
 0x9be   :  { %3296 = vmatpush1.msra.mxu0 %v9388_v37  ;;  %3367 = vmatpush1.msra.mxu1 %v9391_v24  ;;  %v13275_v37 = vld [vmem:[#allocation222_spill] sm:$0xff]  ;;  %v13276_v24 = vld [vmem:[#allocation224_spill] sm:$0xff] }
 0x9bf   :  { %3297 = vmatprep.subr.mxu0 %v9394_v6  ;;  %3368 = vmatprep.subr.mxu1 %v13266_v26  ;;  %v13277_v6 = vld [vmem:[#allocation25_spill] sm:$0xff]  ;;  %v13311_v26 = vld [vmem:[#allocation55_spill] sm:$0xff] }
 0x9c0   :  { %3298 = vmatpush1.msra.mxu0 %v13267_v21  ;;  %3369 = vmatpush1.msra.mxu1 %v13268_v8  ;;  %v13312_v21 = vld [vmem:[#allocation56_spill] sm:$0xff]  ;;  %v13313_v8 = vld [vmem:[#allocation57_spill] sm:$0xff] }
 0x9c1   :  { %3299 = vmatprep.subr.mxu0 %v13269_v20  ;;  %3370 = vmatprep.subr.mxu1 %v13270_v50  ;;  %v13314_v20 = vld [vmem:[#allocation58_spill] sm:$0xff]  ;;  %v13315_v50 = vld [vmem:[#allocation59_spill] sm:$0xff] }
 0x9c2   :  { %3300 = vmatpush1.msra.mxu0 %v13271_v63  ;;  %3371 = vmatpush1.msra.mxu1 %v13272_v55  ;;  %v13316_v63 = vld [vmem:[#allocation60_spill] sm:$0xff]  ;;  %v13317_v55 = vld [vmem:[#allocation61_spill] sm:$0xff] }
 0x9c3   :  { %3301 = vmatprep.subr.mxu0 %v13273_v29  ;;  %3372 = vmatprep.subr.mxu1 %v13274_v31  ;;  %v13318_v29 = vld [vmem:[#allocation62_spill] sm:$0xff]  ;;  %v13319_v31 = vld [vmem:[#allocation63_spill] sm:$0xff] }
 0x9c4   :  { %3302 = vmatpush1.msra.mxu0 %v13275_v37  ;;  %3373 = vmatpush1.msra.mxu1 %v13276_v24  ;;  %v13320_v37 = vld [vmem:[#allocation64_spill] sm:$0xff]  ;;  %v13321_v24 = vld [vmem:[#allocation65_spill] sm:$0xff] }
 0x9c5   :  { %3303 = vmatprep.subr.mxu0 %v13277_v6  ;;  %3374 = vmatprep.subr.mxu1 %v13278_v4  ;;  %v13322_v6 = vld [vmem:[#allocation66_spill] sm:$0xff]  ;;  %v13323_v4 = vld [vmem:[#allocation67_spill] sm:$0xff] }
 0x9c6   :  { %3304 = vmatpush1.msra.mxu0 %v13279_v2  ;;  %3375 = vmatpush1.msra.mxu1 %v13280_v34  ;;  %v13324_v2 = vld [vmem:[#allocation68_spill] sm:$0xff]  ;;  %v13325_v34 = vld [vmem:[#allocation69_spill] sm:$0xff] }
 0x9c7   :  { %3305 = vmatprep.subr.mxu0 %v13281_v46  ;;  %3376 = vmatprep.subr.mxu1 %v13282_v1  ;;  %v13326_v46 = vld [vmem:[#allocation70_spill] sm:$0xff]  ;;  %v13327_v1 = vld [vmem:[#allocation71_spill] sm:$0xff] }
 0x9c8   :  { %3306 = vmatpush1.msra.mxu0 %v13283_v56  ;;  %3377 = vmatpush1.msra.mxu1 %v13284_v42  ;;  %v13328_v56 = vld [vmem:[#allocation72_spill] sm:$0xff]  ;;  %v13329_v42 = vld [vmem:[#allocation73_spill] sm:$0xff] }
 0x9c9   :  { %3307 = vmatprep.subr.mxu0 %v13285_v11  ;;  %3378 = vmatprep.subr.mxu1 %v13286_v27  ;;  %v13330_v11 = vld [vmem:[#allocation74_spill] sm:$0xff]  ;;  %v13331_v27 = vld [vmem:[#allocation75_spill] sm:$0xff] }
 0x9ca   :  { %3308 = vmatpush1.msra.mxu0 %v13287_v33  ;;  %3379 = vmatpush1.msra.mxu1 %v13288_v17  ;;  %v13332_v33 = vld [vmem:[#allocation76_spill] sm:$0xff]  ;;  %v13333_v17 = vld [vmem:[#allocation77_spill] sm:$0xff] }
 0x9cb   :  { %3309 = vmatprep.subr.mxu0 %v13289_v16  ;;  %3380 = vmatprep.subr.mxu1 %v13290_v7  ;;  %v13334_v16 = vld [vmem:[#allocation78_spill] sm:$0xff]  ;;  %v13335_v7 = vld [vmem:[#allocation79_spill] sm:$0xff] }
 0x9cc   :  { %3310 = vmatpush1.msra.mxu0 %v13291_v32  ;;  %3381 = vmatpush1.msra.mxu1 %v13292_v5  ;;  %v13336_v32 = vld [vmem:[#allocation80_spill] sm:$0xff]  ;;  %v13337_v5 = vld [vmem:[#allocation81_spill] sm:$0xff] }
 0x9cd   :  { %3311 = vmatprep.subr.mxu0 %v13293_v25  ;;  %3382 = vmatprep.subr.mxu1 %v13294_v19  ;;  %v13338_v25 = vld [vmem:[#allocation82_spill] sm:$0xff]  ;;  %v13339_v19 = vld [vmem:[#allocation83_spill] sm:$0xff] }
 0x9ce   :  { %3312 = vmatpush1.msra.mxu0 %v13295_v59  ;;  %3383 = vmatpush1.msra.mxu1 %v13296_v47  ;;  %v13340_v59 = vld [vmem:[#allocation84_spill] sm:$0xff]  ;;  %v13341_v47 = vld [vmem:[#allocation85_spill] sm:$0xff] }
 0x9cf   :  { %3313 = vmatprep.subr.mxu0 %v13297_v58  ;;  %3384 = vmatprep.subr.mxu1 %v13298_v49  ;;  %v13342_v58 = vld [vmem:[#allocation86_spill] sm:$0xff]  ;;  %v13343_v49 = vld [vmem:[#allocation87_spill] sm:$0xff] }
 0x9d0   :  { %3314 = vmatpush1.msra.mxu0 %v13299_v40  ;;  %3385 = vmatpush1.msra.mxu1 %v13300_v51  ;;  %v13344_v40 = vld [vmem:[#allocation88_spill] sm:$0xff]  ;;  %v13345_v51 = vld [vmem:[#allocation89_spill] sm:$0xff] }
 0x9d1   :  { %3315 = vmatprep.subr.mxu0 %v13301_v39  ;;  %3386 = vmatprep.subr.mxu1 %v13302_v53  ;;  %v13346_v39 = vld [vmem:[#allocation90_spill] sm:$0xff]  ;;  %v13347_v53 = vld [vmem:[#allocation91_spill] sm:$0xff] }
 0x9d2   :  { %3316 = vmatpush1.msra.mxu0 %v13303_v41  ;;  %3387 = vmatpush1.msra.mxu1 %v13304_v43  ;;  %v13348_v41 = vld [vmem:[#allocation92_spill] sm:$0xff]  ;;  %v13349_v43 = vld [vmem:[#allocation93_spill] sm:$0xff] }
 0x9d3   :  { %3317 = vmatprep.subr.mxu0 %v13305_v45  ;;  %3388 = vmatprep.subr.mxu1 %v13306_v48  ;;  %v13350_v45 = vld [vmem:[#allocation94_spill] sm:$0xff]  ;;  %v13351_v48 = vld [vmem:[#allocation95_spill] sm:$0xff] }
 0x9d4   :  { %3318 = vmatpush1.msra.mxu0 %v13307_v57  ;;  %3389 = vmatpush1.msra.mxu1 %v13308_v60  ;;  %v13352_v57 = vld [vmem:[#allocation96_spill] sm:$0xff]  ;;  %v13353_v60 = vld [vmem:[#allocation97_spill] sm:$0xff] }
 0x9d5   :  { %3319 = vmatprep.subr.mxu0 %v13309_v62  ;;  %3390 = vmatprep.subr.mxu1 %v13310_v36  ;;  %v13354_v62 = vld [vmem:[#allocation98_spill] sm:$0xff]  ;;  %v13355_v36 = vld [vmem:[#allocation99_spill] sm:$0xff] }
 0x9d6   :  { %3320 = vmatpush1.msra.mxu0 %v13311_v26  ;;  %3391 = vmatpush1.msra.mxu1 %v13312_v21  ;;  %v13356_v26 = vld [vmem:[#allocation100_spill] sm:$0xff]  ;;  %v13357_v21 = vld [vmem:[#allocation101_spill] sm:$0xff] }
 0x9d7   :  { %3321 = vmatprep.subr.mxu0 %v13313_v8  ;;  %3392 = vmatprep.subr.mxu1 %v13314_v20  ;;  %v13358_v8 = vld [vmem:[#allocation102_spill] sm:$0xff]  ;;  %v13359_v20 = vld [vmem:[#allocation103_spill] sm:$0xff] }
 0x9d8   :  { %3322 = vmatpush1.msra.mxu0 %v13315_v50  ;;  %3393 = vmatpush1.msra.mxu1 %v13316_v63  ;;  %v13360_v50 = vld [vmem:[#allocation104_spill] sm:$0xff]  ;;  %v13361_v63 = vld [vmem:[#allocation105_spill] sm:$0xff] }
 0x9d9   :  { %3323 = vmatprep.subr.mxu0 %v13317_v55  ;;  %3394 = vmatprep.subr.mxu1 %v13318_v29  ;;  %v13362_v55 = vld [vmem:[#allocation106_spill] sm:$0xff]  ;;  %v13363_v29 = vld [vmem:[#allocation107_spill] sm:$0xff] }
 0x9da   :  { %3324 = vmatpush2.msra.mxu0 %v13319_v31  ;;  %3395 = vmatpush2.msra.mxu1 %v13320_v37  ;;  %v13364_v31 = vld [vmem:[#allocation108_spill] sm:$0xff]  ;;  %v13365_v37 = vld [vmem:[#allocation109_spill] sm:$0xff] }
 0x9db   :  { %3325 = vmatprep.subr.mxu0 %v13321_v24  ;;  %3396 = vmatprep.subr.mxu1 %v13322_v6  ;;  %v13366_v24 = vld [vmem:[#allocation110_spill] sm:$0xff]  ;;  %v13367_v6 = vld [vmem:[#allocation111_spill] sm:$0xff] }
 0x9dc   :  { %3326 = vmatpush2.msra.mxu0 %v13323_v4  ;;  %3397 = vmatpush2.msra.mxu1 %v13324_v2  ;;  %v13368_v4 = vld [vmem:[#allocation112_spill] sm:$0xff]  ;;  %v13369_v2 = vld [vmem:[#allocation113_spill] sm:$0xff] }
 0x9dd   :  { %3327 = vmatprep.subr.mxu0 %v13325_v34  ;;  %3398 = vmatprep.subr.mxu1 %v13326_v46  ;;  %v13370_v34 = vld [vmem:[#allocation114_spill] sm:$0xff]  ;;  %v13371_v46 = vld [vmem:[#allocation115_spill] sm:$0xff] }
 0x9de   :  { %3328 = vmatpush2.msra.mxu0 %v13327_v1  ;;  %3399 = vmatpush2.msra.mxu1 %v13328_v56  ;;  %v13372_v1 = vld [vmem:[#allocation116_spill] sm:$0xff]  ;;  %v13373_v56 = vld [vmem:[#allocation117_spill] sm:$0xff] }
 0x9df   :  { %3329 = vmatprep.subr.mxu0 %v13329_v42  ;;  %3400 = vmatprep.subr.mxu1 %v13330_v11  ;;  %v13374_v42 = vld [vmem:[#allocation118_spill] sm:$0xff]  ;;  %v13375_v11 = vld [vmem:[#allocation119_spill] sm:$0xff] }
 0x9e0   :  { %3330 = vmatpush2.msra.mxu0 %v13331_v27  ;;  %3401 = vmatpush2.msra.mxu1 %v13332_v33  ;;  %v13376_v27 = vld [vmem:[#allocation120_spill] sm:$0xff]  ;;  %v13377_v33 = vld [vmem:[#allocation121_spill] sm:$0xff] }
 0x9e1   :  { %3331 = vmatprep.subr.mxu0 %v13333_v17  ;;  %3402 = vmatprep.subr.mxu1 %v13334_v16  ;;  %v13378_v17 = vld [vmem:[#allocation122_spill] sm:$0xff]  ;;  %v13379_v16 = vld [vmem:[#allocation123_spill] sm:$0xff] }
 0x9e2   :  { %3332 = vmatpush2.msra.mxu0 %v13335_v7  ;;  %3403 = vmatpush2.msra.mxu1 %v13336_v32  ;;  %v13380_v7 = vld [vmem:[#allocation124_spill] sm:$0xff]  ;;  %v13381_v32 = vld [vmem:[#allocation125_spill] sm:$0xff] }
 0x9e3   :  { %3333 = vmatprep.subr.mxu0 %v13337_v5  ;;  %3404 = vmatprep.subr.mxu1 %v13338_v25  ;;  %v13382_v5 = vld [vmem:[#allocation126_spill] sm:$0xff]  ;;  %v13384_v25 = vld [vmem:[#allocation128_spill] sm:$0xff] }
 0x9e4   :  { %3334 = vmatpush2.msra.mxu0 %v13339_v19  ;;  %3405 = vmatpush2.msra.mxu1 %v13340_v59  ;;  %v13385_v19 = vld [vmem:[#allocation129_spill] sm:$0xff]  ;;  %v13386_v59 = vld [vmem:[#allocation130_spill] sm:$0xff] }
 0x9e5   :  { %3335 = vmatprep.subr.mxu0 %v13341_v47  ;;  %3406 = vmatprep.subr.mxu1 %v13342_v58  ;;  %v13387_v47 = vld [vmem:[#allocation131_spill] sm:$0xff]  ;;  %v13388_v58 = vld [vmem:[#allocation132_spill] sm:$0xff] }
 0x9e6   :  { %3336 = vmatpush2.msra.mxu0 %v13343_v49  ;;  %3407 = vmatpush2.msra.mxu1 %v13344_v40  ;;  %v13389_v49 = vld [vmem:[#allocation133_spill] sm:$0xff]  ;;  %v13391_v40 = vld [vmem:[#allocation135_spill] sm:$0xff] }
 0x9e7   :  { %3337 = vmatprep.subr.mxu0 %v13345_v51  ;;  %3408 = vmatprep.subr.mxu1 %v13346_v39  ;;  %v13392_v51 = vld [vmem:[#allocation136_spill] sm:$0xff]  ;;  %v13393_v39 = vld [vmem:[#allocation137_spill] sm:$0xff] }
 0x9e8   :  { %3338 = vmatpush2.msra.mxu0 %v13347_v53  ;;  %3409 = vmatpush2.msra.mxu1 %v13348_v41  ;;  %v13394_v53 = vld [vmem:[#allocation138_spill] sm:$0xff]  ;;  %v13395_v41 = vld [vmem:[#allocation139_spill] sm:$0xff] }
 0x9e9   :  { %3339 = vmatprep.subr.mxu0 %v13349_v43  ;;  %3410 = vmatprep.subr.mxu1 %v13350_v45  ;;  %v13396_v43 = vld [vmem:[#allocation140_spill] sm:$0xff]  ;;  %v13397_v45 = vld [vmem:[#allocation141_spill] sm:$0xff] }
 0x9ea   :  { %3340 = vmatpush2.msra.mxu0 %v13351_v48  ;;  %3411 = vmatpush2.msra.mxu1 %v13352_v57  ;;  %v13398_v48 = vld [vmem:[#allocation142_spill] sm:$0xff]  ;;  %v13399_v57 = vld [vmem:[#allocation143_spill] sm:$0xff] }
 0x9eb   :  { %3341 = vmatprep.subr.mxu0 %v13353_v60  ;;  %3412 = vmatprep.subr.mxu1 %v13354_v62  ;;  %v13400_v60 = vld [vmem:[#allocation144_spill] sm:$0xff]  ;;  %v13401_v62 = vld [vmem:[#allocation145_spill] sm:$0xff] }
 0x9ec   :  { %3342 = vmatpush2.msra.mxu0 %v13355_v36  ;;  %3413 = vmatpush2.msra.mxu1 %v13356_v26  ;;  %v13402_v36 = vld [vmem:[#allocation146_spill] sm:$0xff]  ;;  %v13403_v26 = vld [vmem:[#allocation147_spill] sm:$0xff] }
 0x9ed   :  { %3343 = vmatprep.subr.mxu0 %v13357_v21  ;;  %3414 = vmatprep.subr.mxu1 %v13358_v8  ;;  %v13404_v21 = vld [vmem:[#allocation148_spill] sm:$0xff]  ;;  %v13405_v8 = vld [vmem:[#allocation149_spill] sm:$0xff] }
 0x9ee   :  { %3344 = vmatpush2.msra.mxu0 %v13359_v20  ;;  %3415 = vmatpush2.msra.mxu1 %v13360_v50  ;;  %v13406_v20 = vld [vmem:[#allocation150_spill] sm:$0xff]  ;;  %v13407_v50 = vld [vmem:[#allocation151_spill] sm:$0xff] }
 0x9ef   :  { %3345 = vmatprep.subr.mxu0 %v13361_v63  ;;  %3416 = vmatprep.subr.mxu1 %v13362_v55  ;;  %v13408_v63 = vld [vmem:[#allocation152_spill] sm:$0xff]  ;;  %v13409_v55 = vld [vmem:[#allocation153_spill] sm:$0xff] }
 0x9f0   :  { %3346 = vmatpush2.msra.mxu0 %v13363_v29  ;;  %3417 = vmatpush2.msra.mxu1 %v13364_v31  ;;  %v13410_v29 = vld [vmem:[#allocation154_spill] sm:$0xff]  ;;  %v13411_v31 = vld [vmem:[#allocation155_spill] sm:$0xff] }
 0x9f1   :  { %3347 = vmatprep.subr.mxu0 %v13365_v37  ;;  %3418 = vmatprep.subr.mxu1 %v13366_v24  ;;  %v13412_v37 = vld [vmem:[#allocation156_spill] sm:$0xff]  ;;  %v13413_v24 = vld [vmem:[#allocation157_spill] sm:$0xff] }
 0x9f2   :  { %3348 = vmatpush2.msra.mxu0 %v13367_v6  ;;  %3419 = vmatpush2.msra.mxu1 %v13368_v4  ;;  %v13414_v6 = vld [vmem:[#allocation158_spill] sm:$0xff]  ;;  %v13415_v4 = vld [vmem:[#allocation159_spill] sm:$0xff] }
 0x9f3   :  { %3349 = vmatprep.subr.mxu0 %v13369_v2  ;;  %3420 = vmatprep.subr.mxu1 %v13370_v34  ;;  %v13416_v2 = vld [vmem:[#allocation160_spill] sm:$0xff]  ;;  %v13417_v34 = vld [vmem:[#allocation161_spill] sm:$0xff] }
 0x9f4   :  { %3350 = vmatpush2.msra.mxu0 %v13371_v46  ;;  %3421 = vmatpush2.msra.mxu1 %v13372_v1  ;;  %v13418_v46 = vld [vmem:[#allocation162_spill] sm:$0xff]  ;;  %v13419_v1 = vld [vmem:[#allocation163_spill] sm:$0xff] }
 0x9f5   :  { %3351 = vmatprep.subr.mxu0 %v13373_v56  ;;  %3422 = vmatprep.subr.mxu1 %v13374_v42  ;;  %v13420_v56 = vld [vmem:[#allocation164_spill] sm:$0xff]  ;;  %v13421_v42 = vld [vmem:[#allocation165_spill] sm:$0xff] }
 0x9f6   :  { %3352 = vmatpush2.msra.mxu0 %v9724_v23  ;;  %3423 = vmatpush2.msra.mxu1 %v13375_v11  ;;  %v13383_v23 = vld [vmem:[#allocation127_spill] sm:$0xff]  ;;  %v13422_v11 = vld [vmem:[#allocation166_spill] sm:$0xff] }
 0x9f7   :  { %3353 = vmatprep.subr.mxu0 %v13376_v27  ;;  %3424 = vmatprep.subr.mxu1 %v13377_v33  ;;  %v13423_v27 = vld [vmem:[#allocation167_spill] sm:$0xff]  ;;  %v13424_v33 = vld [vmem:[#allocation168_spill] sm:$0xff] }
 0x9f8   :  { %3354 = vmatpush2.msra.mxu0 %v13378_v17  ;;  %3425 = vmatpush2.msra.mxu1 %v13379_v16  ;;  %v13425_v17 = vld [vmem:[#allocation169_spill] sm:$0xff]  ;;  %v13426_v16 = vld [vmem:[#allocation170_spill] sm:$0xff] }
 0x9f9   :  { %3356 = vmatmul.mubr.f32.vlgmr.msra.gmra.mxu0 %v10064_v14  ;;  %3427 = vmatmul.mubr.f32.vlgmr.msra.gmra.mxu1 %v10064_v14  ;;  %v13390_v14 = vld [vmem:[#allocation134_spill] sm:$0xff] }
 0x9fa   :  { %3494 = vmatprep.subr.mxu0 %v13380_v7  ;;  %3565 = vmatprep.subr.mxu1 %v13381_v32  ;;  %v13427_v7 = vld [vmem:[#allocation171_spill] sm:$0xff]  ;;  %v13428_v32 = vld [vmem:[#allocation172_spill] sm:$0xff] }
 0x9fb   :  { %3495 = vmatpush1.msra.mxu0 %v13382_v5  ;;  %3566 = vmatpush1.msra.mxu1 %v13383_v23  ;;  %v13429_v5 = vld [vmem:[#allocation173_spill] sm:$0xff]  ;;  %v13430_v23 = vld [vmem:[#allocation174_spill] sm:$0xff] }
 0x9fc   :  { %3496 = vmatprep.subr.mxu0 %v13384_v25  ;;  %3567 = vmatprep.subr.mxu1 %v13385_v19  ;;  %v13431_v25 = vld [vmem:[#allocation175_spill] sm:$0xff]  ;;  %v13432_v19 = vld [vmem:[#allocation176_spill] sm:$0xff] }
 0x9fd   :  { %3497 = vmatpush1.msra.mxu0 %v13386_v59  ;;  %3568 = vmatpush1.msra.mxu1 %v13387_v47  ;;  %v13433_v59 = vld [vmem:[#allocation177_spill] sm:$0xff]  ;;  %v13434_v47 = vld [vmem:[#allocation178_spill] sm:$0xff] }
 0x9fe   :  { %3498 = vmatprep.subr.mxu0 %v13388_v58  ;;  %3569 = vmatprep.subr.mxu1 %v13389_v49  ;;  %v13435_v58 = vld [vmem:[#allocation179_spill] sm:$0xff]  ;;  %v13436_v49 = vld [vmem:[#allocation180_spill] sm:$0xff] }
 0x9ff   :  { %3499 = vmatpush1.msra.mxu0 %v13390_v14  ;;  %3570 = vmatpush1.msra.mxu1 %v13391_v40  ;;  %v13437_v14 = vld [vmem:[#allocation181_spill] sm:$0xff]  ;;  %v13438_v40 = vld [vmem:[#allocation182_spill] sm:$0xff] }
 0xa00   :  { %3500 = vmatprep.subr.mxu0 %v13392_v51  ;;  %3571 = vmatprep.subr.mxu1 %v13393_v39  ;;  %v13439_v51 = vld [vmem:[#allocation183_spill] sm:$0xff]  ;;  %v13440_v39 = vld [vmem:[#allocation184_spill] sm:$0xff] }
 0xa01   :  { %3501 = vmatpush1.msra.mxu0 %v13394_v53  ;;  %3572 = vmatpush1.msra.mxu1 %v13395_v41  ;;  %v13441_v53 = vld [vmem:[#allocation185_spill] sm:$0xff]  ;;  %v13442_v41 = vld [vmem:[#allocation186_spill] sm:$0xff] }
 0xa02   :  { %3502 = vmatprep.subr.mxu0 %v13396_v43  ;;  %3573 = vmatprep.subr.mxu1 %v13397_v45  ;;  %v13443_v43 = vld [vmem:[#allocation187_spill] sm:$0xff]  ;;  %v13444_v45 = vld [vmem:[#allocation188_spill] sm:$0xff] }
 0xa03   :  { %3503 = vmatpush1.msra.mxu0 %v13398_v48  ;;  %3574 = vmatpush1.msra.mxu1 %v13399_v57  ;;  %v13445_v48 = vld [vmem:[#allocation189_spill] sm:$0xff]  ;;  %v13446_v57 = vld [vmem:[#allocation190_spill] sm:$0xff] }
 0xa04   :  { %3504 = vmatprep.subr.mxu0 %v13400_v60  ;;  %3575 = vmatprep.subr.mxu1 %v13401_v62  ;;  %v13447_v60 = vld [vmem:[#allocation191_spill] sm:$0xff]  ;;  %v13448_v62 = vld [vmem:[#allocation192_spill] sm:$0xff] }
 0xa05   :  { %3505 = vmatpush1.msra.mxu0 %v13402_v36  ;;  %3576 = vmatpush1.msra.mxu1 %v13403_v26  ;;  %v13449_v36 = vld [vmem:[#allocation193_spill] sm:$0xff]  ;;  %v13450_v26 = vld [vmem:[#allocation194_spill] sm:$0xff] }
 0xa06   :  { %3506 = vmatprep.subr.mxu0 %v13404_v21  ;;  %3577 = vmatprep.subr.mxu1 %v13405_v8  ;;  %v13451_v21 = vld [vmem:[#allocation195_spill] sm:$0xff]  ;;  %v13452_v8 = vld [vmem:[#allocation196_spill] sm:$0xff] }
 0xa07   :  { %3507 = vmatpush1.msra.mxu0 %v13406_v20  ;;  %3578 = vmatpush1.msra.mxu1 %v13407_v50  ;;  %v13453_v20 = vld [vmem:[#allocation197_spill] sm:$0xff]  ;;  %v13454_v50 = vld [vmem:[#allocation198_spill] sm:$0xff] }
 0xa08   :  { %3508 = vmatprep.subr.mxu0 %v13408_v63  ;;  %3579 = vmatprep.subr.mxu1 %v13409_v55  ;;  %v13455_v63 = vld [vmem:[#allocation199_spill] sm:$0xff]  ;;  %v13456_v55 = vld [vmem:[#allocation200_spill] sm:$0xff] }
 0xa09   :  { %3509 = vmatpush1.msra.mxu0 %v13410_v29  ;;  %3580 = vmatpush1.msra.mxu1 %v13411_v31  ;;  %v13457_v29 = vld [vmem:[#allocation201_spill] sm:$0xff]  ;;  %v5505_v31 = vld [vmem:[#allocation4 + $0x688] sm:$0xff] }
 0xa0a   :  { %3510 = vmatprep.subr.mxu0 %v13412_v37  ;;  %3581 = vmatprep.subr.mxu1 %v13413_v24  ;;  %v5506_v37 = vld [vmem:[#allocation4 + $0x698] sm:$0xff]  ;;  %v5507_v24 = vld [vmem:[#allocation4 + $0x680] sm:$0xff] }
 0xa0b   :  { %3511 = vmatpush1.msra.mxu0 %v13414_v6  ;;  %3582 = vmatpush1.msra.mxu1 %v13415_v4  ;;  %v5508_v6 = vld [vmem:[#allocation4 + $0x690] sm:$0xff]  ;;  %v5509_v4 = vld [vmem:[#allocation4 + $0x648] sm:$0xff] }
 0xa0c   :  { %3512 = vmatprep.subr.mxu0 %v13416_v2  ;;  %3583 = vmatprep.subr.mxu1 %v13417_v34  ;;  %v5516_v2 = vld [vmem:[#allocation4 + $0x610] sm:$0xff]  ;;  %v5517_v34 = vld [vmem:[#allocation4 + $0x5c8] sm:$0xff] }
 0xa0d   :  { %3513 = vmatpush1.msra.mxu0 %v13418_v46  ;;  %3584 = vmatpush1.msra.mxu1 %v13419_v1  ;;  %v5518_v46 = vld [vmem:[#allocation4 + $0x5d8] sm:$0xff]  ;;  %v5519_v1 = vld [vmem:[#allocation4 + $0x5c0] sm:$0xff] }
 0xa0e   :  { %3514 = vmatprep.subr.mxu0 %v13420_v56  ;;  %3585 = vmatprep.subr.mxu1 %v13421_v42  ;;  %v5520_v56 = vld [vmem:[#allocation4 + $0x5d0] sm:$0xff]  ;;  %v5521_v42 = vld [vmem:[#allocation4 + $0x588] sm:$0xff] }
 0xa0f   :  { %3515 = vmatpush1.msra.mxu0 %v13422_v11  ;;  %3586 = vmatpush1.msra.mxu1 %v13423_v27  ;;  %v5522_v11 = vld [vmem:[#allocation4 + $0x598] sm:$0xff]  ;;  %v5523_v27 = vld [vmem:[#allocation4 + $0x580] sm:$0xff] }
 0xa10   :  { %3516 = vmatprep.subr.mxu0 %v13424_v33  ;;  %3587 = vmatprep.subr.mxu1 %v13425_v17  ;;  %v5524_v33 = vld [vmem:[#allocation4 + $0x590] sm:$0xff]  ;;  %v5525_v17 = vld [vmem:[#allocation4 + $0x548] sm:$0xff] }
 0xa11   :  { %3517 = vmatpush1.msra.mxu0 %v13426_v16  ;;  %3588 = vmatpush1.msra.mxu1 %v13427_v7  ;;  %v5526_v16 = vld [vmem:[#allocation4 + $0x558] sm:$0xff]  ;;  %v5527_v7 = vld [vmem:[#allocation4 + $0x540] sm:$0xff] }
 0xa12   :  { %3518 = vmatprep.subr.mxu0 %v13428_v32  ;;  %3589 = vmatprep.subr.mxu1 %v13429_v5  ;;  %v5528_v32 = vld [vmem:[#allocation4 + $0x550] sm:$0xff]  ;;  %v5529_v5 = vld [vmem:[#allocation4 + $0x508] sm:$0xff] }
 0xa13   :  { %3519 = vmatpush1.msra.mxu0 %v13430_v23  ;;  %3590 = vmatpush1.msra.mxu1 %v13431_v25  ;;  %v5530_v23 = vld [vmem:[#allocation4 + $0x518] sm:$0xff]  ;;  %v5531_v25 = vld [vmem:[#allocation4 + $0x500] sm:$0xff] }
 0xa14   :  { %3520 = vmatprep.subr.mxu0 %v13432_v19  ;;  %3591 = vmatprep.subr.mxu1 %v13433_v59  ;;  %v5532_v19 = vld [vmem:[#allocation4 + $0x510] sm:$0xff]  ;;  %v5533_v59 = vld [vmem:[#allocation4 + $0x4c8] sm:$0xff] }
 0xa15   :  { %3521 = vmatpush1.msra.mxu0 %v13434_v47  ;;  %3592 = vmatpush1.msra.mxu1 %v13435_v58  ;;  %v5534_v47 = vld [vmem:[#allocation4 + $0x4d8] sm:$0xff]  ;;  %v5535_v58 = vld [vmem:[#allocation4 + $0x4c0] sm:$0xff] }
 0xa16   :  { %3522 = vmatprep.subr.mxu0 %v13436_v49  ;;  %3593 = vmatprep.subr.mxu1 %v13437_v14  ;;  %v5536_v49 = vld [vmem:[#allocation4 + $0x4d0] sm:$0xff]  ;;  %v5537_v14 = vld [vmem:[#allocation4 + $0x488] sm:$0xff] }
 0xa17   :  { %3523 = vmatpush1.msra.mxu0 %v13438_v40  ;;  %3594 = vmatpush1.msra.mxu1 %v13439_v51  ;;  %v5538_v40 = vld [vmem:[#allocation4 + $0x498] sm:$0xff]  ;;  %v5539_v51 = vld [vmem:[#allocation4 + $0x480] sm:$0xff] }
 0xa18   :  { %3524 = vmatprep.subr.mxu0 %v13440_v39  ;;  %3595 = vmatprep.subr.mxu1 %v13441_v53  ;;  %v5540_v39 = vld [vmem:[#allocation4 + $0x490] sm:$0xff]  ;;  %v5541_v53 = vld [vmem:[#allocation4 + $0x448] sm:$0xff] }
 0xa19   :  { %3525 = vmatpush1.msra.mxu0 %v13442_v41  ;;  %3596 = vmatpush1.msra.mxu1 %v13443_v43  ;;  %v5542_v41 = vld [vmem:[#allocation4 + $0x458] sm:$0xff]  ;;  %v5543_v43 = vld [vmem:[#allocation4 + $0x440] sm:$0xff] }
 0xa1a   :  { %3526 = vmatprep.subr.mxu0 %v13444_v45  ;;  %3597 = vmatprep.subr.mxu1 %v13445_v48  ;;  %v5544_v45 = vld [vmem:[#allocation4 + $0x450] sm:$0xff]  ;;  %v5545_v48 = vld [vmem:[#allocation4 + $0x408] sm:$0xff] }
 0xa1b   :  { %3527 = vmatpush2.msra.mxu0 %v13446_v57  ;;  %3598 = vmatpush2.msra.mxu1 %v13447_v60  ;;  %v5546_v57 = vld [vmem:[#allocation4 + $0x418] sm:$0xff]  ;;  %v5547_v60 = vld [vmem:[#allocation4 + $0x400] sm:$0xff] }
 0xa1c   :  { %3528 = vmatprep.subr.mxu0 %v13448_v62  ;;  %3599 = vmatprep.subr.mxu1 %v13449_v36  ;;  %v5548_v62 = vld [vmem:[#allocation4 + $0x410] sm:$0xff]  ;;  %v10284_v36 = vld [vmem:[#allocation4 + $0x3e8] sm:$0xff] }
 0xa1d   :  { %3529 = vmatpush2.msra.mxu0 %v13450_v26  ;;  %3600 = vmatpush2.msra.mxu1 %v13451_v21  ;;  %v10287_v26 = vld [vmem:[#allocation4 + $0x3f8] sm:$0xff] }
 0xa1e   :  { %3530 = vmatprep.subr.mxu0 %v13452_v8  ;;  %3601 = vmatprep.subr.mxu1 %v13453_v20  ;;  %v13458_v21 = vld [vmem:[#allocation225_spill] sm:$0xff] }
 0xa1f   :  { %3531 = vmatpush2.msra.mxu0 %v13454_v50  ;;  %3602 = vmatpush2.msra.mxu1 %v13455_v63  ;;  %v253_v8 = vadd.f32 %v13458_v21, %v12018_v15  ;;  %v13459_v50 = vld [vmem:[#allocation227_spill] sm:$0xff]  ;;  %v10500_v15 = vld [vmem:[#allocation4 + $0x20] sm:$0xff] }
 0xa20   :  { %3532 = vmatprep.subr.mxu0 %v13456_v55  ;;  %3603 = vmatprep.subr.mxu1 %v13457_v29  ;;  %v255_v63 = vadd.f32 %v13459_v50, %v12017_v13  ;;  %v10494_v13 = vld [vmem:[#allocation4 + $0x28] sm:$0xff]  ;;  %13470 = vst [vmem:[#allocation241_spill] sm:$0xff] %v10500_v15 }
 0xa21   :  { %3533 = vmatpush2.msra.mxu0 %v9978_v52  ;;  %3604 = vmatpush2.msra.mxu1 %v9981_v61  ;;  %v5510_v52 = vld [vmem:[#allocation4 + $0x658] sm:$0xff]  ;;  %v5511_v61 = vld [vmem:[#allocation4 + $0x640] sm:$0xff]  ;;  %13468 = vst [vmem:[#allocation209_spill] sm:$0xff] %v10494_v13 }
 0xa22   :  { %3534 = vmatprep.subr.mxu0 %v9984_v0  ;;  %3605 = vmatprep.subr.mxu1 %v9987_v22  ;;  %v5512_v0 = vld [vmem:[#allocation4 + $0x650] sm:$0xff]  ;;  %v5513_v22 = vld [vmem:[#allocation4 + $0x608] sm:$0xff] }
 0xa23   :  { %3535 = vmatpush2.msra.mxu0 %v9990_v44  ;;  %3606 = vmatpush2.msra.mxu1 %v9993_v18  ;;  %v5514_v44 = vld [vmem:[#allocation4 + $0x618] sm:$0xff]  ;;  %v5515_v18 = vld [vmem:[#allocation4 + $0x600] sm:$0xff] }
 0xa24   :  { %3536 = vmatprep.subr.mxu0 %v5505_v31  ;;  %3607 = vmatprep.subr.mxu1 %v5506_v37 }
 0xa25   :  { %3537 = vmatpush2.msra.mxu0 %v5507_v24  ;;  %3608 = vmatpush2.msra.mxu1 %v5508_v6 }
 0xa26   :  { %3538 = vmatprep.subr.mxu0 %v5509_v4  ;;  %3609 = vmatprep.subr.mxu1 %v5510_v52  ;;  %v13460_v4 = vld [vmem:[#allocation233_spill] sm:$0xff] }
 0xa27   :  { %3539 = vmatpush2.msra.mxu0 %v5511_v61  ;;  %3610 = vmatpush2.msra.mxu1 %v5512_v0  ;;  %v378_v52 = vadd.f32 %v13460_v4, %v6033_v30  ;;  %v10332_v4 = vld [vmem:[#allocation4 + $0x3a0] sm:$0xff]  ;;  %v10497_v30 = vld [vmem:[#allocation4 + $0x38] sm:$0xff] }
 0xa28   :  { %3540 = vmatprep.subr.mxu0 %v5513_v22  ;;  %3611 = vmatprep.subr.mxu1 %v5514_v44  ;;  %13469 = vst [vmem:[#allocation240_spill] sm:$0xff] %v10497_v30 }
 0xa29   :  { %3541 = vmatpush2.msra.mxu0 %v5515_v18  ;;  %3612 = vmatpush2.msra.mxu1 %v5516_v2 }
 0xa2a   :  { %3542 = vmatprep.subr.mxu0 %v5517_v34  ;;  %3613 = vmatprep.subr.mxu1 %v5518_v46 }
 0xa2b   :  { %3543 = vmatpush2.msra.mxu0 %v5519_v1  ;;  %3614 = vmatpush2.msra.mxu1 %v5520_v56 }
 0xa2c   :  { %3544 = vmatprep.subr.mxu0 %v5521_v42  ;;  %3615 = vmatprep.subr.mxu1 %v5522_v11 }
 0xa2d   :  { %3545 = vmatpush2.msra.mxu0 %v5523_v27  ;;  %3616 = vmatpush2.msra.mxu1 %v5524_v33 }
 0xa2e   :  { %3546 = vmatprep.subr.mxu0 %v5525_v17  ;;  %3617 = vmatprep.subr.mxu1 %v5526_v16 }
 0xa2f   :  { %3547 = vmatpush2.msra.mxu0 %v5527_v7  ;;  %3618 = vmatpush2.msra.mxu1 %v5528_v32 }
 0xa30   :  { %3548 = vmatprep.subr.mxu0 %v5529_v5  ;;  %3619 = vmatprep.subr.mxu1 %v5530_v23  ;;  %v13462_v23 = vld [vmem:[#allocation234_spill] sm:$0xff] }
 0xa31   :  { %3549 = vmatpush2.msra.mxu0 %v5531_v25  ;;  %3620 = vmatpush2.msra.mxu1 %v5532_v19  ;;  %v380_v25 = vadd.f32 %v13462_v23, %v6029_v10  ;;  %v10392_v23 = vld [vmem:[#allocation4 + $0x260] sm:$0xff]  ;;  %v10485_v10 = vld [vmem:[#allocation4 + $0x78] sm:$0xff] }
 0xa32   :  { %3550 = vmatprep.subr.mxu0 %v5533_v59  ;;  %3621 = vmatprep.subr.mxu1 %v5534_v47  ;;  %13465 = vst [vmem:[#allocation206_spill] sm:$0xff] %v10485_v10 }
 0xa33   :  { %3551 = vmatpush2.msra.mxu0 %v5535_v58  ;;  %3622 = vmatpush2.msra.mxu1 %v5536_v49 }
 0xa34   :  { %3552 = vmatprep.subr.mxu0 %v5537_v14  ;;  %3623 = vmatprep.subr.mxu1 %v5538_v40 }
 0xa35   :  { %3553 = vmatpush2.msra.mxu0 %v5539_v51  ;;  %3624 = vmatpush2.msra.mxu1 %v5540_v39 }
 0xa36   :  { %3554 = vmatprep.subr.mxu0 %v5541_v53  ;;  %3625 = vmatprep.subr.mxu1 %v5542_v41 }
 0xa37   :  { %3555 = vmatpush2.msra.mxu0 %v5543_v43  ;;  %3626 = vmatpush2.msra.mxu1 %v5544_v45 }
 0xa38   :  { %3556 = vmatprep.subr.mxu0 %v5545_v48  ;;  %3627 = vmatprep.subr.mxu1 %v5546_v57 }
 0xa39   :  { %3557 = vmatpush2.msra.mxu0 %v5547_v60  ;;  %3628 = vmatpush2.msra.mxu1 %v5548_v62 }
 0xa3a   :  { %3636 = vmatprep.subr.mxu0 %v10284_v36  ;;  %3707 = vmatprep.subr.mxu1 %v10287_v26 }
 0xa78   :  { %v3215_v20 = vpop.f32.mrf.mxu0  ;;  %v3286_v6 = vpop.f32.mrf.mxu1 }
 0xa79   :  { %v3466_v55 = vadd.f32 %v3215_v20, %v253_v8  ;;  %v3468_v61 = vadd.f32 %v3286_v6, %v378_v52  ;;  %v10328_v6 = vld [vmem:[#allocation4 + $0x3b8] sm:$0xff]  ;;  %v10335_v52 = vld [vmem:[#allocation4 + $0x3b0] sm:$0xff] }
 0xa7a   :  { %v3217_v29 = vpop.f32.mrf.mxu0  ;;  %v3288_v17 = vpop.f32.mrf.mxu1 }
 0xa7b   :  { %v4218_v31 = vmul.f32 -1.442695, %v3466_v55  ;;  %v3467_v37 = vadd.f32 %v3217_v29, %v255_v63  ;;  %v3469_v59 = vadd.f32 %v3288_v17, %v380_v25  ;;  %v10377_v17 = vld [vmem:[#allocation4 + $0x2b8] sm:$0xff]  ;;  %v10395_v25 = vld [vmem:[#allocation4 + $0x270] sm:$0xff] }
 0xa7d   :  { %4573 = vpow2.f32 %v4218_v31  ;;  %v4219_v24 = vmul.f32 -1.442695, %v3467_v37  ;;  %v4220_v47 = vmul.f32 -1.442695, %v3469_v59  ;;  %v10321_v37 = vld [vmem:[#allocation4 + $0x3f0] sm:$0xff]  ;;  %v10401_v59 = vld [vmem:[#allocation4 + $0x238] sm:$0xff] }
 0xa7f   :  { %4575 = vpow2.f32 %v4219_v24  ;;  %v10324_v24 = vld [vmem:[#allocation4 + $0x3a8] sm:$0xff] }
 0xa80   :  { %4577 = vtanh.f32 %v3468_v61  ;;  %v10338_v61 = vld [vmem:[#allocation4 + $0x368] sm:$0xff] }
 0xa8a   :  { %v4574_v0 = vpop.eup %4573 }
 0xa8b   :  { %v3473_v22 = vadd.f32 1.0, %v4574_v0  ;;  %v10341_v0 = vld [vmem:[#allocation4 + $0x378] sm:$0xff] }
 0xa8c   :  { %v4576_v44 = vpop.eup %4575 }
 0xa8d   :  { %4579 = vrcp.f32 %v3473_v22  ;;  %v3479_v18 = vadd.f32 1.0, %v4576_v44  ;;  %v4578_v2 = vpop.eup %4577  ;;  %v10344_v22 = vld [vmem:[#allocation4 + $0x360] sm:$0xff]  ;;  %v10347_v44 = vld [vmem:[#allocation4 + $0x370] sm:$0xff] }
 0xa8f   :  { %4581 = vrcp.f32 %v3479_v18  ;;  %v10350_v18 = vld [vmem:[#allocation4 + $0x328] sm:$0xff] }
 0xa9a   :  { %v4580_v34 = vpop.eup %4579 }
 0xa9b   :  { %v3490_v46 = vmul.f32 %v4580_v34, %v4578_v2  ;;  %v10353_v2 = vld [vmem:[#allocation4 + $0x338] sm:$0xff]  ;;  %v10356_v34 = vld [vmem:[#allocation4 + $0x320] sm:$0xff] }
 0xa9c   :  { %v4582_v1 = vpop.eup %4581 }
 0xa9d   :  { %v3489_v56 = vmul.f32 %v4582_v1, %v10049_v38  ;;  %v10362_v1 = vld [vmem:[#allocation4 + $0x2e8] sm:$0xff] }
 0xa9f   :  { %v10297_v42 = vadd.f32 %v3490_v46, %v3489_v56  ;;  %v10359_v46 = vld [vmem:[#allocation4 + $0x330] sm:$0xff]  ;;  %v10365_v56 = vld [vmem:[#allocation4 + $0x2f8] sm:$0xff] }
 0xaa1   :  { %13461 = vst [vmem:[#allocation203_spill] sm:$0xff] %v10297_v42 }
 0xab9   :  { %v3357_v11 = vpop.f32.mrf.mxu0  ;;  %v3428_v32 = vpop.f32.mrf.mxu1 }
 0xaba   :  { %v3433_v27 = vadd.f32 %v3357_v11, %v6795_v3  ;;  %v3435_v14 = vadd.f32 %v3428_v32, %v6812_v35  ;;  %v10368_v11 = vld [vmem:[#allocation4 + $0x2e0] sm:$0xff]  ;;  %v10386_v32 = vld [vmem:[#allocation4 + $0x268] sm:$0xff]  ;;  %v10479_v35 = vld [vmem:[#allocation4 + $0xb0] sm:$0xff] }
 0xabb   :  { %v3359_v33 = vpop.f32.mrf.mxu0  ;;  %v3430_v19 = vpop.f32.mrf.mxu1  ;;  %v10491_v3 = vld [vmem:[#allocation4 + $0x70] sm:$0xff] }
 0xabc   :  { %v4215_v16 = vmul.f32 -1.442695, %v3433_v27  ;;  %v3434_v7 = vadd.f32 %v3359_v33, %v6799_v9  ;;  %v3436_v38 = vadd.f32 %v3430_v19, %v13264_v54  ;;  %v10371_v27 = vld [vmem:[#allocation4 + $0x2f0] sm:$0xff]  ;;  %v10374_v33 = vld [vmem:[#allocation4 + $0x2a8] sm:$0xff]  ;;  %v10488_v9 = vld [vmem:[#allocation4 + $0x60] sm:$0xff]  ;;  %13467 = vst [vmem:[#allocation208_spill] sm:$0xff] %v10491_v3 }
 0xabd   :  { %v10398_v19 = vld [vmem:[#allocation4 + $0x228] sm:$0xff]  ;;  %13466 = vst [vmem:[#allocation207_spill] sm:$0xff] %v10488_v9 }
 0xabe   :  { %4583 = vpow2.f32 %v4215_v16  ;;  %v4216_v5 = vmul.f32 -1.442695, %v3434_v7  ;;  %v4217_v58 = vmul.f32 -1.442695, %v3436_v38  ;;  %v10380_v16 = vld [vmem:[#allocation4 + $0x2a0] sm:$0xff]  ;;  %v10383_v7 = vld [vmem:[#allocation4 + $0x2b0] sm:$0xff] }
 0xabf   :  { %v10404_v38 = vld [vmem:[#allocation4 + $0x220] sm:$0xff]  ;;  %v10482_v54 = vld [vmem:[#allocation4 + $0x68] sm:$0xff] }
 0xac0   :  { %4585 = vpow2.f32 %v4216_v5  ;;  %v10389_v5 = vld [vmem:[#allocation4 + $0x278] sm:$0xff] }
 0xac1   :  { %4587 = vpow2.f32 %v4220_v47  ;;  %v10407_v47 = vld [vmem:[#allocation4 + $0x230] sm:$0xff] }
 0xac2   :  { %4589 = vpow2.f32 %v4217_v58  ;;  %v10410_v58 = vld [vmem:[#allocation4 + $0x1e8] sm:$0xff] }
 0xacb   :  { %v4584_v49 = vpop.eup %4583 }
 0xacc   :  { %v3440_v40 = vadd.f32 1.0, %v4584_v49  ;;  %v10413_v49 = vld [vmem:[#allocation4 + $0x1f8] sm:$0xff] }
 0xacd   :  { %v4586_v51 = vpop.eup %4585 }
 0xace   :  { %4591 = vrcp.f32 %v3440_v40  ;;  %v3446_v39 = vadd.f32 1.0, %v4586_v51  ;;  %v4588_v53 = vpop.eup %4587  ;;  %v10419_v40 = vld [vmem:[#allocation4 + $0x1f0] sm:$0xff]  ;;  %v10422_v51 = vld [vmem:[#allocation4 + $0x1a8] sm:$0xff] }
 0xacf   :  { %4593 = vtanh.f32 %v3435_v14  ;;  %v4590_v41 = vpop.eup %4589  ;;  %v3486_v21 = vadd.f32 1.0, %v4588_v53  ;;  %v10416_v14 = vld [vmem:[#allocation4 + $0x1e0] sm:$0xff] }
 0xad0   :  { %4595 = vrcp.f32 %v3446_v39  ;;  %v3453_v57 = vadd.f32 1.0, %v4590_v41  ;;  %v10425_v39 = vld [vmem:[#allocation4 + $0x1b8] sm:$0xff]  ;;  %v10428_v53 = vld [vmem:[#allocation4 + $0x1a0] sm:$0xff]  ;;  %v10431_v41 = vld [vmem:[#allocation4 + $0x1b0] sm:$0xff] }
 0xad1   :  { %4597 = vtanh.f32 %v10297_v42  ;;  %v10476_v42 = vld [vmem:[#allocation4 + $0xa0] sm:$0xff] }
 0xad2   :  { %4599 = vrcp.f32 %v3453_v57  ;;  %v10443_v57 = vld [vmem:[#allocation4 + $0x170] sm:$0xff] }
 0xadb   :  { %v4592_v43 = vpop.eup %4591 }
 0xadc   :  { %v4594_v45 = vpop.eup %4593 }
 0xadd   :  { %v4596_v48 = vpop.eup %4595  ;;  %v3457_v60 = vmul.f32 %v4594_v45, %v4592_v43  ;;  %v10434_v43 = vld [vmem:[#allocation4 + $0x168] sm:$0xff]  ;;  %v10437_v45 = vld [vmem:[#allocation4 + $0x178] sm:$0xff] }
 0xade   :  { %v3456_v62 = vmul.f32 %v4596_v48, %v10058_v28  ;;  %v4598_v20 = vpop.eup %4597  ;;  %v10318_v28 = vld [vmem:[#allocation4 + $0x3e0] sm:$0xff] }
 0xadf   :  { %v4600_v50 = vpop.eup %4599  ;;  %v10440_v48 = vld [vmem:[#allocation4 + $0x160] sm:$0xff] }
 0xae0   :  { %v10306_v8 = vadd.f32 %v3457_v60, %v3456_v62  ;;  %v10446_v60 = vld [vmem:[#allocation4 + $0x128] sm:$0xff]  ;;  %v10449_v62 = vld [vmem:[#allocation4 + $0x138] sm:$0xff] }
 0xae2   :  { %13463 = vst [vmem:[#allocation204_spill] sm:$0xff] %v10306_v8  ;;  %4601 = vtanh.f32 %v10306_v8  ;;  %v10473_v8 = vld [vmem:[#allocation4 + $0xb8] sm:$0xff] }
 0xae3   :  { %4603 = vrcp.f32 %v3486_v21  ;;  %v10452_v21 = vld [vmem:[#allocation4 + $0x120] sm:$0xff] }
 0xaef   :  { %v4602_v63 = vpop.eup %4601 }
 0xaf0   :  { %v4604_v55 = vpop.eup %4603  ;;  %v10310_v29 = vmul.f32 %v4602_v63, %v4600_v50  ;;  %v10458_v50 = vld [vmem:[#allocation4 + $0xe8] sm:$0xff]  ;;  %v10461_v63 = vld [vmem:[#allocation4 + $0xf8] sm:$0xff] }
 0xaf1   :  { %v10312_v31 = vmul.f32 %v4604_v55, %v4598_v20  ;;  %v10455_v20 = vld [vmem:[#allocation4 + $0x130] sm:$0xff]  ;;  %v10464_v55 = vld [vmem:[#allocation4 + $0xe0] sm:$0xff] }
 0xaf2   :  { %13464 = vst [vmem:[#allocation205_spill] sm:$0xff] %v10310_v29  ;;  %3558 = vmatprep.mubr.f32.mxu0 %v10310_v29  ;;  %3629 = vmatprep.mubr.f32.mxu1 %v10310_v29 }
 0xaf3   :  { %3559 = vmatmul.mubr.f32.vlgmr.msra.gmra.mxu0 %v10312_v31  ;;  %3630 = vmatmul.mubr.f32.vlgmr.msra.gmra.mxu1 %v10312_v31 }
 0xaf4   :  { %3637 = vmatpush1.msra.mxu0 %v10318_v28  ;;  %3708 = vmatpush1.msra.mxu1 %v10321_v37 }
 0xaf5   :  { %3638 = vmatprep.subr.mxu0 %v10324_v24  ;;  %3700 = vmatprep.mubr.f32.mxu0 %v10310_v29 }
 0xaf6   :  { %3709 = vmatprep.subr.mxu1 %v10328_v6  ;;  %3771 = vmatprep.mubr.f32.mxu1 %v10310_v29  ;;  %v10467_v29 = vld [vmem:[#allocation4 + $0xf0] sm:$0xff] }
 0xaf7   :  { %3639 = vmatpush1.msra.mxu0 %v10332_v4  ;;  %3710 = vmatpush1.msra.mxu1 %v10335_v52 }
 0xaf8   :  { %3640 = vmatprep.subr.mxu0 %v10338_v61  ;;  %3711 = vmatprep.subr.mxu1 %v10341_v0 }
 0xaf9   :  { %3641 = vmatpush1.msra.mxu0 %v10344_v22  ;;  %3712 = vmatpush1.msra.mxu1 %v10347_v44 }
 0xafa   :  { %3642 = vmatprep.subr.mxu0 %v10350_v18  ;;  %3713 = vmatprep.subr.mxu1 %v10353_v2 }
 0xafb   :  { %3643 = vmatpush1.msra.mxu0 %v10356_v34  ;;  %3714 = vmatpush1.msra.mxu1 %v10359_v46 }
 0xafc   :  { %3644 = vmatprep.subr.mxu0 %v10362_v1  ;;  %3715 = vmatprep.subr.mxu1 %v10365_v56 }
 0xafd   :  { %3645 = vmatpush1.msra.mxu0 %v10368_v11  ;;  %3716 = vmatpush1.msra.mxu1 %v10371_v27 }
 0xafe   :  { %3646 = vmatprep.subr.mxu0 %v10374_v33  ;;  %3717 = vmatprep.subr.mxu1 %v10377_v17 }
 0xaff   :  { %3647 = vmatpush1.msra.mxu0 %v10380_v16  ;;  %3718 = vmatpush1.msra.mxu1 %v10383_v7 }
 0xb00   :  { %3648 = vmatprep.subr.mxu0 %v10386_v32  ;;  %3719 = vmatprep.subr.mxu1 %v10389_v5 }
 0xb01   :  { %3649 = vmatpush1.msra.mxu0 %v10392_v23  ;;  %3720 = vmatpush1.msra.mxu1 %v10395_v25 }
 0xb02   :  { %3650 = vmatprep.subr.mxu0 %v10398_v19  ;;  %3721 = vmatprep.subr.mxu1 %v10401_v59 }
 0xb03   :  { %3651 = vmatpush1.msra.mxu0 %v10404_v38  ;;  %3722 = vmatpush1.msra.mxu1 %v10407_v47 }
 0xb04   :  { %3652 = vmatprep.subr.mxu0 %v10410_v58  ;;  %3723 = vmatprep.subr.mxu1 %v10413_v49 }
 0xb05   :  { %3653 = vmatpush1.msra.mxu0 %v10416_v14  ;;  %3724 = vmatpush1.msra.mxu1 %v10419_v40 }
 0xb06   :  { %3654 = vmatprep.subr.mxu0 %v10422_v51  ;;  %3725 = vmatprep.subr.mxu1 %v10425_v39 }
 0xb07   :  { %3655 = vmatpush1.msra.mxu0 %v10428_v53  ;;  %3726 = vmatpush1.msra.mxu1 %v10431_v41 }
 0xb08   :  { %3656 = vmatprep.subr.mxu0 %v10434_v43  ;;  %3727 = vmatprep.subr.mxu1 %v10437_v45 }
 0xb09   :  { %3657 = vmatpush1.msra.mxu0 %v10440_v48  ;;  %3728 = vmatpush1.msra.mxu1 %v10443_v57 }
 0xb0a   :  { %3658 = vmatprep.subr.mxu0 %v10446_v60  ;;  %3729 = vmatprep.subr.mxu1 %v10449_v62 }
 0xb0b   :  { %3659 = vmatpush1.msra.mxu0 %v10452_v21  ;;  %3730 = vmatpush1.msra.mxu1 %v10455_v20 }
 0xb0c   :  { %3660 = vmatprep.subr.mxu0 %v10458_v50  ;;  %3731 = vmatprep.subr.mxu1 %v10461_v63 }
 0xb0d   :  { %3661 = vmatpush1.msra.mxu0 %v10464_v55  ;;  %3732 = vmatpush1.msra.mxu1 %v10467_v29 }
 0xb0e   :  { %3662 = vmatprep.subr.mxu0 %v10470_v12  ;;  %3733 = vmatprep.subr.mxu1 %v10473_v8 }
 0xb0f   :  { %3663 = vmatpush1.msra.mxu0 %v10476_v42  ;;  %3734 = vmatpush1.msra.mxu1 %v10479_v35 }
 0xb10   :  { %3664 = vmatprep.subr.mxu0 %v10482_v54  ;;  %3735 = vmatprep.subr.mxu1 %v10485_v10  ;;  %v10503_v10 = vld [vmem:[#allocation4 + $0x30] sm:$0xff] }
 0xb11   :  { %3665 = vmatpush1.msra.mxu0 %v10488_v9  ;;  %3736 = vmatpush1.msra.mxu1 %v10491_v3  ;;  %13471 = vst [vmem:[#allocation242_spill] sm:$0xff] %v10503_v10  ;;  %v10506_v9 = vld [vmem:[#allocation4 + $0x7e8] sm:$0xff]  ;;  %v10509_v3 = vld [vmem:[#allocation4 + $0x7f8] sm:$0xff] }
 0xb12   :  { %3666 = vmatprep.subr.mxu0 %v10494_v13  ;;  %3737 = vmatprep.subr.mxu1 %v10497_v30  ;;  %13472 = vst [vmem:[#allocation217_spill] sm:$0xff] %v10506_v9  ;;  %13473 = vst [vmem:[#allocation219_spill] sm:$0xff] %v10509_v3  ;;  %v10512_v13 = vld [vmem:[#allocation4 + $0x7e0] sm:$0xff]  ;;  %v10515_v30 = vld [vmem:[#allocation4 + $0x7f0] sm:$0xff] }
 0xb13   :  { %3667 = vmatpush1.msra.mxu0 %v10500_v15  ;;  %3738 = vmatpush1.msra.mxu1 %v10503_v10  ;;  %13474 = vst [vmem:[#allocation226_spill] sm:$0xff] %v10512_v13  ;;  %13475 = vst [vmem:[#allocation228_spill] sm:$0xff] %v10515_v30  ;;  %v10518_v15 = vld [vmem:[#allocation4 + $0x7a8] sm:$0xff]  ;;  %v10521_v10 = vld [vmem:[#allocation4 + $0x7b8] sm:$0xff] }
 0xb14   :  { %3668 = vmatprep.subr.mxu0 %v10506_v9  ;;  %3739 = vmatprep.subr.mxu1 %v10509_v3  ;;  %13476 = vst [vmem:[#allocation244_spill] sm:$0xff] %v10518_v15  ;;  %13477 = vst [vmem:[#allocation245_spill] sm:$0xff] %v10521_v10  ;;  %v10524_v9 = vld [vmem:[#allocation4 + $0x7a0] sm:$0xff]  ;;  %v10527_v3 = vld [vmem:[#allocation4 + $0x7b0] sm:$0xff] }
 0xb15   :  { %3669 = vmatpush2.msra.mxu0 %v10512_v13  ;;  %3740 = vmatpush2.msra.mxu1 %v10515_v30  ;;  %13478 = vst [vmem:[#allocation246_spill] sm:$0xff] %v10524_v9  ;;  %13479 = vst [vmem:[#allocation247_spill] sm:$0xff] %v10527_v3  ;;  %v10530_v13 = vld [vmem:[#allocation4 + $0x768] sm:$0xff]  ;;  %v10533_v30 = vld [vmem:[#allocation4 + $0x778] sm:$0xff] }
 0xb16   :  { %3670 = vmatprep.subr.mxu0 %v10518_v15  ;;  %3741 = vmatprep.subr.mxu1 %v10521_v10  ;;  %13480 = vst [vmem:[#allocation211_spill] sm:$0xff] %v10530_v13  ;;  %13481 = vst [vmem:[#allocation212_spill] sm:$0xff] %v10533_v30  ;;  %v10536_v15 = vld [vmem:[#allocation4 + $0x760] sm:$0xff]  ;;  %v10539_v10 = vld [vmem:[#allocation4 + $0x770] sm:$0xff] }
 0xb17   :  { %3671 = vmatpush2.msra.mxu0 %v10524_v9  ;;  %3742 = vmatpush2.msra.mxu1 %v10527_v3  ;;  %13482 = vst [vmem:[#allocation218_spill] sm:$0xff] %v10536_v15  ;;  %13483 = vst [vmem:[#allocation220_spill] sm:$0xff] %v10539_v10  ;;  %v10542_v9 = vld [vmem:[#allocation4 + $0x728] sm:$0xff]  ;;  %v10545_v3 = vld [vmem:[#allocation4 + $0x738] sm:$0xff] }
 0xb18   :  { %3672 = vmatprep.subr.mxu0 %v10530_v13  ;;  %3743 = vmatprep.subr.mxu1 %v10533_v30  ;;  %13484 = vst [vmem:[#allocation16_spill] sm:$0xff] %v10542_v9  ;;  %13485 = vst [vmem:[#allocation221_spill] sm:$0xff] %v10545_v3  ;;  %v10548_v13 = vld [vmem:[#allocation4 + $0x720] sm:$0xff]  ;;  %v10551_v30 = vld [vmem:[#allocation4 + $0x730] sm:$0xff] }
 0xb19   :  { %3673 = vmatpush2.msra.mxu0 %v10536_v15  ;;  %3744 = vmatpush2.msra.mxu1 %v10539_v10  ;;  %13486 = vst [vmem:[#allocation223_spill] sm:$0xff] %v10548_v13  ;;  %13487 = vst [vmem:[#allocation230_spill] sm:$0xff] %v10551_v30  ;;  %v10554_v15 = vld [vmem:[#allocation4 + $0x6e8] sm:$0xff]  ;;  %v10557_v10 = vld [vmem:[#allocation4 + $0x6f8] sm:$0xff] }
 0xb1a   :  { %3674 = vmatprep.subr.mxu0 %v10542_v9  ;;  %3745 = vmatprep.subr.mxu1 %v10545_v3  ;;  %13488 = vst [vmem:[#allocation232_spill] sm:$0xff] %v10554_v15  ;;  %13489 = vst [vmem:[#allocation18_spill] sm:$0xff] %v10557_v10  ;;  %v10560_v9 = vld [vmem:[#allocation4 + $0x6e0] sm:$0xff]  ;;  %v10563_v3 = vld [vmem:[#allocation4 + $0x6f0] sm:$0xff] }
 0xb1b   :  { %3675 = vmatpush2.msra.mxu0 %v10548_v13  ;;  %3746 = vmatpush2.msra.mxu1 %v10551_v30  ;;  %13490 = vst [vmem:[#allocation19_spill] sm:$0xff] %v10560_v9  ;;  %13491 = vst [vmem:[#allocation20_spill] sm:$0xff] %v10563_v3  ;;  %v10566_v13 = vld [vmem:[#allocation4 + $0x6a8] sm:$0xff]  ;;  %v10569_v30 = vld [vmem:[#allocation4 + $0x6b8] sm:$0xff] }
 0xb1c   :  { %3676 = vmatprep.subr.mxu0 %v10554_v15  ;;  %3747 = vmatprep.subr.mxu1 %v10557_v10  ;;  %13492 = vst [vmem:[#allocation21_spill] sm:$0xff] %v10566_v13  ;;  %13493 = vst [vmem:[#allocation22_spill] sm:$0xff] %v10569_v30  ;;  %v10572_v15 = vld [vmem:[#allocation4 + $0x6a0] sm:$0xff]  ;;  %v10575_v10 = vld [vmem:[#allocation4 + $0x6b0] sm:$0xff] }
 0xb1d   :  { %3677 = vmatpush2.msra.mxu0 %v10560_v9  ;;  %3748 = vmatpush2.msra.mxu1 %v10563_v3  ;;  %13494 = vst [vmem:[#allocation23_spill] sm:$0xff] %v10572_v15  ;;  %13495 = vst [vmem:[#allocation24_spill] sm:$0xff] %v10575_v10  ;;  %v10578_v9 = vld [vmem:[#allocation4 + $0x668] sm:$0xff]  ;;  %v10581_v3 = vld [vmem:[#allocation4 + $0x678] sm:$0xff] }
 0xb1e   :  { %3678 = vmatprep.subr.mxu0 %v10566_v13  ;;  %3749 = vmatprep.subr.mxu1 %v10569_v30  ;;  %13496 = vst [vmem:[#allocation213_spill] sm:$0xff] %v10578_v9  ;;  %13497 = vst [vmem:[#allocation215_spill] sm:$0xff] %v10581_v3  ;;  %v10584_v13 = vld [vmem:[#allocation4 + $0x660] sm:$0xff]  ;;  %v10587_v30 = vld [vmem:[#allocation4 + $0x670] sm:$0xff] }
 0xb1f   :  { %3679 = vmatpush2.msra.mxu0 %v10572_v15  ;;  %3750 = vmatpush2.msra.mxu1 %v10575_v10  ;;  %13498 = vst [vmem:[#allocation222_spill] sm:$0xff] %v10584_v13  ;;  %13499 = vst [vmem:[#allocation224_spill] sm:$0xff] %v10587_v30  ;;  %v10590_v15 = vld [vmem:[#allocation4 + $0x628] sm:$0xff]  ;;  %v10593_v10 = vld [vmem:[#allocation4 + $0x638] sm:$0xff] }
 0xb20   :  { %3680 = vmatprep.subr.mxu0 %v10578_v9  ;;  %3751 = vmatprep.subr.mxu1 %v10581_v3  ;;  %13500 = vst [vmem:[#allocation25_spill] sm:$0xff] %v10590_v15  ;;  %13501 = vst [vmem:[#allocation10_spill] sm:$0xff] %v10593_v10  ;;  %v10596_v9 = vld [vmem:[#allocation4 + $0x620] sm:$0xff]  ;;  %v10599_v3 = vld [vmem:[#allocation4 + $0x630] sm:$0xff] }
 0xb21   :  { %3681 = vmatpush2.msra.mxu0 %v10584_v13  ;;  %3752 = vmatpush2.msra.mxu1 %v10587_v30  ;;  %13502 = vst [vmem:[#allocation210_spill] sm:$0xff] %v10596_v9  ;;  %13503 = vst [vmem:[#allocation214_spill] sm:$0xff] %v10599_v3  ;;  %v10602_v13 = vld [vmem:[#allocation4 + $0x5e8] sm:$0xff]  ;;  %v10605_v30 = vld [vmem:[#allocation4 + $0x5f8] sm:$0xff] }
 0xb22   :  { %3682 = vmatprep.subr.mxu0 %v10590_v15  ;;  %3753 = vmatprep.subr.mxu1 %v10593_v10  ;;  %13504 = vst [vmem:[#allocation216_spill] sm:$0xff] %v10602_v13  ;;  %13505 = vst [vmem:[#allocation26_spill] sm:$0xff] %v10605_v30  ;;  %v10608_v15 = vld [vmem:[#allocation4 + $0x5e0] sm:$0xff]  ;;  %v10611_v10 = vld [vmem:[#allocation4 + $0x5f0] sm:$0xff] }
 0xb23   :  { %3683 = vmatpush2.msra.mxu0 %v10596_v9  ;;  %3754 = vmatpush2.msra.mxu1 %v10599_v3  ;;  %13506 = vst [vmem:[#allocation27_spill] sm:$0xff] %v10608_v15  ;;  %13507 = vst [vmem:[#allocation28_spill] sm:$0xff] %v10611_v10  ;;  %v10614_v9 = vld [vmem:[#allocation4 + $0x5a8] sm:$0xff]  ;;  %v10617_v3 = vld [vmem:[#allocation4 + $0x5b8] sm:$0xff] }
 0xb24   :  { %3684 = vmatprep.subr.mxu0 %v10602_v13  ;;  %3755 = vmatprep.subr.mxu1 %v10605_v30  ;;  %13508 = vst [vmem:[#allocation29_spill] sm:$0xff] %v10614_v9  ;;  %13509 = vst [vmem:[#allocation30_spill] sm:$0xff] %v10617_v3  ;;  %v10620_v13 = vld [vmem:[#allocation4 + $0x5a0] sm:$0xff]  ;;  %v10623_v30 = vld [vmem:[#allocation4 + $0x5b0] sm:$0xff] }
 0xb25   :  { %3685 = vmatpush2.msra.mxu0 %v10608_v15  ;;  %3756 = vmatpush2.msra.mxu1 %v10611_v10  ;;  %13510 = vst [vmem:[#allocation31_spill] sm:$0xff] %v10620_v13  ;;  %13511 = vst [vmem:[#allocation32_spill] sm:$0xff] %v10623_v30  ;;  %v10626_v15 = vld [vmem:[#allocation4 + $0x568] sm:$0xff]  ;;  %v10629_v10 = vld [vmem:[#allocation4 + $0x578] sm:$0xff] }
 0xb26   :  { %3686 = vmatprep.subr.mxu0 %v10614_v9  ;;  %3757 = vmatprep.subr.mxu1 %v10617_v3  ;;  %13512 = vst [vmem:[#allocation33_spill] sm:$0xff] %v10626_v15  ;;  %13513 = vst [vmem:[#allocation34_spill] sm:$0xff] %v10629_v10  ;;  %v10632_v9 = vld [vmem:[#allocation4 + $0x560] sm:$0xff]  ;;  %v10635_v3 = vld [vmem:[#allocation4 + $0x570] sm:$0xff] }
 0xb27   :  { %3687 = vmatpush2.msra.mxu0 %v10620_v13  ;;  %3758 = vmatpush2.msra.mxu1 %v10623_v30  ;;  %13514 = vst [vmem:[#allocation35_spill] sm:$0xff] %v10632_v9  ;;  %13515 = vst [vmem:[#allocation36_spill] sm:$0xff] %v10635_v3  ;;  %v10638_v13 = vld [vmem:[#allocation4 + $0x528] sm:$0xff]  ;;  %v10641_v30 = vld [vmem:[#allocation4 + $0x538] sm:$0xff] }
 0xb28   :  { %3688 = vmatprep.subr.mxu0 %v10626_v15  ;;  %3759 = vmatprep.subr.mxu1 %v10629_v10  ;;  %13516 = vst [vmem:[#allocation37_spill] sm:$0xff] %v10638_v13  ;;  %13517 = vst [vmem:[#allocation38_spill] sm:$0xff] %v10641_v30  ;;  %v10644_v15 = vld [vmem:[#allocation4 + $0x520] sm:$0xff]  ;;  %v10647_v10 = vld [vmem:[#allocation4 + $0x530] sm:$0xff] }
 0xb29   :  { %3689 = vmatpush2.msra.mxu0 %v10632_v9  ;;  %3760 = vmatpush2.msra.mxu1 %v10635_v3  ;;  %13518 = vst [vmem:[#allocation39_spill] sm:$0xff] %v10644_v15  ;;  %13519 = vst [vmem:[#allocation40_spill] sm:$0xff] %v10647_v10  ;;  %v10650_v9 = vld [vmem:[#allocation4 + $0x4e8] sm:$0xff]  ;;  %v10653_v3 = vld [vmem:[#allocation4 + $0x4f8] sm:$0xff] }
 0xb2a   :  { %3690 = vmatprep.subr.mxu0 %v10638_v13  ;;  %3761 = vmatprep.subr.mxu1 %v10641_v30  ;;  %13520 = vst [vmem:[#allocation41_spill] sm:$0xff] %v10650_v9  ;;  %13521 = vst [vmem:[#allocation42_spill] sm:$0xff] %v10653_v3  ;;  %v10656_v13 = vld [vmem:[#allocation4 + $0x4e0] sm:$0xff]  ;;  %v10659_v30 = vld [vmem:[#allocation4 + $0x4f0] sm:$0xff] }
 0xb2b   :  { %3691 = vmatpush2.msra.mxu0 %v10644_v15  ;;  %3762 = vmatpush2.msra.mxu1 %v10647_v10  ;;  %13522 = vst [vmem:[#allocation43_spill] sm:$0xff] %v10656_v13  ;;  %13523 = vst [vmem:[#allocation44_spill] sm:$0xff] %v10659_v30  ;;  %v10662_v15 = vld [vmem:[#allocation4 + $0x4a8] sm:$0xff]  ;;  %v10665_v10 = vld [vmem:[#allocation4 + $0x4b8] sm:$0xff] }
 0xb2c   :  { %3692 = vmatprep.subr.mxu0 %v10650_v9  ;;  %3763 = vmatprep.subr.mxu1 %v10653_v3  ;;  %13524 = vst [vmem:[#allocation45_spill] sm:$0xff] %v10662_v15  ;;  %13525 = vst [vmem:[#allocation46_spill] sm:$0xff] %v10665_v10  ;;  %v10668_v9 = vld [vmem:[#allocation4 + $0x4a0] sm:$0xff]  ;;  %v10671_v3 = vld [vmem:[#allocation4 + $0x4b0] sm:$0xff] }
 0xb2d   :  { %3693 = vmatpush2.msra.mxu0 %v10656_v13  ;;  %3764 = vmatpush2.msra.mxu1 %v10659_v30  ;;  %13526 = vst [vmem:[#allocation47_spill] sm:$0xff] %v10668_v9  ;;  %13527 = vst [vmem:[#allocation48_spill] sm:$0xff] %v10671_v3  ;;  %v10674_v13 = vld [vmem:[#allocation4 + $0x468] sm:$0xff]  ;;  %v10677_v30 = vld [vmem:[#allocation4 + $0x478] sm:$0xff] }
 0xb2e   :  { %3694 = vmatprep.subr.mxu0 %v10662_v15  ;;  %3765 = vmatprep.subr.mxu1 %v10665_v10  ;;  %13528 = vst [vmem:[#allocation49_spill] sm:$0xff] %v10674_v13  ;;  %13529 = vst [vmem:[#allocation50_spill] sm:$0xff] %v10677_v30  ;;  %v10680_v15 = vld [vmem:[#allocation4 + $0x460] sm:$0xff]  ;;  %v10683_v10 = vld [vmem:[#allocation4 + $0x470] sm:$0xff] }
 0xb2f   :  { %3695 = vmatpush2.msra.mxu0 %v10668_v9  ;;  %3766 = vmatpush2.msra.mxu1 %v10671_v3  ;;  %v10686_v9 = vld [vmem:[#allocation4 + $0x428] sm:$0xff]  ;;  %v10689_v3 = vld [vmem:[#allocation4 + $0x438] sm:$0xff] }
 0xb30   :  { %3696 = vmatprep.subr.mxu0 %v10674_v13  ;;  %3767 = vmatprep.subr.mxu1 %v10677_v30  ;;  %v10692_v13 = vld [vmem:[#allocation4 + $0x420] sm:$0xff]  ;;  %v10695_v30 = vld [vmem:[#allocation4 + $0x430] sm:$0xff] }
 0xb31   :  { %3697 = vmatpush2.msra.mxu0 %v10680_v15  ;;  %3768 = vmatpush2.msra.mxu1 %v10683_v10 }
 0xb32   :  { %3698 = vmatprep.subr.mxu0 %v10686_v9  ;;  %3769 = vmatprep.subr.mxu1 %v10689_v3 }
 0xb33   :  { %3699 = vmatpush2.msra.mxu0 %v10692_v13  ;;  %3770 = vmatpush2.msra.mxu1 %v10695_v30 }
 0xb34   :  { %3701 = vmatmul.mubr.f32.vlgmr.msra.gmra.mxu0 %v10312_v31  ;;  %3772 = vmatmul.mubr.f32.vlgmr.msra.gmra.mxu1 %v10312_v31  ;;  %v13532_v31 = vld [vmem:[#allocation208_spill] sm:$0xff] }
 0xb35   :  { %3839 = vmatprep.subr.mxu0 %v10284_v36  ;;  %3910 = vmatprep.subr.mxu1 %v10287_v26  ;;  %v13530_v36 = vld [vmem:[#allocation206_spill] sm:$0xff]  ;;  %v13531_v26 = vld [vmem:[#allocation207_spill] sm:$0xff] }
 0xb36   :  { %3840 = vmatpush1.msra.mxu0 %v10318_v28  ;;  %3911 = vmatpush1.msra.mxu1 %v10321_v37  ;;  %v13533_v28 = vld [vmem:[#allocation209_spill] sm:$0xff]  ;;  %v13534_v37 = vld [vmem:[#allocation240_spill] sm:$0xff] }
 0xb37   :  { %3841 = vmatprep.subr.mxu0 %v10324_v24  ;;  %3912 = vmatprep.subr.mxu1 %v10328_v6  ;;  %v13541_v24 = vld [vmem:[#allocation244_spill] sm:$0xff]  ;;  %v13542_v6 = vld [vmem:[#allocation245_spill] sm:$0xff] }
 0xb38   :  { %3842 = vmatpush1.msra.mxu0 %v10332_v4  ;;  %3913 = vmatpush1.msra.mxu1 %v10335_v52  ;;  %v13543_v4 = vld [vmem:[#allocation246_spill] sm:$0xff]  ;;  %v13544_v52 = vld [vmem:[#allocation247_spill] sm:$0xff] }
 0xb39   :  { %3843 = vmatprep.subr.mxu0 %v10338_v61  ;;  %3914 = vmatprep.subr.mxu1 %v10341_v0  ;;  %v13545_v61 = vld [vmem:[#allocation211_spill] sm:$0xff]  ;;  %v13546_v0 = vld [vmem:[#allocation212_spill] sm:$0xff] }
 0xb3a   :  { %3844 = vmatpush1.msra.mxu0 %v10344_v22  ;;  %3915 = vmatpush1.msra.mxu1 %v10347_v44  ;;  %v13547_v22 = vld [vmem:[#allocation218_spill] sm:$0xff]  ;;  %v13548_v44 = vld [vmem:[#allocation220_spill] sm:$0xff] }
 0xb3b   :  { %3845 = vmatprep.subr.mxu0 %v10350_v18  ;;  %3916 = vmatprep.subr.mxu1 %v10353_v2  ;;  %v13549_v18 = vld [vmem:[#allocation16_spill] sm:$0xff]  ;;  %v13550_v2 = vld [vmem:[#allocation221_spill] sm:$0xff] }
 0xb3c   :  { %3846 = vmatpush1.msra.mxu0 %v10356_v34  ;;  %3917 = vmatpush1.msra.mxu1 %v10359_v46  ;;  %v13551_v34 = vld [vmem:[#allocation223_spill] sm:$0xff]  ;;  %v13552_v46 = vld [vmem:[#allocation230_spill] sm:$0xff] }
 0xb3d   :  { %3847 = vmatprep.subr.mxu0 %v10362_v1  ;;  %3918 = vmatprep.subr.mxu1 %v10365_v56  ;;  %v13553_v1 = vld [vmem:[#allocation232_spill] sm:$0xff]  ;;  %v13554_v56 = vld [vmem:[#allocation18_spill] sm:$0xff] }
 0xb3e   :  { %3848 = vmatpush1.msra.mxu0 %v10368_v11  ;;  %3919 = vmatpush1.msra.mxu1 %v10371_v27  ;;  %v13555_v11 = vld [vmem:[#allocation19_spill] sm:$0xff]  ;;  %v13556_v27 = vld [vmem:[#allocation20_spill] sm:$0xff] }
 0xb3f   :  { %3849 = vmatprep.subr.mxu0 %v10374_v33  ;;  %3920 = vmatprep.subr.mxu1 %v10377_v17  ;;  %v13557_v33 = vld [vmem:[#allocation21_spill] sm:$0xff]  ;;  %v13558_v17 = vld [vmem:[#allocation22_spill] sm:$0xff] }
 0xb40   :  { %3850 = vmatpush1.msra.mxu0 %v10380_v16  ;;  %3921 = vmatpush1.msra.mxu1 %v10383_v7  ;;  %v13559_v16 = vld [vmem:[#allocation23_spill] sm:$0xff]  ;;  %v13560_v7 = vld [vmem:[#allocation24_spill] sm:$0xff] }
 0xb41   :  { %3851 = vmatprep.subr.mxu0 %v10386_v32  ;;  %3922 = vmatprep.subr.mxu1 %v10389_v5  ;;  %v13561_v32 = vld [vmem:[#allocation213_spill] sm:$0xff]  ;;  %v13562_v5 = vld [vmem:[#allocation215_spill] sm:$0xff] }
 0xb42   :  { %3852 = vmatpush1.msra.mxu0 %v10392_v23  ;;  %3923 = vmatpush1.msra.mxu1 %v10395_v25  ;;  %v13563_v23 = vld [vmem:[#allocation222_spill] sm:$0xff]  ;;  %v13564_v25 = vld [vmem:[#allocation224_spill] sm:$0xff] }
 0xb43   :  { %3853 = vmatprep.subr.mxu0 %v10398_v19  ;;  %3924 = vmatprep.subr.mxu1 %v10401_v59  ;;  %v13565_v19 = vld [vmem:[#allocation25_spill] sm:$0xff]  ;;  %v13566_v59 = vld [vmem:[#allocation10_spill] sm:$0xff] }
 0xb44   :  { %3854 = vmatpush1.msra.mxu0 %v10404_v38  ;;  %3925 = vmatpush1.msra.mxu1 %v10407_v47  ;;  %v13567_v38 = vld [vmem:[#allocation210_spill] sm:$0xff] }
 0xb45   :  { %3855 = vmatprep.subr.mxu0 %v10410_v58  ;;  %3926 = vmatprep.subr.mxu1 %v10413_v49  ;;  %v13568_v47 = vld [vmem:[#allocation214_spill] sm:$0xff]  ;;  %v13569_v58 = vld [vmem:[#allocation216_spill] sm:$0xff] }
 0xb46   :  { %3856 = vmatpush1.msra.mxu0 %v10416_v14  ;;  %3927 = vmatpush1.msra.mxu1 %v10419_v40  ;;  %v13570_v49 = vld [vmem:[#allocation26_spill] sm:$0xff]  ;;  %v13571_v14 = vld [vmem:[#allocation27_spill] sm:$0xff]  ;;  %v13572_v40 = vld [vmem:[#allocation28_spill] sm:$0xff] }
 0xb47   :  { %3857 = vmatprep.subr.mxu0 %v10422_v51  ;;  %3928 = vmatprep.subr.mxu1 %v10425_v39  ;;  %v13573_v51 = vld [vmem:[#allocation29_spill] sm:$0xff]  ;;  %v13574_v39 = vld [vmem:[#allocation30_spill] sm:$0xff] }
 0xb48   :  { %3858 = vmatpush1.msra.mxu0 %v10428_v53  ;;  %3929 = vmatpush1.msra.mxu1 %v10431_v41  ;;  %v13575_v53 = vld [vmem:[#allocation31_spill] sm:$0xff]  ;;  %v13576_v41 = vld [vmem:[#allocation32_spill] sm:$0xff] }
 0xb49   :  { %3859 = vmatprep.subr.mxu0 %v10434_v43  ;;  %3930 = vmatprep.subr.mxu1 %v10437_v45  ;;  %v13577_v43 = vld [vmem:[#allocation33_spill] sm:$0xff]  ;;  %v13578_v45 = vld [vmem:[#allocation34_spill] sm:$0xff] }
 0xb4a   :  { %3860 = vmatpush1.msra.mxu0 %v10440_v48  ;;  %3931 = vmatpush1.msra.mxu1 %v10443_v57  ;;  %v13579_v48 = vld [vmem:[#allocation35_spill] sm:$0xff]  ;;  %v13580_v57 = vld [vmem:[#allocation36_spill] sm:$0xff] }
 0xb4b   :  { %3861 = vmatprep.subr.mxu0 %v10446_v60  ;;  %3932 = vmatprep.subr.mxu1 %v10449_v62  ;;  %v13581_v60 = vld [vmem:[#allocation37_spill] sm:$0xff]  ;;  %v13582_v62 = vld [vmem:[#allocation38_spill] sm:$0xff] }
 0xb4c   :  { %3862 = vmatpush1.msra.mxu0 %v10452_v21  ;;  %3933 = vmatpush1.msra.mxu1 %v10455_v20  ;;  %v13583_v21 = vld [vmem:[#allocation39_spill] sm:$0xff]  ;;  %v13584_v20 = vld [vmem:[#allocation40_spill] sm:$0xff] }
 0xb4d   :  { %3863 = vmatprep.subr.mxu0 %v10458_v50  ;;  %3934 = vmatprep.subr.mxu1 %v10461_v63  ;;  %v13585_v50 = vld [vmem:[#allocation41_spill] sm:$0xff]  ;;  %v13586_v63 = vld [vmem:[#allocation42_spill] sm:$0xff] }
 0xb4e   :  { %3864 = vmatpush1.msra.mxu0 %v10464_v55  ;;  %3935 = vmatpush1.msra.mxu1 %v10467_v29  ;;  %v13535_v29 = vld [vmem:[#allocation241_spill] sm:$0xff]  ;;  %v13587_v55 = vld [vmem:[#allocation43_spill] sm:$0xff] }
 0xb4f   :  { %3865 = vmatprep.subr.mxu0 %v10470_v12  ;;  %3936 = vmatprep.subr.mxu1 %v10473_v8  ;;  %v13536_v12 = vld [vmem:[#allocation242_spill] sm:$0xff]  ;;  %v13537_v8 = vld [vmem:[#allocation217_spill] sm:$0xff] }
 0xb50   :  { %3866 = vmatpush1.msra.mxu0 %v10476_v42  ;;  %3937 = vmatpush1.msra.mxu1 %v10479_v35  ;;  %v13538_v42 = vld [vmem:[#allocation219_spill] sm:$0xff]  ;;  %v13539_v35 = vld [vmem:[#allocation226_spill] sm:$0xff] }
 0xb51   :  { %3867 = vmatprep.subr.mxu0 %v10482_v54  ;;  %3938 = vmatprep.subr.mxu1 %v13530_v36  ;;  %v13540_v54 = vld [vmem:[#allocation228_spill] sm:$0xff] }
 0xb52   :  { %3868 = vmatpush1.msra.mxu0 %v13531_v26  ;;  %3939 = vmatpush1.msra.mxu1 %v13532_v31  ;;  %v13588_v36 = vld [vmem:[#allocation44_spill] sm:$0xff]  ;;  %v13589_v26 = vld [vmem:[#allocation45_spill] sm:$0xff]  ;;  %v13590_v31 = vld [vmem:[#allocation46_spill] sm:$0xff] }
 0xb53   :  { %3869 = vmatprep.subr.mxu0 %v13533_v28  ;;  %3940 = vmatprep.subr.mxu1 %v13534_v37  ;;  %v13591_v28 = vld [vmem:[#allocation47_spill] sm:$0xff]  ;;  %v13592_v37 = vld [vmem:[#allocation48_spill] sm:$0xff] }
 0xb54   :  { %3870 = vmatpush1.msra.mxu0 %v13535_v29  ;;  %3941 = vmatpush1.msra.mxu1 %v13536_v12  ;;  %v13593_v29 = vld [vmem:[#allocation49_spill] sm:$0xff]  ;;  %v13594_v12 = vld [vmem:[#allocation50_spill] sm:$0xff] }
 0xb55   :  { %3871 = vmatprep.subr.mxu0 %v13537_v8  ;;  %3942 = vmatprep.subr.mxu1 %v13538_v42  ;;  %v10828_v8 = vld [vmem:[#allocation6 + $0x78] sm:$0xff]  ;;  %v13595_v42 = vld [vmem:[#allocation12_spill] sm:$0xff] }
 0xb56   :  { %3872 = vmatpush2.msra.mxu0 %v13539_v35  ;;  %3943 = vmatpush2.msra.mxu1 %v13540_v54  ;;  %v13596_v35 = vld [vmem:[#allocation229_spill] sm:$0xff] }
 0xb57   :  { %3873 = vmatprep.subr.mxu0 %v13541_v24  ;;  %3944 = vmatprep.subr.mxu1 %v13542_v6  ;;  %v259_v54 = vadd.f32 %v13596_v35, %v13595_v42  ;;  %v13597_v6 = vld [vmem:[#allocation15_spill] sm:$0xff] }
 0xb58   :  { %3874 = vmatpush2.msra.mxu0 %v13543_v4  ;;  %3945 = vmatpush2.msra.mxu1 %v13544_v52 }
 0xb59   :  { %3875 = vmatprep.subr.mxu0 %v13545_v61  ;;  %3946 = vmatprep.subr.mxu1 %v13546_v0 }
 0xb5a   :  { %3876 = vmatpush2.msra.mxu0 %v13547_v22  ;;  %3947 = vmatpush2.msra.mxu1 %v13548_v44 }
 0xb5b   :  { %3877 = vmatprep.subr.mxu0 %v13549_v18  ;;  %3948 = vmatprep.subr.mxu1 %v13550_v2  ;;  %v13599_v18 = vld [vmem:[#allocation13_spill] sm:$0xff]  ;;  %v13600_v2 = vld [vmem:[#allocation231_spill] sm:$0xff] }
 0xb5c   :  { %3878 = vmatpush2.msra.mxu0 %v13551_v34  ;;  %3949 = vmatpush2.msra.mxu1 %v13552_v46  ;;  %v261_v34 = vadd.f32 %v13600_v2, %v13599_v18  ;;  %v4021_v18 = vld [vmem:[#allocation6 + $0x28] sm:$0xff]  ;;  %v4020_v2 = vld [vmem:[#allocation6 + $0x20] sm:$0xff] }
 0xb5d   :  { %3879 = vmatprep.subr.mxu0 %v13553_v1  ;;  %3950 = vmatprep.subr.mxu1 %v13554_v56 }
 0xb5e   :  { %3880 = vmatpush2.msra.mxu0 %v13555_v11  ;;  %3951 = vmatpush2.msra.mxu1 %v13556_v27  ;;  %v13601_v11 = vld [vmem:[#allocation11_spill] sm:$0xff] }
 0xb5f   :  { %3881 = vmatprep.subr.mxu0 %v13557_v33  ;;  %3952 = vmatprep.subr.mxu1 %v13558_v17 }
 0xb60   :  { %3882 = vmatpush2.msra.mxu0 %v13559_v16  ;;  %3953 = vmatpush2.msra.mxu1 %v13560_v7  ;;  %v13602_v7 = vld [vmem:[#allocation237_spill] sm:$0xff] }
 0xb61   :  { %3883 = vmatprep.subr.mxu0 %v13561_v32  ;;  %3954 = vmatprep.subr.mxu1 %v13562_v5 }
 0xb62   :  { %3884 = vmatpush2.msra.mxu0 %v13563_v23  ;;  %3955 = vmatpush2.msra.mxu1 %v13564_v25 }
 0xb63   :  { %3885 = vmatprep.subr.mxu0 %v13565_v19  ;;  %3956 = vmatprep.subr.mxu1 %v13566_v59  ;;  %v13603_v19 = vld [vmem:[#allocation14_spill] sm:$0xff]  ;;  %v13604_v59 = vld [vmem:[#allocation236_spill] sm:$0xff] }
 0xb64   :  { %3886 = vmatpush2.msra.mxu0 %v13567_v38  ;;  %3957 = vmatpush2.msra.mxu1 %v13568_v47  ;;  %v386_v38 = vadd.f32 %v13604_v59, %v13603_v19 }
 0xb65   :  { %3887 = vmatprep.subr.mxu0 %v13569_v58  ;;  %3958 = vmatprep.subr.mxu1 %v13570_v49 }
 0xb66   :  { %3888 = vmatpush2.msra.mxu0 %v13571_v14  ;;  %3959 = vmatpush2.msra.mxu1 %v13572_v40  ;;  %v13605_v14 = vld [vmem:[#allocation238_spill] sm:$0xff] }
 0xb67   :  { %3889 = vmatprep.subr.mxu0 %v13573_v51  ;;  %3960 = vmatprep.subr.mxu1 %v13574_v39 }
 0xb68   :  { %3890 = vmatpush2.msra.mxu0 %v13575_v53  ;;  %3961 = vmatpush2.msra.mxu1 %v13576_v41  ;;  %v13606_v41 = vld [vmem:[#allocation239_spill] sm:$0xff] }
 0xb69   :  { %3891 = vmatprep.subr.mxu0 %v13577_v43  ;;  %3962 = vmatprep.subr.mxu1 %v13578_v45 }
 0xb6a   :  { %3892 = vmatpush2.msra.mxu0 %v13579_v48  ;;  %3963 = vmatpush2.msra.mxu1 %v13580_v57 }
 0xb6b   :  { %3893 = vmatprep.subr.mxu0 %v13581_v60  ;;  %3964 = vmatprep.subr.mxu1 %v13582_v62  ;;  %v13607_v62 = vld [vmem:[#allocation203_spill] sm:$0xff] }
 0xb6c   :  { %3894 = vmatpush2.msra.mxu0 %v13583_v21  ;;  %3965 = vmatpush2.msra.mxu1 %v13584_v20 }
 0xb6d   :  { %3895 = vmatprep.subr.mxu0 %v13585_v50  ;;  %3966 = vmatprep.subr.mxu1 %v13586_v63 }
 0xb6e   :  { %3896 = vmatpush2.msra.mxu0 %v13587_v55  ;;  %3967 = vmatpush2.msra.mxu1 %v13588_v36 }
 0xb6f   :  { %3897 = vmatprep.subr.mxu0 %v13589_v26  ;;  %3968 = vmatprep.subr.mxu1 %v13590_v31 }
 0xb70   :  { %3898 = vmatpush2.msra.mxu0 %v13591_v28  ;;  %3969 = vmatpush2.msra.mxu1 %v13592_v37  ;;  %v13608_v37 = vld [vmem:[#allocation204_spill] sm:$0xff] }
 0xb71   :  { %3899 = vmatprep.subr.mxu0 %v13593_v29  ;;  %3970 = vmatprep.subr.mxu1 %v13594_v12 }
 0xb72   :  { %3900 = vmatpush2.msra.mxu0 %v10680_v15  ;;  %3971 = vmatpush2.msra.mxu1 %v10683_v10 }
 0xb73   :  { %3901 = vmatprep.subr.mxu0 %v10686_v9  ;;  %3972 = vmatprep.subr.mxu1 %v10689_v3  ;;  %v13598_v3 = vld [vmem:[#allocation235_spill] sm:$0xff] }
 0xb74   :  { %3902 = vmatpush2.msra.mxu0 %v10692_v13  ;;  %3973 = vmatpush2.msra.mxu1 %v10695_v30  ;;  %v384_v4 = vadd.f32 %v13598_v3, %v13597_v6  ;;  %v4030_v6 = vld [vmem:[#allocation6 + $0x70] sm:$0xff]  ;;  %v4029_v3 = vld [vmem:[#allocation6 + $0x68] sm:$0xff] }
 0xb75   :  { %4253 = vmatprep.subr.mxu0 %v10828_v8  ;;  %4294 = vmatprep.subr.mxu1 %v10828_v8 }
 0xbb3   :  { %v3560_v15 = vpop.f32.mrf.mxu0  ;;  %v3631_v9 = vpop.f32.mrf.mxu1 }
 0xbb4   :  { %v3811_v24 = vadd.f32 %v3560_v15, %v259_v54  ;;  %v3813_v13 = vadd.f32 %v3631_v9, %v384_v4  ;;  %v13609_v4 = vld [vmem:[#allocation243_spill] sm:$0xff] }
 0xbb5   :  { %v3562_v44 = vpop.f32.mrf.mxu0  ;;  %v3633_v17 = vpop.f32.mrf.mxu1 }
 0xbb6   :  { %v4224_v10 = vmul.f32 -1.442695, %v3811_v24  ;;  %v3812_v46 = vadd.f32 %v3562_v44, %v261_v34  ;;  %v3814_v49 = vadd.f32 %v3633_v17, %v386_v38  ;;  %v4022_v44 = vld [vmem:[#allocation6 + $0x30] sm:$0xff]  ;;  %v4019_v34 = vld [vmem:[#allocation6 + $0x18] sm:$0xff] }
 0xbb8   :  { %4605 = vpow2.f32 %v4224_v10  ;;  %v4225_v1 = vmul.f32 -1.442695, %v3812_v46  ;;  %v4226_v51 = vmul.f32 -1.442695, %v3814_v49  ;;  %v4018_v46 = vld [vmem:[#allocation6 + $0x10] sm:$0xff] }
 0xbb9   :  { %4607 = vtanh.f32 %v3813_v13  ;;  %v13610_v13 = vld [vmem:[#allocation202_spill] sm:$0xff] }
 0xbc5   :  { %v4606_v52 = vpop.eup %4605 }
 0xbc6   :  { %v3818_v30 = vadd.f32 1.0, %v4606_v52  ;;  %v4608_v61 = vpop.eup %4607  ;;  %v4028_v52 = vld [vmem:[#allocation6 + $0x60] sm:$0xff] }
 0xbc8   :  { %4609 = vrcp.f32 %v3818_v30  ;;  %v4027_v30 = vld [vmem:[#allocation6 + $0x58] sm:$0xff] }
 0xbc9   :  { %4611 = vpow2.f32 %v4225_v1  ;;  %v4017_v1 = vld [vmem:[#allocation6 + $0x8] sm:$0xff] }
 0xbd5   :  { %v4610_v0 = vpop.eup %4609 }
 0xbd6   :  { %v3835_v22 = vmul.f32 %v4610_v0, %v4608_v61  ;;  %v4612_v25 = vpop.eup %4611  ;;  %v4025_v61 = vld [vmem:[#allocation6 + $0x48] sm:$0xff]  ;;  %v4024_v0 = vld [vmem:[#allocation6 + $0x40] sm:$0xff] }
 0xbd7   :  { %v3824_v58 = vadd.f32 1.0, %v4612_v25 }
 0xbf4   :  { %v3702_v56 = vpop.f32.mrf.mxu0  ;;  %v3773_v5 = vpop.f32.mrf.mxu1 }
 0xbf5   :  { %v3778_v27 = vadd.f32 %v3702_v56, %v13601_v11  ;;  %v3780_v43 = vadd.f32 %v3773_v5, %v13606_v41  ;;  %v4016_v56 = vld [vmem:[#allocation6] sm:$0xff] }
 0xbf6   :  { %v3704_v33 = vpop.f32.mrf.mxu0  ;;  %v3775_v47 = vpop.f32.mrf.mxu1 }
 0xbf7   :  { %v4221_v16 = vmul.f32 -1.442695, %v3778_v27  ;;  %v3779_v32 = vadd.f32 %v3704_v33, %v13602_v7  ;;  %v3781_v40 = vadd.f32 %v3775_v47, %v13605_v14  ;;  %v13611_v27 = vld [vmem:[#allocation17_spill] sm:$0xff] }
 0xbf8   :  { %v13612_v33 = vld [vmem:[#allocation205_spill] sm:$0xff] }
 0xbf9   :  { %4613 = vpow2.f32 %v4221_v16  ;;  %v4222_v23 = vmul.f32 -1.442695, %v3779_v32  ;;  %v4223_v39 = vmul.f32 -1.442695, %v3781_v40 }
 0xbfb   :  { %4615 = vpow2.f32 %v4222_v23 }
 0xbfc   :  { %4617 = vrcp.f32 %v3824_v58 }
 0xbfd   :  { %4619 = vpow2.f32 %v4226_v51 }
 0xbfe   :  { %4621 = vpow2.f32 %v4223_v39 }
 0xc06   :  { %v4614_v53 = vpop.eup %4613 }
 0xc07   :  { %v3785_v45 = vadd.f32 1.0, %v4614_v53 }
 0xc08   :  { %v4616_v48 = vpop.eup %4615 }
 0xc09   :  { %4623 = vrcp.f32 %v3785_v45  ;;  %v3791_v57 = vadd.f32 1.0, %v4616_v48  ;;  %v4618_v60 = vpop.eup %4617 }
 0xc0a   :  { %4625 = vtanh.f32 %v3780_v43  ;;  %v3834_v21 = vmul.f32 %v4618_v60, %v13607_v62  ;;  %v4620_v20 = vpop.eup %4619 }
 0xc0b   :  { %4627 = vrcp.f32 %v3791_v57  ;;  %v4622_v50 = vpop.eup %4621  ;;  %v3831_v12 = vadd.f32 1.0, %v4620_v20 }
 0xc0c   :  { %v3836_v36 = vadd.f32 %v3835_v22, %v3834_v21  ;;  %v3798_v31 = vadd.f32 1.0, %v4622_v50  ;;  %v4023_v22 = vld [vmem:[#allocation6 + $0x38] sm:$0xff] }
 0xc0e   :  { %4629 = vtanh.f32 %v3836_v36 }
 0xc0f   :  { %4631 = vrcp.f32 %v3798_v31 }
 0xc16   :  { %v4624_v63 = vpop.eup %4623 }
 0xc17   :  { %v4626_v55 = vpop.eup %4625 }
 0xc18   :  { %v4628_v26 = vpop.eup %4627  ;;  %v3802_v28 = vmul.f32 %v4626_v55, %v4624_v63 }
 0xc19   :  { %v3801_v29 = vmul.f32 %v4628_v26, %v13608_v37 }
 0xc1b   :  { %v10846_v42 = vadd.f32 %v3802_v28, %v3801_v29  ;;  %v4630_v35 = vpop.eup %4629 }
 0xc1c   :  { %v4632_v54 = vpop.eup %4631 }
 0xc1d   :  { %4633 = vtanh.f32 %v10846_v42 }
 0xc1e   :  { %4635 = vrcp.f32 %v3831_v12 }
 0xc2a   :  { %v4634_v15 = vpop.eup %4633 }
 0xc2b   :  { %v4636_v24 = vpop.eup %4635  ;;  %v10849_v10 = vmul.f32 %v4634_v15, %v4632_v54 }
 0xc2c   :  { %v3838_v9 = vmul.f32 %v4636_v24, %v4630_v35 }
 0xc2d   :  { %3903 = vmatprep.mubr.f32.mxu0 %v10849_v10  ;;  %3974 = vmatprep.mubr.f32.mxu1 %v10849_v10 }
 0xc2e   :  { %3904 = vmatmul.mubr.f32.vlgmr.msra.gmra.mxu0 %v3838_v9  ;;  %3975 = vmatmul.mubr.f32.vlgmr.msra.gmra.mxu1 %v3838_v9 }
 0xc2f   :  { %4254 = vmatpush3.msra.mxu0 %v10828_v8  ;;  %4310 = vmatpush3.msra.mxu1 %v10828_v8  ;;  %v4026_v8 = vld [vmem:[#allocation6 + $0x50] sm:$0xff] }
 0xc30   :  { %4255 = vmatprep.subr.mxu0 %v4030_v6  ;;  %4295 = vmatprep.subr.mxu1 %v4030_v6 }
 0xc31   :  { %4285 = vmatprep.mubr.f32.mxu0 %v13609_v4  ;;  %4288 = vmatprep.mubr.f32.mxu1 %v13610_v13 }
 0xc32   :  { %4256 = vmatpush3.msra.mxu0 %v4030_v6  ;;  %4311 = vmatpush3.msra.mxu1 %v4030_v6 }
 0xc33   :  { %4257 = vmatprep.subr.mxu0 %v4029_v3  ;;  %4296 = vmatprep.subr.mxu1 %v4029_v3 }
 0xc34   :  { %4258 = vmatpush3.msra.mxu0 %v4029_v3  ;;  %4312 = vmatpush3.msra.mxu1 %v4029_v3 }
 0xc35   :  { %4259 = vmatprep.subr.mxu0 %v4028_v52  ;;  %4297 = vmatprep.subr.mxu1 %v4028_v52 }
 0xc36   :  { %4260 = vmatpush3.msra.mxu0 %v4028_v52  ;;  %4313 = vmatpush3.msra.mxu1 %v4028_v52 }
 0xc37   :  { %4261 = vmatprep.subr.mxu0 %v4027_v30  ;;  %4298 = vmatprep.subr.mxu1 %v4027_v30 }
 0xc38   :  { %4262 = vmatpush3.msra.mxu0 %v4027_v30  ;;  %4314 = vmatpush3.msra.mxu1 %v4027_v30 }
 0xc39   :  { %4263 = vmatprep.subr.mxu0 %v4026_v8  ;;  %4299 = vmatprep.subr.mxu1 %v4026_v8 }
 0xc3a   :  { %4264 = vmatpush3.msra.mxu0 %v4026_v8  ;;  %4315 = vmatpush3.msra.mxu1 %v4026_v8 }
 0xc3b   :  { %4265 = vmatprep.subr.mxu0 %v4025_v61  ;;  %4300 = vmatprep.subr.mxu1 %v4025_v61 }
 0xc3c   :  { %4266 = vmatpush3.msra.mxu0 %v4025_v61  ;;  %4316 = vmatpush3.msra.mxu1 %v4025_v61 }
 0xc3d   :  { %4267 = vmatprep.subr.mxu0 %v4024_v0  ;;  %4301 = vmatprep.subr.mxu1 %v4024_v0 }
 0xc3e   :  { %4268 = vmatpush3.msra.mxu0 %v4024_v0  ;;  %4317 = vmatpush3.msra.mxu1 %v4024_v0 }
 0xc3f   :  { %4269 = vmatprep.subr.mxu0 %v4023_v22  ;;  %4302 = vmatprep.subr.mxu1 %v4023_v22 }
 0xc40   :  { %4270 = vmatpush3.msra.mxu0 %v4023_v22  ;;  %4318 = vmatpush3.msra.mxu1 %v4023_v22 }
 0xc41   :  { %4271 = vmatprep.subr.mxu0 %v4022_v44  ;;  %4303 = vmatprep.subr.mxu1 %v4022_v44 }
 0xc42   :  { %4272 = vmatpush3.msra.mxu0 %v4022_v44  ;;  %4319 = vmatpush3.msra.mxu1 %v4022_v44 }
 0xc43   :  { %4273 = vmatprep.subr.mxu0 %v4021_v18  ;;  %4304 = vmatprep.subr.mxu1 %v4021_v18 }
 0xc44   :  { %4274 = vmatpush3.msra.mxu0 %v4021_v18  ;;  %4320 = vmatpush3.msra.mxu1 %v4021_v18 }
 0xc45   :  { %4275 = vmatprep.subr.mxu0 %v4020_v2  ;;  %4305 = vmatprep.subr.mxu1 %v4020_v2 }
 0xc46   :  { %4276 = vmatpush3.msra.mxu0 %v4020_v2  ;;  %4321 = vmatpush3.msra.mxu1 %v4020_v2 }
 0xc47   :  { %4277 = vmatprep.subr.mxu0 %v4019_v34  ;;  %4306 = vmatprep.subr.mxu1 %v4019_v34 }
 0xc48   :  { %4278 = vmatpush3.msra.mxu0 %v4019_v34  ;;  %4322 = vmatpush3.msra.mxu1 %v4019_v34 }
 0xc49   :  { %4279 = vmatprep.subr.mxu0 %v4018_v46  ;;  %4307 = vmatprep.subr.mxu1 %v4018_v46 }
 0xc4a   :  { %4280 = vmatpush3.msra.mxu0 %v4018_v46  ;;  %4323 = vmatpush3.msra.mxu1 %v4018_v46 }
 0xc4b   :  { %4281 = vmatprep.subr.mxu0 %v4017_v1  ;;  %4308 = vmatprep.subr.mxu1 %v4017_v1 }
 0xc4c   :  { %4282 = vmatpush3.msra.mxu0 %v4017_v1  ;;  %4324 = vmatpush3.msra.mxu1 %v4017_v1 }
 0xc4d   :  { %4283 = vmatprep.subr.mxu0 %v4016_v56  ;;  %4309 = vmatprep.subr.mxu1 %v4016_v56 }
 0xc4e   :  { %4284 = vmatpush3.msra.mxu0 %v4016_v56  ;;  %4325 = vmatpush3.msra.mxu1 %v4016_v56 }
 0xc4f   :  { %4286 = vmatmul.mubr.f32.vlgmr.msra.gmra.mxu0 %v13611_v27  ;;  %4289 = vmatmul.mubr.f32.vlgmr.msra.gmra.mxu1 %v13612_v33 }
 0xc50   :  { %4291 = vmatprep.mubr.f32.mxu1 %v10849_v10 }
 0xcee   :  { %v3905_v17 = vpop.f32.mrf.mxu0  ;;  %v3976_v25 = vpop.f32.mrf.mxu1 }
 0xcef   :  { %v3981_v16 = vadd.f32 %v3905_v17, %v13601_v11  ;;  %v3983_v49 = vadd.f32 %v3976_v25, %v13606_v41 }
 0xcf0   :  { %v3907_v32 = vpop.f32.mrf.mxu0  ;;  %v3978_v59 = vpop.f32.mrf.mxu1 }
 0xcf1   :  { %v4227_v5 = vmul.f32 -1.442695, %v3981_v16  ;;  %v3982_v23 = vadd.f32 %v3907_v32, %v13602_v7  ;;  %v3984_v38 = vadd.f32 %v3978_v59, %v13605_v14  ;;  %v4230_v7 = vld [vmem:[%s10892_s6] ss:$0 sm:$0xff] }
 0xcf3   :  { %4637 = vpow2.f32 %v4227_v5  ;;  %v4228_v19 = vmul.f32 -1.442695, %v3982_v23  ;;  %v4229_v47 = vmul.f32 -1.442695, %v3984_v38 }
 0xcf5   :  { %4639 = vpow2.f32 %v4228_v19 }
 0xcf6   :  { %4641 = vpow2.f32 %v4229_v47 }
 0xd00   :  { %v4638_v58 = vpop.eup %4637 }
 0xd01   :  { %v3988_v40 = vadd.f32 1.0, %v4638_v58 }
 0xd02   :  { %v4640_v51 = vpop.eup %4639 }
 0xd03   :  { %4643 = vrcp.f32 %v3988_v40  ;;  %v3994_v11 = vadd.f32 1.0, %v4640_v51  ;;  %v4642_v39 = vpop.eup %4641 }
 0xd04   :  { %4645 = vtanh.f32 %v3983_v49  ;;  %v4001_v21 = vadd.f32 1.0, %v4642_v39 }
 0xd05   :  { %4647 = vrcp.f32 %v3994_v11 }
 0xd06   :  { %4649 = vrcp.f32 %v4001_v21 }
 0xd0f   :  { %v4287_v53 = vpop.f32.mrf.mxu0  ;;  %v4290_v43 = vpop.f32.mrf.mxu1 }
 0xd10   :  { %v4644_v45 = vpop.eup %4643  ;;  %v4111_v14 = vadd.f32 %v4287_v53, %v4230_v7  ;;  %v4121_v48 = vadd.f32 %v4290_v43, %v4230_v7 }
 0xd11   :  { %v4646_v57 = vpop.eup %4645  ;;  %v4105_v60 = vpop.f32.mrf.mxu0 }
 0xd12   :  { %v4115_v41 = vpop.f32.mrf.mxu1  ;;  %v4648_v62 = vpop.eup %4647  ;;  %4135 = vst [vmem:[%s10893_s7 + $0x8] sm:$0xff] %v4111_v14  ;;  %4137 = vst [vmem:[%s10893_s7 + $0x18] sm:$0xff] %v4121_v48  ;;  %v4106_v20 = vadd.f32 %v4230_v7, %v4105_v60  ;;  %v4005_v63 = vmul.f32 %v4646_v57, %v4644_v45 }
 0xd13   :  { %v4116_v50 = vadd.f32 %v4230_v7, %v4115_v41  ;;  %v4004_v55 = vmul.f32 %v4648_v62, %v10846_v42  ;;  %v4650_v26 = vpop.eup %4649 }
 0xd14   :  { %4134 = vst [vmem:[%s10893_s7] sm:$0xff] %v4106_v20 }
 0xd15   :  { %4136 = vst [vmem:[%s10893_s7 + $0x10] sm:$0xff] %v4116_v50  ;;  %v4006_v36 = vadd.f32 %v4005_v63, %v4004_v55 }
 0xd17   :  { %4651 = vtanh.f32 %v4006_v36 }
 0xd24   :  { %v4652_v31 = vpop.eup %4651 }
 0xd25   :  { %v4008_v28 = vmul.f32 %v4652_v31, %v4650_v26 }
 0xd27   :  { %4292 = vmatmul.mubr.f32.gmra.mxu1 %v4008_v28 }
 0xde7   :  { %v4293_v37 = vpop.f32.mrf.mxu1 }
 0xde8   :  { %v4131_v29 = vadd.f32 %v4293_v37, %v4230_v7 }
 0xde9   :  { %v4125_v12 = vpop.f32.mrf.mxu1 }
 0xdea   :  { %4139 = vst [vmem:[%s10893_s7 + $0x28] sm:$0xff] %v4131_v29  ;;  %v4126_v42 = vadd.f32 %v4230_v7, %v4125_v12 }
 0xdec   :  { %4138 = vst [vmem:[%s10893_s7 + $0x20] sm:$0xff] %v4126_v42 }
 0xded   :  { %4144 = vsyncpa [#allocation5], 1 }
 0xdee   :  { %4145 = vsyncpa [#allocation7], 1 }

</bundles_post_ra>
